<compile_context>
chip_gen: v7x
topology: tpu7x:2x2x1
jax: 0.10.0
libtpu: 0.0.40
codegen_flags: <defaults>
</compile_context>

<pallas_src>
import jax
import jax.numpy as jnp
import numpy as np
from jax.experimental import pallas as pl
from jax.experimental.pallas import tpu as pltpu

# ---- module hyper-params (match KANLinear defaults) -------------------------
IN_FEATURES = 16
OUT_FEATURES = 32
GRID_SIZE = 5
SPLINE_ORDER = 3
NUM_COEFF = GRID_SIZE + SPLINE_ORDER                 # 8 final B-spline coeffs
NUM_BASES0 = GRID_SIZE + 2 * SPLINE_ORDER            # 11 level-0 indicator bases
NUM_KNOTS = NUM_BASES0 + 1                           # 12 knots per feature
GRID_RANGE = (-1.0, 1.0)

# Lane-dense packing: lane = c * IN_FEATURES + i  (coefficient-major).
LANE_W = ((NUM_BASES0 * IN_FEATURES + 127) // 128) * 128     # 256 lanes
COEFF_SLOTS = LANE_W // IN_FEATURES                          # 16 coeff slots
SPLINE_K = NUM_COEFF * IN_FEATURES                           # 128 (fused matmul K)


# ---- Pallas kernel -----------------------------------------------------------
def kan_linear_kernel(x_ref, pk_ref, rep_ref, bw_ref, sw_ref, o_ref):
    # x_ref  : (TB, in)             input tile
    # pk_ref : (16, LANE_W)         packed per-lane knot constants (see wrapper)
    # rep_ref: (in, LANE_W)         0/1 replication matrix, rep[i, c*in+i] = 1
    # bw_ref : (in, out)            base_weight^T
    # sw_ref : (SPLINE_K, out)      scaled spline weight, row = c*in + i
    # o_ref  : (TB, out)
    x = x_ref[...]                                           # (TB, in)

    # ---- base path: SiLU(x) @ base_weight^T  (MXU) ----
    acc = jnp.dot(x * jax.nn.sigmoid(x), bw_ref[...],
                  preferred_element_type=jnp.float32)        # (TB, out)

    # ---- replicate x across 256 lanes on the (otherwise idle) MXU ----
    # xx[:, c*in + i] = x[:, i].  Split x into a bf16-exact part and its
    # residual so the replication stays (almost) exact even if the f32 matmul
    # is internally demoted to bf16 (the 0/1 replication matrix is bf16-exact).
    rep = rep_ref[...]
    x_hi = x.astype(jnp.bfloat16).astype(jnp.float32)
    x_lo = x - x_hi
    xx = (jnp.dot(x_hi, rep, preferred_element_type=jnp.float32)
          + jnp.dot(x_lo, rep, preferred_element_type=jnp.float32))  # (TB, LANE_W)

    # ---- B-spline bases: lane-dense Cox-de Boor recursion ----
    # Level 0: interval indicator.  Unused coefficient slots are forced to 0
    # by +/-1e30 sentinels packed in the wrapper.
    bases = jnp.where((xx >= pk_ref[0:1, :]) & (xx < pk_ref[1:2, :]), 1.0, 0.0)
    for k in range(1, SPLINE_ORDER + 1):
        r = 2 + 4 * (k - 1)
        la = pk_ref[r + 0:r + 1, :]      # grid[i, c]
        lr = pk_ref[r + 1:r + 2, :]      # 1 / (grid[i, c+k]   - grid[i, c])
        rb = pk_ref[r + 2:r + 3, :]      # grid[i, c+k+1]
        rr = pk_ref[r + 3:r + 4, :]      # 1 / (grid[i, c+k+1] - grid[i, c+1])
        # bases[c+1] lives IN_FEATURES lanes to the right: out[L] = in[L + in]
        # (pltpu.roll follows jnp.roll semantics; wrap-around lanes are killed
        #  by the zero constants packed for the last coefficient slot).
        shifted = pltpu.roll(bases, LANE_W - IN_FEATURES, 1)
        bases = ((xx - la) * lr) * bases + ((rb - xx) * rr) * shifted
    # bases: (TB, LANE_W); lanes [0, SPLINE_K) hold the 8 valid coefficients
    # per feature, lanes [SPLINE_K, LANE_W) are exactly zero.

    # ---- spline path: one fused K=128 MXU matmul ----
    acc = acc + jnp.dot(bases[:, :SPLINE_K], sw_ref[...],
                        preferred_element_type=jnp.float32)  # (TB, out)

    # TODO(synk): OUT_FEATURES=32 < 128 means the final store is lane-masked;
    # a (TB/4, 128) lane-dense output layout would speed up the writeback path
    # if the store slot ever becomes the measured bottleneck.
    o_ref[...] = acc.astype(o_ref.dtype)


# ---- wrapper-side parameter packing (all x-independent) ----------------------
def _pack_rows(rows, fill):
    """rows: (n_c, in) per-coeff/per-feature values -> (1, LANE_W) lane slab
    with lane = c*in + i; unused coefficient slots filled with `fill`."""
    slab = jnp.full((COEFF_SLOTS, IN_FEATURES), fill, jnp.float32)
    slab = slab.at[:rows.shape[0], :].set(rows.astype(jnp.float32))
    return slab.reshape(1, LANE_W)


def _pack_grid_constants(grid_buf):
    """Pre-pack every Cox-de Boor constant (incl. safe reciprocals of knot
    differences) into a (16, LANE_W) table of lane slabs."""
    gT = jnp.asarray(grid_buf, jnp.float32).T            # (num_knots, in)
    slabs = [
        _pack_rows(gT[:NUM_BASES0], 1e30),               # indicator lower knots
        _pack_rows(gT[1:NUM_BASES0 + 1], -1e30),         # indicator upper knots
    ]
    for k in range(1, SPLINE_ORDER + 1):
        n = NUM_BASES0 - k
        left_den = gT[k:k + n] - gT[:n]
        right_den = gT[k + 1:k + 1 + n] - gT[1:1 + n]
        slabs += [
            _pack_rows(gT[:n], 0.0),                                          # la
            _pack_rows(jnp.where(left_den != 0, 1.0 / left_den, 0.0), 0.0),   # lr
            _pack_rows(gT[k + 1:k + 1 + n], 0.0),                             # rb
            _pack_rows(jnp.where(right_den != 0, 1.0 / right_den, 0.0), 0.0), # rr
        ]
    packed = jnp.concatenate(slabs, axis=0)              # (14, LANE_W)
    pad = (-packed.shape[0]) % 8
    return jnp.pad(packed, ((0, pad), (0, 0)))           # (16, LANE_W)


# ---- forward wrapper ----------------------------------------------------------
def kan_linear_forward(x, grid_buf, base_weight, spline_weight, spline_scaler,
                       *, tile_b=512):
    """x: (..., in_features)  ->  (..., out_features)"""
    orig_shape = x.shape
    x2d = x.reshape(-1, IN_FEATURES).astype(jnp.float32)
    B = x2d.shape[0]
    B_pad = ((B + tile_b - 1) // tile_b) * tile_b
    if B_pad != B:
        x2d = jnp.pad(x2d, ((0, B_pad - B), (0, 0)))

    # parameter prep (plain JAX glue, all x-independent)
    packed = _pack_grid_constants(grid_buf)                                # (16, 256)
    rep = jnp.tile(jnp.eye(IN_FEATURES, dtype=jnp.float32), (1, COEFF_SLOTS))  # (16, 256)
    bw_t = base_weight.T.astype(jnp.float32)                               # (in, out)
    scaled_sw = spline_weight * spline_scaler[..., None]                   # (out, in, C)
    sw_flat = jnp.transpose(scaled_sw, (2, 1, 0)).reshape(
        SPLINE_K, OUT_FEATURES).astype(jnp.float32)                        # (C*in, out)

    out2d = pl.pallas_call(
        kan_linear_kernel,
        out_shape=jax.ShapeDtypeStruct((B_pad, OUT_FEATURES), jnp.float32),
        grid_spec=pltpu.PrefetchScalarGridSpec(
            num_scalar_prefetch=0,
            grid=(B_pad // tile_b,),
            in_specs=[
                pl.BlockSpec((tile_b, IN_FEATURES), lambda i: (i, 0)),
                pl.BlockSpec(packed.shape, lambda i: (0, 0)),
                pl.BlockSpec(rep.shape, lambda i: (0, 0)),
                pl.BlockSpec(bw_t.shape, lambda i: (0, 0)),
                pl.BlockSpec(sw_flat.shape, lambda i: (0, 0)),
            ],
            out_specs=pl.BlockSpec((tile_b, OUT_FEATURES), lambda i: (i, 0)),
        ),
        compiler_params=pltpu.CompilerParams(
            dimension_semantics=("parallel",)),
    )(x2d, packed, rep, bw_t, sw_flat)

    return out2d[:B].reshape(*orig_shape[:-1], OUT_FEATURES)


# ---- pure-JAX reference (mirrors the PyTorch forward, f32-accurate) -----------
def kan_linear_ref(x, grid_buf, base_weight, spline_weight, spline_scaler):
    hi = jax.lax.Precision.HIGHEST
    orig_shape = x.shape
    x2d = x.reshape(-1, IN_FEATURES).astype(jnp.float32)
    silu = x2d * jax.nn.sigmoid(x2d)
    base_out = jnp.dot(silu, base_weight.T, precision=hi)
    g = grid_buf[None, :, :]                                     # (1, in, 12)
    xe = x2d[:, :, None]                                         # (B, in, 1)
    bases = ((xe >= g[:, :, :-1]) & (xe < g[:, :, 1:])).astype(jnp.float32)
    for k in range(1, SPLINE_ORDER + 1):
        bases = ((xe - g[:, :, :-(k + 1)]) / (g[:, :, k:-1] - g[:, :, :-(k + 1)])
                 * bases[:, :, :-1]
                 + (g[:, :, k + 1:] - xe) / (g[:, :, k + 1:] - g[:, :, 1:-k])
                 * bases[:, :, 1:])
    scaled_sw = spline_weight * spline_scaler[..., None]
    spline_out = jnp.dot(bases.reshape(x2d.shape[0], -1),
                         scaled_sw.reshape(OUT_FEATURES, -1).T, precision=hi)
    out = base_out + spline_out
    return out.reshape(*orig_shape[:-1], OUT_FEATURES)


if __name__ == "__main__":
    key = jax.random.PRNGKey(0)
    k_x, k_bw, k_sw, k_sc = jax.random.split(key, 4)

    # deterministic synthetic parameters (shapes per KANLinear.__init__)
    h = (GRID_RANGE[1] - GRID_RANGE[0]) / GRID_SIZE
    grid_buf = (jnp.arange(-SPLINE_ORDER, GRID_SIZE + SPLINE_ORDER + 1,
                           dtype=jnp.float32) * h + GRID_RANGE[0])
    grid_buf = jnp.broadcast_to(grid_buf, (IN_FEATURES, grid_buf.shape[0]))

    bound = 1.0 / np.sqrt(IN_FEATURES)
    base_weight = jax.random.uniform(k_bw, (OUT_FEATURES, IN_FEATURES),
                                     jnp.float32, -bound, bound)
    # TODO(synk): torch init uses curve2coeff (lstsq) for spline_weight; a
    # deterministic small uniform init is used instead (forward math unchanged).
    spline_weight = jax.random.uniform(
        k_sw, (OUT_FEATURES, IN_FEATURES, NUM_COEFF), jnp.float32, -0.02, 0.02)
    spline_scaler = jax.random.uniform(k_sc, (OUT_FEATURES, IN_FEATURES),
                                       jnp.float32, -bound, bound)

    # small example input: (batch=2, seq=8, in_features=16)
    x = jax.random.uniform(k_x, (2, 8, IN_FEATURES), jnp.float32, -1.0, 1.0)

    out = kan_linear_forward(x, grid_buf, base_weight, spline_weight, spline_scaler)
    out = jax.block_until_ready(out)

    ref = kan_linear_ref(x, grid_buf, base_weight, spline_weight, spline_scaler)
    # Observed error is ~1e-6; the tolerance leaves headroom for MXU precision
    # differences across TPU generations without masking real layout bugs.
    np.testing.assert_allclose(np.asarray(out), np.asarray(ref),
                               rtol=1e-3, atol=1e-3)
    assert out.shape == (2, 8, OUT_FEATURES)
    print("KERNEL_OK")
</pallas_src>

<mosaic_0001>
module attributes {stable_mosaic.version = 11 : i64} {
  func.func @kan_linear_kernel(%arg0: i32, %arg1: memref<512x16xf32, #tpu.memory_space<vmem>>, %arg2: memref<16x256xf32, #tpu.memory_space<vmem>>, %arg3: memref<16x256xf32, #tpu.memory_space<vmem>>, %arg4: memref<16x32xf32, #tpu.memory_space<vmem>>, %arg5: memref<128x32xf32, #tpu.memory_space<vmem>>, %arg6: memref<512x32xf32, #tpu.memory_space<vmem>>) attributes {dimension_semantics = [#tpu.dimension_semantics<parallel>], iteration_bounds = array<i64: 1>, scalar_prefetch = 0 : i64, scratch_operands = 0 : i64, tpu.core_type = #tpu.core_type<tc>, window_params = [{transform_indices = @transform_0, window_bounds = array<i64: 512, 16>}, {pipeline_mode = #tpu.pipeline_mode<synchronous>, transform_indices = @transform_1, window_bounds = array<i64: 16, 256>}, {pipeline_mode = #tpu.pipeline_mode<synchronous>, transform_indices = @transform_2, window_bounds = array<i64: 16, 256>}, {pipeline_mode = #tpu.pipeline_mode<synchronous>, transform_indices = @transform_3, window_bounds = array<i64: 16, 32>}, {pipeline_mode = #tpu.pipeline_mode<synchronous>, transform_indices = @transform_4, window_bounds = array<i64: 128, 32>}, {transform_indices = @transform_5, window_bounds = array<i64: 512, 32>}]} {
    %c0 = arith.constant 0 : index
    %c0_0 = arith.constant 0 : index
    %0 = vector.load %arg1[%c0, %c0_0] : memref<512x16xf32, #tpu.memory_space<vmem>>, vector<512x16xf32>
    %1 = arith.negf %0 : vector<512x16xf32>
    %2 = math.exp %1 : vector<512x16xf32>
    %cst = arith.constant 1.000000e+00 : f32
    %3 = vector.broadcast %cst : f32 to vector<512x16xf32>
    %4 = arith.addf %3, %2 : vector<512x16xf32>
    %5 = arith.divf %3, %4 : vector<512x16xf32>
    %6 = arith.mulf %0, %5 : vector<512x16xf32>
    %c0_1 = arith.constant 0 : index
    %c0_2 = arith.constant 0 : index
    %7 = vector.load %arg4[%c0_1, %c0_2] : memref<16x32xf32, #tpu.memory_space<vmem>>, vector<16x32xf32>
    %cst_3 = arith.constant dense<0.000000e+00> : vector<512x32xf32>
    %8 = tpu.matmul %6, %7, %cst_3 {dimension_numbers = #tpu.dot_dimension_numbers<[1], [0], [0], [1], [0, 0, 1, 1], [], []>} : vector<512x16xf32>, vector<16x32xf32>, vector<512x32xf32> -> vector<512x32xf32>
    %c0_4 = arith.constant 0 : index
    %c0_5 = arith.constant 0 : index
    %9 = vector.load %arg3[%c0_4, %c0_5] : memref<16x256xf32, #tpu.memory_space<vmem>>, vector<16x256xf32>
    %10 = arith.truncf %0 : vector<512x16xf32> to vector<512x16xbf16>
    %11 = arith.extf %10 : vector<512x16xbf16> to vector<512x16xf32>
    %12 = arith.subf %0, %11 : vector<512x16xf32>
    %cst_6 = arith.constant dense<0.000000e+00> : vector<512x256xf32>
    %13 = tpu.matmul %11, %9, %cst_6 {dimension_numbers = #tpu.dot_dimension_numbers<[1], [0], [0], [1], [0, 0, 1, 1], [], []>} : vector<512x16xf32>, vector<16x256xf32>, vector<512x256xf32> -> vector<512x256xf32>
    %cst_7 = arith.constant dense<0.000000e+00> : vector<512x256xf32>
    %14 = tpu.matmul %12, %9, %cst_7 {dimension_numbers = #tpu.dot_dimension_numbers<[1], [0], [0], [1], [0, 0, 1, 1], [], []>} : vector<512x16xf32>, vector<16x256xf32>, vector<512x256xf32> -> vector<512x256xf32>
    %15 = arith.addf %13, %14 : vector<512x256xf32>
    %c0_8 = arith.constant 0 : index
    %c0_9 = arith.constant 0 : index
    %16 = vector.load %arg2[%c0_8, %c0_9] : memref<16x256xf32, #tpu.memory_space<vmem>>, vector<1x256xf32>
    %17 = vector.broadcast %16 : vector<1x256xf32> to vector<512x256xf32>
    %18 = arith.cmpf oge, %15, %17 : vector<512x256xf32>
    %c1 = arith.constant 1 : index
    %c0_10 = arith.constant 0 : index
    %19 = vector.load %arg2[%c1, %c0_10] : memref<16x256xf32, #tpu.memory_space<vmem>>, vector<1x256xf32>
    %20 = vector.broadcast %19 : vector<1x256xf32> to vector<512x256xf32>
    %21 = arith.cmpf olt, %15, %20 : vector<512x256xf32>
    %22 = arith.andi %18, %21 : vector<512x256xi1>
    %cst_11 = arith.constant 1.000000e+00 : f32
    %cst_12 = arith.constant 0.000000e+00 : f32
    %23 = vector.broadcast %cst_11 : f32 to vector<512x256xf32>
    %24 = vector.broadcast %cst_12 : f32 to vector<512x256xf32>
    %25 = arith.select %22, %23, %24 : vector<512x256xi1>, vector<512x256xf32>
    %c2 = arith.constant 2 : index
    %c0_13 = arith.constant 0 : index
    %26 = vector.load %arg2[%c2, %c0_13] : memref<16x256xf32, #tpu.memory_space<vmem>>, vector<1x256xf32>
    %c3 = arith.constant 3 : index
    %c0_14 = arith.constant 0 : index
    %27 = vector.load %arg2[%c3, %c0_14] : memref<16x256xf32, #tpu.memory_space<vmem>>, vector<1x256xf32>
    %c4 = arith.constant 4 : index
    %c0_15 = arith.constant 0 : index
    %28 = vector.load %arg2[%c4, %c0_15] : memref<16x256xf32, #tpu.memory_space<vmem>>, vector<1x256xf32>
    %c5 = arith.constant 5 : index
    %c0_16 = arith.constant 0 : index
    %29 = vector.load %arg2[%c5, %c0_16] : memref<16x256xf32, #tpu.memory_space<vmem>>, vector<1x256xf32>
    %c240_i32 = arith.constant 240 : i32
    %30 = tpu.dynamic_rotate %25 by %c240_i32 dim 1 : vector<512x256xf32>, i32 -> vector<512x256xf32>
    %31 = vector.broadcast %26 : vector<1x256xf32> to vector<512x256xf32>
    %32 = arith.subf %15, %31 : vector<512x256xf32>
    %33 = vector.broadcast %27 : vector<1x256xf32> to vector<512x256xf32>
    %34 = arith.mulf %32, %33 : vector<512x256xf32>
    %35 = arith.mulf %34, %25 : vector<512x256xf32>
    %36 = vector.broadcast %28 : vector<1x256xf32> to vector<512x256xf32>
    %37 = arith.subf %36, %15 : vector<512x256xf32>
    %38 = vector.broadcast %29 : vector<1x256xf32> to vector<512x256xf32>
    %39 = arith.mulf %37, %38 : vector<512x256xf32>
    %40 = arith.mulf %39, %30 : vector<512x256xf32>
    %41 = arith.addf %35, %40 : vector<512x256xf32>
    %c6 = arith.constant 6 : index
    %c0_17 = arith.constant 0 : index
    %42 = vector.load %arg2[%c6, %c0_17] : memref<16x256xf32, #tpu.memory_space<vmem>>, vector<1x256xf32>
    %c7 = arith.constant 7 : index
    %c0_18 = arith.constant 0 : index
    %43 = vector.load %arg2[%c7, %c0_18] : memref<16x256xf32, #tpu.memory_space<vmem>>, vector<1x256xf32>
    %c8 = arith.constant 8 : index
    %c0_19 = arith.constant 0 : index
    %44 = vector.load %arg2[%c8, %c0_19] : memref<16x256xf32, #tpu.memory_space<vmem>>, vector<1x256xf32>
    %c9 = arith.constant 9 : index
    %c0_20 = arith.constant 0 : index
    %45 = vector.load %arg2[%c9, %c0_20] : memref<16x256xf32, #tpu.memory_space<vmem>>, vector<1x256xf32>
    %c240_i32_21 = arith.constant 240 : i32
    %46 = tpu.dynamic_rotate %41 by %c240_i32_21 dim 1 : vector<512x256xf32>, i32 -> vector<512x256xf32>
    %47 = vector.broadcast %42 : vector<1x256xf32> to vector<512x256xf32>
    %48 = arith.subf %15, %47 : vector<512x256xf32>
    %49 = vector.broadcast %43 : vector<1x256xf32> to vector<512x256xf32>
    %50 = arith.mulf %48, %49 : vector<512x256xf32>
    %51 = arith.mulf %50, %41 : vector<512x256xf32>
    %52 = vector.broadcast %44 : vector<1x256xf32> to vector<512x256xf32>
    %53 = arith.subf %52, %15 : vector<512x256xf32>
    %54 = vector.broadcast %45 : vector<1x256xf32> to vector<512x256xf32>
    %55 = arith.mulf %53, %54 : vector<512x256xf32>
    %56 = arith.mulf %55, %46 : vector<512x256xf32>
    %57 = arith.addf %51, %56 : vector<512x256xf32>
    %c10 = arith.constant 10 : index
    %c0_22 = arith.constant 0 : index
    %58 = vector.load %arg2[%c10, %c0_22] : memref<16x256xf32, #tpu.memory_space<vmem>>, vector<1x256xf32>
    %c11 = arith.constant 11 : index
    %c0_23 = arith.constant 0 : index
    %59 = vector.load %arg2[%c11, %c0_23] : memref<16x256xf32, #tpu.memory_space<vmem>>, vector<1x256xf32>
    %c12 = arith.constant 12 : index
    %c0_24 = arith.constant 0 : index
    %60 = vector.load %arg2[%c12, %c0_24] : memref<16x256xf32, #tpu.memory_space<vmem>>, vector<1x256xf32>
    %c13 = arith.constant 13 : index
    %c0_25 = arith.constant 0 : index
    %61 = vector.load %arg2[%c13, %c0_25] : memref<16x256xf32, #tpu.memory_space<vmem>>, vector<1x256xf32>
    %c240_i32_26 = arith.constant 240 : i32
    %62 = tpu.dynamic_rotate %57 by %c240_i32_26 dim 1 : vector<512x256xf32>, i32 -> vector<512x256xf32>
    %63 = vector.broadcast %58 : vector<1x256xf32> to vector<512x256xf32>
    %64 = arith.subf %15, %63 : vector<512x256xf32>
    %65 = vector.broadcast %59 : vector<1x256xf32> to vector<512x256xf32>
    %66 = arith.mulf %64, %65 : vector<512x256xf32>
    %67 = arith.mulf %66, %57 : vector<512x256xf32>
    %68 = vector.broadcast %60 : vector<1x256xf32> to vector<512x256xf32>
    %69 = arith.subf %68, %15 : vector<512x256xf32>
    %70 = vector.broadcast %61 : vector<1x256xf32> to vector<512x256xf32>
    %71 = arith.mulf %69, %70 : vector<512x256xf32>
    %72 = arith.mulf %71, %62 : vector<512x256xf32>
    %73 = arith.addf %67, %72 : vector<512x256xf32>
    %74 = vector.extract_strided_slice %73 {offsets = [0, 0], sizes = [512, 128], strides = [1, 1]} : vector<512x256xf32> to vector<512x128xf32>
    %c0_27 = arith.constant 0 : index
    %c0_28 = arith.constant 0 : index
    %75 = vector.load %arg5[%c0_27, %c0_28] : memref<128x32xf32, #tpu.memory_space<vmem>>, vector<128x32xf32>
    %cst_29 = arith.constant dense<0.000000e+00> : vector<512x32xf32>
    %76 = tpu.matmul %74, %75, %cst_29 {dimension_numbers = #tpu.dot_dimension_numbers<[1], [0], [0], [1], [0, 0, 1, 1], [], []>} : vector<512x128xf32>, vector<128x32xf32>, vector<512x32xf32> -> vector<512x32xf32>
    %77 = arith.addf %8, %76 : vector<512x32xf32>
    %c0_30 = arith.constant 0 : index
    %c0_31 = arith.constant 0 : index
    %78 = vector.load %arg6[%c0_30, %c0_31] : memref<512x32xf32, #tpu.memory_space<vmem>>, vector<512x32xf32>
    tpu.vector_store %arg6[%c0_30, %c0_31], %77 {strides = array<i32>} : memref<512x32xf32, #tpu.memory_space<vmem>>, vector<512x32xf32>,
    return
  }
  func.func @transform_0(%arg0: i32) -> (i32, i32) {
    %c0_i32 = arith.constant 0 : i32
    %c0_i32_0 = arith.constant 0 : i32
    return %arg0, %c0_i32 : i32, i32
  }
  func.func @transform_1(%arg0: i32) -> (i32, i32) {
    %c0_i32 = arith.constant 0 : i32
    %c0_i32_0 = arith.constant 0 : i32
    %c0_i32_1 = arith.constant 0 : i32
    return %c0_i32, %c0_i32_0 : i32, i32
  }
  func.func @transform_2(%arg0: i32) -> (i32, i32) {
    %c0_i32 = arith.constant 0 : i32
    %c0_i32_0 = arith.constant 0 : i32
    %c0_i32_1 = arith.constant 0 : i32
    return %c0_i32, %c0_i32_0 : i32, i32
  }
  func.func @transform_3(%arg0: i32) -> (i32, i32) {
    %c0_i32 = arith.constant 0 : i32
    %c0_i32_0 = arith.constant 0 : i32
    %c0_i32_1 = arith.constant 0 : i32
    return %c0_i32, %c0_i32_0 : i32, i32
  }
  func.func @transform_4(%arg0: i32) -> (i32, i32) {
    %c0_i32 = arith.constant 0 : i32
    %c0_i32_0 = arith.constant 0 : i32
    %c0_i32_1 = arith.constant 0 : i32
    return %c0_i32, %c0_i32_0 : i32, i32
  }
  func.func @transform_5(%arg0: i32) -> (i32, i32) {
    %c0_i32 = arith.constant 0 : i32
    %c0_i32_0 = arith.constant 0 : i32
    return %arg0, %c0_i32 : i32, i32
  }
}

</mosaic_0001>

<bundles_post_ra>
// kernel: tpu_custom_call.1
= control target key start
LH: loop header
LB: loop body
LE: loop exit
PB: predicated region body
PF: predicated region fallthrough
CT: control target
= control target key end

     0   :  { %v17817_v3 = vmov 0.0   ;;  %vm698_vm0 = vcmask 130048   ;;  %s8557_s20 = smov 112   ;;  %s17807_s2 = inlined_call_operand.vmem [shape: f32[16,256], index: 2, kind: input, shape index: {}]   ;;  %s17808_s0 = inlined_call_operand.vmem [shape: f32[512,16], index: 0, kind: input, shape index: {}]   ;;  %s17809_s1 = inlined_call_operand.vmem [shape: f32[16,256], index: 1, kind: input, shape index: {}]   ;;  %s17810_s4 = inlined_call_operand.vmem [shape: f32[128,32], index: 4, kind: input, shape index: {}]   ;;  %s17811_s3 = inlined_call_operand.vmem [shape: f32[16,32], index: 3, kind: input, shape index: {}]   ;;  %s17812_s5 = inlined_call_operand.vmem [shape: f32[512,32], index: 5, kind: output, shape index: {}]  }
   0x1   :  { %v535_v0 = vld [vmem:[%s17807_s2 + $0x8] sm:$0xff]  ;;  %v537_v1 = vld [vmem:[%s17807_s2 + $0x18] sm:$0xff]  ;;  %v534_v2 = vld [vmem:[%s17807_s2] sm:$0xff]  ;;  %955 = vmatprep.mubr.f32.mxu0 %v17817_v3  ;;  %1147 = vmatprep.mubr.f32.mxu1 %v17817_v3 }
   0x2   :  { %v7675_v4 = vpack.c.bf16 %v537_v1, %v535_v0  ;;  %v536_v5 = vld [vmem:[%s17807_s2 + $0x10] sm:$0xff]  ;;  %v20_v6 = vld [vmem:[%s17808_s0] sm:$0xff]  ;;  %v21_v7 = vld [vmem:[%s17808_s0 + $0x8] sm:$0xff] }
   0x3   :  { %v7677_v8 = vpack.c.bf16 %v536_v5, %v534_v2  ;;  %v8608_v9 = vpack.c.bf16 %v21_v7, %v20_v6  ;;  %v22_v10 = vld [vmem:[%s17808_s0 + $0x10] sm:$0xff]  ;;  %v23_v11 = vld [vmem:[%s17808_s0 + $0x18] sm:$0xff]  ;;  %v24_v18 = vld [vmem:[%s17808_s0 + $0x20] sm:$0xff] }
   0x4   :  { %7676 = vmatprep.subr.bf16.mxu0 %v7675_v4  ;;  %7719 = vmatprep.subr.bf16.mxu1 %v7675_v4  ;;  %v8618_v14 = vpack.c.bf16 %v23_v11, %v22_v10  ;;  %v25_v19 = vld [vmem:[%s17808_s0 + $0x28] sm:$0xff]  ;;  %v26_v25 = vld [vmem:[%s17808_s0 + $0x30] sm:$0xff]  ;;  %v27_v26 = vld [vmem:[%s17808_s0 + $0x38] sm:$0xff] }
   0x5   :  { %7678 = vmatpush1.bf16.msra.mxu0 %v7677_v8  ;;  %v570_v12 = vunpack.c.l.bf16 %v8608_v9  ;;  %v571_v13 = vunpack.c.h.bf16 %v8608_v9  ;;  %7720 = vmatpush1.bf16.msra.mxu1 %v7677_v8  ;;  %v8637_v22 = vpack.c.bf16 %v25_v19, %v24_v18  ;;  %v8655_v29 = vpack.c.bf16 %v27_v26, %v26_v25  ;;  %v28_v32 = vld [vmem:[%s17808_s0 + $0x40] sm:$0xff]  ;;  %v29_v33 = vld [vmem:[%s17808_s0 + $0x48] sm:$0xff]  ;;  %v30_v39 = vld [vmem:[%s17808_s0 + $0x50] sm:$0xff] }
   0x6   :  { %7680 = vmatprep.subr.bf16.mxu0 %v7675_v4  ;;  %v572_v17 = vunpack.c.l.bf16 %v8618_v14  ;;  %v573_v21 = vunpack.c.h.bf16 %v8618_v14  ;;  %v8673_v36 = vpack.c.bf16 %v29_v33, %v28_v32  ;;  %v31_v40 = vld [vmem:[%s17808_s0 + $0x58] sm:$0xff]  ;;  %v32_v46 = vld [vmem:[%s17808_s0 + $0x60] sm:$0xff]  ;;  %v33_v47 = vld [vmem:[%s17808_s0 + $0x68] sm:$0xff] }
   0x7   :  { %v634_v15 = vsub.f32 %v20_v6, %v570_v12  ;;  %v635_v16 = vsub.f32 %v21_v7, %v571_v13  ;;  %v574_v24 = vunpack.c.l.bf16 %v8637_v22  ;;  %v575_v28 = vunpack.c.h.bf16 %v8637_v22  ;;  %v34_v53 = vld [vmem:[%s17808_s0 + $0x70] sm:$0xff]  ;;  %v35_v54 = vld [vmem:[%s17808_s0 + $0x78] sm:$0xff]  ;;  %v36_v60 = vld [vmem:[%s17808_s0 + $0x80] sm:$0xff] }
   0x8   :  { %v636_v20 = vsub.f32 %v22_v10, %v572_v17  ;;  %v637_v23 = vsub.f32 %v23_v11, %v573_v21  ;;  %v576_v31 = vunpack.c.l.bf16 %v8655_v29  ;;  %v577_v35 = vunpack.c.h.bf16 %v8655_v29  ;;  %v37_v61 = vld [vmem:[%s17808_s0 + $0x88] sm:$0xff]  ;;  %v38_v4 = vld [vmem:[%s17808_s0 + $0x90] sm:$0xff]  ;;  %v39_v5 = vld [vmem:[%s17808_s0 + $0x98] sm:$0xff] }
   0x9   :  { %7096 = vmatmul.mubr.msk.f32.vlgmr.msra.gmra.mrb[0].mxu0 %vm698_vm0, %v634_v15  ;;  %v638_v27 = vsub.f32 %v24_v18, %v574_v24  ;;  %v639_v30 = vsub.f32 %v25_v19, %v575_v28  ;;  %v578_v38 = vunpack.c.l.bf16 %v8673_v36  ;;  %v579_v42 = vunpack.c.h.bf16 %v8673_v36  ;;  %v40_v15 = vld [vmem:[%s17808_s0 + $0xa0] sm:$0xff]  ;;  %v58_v14 = vld [vmem:[%s17808_s0 + $0x130] sm:$0xff] }
   0xa   :  { %7682 = vmatpush1.bf16.msra.mxu0 %v7677_v8  ;;  %961 = vmatprep.mubr.f32.mxu0 %v17817_v3  ;;  %v640_v34 = vsub.f32 %v26_v25, %v576_v31  ;;  %v641_v37 = vsub.f32 %v27_v26, %v577_v35  ;;  %v8691_v43 = vpack.c.bf16 %v31_v40, %v30_v39  ;;  %v42_v26 = vld [vmem:[%s17808_s0 + $0xb0] sm:$0xff]  ;;  %v56_v9 = vld [vmem:[%s17808_s0 + $0x120] sm:$0xff] }
   0xb   :  { %v642_v41 = vsub.f32 %v28_v32, %v578_v38  ;;  %v643_v44 = vsub.f32 %v29_v33, %v579_v42  ;;  %v8709_v50 = vpack.c.bf16 %v33_v47, %v32_v46  ;;  %v8727_v57 = vpack.c.bf16 %v35_v54, %v34_v53  ;;  %v60_v22 = vld [vmem:[%s17808_s0 + $0x140] sm:$0xff]  ;;  %v62_v29 = vld [vmem:[%s17808_s0 + $0x150] sm:$0xff] }
   0xc   :  { %v580_v45 = vunpack.c.l.bf16 %v8691_v43  ;;  %v581_v49 = vunpack.c.h.bf16 %v8691_v43  ;;  %v8745_v0 = vpack.c.bf16 %v37_v61, %v36_v60  ;;  %v8763_v8 = vpack.c.bf16 %v39_v5, %v38_v4  ;;  %v64_v36 = vld [vmem:[%s17808_s0 + $0x160] sm:$0xff]  ;;  %v66_v43 = vld [vmem:[%s17808_s0 + $0x170] sm:$0xff] }
   0xd   :  { %7097 = vmatmul.mubr.msk.f32.gmra.mrb[2].mxu0 %vm698_vm0, %v635_v16  ;;  %v582_v52 = vunpack.c.l.bf16 %v8709_v50  ;;  %v583_v56 = vunpack.c.h.bf16 %v8709_v50  ;;  %v584_v59 = vunpack.c.l.bf16 %v8727_v57  ;;  %v585_v63 = vunpack.c.h.bf16 %v8727_v57  ;;  %v41_v16 = vld [vmem:[%s17808_s0 + $0xa8] sm:$0xff]  ;;  %v68_v50 = vld [vmem:[%s17808_s0 + $0x180] sm:$0xff]  ;;  %v70_v57 = vld [vmem:[%s17808_s0 + $0x190] sm:$0xff] }
   0xe   :  { %967 = vmatprep.mubr.f32.mxu0 %v17817_v3  ;;  %v644_v48 = vsub.f32 %v30_v39, %v580_v45  ;;  %v645_v51 = vsub.f32 %v31_v40, %v581_v49  ;;  %v586_v2 = vunpack.c.l.bf16 %v8745_v0  ;;  %v587_v7 = vunpack.c.h.bf16 %v8745_v0  ;;  %v44_v39 = vld [vmem:[%s17808_s0 + $0xc0] sm:$0xff]  ;;  %v45_v40 = vld [vmem:[%s17808_s0 + $0xc8] sm:$0xff] }
   0xf   :  { %v646_v55 = vsub.f32 %v32_v46, %v582_v52  ;;  %v647_v58 = vsub.f32 %v33_v47, %v583_v56  ;;  %v648_v62 = vsub.f32 %v34_v53, %v584_v59  ;;  %v649_v1 = vsub.f32 %v35_v54, %v585_v63  ;;  %v47_v53 = vld [vmem:[%s17808_s0 + $0xd8] sm:$0xff]  ;;  %v72_v0 = vld [vmem:[%s17808_s0 + $0x1a0] sm:$0xff] }
  0x10   :  { %v650_v6 = vsub.f32 %v36_v60, %v586_v2  ;;  %v651_v10 = vsub.f32 %v37_v61, %v587_v7  ;;  %v588_v11 = vunpack.c.l.bf16 %v8763_v8  ;;  %v589_v19 = vunpack.c.h.bf16 %v8763_v8  ;;  %v74_v8 = vld [vmem:[%s17808_s0 + $0x1b0] sm:$0xff] }
  0x11   :  { %7098 = vmatmul.mubr.msk.f32.gmra.mrb[4].mxu0 %vm698_vm0, %v636_v20  ;;  %v8781_v20 = vpack.c.bf16 %v41_v16, %v40_v15  ;;  %v8817_v46 = vpack.c.bf16 %v45_v40, %v44_v39 }
  0x12   :  { %973 = vmatprep.mubr.f32.mxu0 %v17817_v3  ;;  %v652_v18 = vsub.f32 %v38_v4, %v588_v11 }
  0x13   :  { %v590_v25 = vunpack.c.l.bf16 %v8781_v20  ;;  %v591_v32 = vunpack.c.h.bf16 %v8781_v20  ;;  %v76_v20 = vld [vmem:[%s17808_s0 + $0x1c0] sm:$0xff] }
  0x15   :  { %7099 = vmatmul.mubr.msk.f32.gmra.mrb[6].mxu0 %vm698_vm0, %v637_v23  ;;  %v653_v23 = vsub.f32 %v39_v5, %v589_v19 }
  0x16   :  { %979 = vmatprep.mubr.f32.mxu0 %v17817_v3 }
  0x19   :  { %7100 = vmatmul.mubr.msk.f32.gmra.mrb[8].mxu0 %vm698_vm0, %v638_v27  ;;  %v43_v27 = vld [vmem:[%s17808_s0 + $0xb8] sm:$0xff] }
  0x1a   :  { %985 = vmatprep.mubr.f32.mxu0 %v17817_v3  ;;  %v8799_v33 = vpack.c.bf16 %v43_v27, %v42_v26 }
  0x1d   :  { %7101 = vmatmul.mubr.msk.f32.gmra.mrb[10].mxu0 %vm698_vm0, %v639_v30  ;;  %v654_v30 = vsub.f32 %v40_v15, %v590_v25 }
  0x1e   :  { %991 = vmatprep.mubr.f32.mxu0 %v17817_v3 }
  0x21   :  { %7102 = vmatmul.mubr.msk.f32.gmra.mrb[12].mxu0 %vm698_vm0, %v640_v34  ;;  %v655_v34 = vsub.f32 %v41_v16, %v591_v32  ;;  %v50_v16 = vld [vmem:[%s17808_s0 + $0xf0] sm:$0xff] }
  0x22   :  { %997 = vmatprep.mubr.f32.mxu0 %v17817_v3 }
  0x25   :  { %7103 = vmatmul.mubr.msk.f32.gmra.mrb[14].mxu0 %vm698_vm0, %v641_v37  ;;  %v592_v37 = vunpack.c.l.bf16 %v8799_v33 }
  0x26   :  { %1003 = vmatprep.mubr.f32.mxu0 %v17817_v3 }
  0x29   :  { %7104 = vmatmul.mubr.msk.f32.gmra.mrb[16].mxu0 %vm698_vm0, %v642_v41  ;;  %v656_v41 = vsub.f32 %v42_v26, %v592_v37 }
  0x2a   :  { %1009 = vmatprep.mubr.f32.mxu0 %v17817_v3 }
  0x2d   :  { %7105 = vmatmul.mubr.msk.f32.gmra.mrb[18].mxu0 %vm698_vm0, %v643_v44  ;;  %v593_v44 = vunpack.c.h.bf16 %v8799_v33  ;;  %v17813_v33 = vlaneseq }
  0x2e   :  { %1015 = vmatprep.mubr.f32.mxu0 %v17817_v3 }
  0x2f   :  { %v657_v47 = vsub.f32 %v43_v27, %v593_v44 }
  0x31   :  { %7106 = vmatmul.mubr.msk.f32.gmra.mrb[20].mxu0 %vm698_vm0, %v644_v48  ;;  %v594_v48 = vunpack.c.l.bf16 %v8817_v46 }
  0x32   :  { %1021 = vmatprep.mubr.f32.mxu0 %v17817_v3 }
  0x33   :  { %v658_v54 = vsub.f32 %v44_v39, %v594_v48 }
  0x35   :  { %7107 = vmatmul.mubr.msk.f32.gmra.mrb[22].mxu0 %vm698_vm0, %v645_v51  ;;  %v46_v51 = vld [vmem:[%s17808_s0 + $0xd0] sm:$0xff] }
  0x36   :  { %1027 = vmatprep.mubr.f32.mxu0 %v17817_v3 }
  0x39   :  { %7108 = vmatmul.mubr.msk.f32.gmra.mrb[24].mxu0 %vm698_vm0, %v646_v55  ;;  %v595_v55 = vunpack.c.h.bf16 %v8817_v46  ;;  %v1981_v46 = vld [vmem:[%s17809_s1] ss:$8 sm:$0x3] }
  0x3a   :  { %1033 = vmatprep.mubr.f32.mxu0 %v17817_v3 }
  0x3b   :  { %v659_v60 = vsub.f32 %v45_v40, %v595_v55 }
  0x3d   :  { %7109 = vmatmul.mubr.msk.f32.gmra.mrb[26].mxu0 %vm698_vm0, %v647_v58  ;;  %v8835_v58 = vpack.c.bf16 %v47_v53, %v46_v51 }
  0x3e   :  { %1039 = vmatprep.mubr.f32.mxu0 %v17817_v3 }
  0x3f   :  { %v596_v61 = vunpack.c.l.bf16 %v8835_v58  ;;  %v597_v5 = vunpack.c.h.bf16 %v8835_v58  ;;  %v7225_v58 = vld [vmem:[%s17809_s1 + $0x2] ss:$8 sm:$0x3] }
  0x41   :  { %7110 = vmatmul.mubr.msk.f32.gmra.mrb[28].mxu0 %vm698_vm0, %v648_v62  ;;  %v48_v62 = vld [vmem:[%s17808_s0 + $0xe0] sm:$0xff]  ;;  %v660_v4 = vsub.f32 %v46_v51, %v596_v61  ;;  %v53_v51 = vld [vmem:[%s17808_s0 + $0x108] sm:$0xff] }
  0x42   :  { %1045 = vmatprep.mubr.f32.mxu0 %v17817_v3 }
  0x45   :  { %7111 = vmatmul.mubr.msk.f32.gmra.mrb[30].mxu0 %vm698_vm0, %v649_v1  ;;  %v49_v1 = vld [vmem:[%s17808_s0 + $0xe8] sm:$0xff] }
  0x46   :  { %1051 = vmatprep.mubr.f32.mxu0 %v17817_v3 }
  0x49   :  { %7112 = vmatmul.mubr.msk.f32.gmra.mrb[32].mxu0 %vm698_vm0, %v650_v6  ;;  %v8853_v6 = vpack.c.bf16 %v49_v1, %v48_v62 }
  0x4a   :  { %1057 = vmatprep.mubr.f32.mxu0 %v17817_v3 }
  0x4b   :  { %v598_v15 = vunpack.c.l.bf16 %v8853_v6  ;;  %v599_v26 = vunpack.c.h.bf16 %v8853_v6 }
  0x4d   :  { %7113 = vmatmul.mubr.msk.f32.gmra.mrb[34].mxu0 %vm698_vm0, %v651_v10  ;;  %v661_v10 = vsub.f32 %v47_v53, %v597_v5 }
  0x4e   :  { %1063 = vmatprep.mubr.f32.mxu0 %v17817_v3 }
  0x51   :  { %7114 = vmatmul.mubr.msk.f32.gmra.mrb[36].mxu0 %vm698_vm0, %v652_v18  ;;  %v51_v18 = vld [vmem:[%s17808_s0 + $0xf8] sm:$0xff] }
  0x52   :  { %1069 = vmatprep.mubr.f32.mxu0 %v17817_v3  ;;  %v8871_v27 = vpack.c.bf16 %v51_v18, %v50_v16 }
  0x54   :  { %v601_v40 = vunpack.c.h.bf16 %v8871_v27 }
  0x55   :  { %7115 = vmatmul.mubr.msk.f32.gmra.mrb[38].mxu0 %vm698_vm0, %v653_v23  ;;  %v662_v23 = vsub.f32 %v48_v62, %v598_v15 }
  0x56   :  { %1075 = vmatprep.mubr.f32.mxu0 %v17817_v3 }
  0x59   :  { %7116 = vmatmul.mubr.msk.f32.gmra.mrb[40].mxu0 %vm698_vm0, %v654_v30  ;;  %v663_v30 = vsub.f32 %v49_v1, %v599_v26  ;;  %v54_v1 = vld [vmem:[%s17808_s0 + $0x110] sm:$0xff] }
  0x5a   :  { %1081 = vmatprep.mubr.f32.mxu0 %v17817_v3 }
  0x5d   :  { %7117 = vmatmul.mubr.msk.f32.gmra.mrb[42].mxu0 %vm698_vm0, %v655_v34  ;;  %v600_v34 = vunpack.c.l.bf16 %v8871_v27 }
  0x5e   :  { %1087 = vmatprep.mubr.f32.mxu0 %v17817_v3 }
  0x5f   :  { %v664_v39 = vsub.f32 %v50_v16, %v600_v34 }
  0x61   :  { %7118 = vmatmul.mubr.msk.f32.gmra.mrb[44].mxu0 %vm698_vm0, %v656_v41  ;;  %v665_v41 = vsub.f32 %v51_v18, %v601_v40 }
  0x62   :  { %1093 = vmatprep.mubr.f32.mxu0 %v17817_v3 }
  0x65   :  { %7119 = vmatmul.mubr.msk.f32.gmra.mrb[46].mxu0 %vm698_vm0, %v657_v47  ;;  %v52_v47 = vld [vmem:[%s17808_s0 + $0x100] sm:$0xff] }
  0x66   :  { %1099 = vmatprep.mubr.f32.mxu0 %v17817_v3  ;;  %v8894_v53 = vpack.c.bf16 %v53_v51, %v52_v47 }
  0x68   :  { %v603_v62 = vunpack.c.h.bf16 %v8894_v53 }
  0x69   :  { %7120 = vmatmul.mubr.msk.f32.gmra.mrb[48].mxu0 %vm698_vm0, %v658_v54  ;;  %v602_v54 = vunpack.c.l.bf16 %v8894_v53 }
  0x6a   :  { %1105 = vmatprep.mubr.f32.mxu0 %v17817_v3 }
  0x6d   :  { %7121 = vmatmul.mubr.msk.f32.gmra.mrb[50].mxu0 %vm698_vm0, %v659_v60  ;;  %v666_v60 = vsub.f32 %v52_v47, %v602_v54 }
  0x6e   :  { %1111 = vmatprep.mubr.f32.mxu0 %v17817_v3 }
  0x6f   :  { %7128 = vmatmul.mubr.msk.f32.vlgmr.msra.gmra.mrb[0].mxu1 %vm698_vm0, %v666_v60 }
  0x70   :  { %1153 = vmatprep.mubr.f32.mxu1 %v17817_v3 }
  0x71   :  { %7122 = vmatmul.mubr.msk.f32.gmra.mrb[52].mxu0 %vm698_vm0, %v660_v4  ;;  %v55_v4 = vld [vmem:[%s17808_s0 + $0x118] sm:$0xff] }
  0x72   :  { %1117 = vmatprep.mubr.f32.mxu0 %v17817_v3  ;;  %v8916_v16 = vpack.c.bf16 %v55_v4, %v54_v1 }
  0x75   :  { %7123 = vmatmul.mubr.msk.f32.gmra.mrb[54].mxu0 %vm698_vm0, %v661_v10  ;;  %v667_v10 = vsub.f32 %v53_v51, %v603_v62 }
  0x76   :  { %1123 = vmatprep.mubr.f32.mxu0 %v17817_v3 }
  0x77   :  { %7129 = vmatmul.mubr.msk.f32.gmra.mrb[2].mxu1 %vm698_vm0, %v667_v10 }
  0x78   :  { %1159 = vmatprep.mubr.f32.mxu1 %v17817_v3 }
  0x79   :  { %7124 = vmatmul.mubr.msk.f32.gmra.mrb[56].mxu0 %vm698_vm0, %v662_v23  ;;  %v605_v23 = vunpack.c.h.bf16 %v8916_v16 }
  0x7a   :  { %1129 = vmatprep.mubr.f32.mxu0 %v17817_v3 }
  0x7d   :  { %7125 = vmatmul.mubr.msk.f32.gmra.mrb[58].mxu0 %vm698_vm0, %v663_v30  ;;  %v669_v30 = vsub.f32 %v55_v4, %v605_v23 }
  0x7e   :  { %1135 = vmatprep.mubr.f32.mxu0 %v17817_v3 }
  0x81   :  { %7126 = vmatmul.mubr.msk.f32.gmra.mrb[60].mxu0 %vm698_vm0, %v664_v39 }
  0x82   :  { %1141 = vmatprep.mubr.f32.mxu0 %v17817_v3 }
  0x85   :  { %7127 = vmatmul.mubr.msk.f32.gmra.mrb[62].mxu0 %vm698_vm0, %v665_v41 }
  0x86   :  { %1596 = vmatprep.mubr.f32.mxu0 %v17817_v3 }
  0x89   :  { %7160 = vmatmul.mubr.msk.f32.vlgmr.msra.gmra.mrb[0].mxu0 %vm698_vm0, %v570_v12  ;;  %v604_v12 = vunpack.c.l.bf16 %v8916_v16 }
  0x8a   :  { %1602 = vmatprep.mubr.f32.mxu0 %v17817_v3 }
  0x8b   :  { %v668_v18 = vsub.f32 %v54_v1, %v604_v12 }
  0x8d   :  { %7161 = vmatmul.mubr.msk.f32.gmra.mrb[2].mxu0 %vm698_vm0, %v571_v13  ;;  %7130 = vmatmul.mubr.msk.f32.gmra.mrb[4].mxu1 %vm698_vm0, %v668_v18  ;;  %v57_v13 = vld [vmem:[%s17808_s0 + $0x128] sm:$0xff] }
  0x8e   :  { %1608 = vmatprep.mubr.f32.mxu0 %v17817_v3  ;;  %1165 = vmatprep.mubr.f32.mxu1 %v17817_v3  ;;  %v8942_v39 = vpack.c.bf16 %v57_v13, %v56_v9 }
  0x90   :  { %v607_v47 = vunpack.c.h.bf16 %v8942_v39 }
  0x91   :  { %7162 = vmatmul.mubr.msk.f32.gmra.mrb[4].mxu0 %vm698_vm0, %v572_v17  ;;  %7131 = vmatmul.mubr.msk.f32.gmra.mrb[6].mxu1 %vm698_vm0, %v669_v30  ;;  %v606_v17 = vunpack.c.l.bf16 %v8942_v39 }
  0x92   :  { %1614 = vmatprep.mubr.f32.mxu0 %v17817_v3  ;;  %1171 = vmatprep.mubr.f32.mxu1 %v17817_v3  ;;  %v671_v51 = vsub.f32 %v57_v13, %v607_v47 }
  0x93   :  { %v670_v41 = vsub.f32 %v56_v9, %v606_v17 }
  0x95   :  { %7163 = vmatmul.mubr.msk.f32.gmra.mrb[6].mxu0 %vm698_vm0, %v573_v21  ;;  %7132 = vmatmul.mubr.msk.f32.gmra.mrb[8].mxu1 %vm698_vm0, %v670_v41  ;;  %v59_v21 = vld [vmem:[%s17808_s0 + $0x138] sm:$0xff] }
  0x96   :  { %1620 = vmatprep.mubr.f32.mxu0 %v17817_v3  ;;  %1177 = vmatprep.mubr.f32.mxu1 %v17817_v3  ;;  %v8968_v60 = vpack.c.bf16 %v59_v21, %v58_v14 }
  0x98   :  { %v609_v4 = vunpack.c.h.bf16 %v8968_v60 }
  0x99   :  { %7164 = vmatmul.mubr.msk.f32.gmra.mrb[8].mxu0 %vm698_vm0, %v574_v24  ;;  %7133 = vmatmul.mubr.msk.f32.gmra.mrb[10].mxu1 %vm698_vm0, %v671_v51  ;;  %v608_v24 = vunpack.c.l.bf16 %v8968_v60 }
  0x9a   :  { %1626 = vmatprep.mubr.f32.mxu0 %v17817_v3  ;;  %1183 = vmatprep.mubr.f32.mxu1 %v17817_v3  ;;  %v673_v10 = vsub.f32 %v59_v21, %v609_v4 }
  0x9b   :  { %v672_v1 = vsub.f32 %v58_v14, %v608_v24 }
  0x9d   :  { %7165 = vmatmul.mubr.msk.f32.gmra.mrb[10].mxu0 %vm698_vm0, %v575_v28  ;;  %7134 = vmatmul.mubr.msk.f32.gmra.mrb[12].mxu1 %vm698_vm0, %v672_v1  ;;  %v61_v28 = vld [vmem:[%s17808_s0 + $0x148] sm:$0xff] }
  0x9e   :  { %1632 = vmatprep.mubr.f32.mxu0 %v17817_v3  ;;  %1189 = vmatprep.mubr.f32.mxu1 %v17817_v3  ;;  %v8994_v18 = vpack.c.bf16 %v61_v28, %v60_v22 }
  0xa0   :  { %v611_v13 = vunpack.c.h.bf16 %v8994_v18 }
  0xa1   :  { %7166 = vmatmul.mubr.msk.f32.gmra.mrb[12].mxu0 %vm698_vm0, %v576_v31  ;;  %7135 = vmatmul.mubr.msk.f32.gmra.mrb[14].mxu1 %vm698_vm0, %v673_v10  ;;  %v610_v31 = vunpack.c.l.bf16 %v8994_v18 }
  0xa2   :  { %1638 = vmatprep.mubr.f32.mxu0 %v17817_v3  ;;  %1195 = vmatprep.mubr.f32.mxu1 %v17817_v3  ;;  %v675_v30 = vsub.f32 %v61_v28, %v611_v13 }
  0xa3   :  { %v674_v9 = vsub.f32 %v60_v22, %v610_v31 }
  0xa5   :  { %7167 = vmatmul.mubr.msk.f32.gmra.mrb[14].mxu0 %vm698_vm0, %v577_v35  ;;  %7136 = vmatmul.mubr.msk.f32.gmra.mrb[16].mxu1 %vm698_vm0, %v674_v9  ;;  %v63_v35 = vld [vmem:[%s17808_s0 + $0x158] sm:$0xff] }
  0xa6   :  { %1644 = vmatprep.mubr.f32.mxu0 %v17817_v3  ;;  %1201 = vmatprep.mubr.f32.mxu1 %v17817_v3  ;;  %v9020_v41 = vpack.c.bf16 %v63_v35, %v62_v29 }
  0xa8   :  { %v613_v21 = vunpack.c.h.bf16 %v9020_v41 }
  0xa9   :  { %7168 = vmatmul.mubr.msk.f32.gmra.mrb[16].mxu0 %vm698_vm0, %v578_v38  ;;  %7137 = vmatmul.mubr.msk.f32.gmra.mrb[18].mxu1 %vm698_vm0, %v675_v30  ;;  %v612_v38 = vunpack.c.l.bf16 %v9020_v41 }
  0xaa   :  { %1650 = vmatprep.mubr.f32.mxu0 %v17817_v3  ;;  %1207 = vmatprep.mubr.f32.mxu1 %v17817_v3  ;;  %v677_v51 = vsub.f32 %v63_v35, %v613_v21 }
  0xab   :  { %v676_v14 = vsub.f32 %v62_v29, %v612_v38 }
  0xad   :  { %7169 = vmatmul.mubr.msk.f32.gmra.mrb[18].mxu0 %vm698_vm0, %v579_v42  ;;  %7138 = vmatmul.mubr.msk.f32.gmra.mrb[20].mxu1 %vm698_vm0, %v676_v14  ;;  %v65_v42 = vld [vmem:[%s17808_s0 + $0x168] sm:$0xff] }
  0xae   :  { %1656 = vmatprep.mubr.f32.mxu0 %v17817_v3  ;;  %1213 = vmatprep.mubr.f32.mxu1 %v17817_v3  ;;  %v9046_v1 = vpack.c.bf16 %v65_v42, %v64_v36 }
  0xb0   :  { %v615_v28 = vunpack.c.h.bf16 %v9046_v1 }
  0xb1   :  { %7170 = vmatmul.mubr.msk.f32.gmra.mrb[20].mxu0 %vm698_vm0, %v580_v45  ;;  %7139 = vmatmul.mubr.msk.f32.gmra.mrb[22].mxu1 %vm698_vm0, %v677_v51  ;;  %v614_v45 = vunpack.c.l.bf16 %v9046_v1 }
  0xb2   :  { %1662 = vmatprep.mubr.f32.mxu0 %v17817_v3  ;;  %1219 = vmatprep.mubr.f32.mxu1 %v17817_v3  ;;  %v679_v10 = vsub.f32 %v65_v42, %v615_v28 }
  0xb3   :  { %v678_v22 = vsub.f32 %v64_v36, %v614_v45 }
  0xb5   :  { %7171 = vmatmul.mubr.msk.f32.gmra.mrb[22].mxu0 %vm698_vm0, %v581_v49  ;;  %7140 = vmatmul.mubr.msk.f32.gmra.mrb[24].mxu1 %vm698_vm0, %v678_v22  ;;  %v67_v49 = vld [vmem:[%s17808_s0 + $0x178] sm:$0xff] }
  0xb6   :  { %1668 = vmatprep.mubr.f32.mxu0 %v17817_v3  ;;  %1225 = vmatprep.mubr.f32.mxu1 %v17817_v3  ;;  %v9072_v9 = vpack.c.bf16 %v67_v49, %v66_v43 }
  0xb8   :  { %v617_v35 = vunpack.c.h.bf16 %v9072_v9 }
  0xb9   :  { %7172 = vmatmul.mubr.msk.f32.gmra.mrb[24].mxu0 %vm698_vm0, %v582_v52  ;;  %7141 = vmatmul.mubr.msk.f32.gmra.mrb[26].mxu1 %vm698_vm0, %v679_v10  ;;  %v616_v52 = vunpack.c.l.bf16 %v9072_v9 }
  0xba   :  { %1674 = vmatprep.mubr.f32.mxu0 %v17817_v3  ;;  %1231 = vmatprep.mubr.f32.mxu1 %v17817_v3  ;;  %v681_v30 = vsub.f32 %v67_v49, %v617_v35 }
  0xbb   :  { %v680_v29 = vsub.f32 %v66_v43, %v616_v52 }
  0xbd   :  { %7173 = vmatmul.mubr.msk.f32.gmra.mrb[26].mxu0 %vm698_vm0, %v583_v56  ;;  %7142 = vmatmul.mubr.msk.f32.gmra.mrb[28].mxu1 %vm698_vm0, %v680_v29  ;;  %v69_v56 = vld [vmem:[%s17808_s0 + $0x188] sm:$0xff] }
  0xbe   :  { %1680 = vmatprep.mubr.f32.mxu0 %v17817_v3  ;;  %1237 = vmatprep.mubr.f32.mxu1 %v17817_v3  ;;  %v9098_v14 = vpack.c.bf16 %v69_v56, %v68_v50 }
  0xc0   :  { %v619_v42 = vunpack.c.h.bf16 %v9098_v14 }
  0xc1   :  { %7174 = vmatmul.mubr.msk.f32.gmra.mrb[28].mxu0 %vm698_vm0, %v584_v59  ;;  %7143 = vmatmul.mubr.msk.f32.gmra.mrb[30].mxu1 %vm698_vm0, %v681_v30  ;;  %v618_v59 = vunpack.c.l.bf16 %v9098_v14 }
  0xc2   :  { %1686 = vmatprep.mubr.f32.mxu0 %v17817_v3  ;;  %1243 = vmatprep.mubr.f32.mxu1 %v17817_v3  ;;  %v683_v51 = vsub.f32 %v69_v56, %v619_v42 }
  0xc3   :  { %v682_v36 = vsub.f32 %v68_v50, %v618_v59 }
  0xc5   :  { %7175 = vmatmul.mubr.msk.f32.gmra.mrb[30].mxu0 %vm698_vm0, %v585_v63  ;;  %7144 = vmatmul.mubr.msk.f32.gmra.mrb[32].mxu1 %vm698_vm0, %v682_v36  ;;  %v71_v63 = vld [vmem:[%s17808_s0 + $0x198] sm:$0xff] }
  0xc6   :  { %1692 = vmatprep.mubr.f32.mxu0 %v17817_v3  ;;  %1249 = vmatprep.mubr.f32.mxu1 %v17817_v3  ;;  %v9124_v22 = vpack.c.bf16 %v71_v63, %v70_v57 }
  0xc8   :  { %v621_v49 = vunpack.c.h.bf16 %v9124_v22 }
  0xc9   :  { %7176 = vmatmul.mubr.msk.f32.gmra.mrb[32].mxu0 %vm698_vm0, %v586_v2  ;;  %7145 = vmatmul.mubr.msk.f32.gmra.mrb[34].mxu1 %vm698_vm0, %v683_v51  ;;  %v620_v2 = vunpack.c.l.bf16 %v9124_v22 }
  0xca   :  { %1698 = vmatprep.mubr.f32.mxu0 %v17817_v3  ;;  %1255 = vmatprep.mubr.f32.mxu1 %v17817_v3  ;;  %v685_v10 = vsub.f32 %v71_v63, %v621_v49 }
  0xcb   :  { %v684_v43 = vsub.f32 %v70_v57, %v620_v2 }
  0xcd   :  { %7177 = vmatmul.mubr.msk.f32.gmra.mrb[34].mxu0 %vm698_vm0, %v587_v7  ;;  %7146 = vmatmul.mubr.msk.f32.gmra.mrb[36].mxu1 %vm698_vm0, %v684_v43  ;;  %v73_v7 = vld [vmem:[%s17808_s0 + $0x1a8] sm:$0xff] }
  0xce   :  { %1704 = vmatprep.mubr.f32.mxu0 %v17817_v3  ;;  %1261 = vmatprep.mubr.f32.mxu1 %v17817_v3  ;;  %v9150_v29 = vpack.c.bf16 %v73_v7, %v72_v0 }
  0xd0   :  { %v623_v56 = vunpack.c.h.bf16 %v9150_v29 }
  0xd1   :  { %7178 = vmatmul.mubr.msk.f32.gmra.mrb[36].mxu0 %vm698_vm0, %v588_v11  ;;  %7147 = vmatmul.mubr.msk.f32.gmra.mrb[38].mxu1 %vm698_vm0, %v685_v10  ;;  %v622_v11 = vunpack.c.l.bf16 %v9150_v29 }
  0xd2   :  { %1710 = vmatprep.mubr.f32.mxu0 %v17817_v3  ;;  %1267 = vmatprep.mubr.f32.mxu1 %v17817_v3  ;;  %v687_v30 = vsub.f32 %v73_v7, %v623_v56 }
  0xd3   :  { %v686_v50 = vsub.f32 %v72_v0, %v622_v11 }
  0xd5   :  { %7179 = vmatmul.mubr.msk.f32.gmra.mrb[38].mxu0 %vm698_vm0, %v589_v19  ;;  %7148 = vmatmul.mubr.msk.f32.gmra.mrb[40].mxu1 %vm698_vm0, %v686_v50  ;;  %v75_v19 = vld [vmem:[%s17808_s0 + $0x1b8] sm:$0xff] }
  0xd6   :  { %1716 = vmatprep.mubr.f32.mxu0 %v17817_v3  ;;  %1273 = vmatprep.mubr.f32.mxu1 %v17817_v3  ;;  %v9176_v36 = vpack.c.bf16 %v75_v19, %v74_v8 }
  0xd8   :  { %v625_v63 = vunpack.c.h.bf16 %v9176_v36 }
  0xd9   :  { %7180 = vmatmul.mubr.msk.f32.gmra.mrb[40].mxu0 %vm698_vm0, %v590_v25  ;;  %7149 = vmatmul.mubr.msk.f32.gmra.mrb[42].mxu1 %vm698_vm0, %v687_v30  ;;  %v624_v25 = vunpack.c.l.bf16 %v9176_v36 }
  0xda   :  { %1722 = vmatprep.mubr.f32.mxu0 %v17817_v3  ;;  %1279 = vmatprep.mubr.f32.mxu1 %v17817_v3  ;;  %v689_v51 = vsub.f32 %v75_v19, %v625_v63 }
  0xdb   :  { %v688_v57 = vsub.f32 %v74_v8, %v624_v25 }
  0xdd   :  { %7181 = vmatmul.mubr.msk.f32.gmra.mrb[42].mxu0 %vm698_vm0, %v591_v32  ;;  %7150 = vmatmul.mubr.msk.f32.gmra.mrb[44].mxu1 %vm698_vm0, %v688_v57  ;;  %v77_v32 = vld [vmem:[%s17808_s0 + $0x1c8] sm:$0xff] }
  0xde   :  { %1728 = vmatprep.mubr.f32.mxu0 %v17817_v3  ;;  %1285 = vmatprep.mubr.f32.mxu1 %v17817_v3  ;;  %v9202_v43 = vpack.c.bf16 %v77_v32, %v76_v20 }
  0xe1   :  { %7182 = vmatmul.mubr.msk.f32.gmra.mrb[44].mxu0 %vm698_vm0, %v592_v37  ;;  %7151 = vmatmul.mubr.msk.f32.gmra.mrb[46].mxu1 %vm698_vm0, %v689_v51  ;;  %v626_v37 = vunpack.c.l.bf16 %v9202_v43 }
  0xe2   :  { %1734 = vmatprep.mubr.f32.mxu0 %v17817_v3  ;;  %1291 = vmatprep.mubr.f32.mxu1 %v17817_v3 }
  0xe3   :  { %v690_v0 = vsub.f32 %v76_v20, %v626_v37 }
  0xe5   :  { %7183 = vmatmul.mubr.msk.f32.gmra.mrb[46].mxu0 %vm698_vm0, %v593_v44  ;;  %7152 = vmatmul.mubr.msk.f32.gmra.mrb[48].mxu1 %vm698_vm0, %v690_v0  ;;  %v1984_v44 = vshrl.u32 %v17813_v33, 7 }
  0xe6   :  { %1740 = vmatprep.mubr.f32.mxu0 %v17817_v3  ;;  %1297 = vmatprep.mubr.f32.mxu1 %v17817_v3 }
  0xe9   :  { %7184 = vmatmul.mubr.msk.f32.gmra.mrb[48].mxu0 %vm698_vm0, %v594_v48  ;;  %v9330_v48 = vsub.s32 0, %v1984_v44 }
  0xea   :  { %1746 = vmatprep.mubr.f32.mxu0 %v17817_v3 }
  0xeb   :  { %18555 = vst [vmem:[#allocation2_spill] sm:$0xff] %v9330_v48 }
  0xed   :  { %7185 = vmatmul.mubr.msk.f32.gmra.mrb[50].mxu0 %vm698_vm0, %v595_v55  ;;  %v7224_v55 = vld [vmem:[%s17809_s1 + $0x1] ss:$8 sm:$0x3] }
  0xee   :  { %1752 = vmatprep.mubr.f32.mxu0 %v17817_v3  ;;  %v9349_v6 = vrot.slane %v7224_v55, %v9330_v48 }
  0xf0   :  { %18557 = vst [vmem:[#allocation4_spill] sm:$0xff] %v9349_v6 }
  0xf1   :  { %7186 = vmatmul.mubr.msk.f32.gmra.mrb[52].mxu0 %vm698_vm0, %v596_v61  ;;  %v7226_v61 = vld [vmem:[%s17809_s1 + $0x3] ss:$8 sm:$0x3] }
  0xf2   :  { %1758 = vmatprep.mubr.f32.mxu0 %v17817_v3 }
  0xf5   :  { %7187 = vmatmul.mubr.msk.f32.gmra.mrb[54].mxu0 %vm698_vm0, %v597_v5  ;;  %v9346_v5 = vrot.slane %v1981_v46, %v9330_v48 }
  0xf6   :  { %1764 = vmatprep.mubr.f32.mxu0 %v17817_v3 }
  0xf7   :  { %18556 = vst [vmem:[#allocation3_spill] sm:$0xff] %v9346_v5 }
  0xf9   :  { %7188 = vmatmul.mubr.msk.f32.gmra.mrb[56].mxu0 %vm698_vm0, %v598_v15  ;;  %v9352_v15 = vrot.slane %v7225_v58, %v9330_v48 }
  0xfa   :  { %1770 = vmatprep.mubr.f32.mxu0 %v17817_v3 }
  0xfb   :  { %18558 = vst [vmem:[#allocation5_spill] sm:$0xff] %v9352_v15 }
  0xfd   :  { %7189 = vmatmul.mubr.msk.f32.gmra.mrb[58].mxu0 %vm698_vm0, %v599_v26  ;;  %v9356_v26 = vrot.slane %v7226_v61, %v9330_v48 }
  0xfe   :  { %1776 = vmatprep.mubr.f32.mxu0 %v17817_v3 }
  0xff   :  { %18559 = vst [vmem:[#allocation6_spill] sm:$0xff] %v9356_v26 }
 0x101   :  { %7190 = vmatmul.mubr.msk.f32.gmra.mrb[60].mxu0 %vm698_vm0, %v600_v34  ;;  %v9360_v34 = vsub.s32 1, %v1984_v44 }
 0x102   :  { %1782 = vmatprep.mubr.f32.mxu0 %v17817_v3 }
 0x103   :  { %18561 = vst [vmem:[#allocation8_spill] sm:$0xff] %v9360_v34  ;;  %v9383_v39 = vrot.slane %v1981_v46, %v9360_v34 }
 0x105   :  { %7191 = vmatmul.mubr.msk.f32.gmra.mrb[62].mxu0 %vm698_vm0, %v601_v40  ;;  %18564 = vst [vmem:[#allocation11_spill] sm:$0xff] %v9383_v39 }
 0x106   :  { %1788 = vmatprep.mubr.f32.mxu0 %v17817_v3 }
 0x109   :  { %7192 = vmatmul.mubr.msk.f32.gmra.mrb[64].mxu0 %vm698_vm0, %v602_v54 }
 0x10a   :  { %1794 = vmatprep.mubr.f32.mxu0 %v17817_v3 }
 0x10d   :  { %7193 = vmatmul.mubr.msk.f32.gmra.mrb[66].mxu0 %vm698_vm0, %v603_v62 }
 0x10e   :  { %1800 = vmatprep.mubr.f32.mxu0 %v17817_v3 }
 0x111   :  { %7194 = vmatmul.mubr.msk.f32.gmra.mrb[68].mxu0 %vm698_vm0, %v604_v12 }
 0x112   :  { %1806 = vmatprep.mubr.f32.mxu0 %v17817_v3 }
 0x115   :  { %7195 = vmatmul.mubr.msk.f32.gmra.mrb[70].mxu0 %vm698_vm0, %v605_v23 }
 0x116   :  { %1812 = vmatprep.mubr.f32.mxu0 %v17817_v3 }
 0x119   :  { %7196 = vmatmul.mubr.msk.f32.gmra.mrb[72].mxu0 %vm698_vm0, %v606_v17  ;;  %v9386_v17 = vrot.slane %v7224_v55, %v9360_v34 }
 0x11a   :  { %1818 = vmatprep.mubr.f32.mxu0 %v17817_v3 }
 0x11b   :  { %18565 = vst [vmem:[#allocation12_spill] sm:$0xff] %v9386_v17 }
 0x11d   :  { %7197 = vmatmul.mubr.msk.f32.gmra.mrb[74].mxu0 %vm698_vm0, %v607_v47  ;;  %v9389_v47 = vrot.slane %v7225_v58, %v9360_v34 }
 0x11e   :  { %1824 = vmatprep.mubr.f32.mxu0 %v17817_v3 }
 0x11f   :  { %18566 = vst [vmem:[#allocation13_spill] sm:$0xff] %v9389_v47 }
 0x121   :  { %7198 = vmatmul.mubr.msk.f32.gmra.mrb[76].mxu0 %vm698_vm0, %v608_v24 }
 0x122   :  { %1830 = vmatprep.mubr.f32.mxu0 %v17817_v3 }
 0x125   :  { %7199 = vmatmul.mubr.msk.f32.gmra.mrb[78].mxu0 %vm698_vm0, %v609_v4 }
 0x126   :  { %1836 = vmatprep.mubr.f32.mxu0 %v17817_v3 }
 0x129   :  { %7200 = vmatmul.mubr.msk.f32.gmra.mrb[80].mxu0 %vm698_vm0, %v610_v31 }
 0x12a   :  { %1842 = vmatprep.mubr.f32.mxu0 %v17817_v3 }
 0x12d   :  { %7201 = vmatmul.mubr.msk.f32.gmra.mrb[82].mxu0 %vm698_vm0, %v611_v13  ;;  %v9414_v13 = vrot.slane %v7226_v61, %v9360_v34 }
 0x12e   :  { %1848 = vmatprep.mubr.f32.mxu0 %v17817_v3 }
 0x12f   :  { %18569 = vst [vmem:[#allocation16_spill] sm:$0xff] %v9414_v13 }
 0x131   :  { %7202 = vmatmul.mubr.msk.f32.gmra.mrb[84].mxu0 %vm698_vm0, %v612_v38 }
 0x132   :  { %1854 = vmatprep.mubr.f32.mxu0 %v17817_v3 }
 0x135   :  { %7203 = vmatmul.mubr.msk.f32.gmra.mrb[86].mxu0 %vm698_vm0, %v613_v21 }
 0x136   :  { %1860 = vmatprep.mubr.f32.mxu0 %v17817_v3 }
 0x139   :  { %7204 = vmatmul.mubr.msk.f32.gmra.mrb[88].mxu0 %vm698_vm0, %v614_v45 }
 0x13a   :  { %1866 = vmatprep.mubr.f32.mxu0 %v17817_v3 }
 0x13d   :  { %7205 = vmatmul.mubr.msk.f32.gmra.mrb[90].mxu0 %vm698_vm0, %v615_v28 }
 0x13e   :  { %1872 = vmatprep.mubr.f32.mxu0 %v17817_v3 }
 0x141   :  { %7206 = vmatmul.mubr.msk.f32.gmra.mrb[92].mxu0 %vm698_vm0, %v616_v52 }
 0x142   :  { %1878 = vmatprep.mubr.f32.mxu0 %v17817_v3  ;;  %v9362_v40 = vpop.f32.mrb[0].mxu1 }
 0x143   :  { %v9375_v62 = vpop.f32.mrb[1].mxu1 }
 0x145   :  { %7207 = vmatmul.mubr.msk.f32.gmra.mrb[94].mxu0 %vm698_vm0, %v617_v35 }
 0x146   :  { %1884 = vmatprep.mubr.f32.mxu0 %v17817_v3 }
 0x149   :  { %7208 = vmatmul.mubr.msk.f32.gmra.mrb[96].mxu0 %vm698_vm0, %v618_v59 }
 0x14a   :  { %1890 = vmatprep.mubr.f32.mxu0 %v17817_v3  ;;  %v9404_v18 = vpop.f32.mrb[2].mxu1 }
 0x14b   :  { %v9416_v41 = vpop.f32.mrb[3].mxu1 }
 0x14d   :  { %7209 = vmatmul.mubr.msk.f32.gmra.mrb[98].mxu0 %vm698_vm0, %v619_v42 }
 0x14e   :  { %1896 = vmatprep.mubr.f32.mxu0 %v17817_v3 }
 0x151   :  { %7210 = vmatmul.mubr.msk.f32.gmra.mrb[100].mxu0 %vm698_vm0, %v620_v2 }
 0x152   :  { %1902 = vmatprep.mubr.f32.mxu0 %v17817_v3 }
 0x155   :  { %7211 = vmatmul.mubr.msk.f32.gmra.mrb[102].mxu0 %vm698_vm0, %v621_v49 }
 0x156   :  { %1908 = vmatprep.mubr.f32.mxu0 %v17817_v3 }
 0x159   :  { %7212 = vmatmul.mubr.msk.f32.gmra.mrb[104].mxu0 %vm698_vm0, %v622_v11 }
 0x15a   :  { %1914 = vmatprep.mubr.f32.mxu0 %v17817_v3 }
 0x15c   :  { %v9358_v27 = vpop.f32.mrb[0].mxu0 }
 0x15d   :  { %18560 = vst [vmem:[#allocation7_spill] sm:$0xff] %v9358_v27  ;;  %v9364_v53 = vpop.f32.mrb[1].mxu0  ;;  %7213 = vmatmul.mubr.msk.f32.gmra.mrb[106].mxu0 %vm698_vm0, %v623_v56  ;;  %vm1993_vm1 = vcmp.ge.f32.partialorder %v9358_v27, %v9346_v5  ;;  %vm2134_vm2 = vcmp.lt.f32.partialorder %v9358_v27, %v9349_v6  ;;  %v2924_v54 = vsub.f32 %v9358_v27, %v9352_v15 }
 0x15e   :  { %18562 = vst [vmem:[#allocation9_spill] sm:$0xff] %v9364_v53  ;;  %1920 = vmatprep.mubr.f32.mxu0 %v17817_v3  ;;  %vm2262_vm3 = vmand %vm1993_vm1, %vm2134_vm2 }
 0x15f   :  { %v2390_v16 = vsel %vm2262_vm3, 1.0, %v17817_v3  ;;  %v3063_v12 = vmul.f32 %v9356_v26, %v2924_v54 }
 0x160   :  { %v9380_v23 = vpop.f32.mrb[2].mxu0  ;;  %v9420_v1 = vpop.f32.mrb[4].mxu1 }
 0x161   :  { %18563 = vst [vmem:[#allocation10_spill] sm:$0xff] %v9380_v23  ;;  %v9391_v60 = vpop.f32.mrb[3].mxu0  ;;  %7214 = vmatmul.mubr.msk.f32.gmra.mrb[108].mxu0 %vm698_vm0, %v624_v25  ;;  %vm1995_vm4 = vcmp.ge.f32.partialorder %v9380_v23, %v9346_v5  ;;  %vm2136_vm5 = vcmp.lt.f32.partialorder %v9380_v23, %v9349_v6  ;;  %v2926_v24 = vsub.f32 %v9380_v23, %v9352_v15  ;;  %v9437_v59 = vpop.f32.mrb[5].mxu1 }
 0x162   :  { %18567 = vst [vmem:[#allocation14_spill] sm:$0xff] %v9391_v60  ;;  %v9402_v4 = vmul.f32 %v3063_v12, %v2390_v16  ;;  %1926 = vmatprep.mubr.f32.mxu0 %v17817_v3  ;;  %vm2264_vm6 = vmand %vm1995_vm4, %vm2136_vm5  ;;  %vm1996_vm7 = vcmp.ge.f32.partialorder %v9391_v60, %v9383_v39  ;;  %vm2137_vm8 = vcmp.lt.f32.partialorder %v9391_v60, %v9386_v17 }
 0x163   :  { %v2927_v31 = vsub.f32 %v9391_v60, %v9389_v47  ;;  %v2392_v38 = vsel %vm2264_vm6, 1.0, %v17817_v3  ;;  %v3065_v21 = vmul.f32 %v9356_v26, %v2926_v24  ;;  %vm2265_vm9 = vmand %vm1996_vm7, %vm2137_vm8 }
 0x164   :  { %18568 = vst [vmem:[#allocation15_spill] sm:$0xff] %v9402_v4  ;;  %v9422_v45 = vpop.f32.mrb[4].mxu0  ;;  %v7915_v28 = vpack.i.bf16 %v2392_v38, %v2390_v16  ;;  %v2393_v9 = vsel %vm2265_vm9, 1.0, %v17817_v3  ;;  %v9453_v49 = vpop.f32.mrb[6].mxu1 }
 0x165   :  { %18570 = vst [vmem:[#allocation17_spill] sm:$0xff] %v9422_v45  ;;  %v3066_v52 = vmul.f32 %v9414_v13, %v2927_v31  ;;  %v9426_v35 = vpop.f32.mrb[5].mxu0  ;;  %7215 = vmatmul.mubr.msk.f32.gmra.mrb[110].mxu0 %vm698_vm0, %v625_v63  ;;  %v9431_v14 = vmul.f32 %v3065_v21, %v2392_v38  ;;  %vm1997_vm10 = vcmp.ge.f32.partialorder %v9422_v45, %v9346_v5  ;;  %v9468_v56 = vpop.f32.mrb[7].mxu1 }
 0x166   :  { %18571 = vst [vmem:[#allocation18_spill] sm:$0xff] %v9426_v35  ;;  %vm2138_vm11 = vcmp.lt.f32.partialorder %v9422_v45, %v9349_v6  ;;  %7916 = vrot.lane.b32.xlu0 %v7915_v28, %s8557_s20  ;;  %1932 = vmatprep.mubr.f32.mxu0 %v17817_v3  ;;  %vm1998_vm12 = vcmp.ge.f32.partialorder %v9426_v35, %v9383_v39 }
 0x167   :  { %18572 = vst [vmem:[#allocation19_spill] sm:$0xff] %v9431_v14  ;;  %vm2139_vm13 = vcmp.lt.f32.partialorder %v9426_v35, %v9386_v17  ;;  %v2929_v42 = vsub.f32 %v9426_v35, %v9389_v47  ;;  %vm9447_vm14 = vmand %vm1997_vm10, %vm2138_vm11  ;;  %v9451_v2 = vmul.f32 %v3066_v52, %v2393_v9  ;;  %v2928_v8 = vsub.f32 %v9422_v45, %v9352_v15 }
 0x168   :  { %vm2267_vm15 = vmand %vm1998_vm12, %vm2139_vm13  ;;  %v9455_v7 = vpop.f32.mrb[6].mxu0  ;;  %v2394_v30 = vsel %vm9447_vm14, 1.0, %v17817_v3  ;;  %v9484_v25 = vpop.f32.mrb[8].mxu1 }
 0x169   :  { %18575 = vst [vmem:[#allocation20_spill] sm:$0xff] %v9451_v2  ;;  %18576 = vst [vmem:[#allocation21_spill] sm:$0xff] %v9455_v7  ;;  %v2395_v10 = vsel %vm2267_vm15, 1.0, %v17817_v3  ;;  %v3068_v29 = vmul.f32 %v9414_v13, %v2929_v42  ;;  %v9459_v11 = vpop.f32.mrb[7].mxu0  ;;  %7216 = vmatmul.mubr.msk.f32.gmra.mrb[112].mxu0 %vm698_vm0, %v626_v37  ;;  %vm1999_vm1 = vcmp.ge.f32.partialorder %v9455_v7, %v9346_v5  ;;  %v9497_v37 = vpop.f32.mrb[9].mxu1 }
 0x16a   :  { %18577 = vst [vmem:[#allocation22_spill] sm:$0xff] %v9459_v11  ;;  %v7920_v50 = vpack.i.bf16 %v2395_v10, %v2393_v9  ;;  %vm2140_vm2 = vcmp.lt.f32.partialorder %v9455_v7, %v9349_v6  ;;  %vm2000_vm4 = vcmp.ge.f32.partialorder %v9459_v11, %v9383_v39  ;;  %vm2141_vm5 = vcmp.lt.f32.partialorder %v9459_v11, %v9386_v17 }
 0x16b   :  { %v9472_v19 = vmul.f32 %v3068_v29, %v2395_v10  ;;  %vm2268_vm3 = vmand %vm1999_vm1, %vm2140_vm2  ;;  %1938 = vmatprep.mubr.f32.mxu0 %v17817_v3  ;;  %v3067_v57 = vmul.f32 %v9356_v26, %v2928_v8  ;;  %v2930_v32 = vsub.f32 %v9455_v7, %v9352_v15  ;;  %v2931_v16 = vsub.f32 %v9459_v11, %v9389_v47 }
 0x16c   :  { %7921 = vrot.lane.b32.xlu1 %v7920_v50, %s8557_s20  ;;  %v2396_v36 = vsel %vm2268_vm3, 1.0, %v17817_v3  ;;  %v9487_v63 = vpop.f32.mrb[8].mxu0  ;;  %vm2269_vm6 = vmand %vm2000_vm4, %vm2141_vm5  ;;  %v9507_v46 = vpop.f32.mrb[10].mxu1 }
 0x16d   :  { %18578 = vst [vmem:[#allocation23_spill] sm:$0xff] %v9472_v19  ;;  %18579 = vst [vmem:[#allocation24_spill] sm:$0xff] %v9487_v63  ;;  %v7925_v20 = vpack.i.bf16 %v2396_v36, %v2394_v30  ;;  %v9491_v51 = vpop.f32.mrb[9].mxu0  ;;  %vm2001_vm7 = vcmp.ge.f32.partialorder %v9487_v63, %v9346_v5  ;;  %vm2142_vm8 = vcmp.lt.f32.partialorder %v9487_v63, %v9349_v6  ;;  %v2397_v58 = vsel %vm2269_vm6, 1.0, %v17817_v3  ;;  %v9523_v31 = vpop.f32.mrb[11].mxu1 }
 0x16e   :  { %18580 = vst [vmem:[#allocation25_spill] sm:$0xff] %v9491_v51  ;;  %v9499_v0 = vmul.f32 %v3067_v57, %v2394_v30  ;;  %vm2002_vm9 = vcmp.ge.f32.partialorder %v9491_v51, %v9383_v39  ;;  %vm2143_vm10 = vcmp.lt.f32.partialorder %v9491_v51, %v9386_v17  ;;  %v3069_v44 = vmul.f32 %v9356_v26, %v2930_v32  ;;  %vm2270_vm12 = vmand %vm2001_vm7, %vm2142_vm8 }
 0x16f   :  { %7926 = vrot.lane.b32.xlu0 %v7925_v20, %s8557_s20  ;;  %vm2271_vm11 = vmand %vm2002_vm9, %vm2143_vm10  ;;  %v2398_v38 = vsel %vm2270_vm12, 1.0, %v17817_v3  ;;  %v3070_v9 = vmul.f32 %v9414_v13, %v2931_v16  ;;  %v2933_v22 = vsub.f32 %v9491_v51, %v9389_v47 }
 0x170   :  { %18581 = vst [vmem:[#allocation26_spill] sm:$0xff] %v9499_v0  ;;  %v9509_v55 = vpop.f32.mrb[10].mxu0  ;;  %v2399_v61 = vsel %vm2271_vm11, 1.0, %v17817_v3  ;;  %v9513_v54 = vmul.f32 %v3069_v44, %v2396_v36  ;;  %v9534_v28 = vpop.f32.mrb[12].mxu1  ;;  %v2932_v36 = vsub.f32 %v9487_v63, %v9352_v15 }
 0x171   :  { %18582 = vst [vmem:[#allocation27_spill] sm:$0xff] %v9509_v55  ;;  %v9517_v12 = vpop.f32.mrb[11].mxu0  ;;  %v7930_v24 = vpack.i.bf16 %v2399_v61, %v2397_v58  ;;  %vm2003_vm13 = vcmp.ge.f32.partialorder %v9509_v55, %v9346_v5  ;;  %vm2144_vm14 = vcmp.lt.f32.partialorder %v9509_v55, %v9349_v6  ;;  %v9548_v29 = vpop.f32.mrb[13].mxu1  ;;  %v9550_v50 = vmul.f32 %v3070_v9, %v2397_v58 }
 0x172   :  { %18583 = vst [vmem:[#allocation28_spill] sm:$0xff] %v9513_v54  ;;  %18584 = vst [vmem:[#allocation29_spill] sm:$0xff] %v9517_v12  ;;  %vm2004_vm1 = vcmp.ge.f32.partialorder %v9517_v12, %v9383_v39  ;;  %vm2145_vm2 = vcmp.lt.f32.partialorder %v9517_v12, %v9386_v17  ;;  %v3072_v8 = vmul.f32 %v9414_v13, %v2933_v22 }
 0x173   :  { %vm2272_vm15 = vmand %vm2003_vm13, %vm2144_vm14  ;;  %7931 = vrot.lane.b32.xlu0 %v7930_v24, %s8557_s20  ;;  %18587 = vst [vmem:[#allocation32_spill] sm:$0xff] %v9550_v50 }
 0x174   :  { %v9532_v21 = vsel %vm2272_vm15, 1.0, %v17817_v3  ;;  %v9537_v52 = vpop.f32.mrb[12].mxu0  ;;  %vm2273_vm3 = vmand %vm2004_vm1, %vm2145_vm2  ;;  %v9558_v30 = vpop.f32.mrb[14].mxu1  ;;  %v9568_v44 = vmul.f32 %v3072_v8, %v2399_v61  ;;  %v3071_v61 = vmul.f32 %v9356_v26, %v2932_v36  ;;  %v2935_v8 = vsub.f32 %v9517_v12, %v9389_v47 }
 0x175   :  { %18585 = vst [vmem:[#allocation30_spill] sm:$0xff] %v9537_v52  ;;  %v7935_v42 = vpack.i.bf16 %v9532_v21, %v2398_v38  ;;  %v9542_v10 = vpop.f32.mrb[13].mxu0  ;;  %vm2005_vm4 = vcmp.ge.f32.partialorder %v9537_v52, %v9346_v5  ;;  %vm2146_vm5 = vcmp.lt.f32.partialorder %v9537_v52, %v9349_v6  ;;  %v2401_v20 = vsel %vm2273_vm3, 1.0, %v17817_v3  ;;  %v9577_v24 = vpop.f32.mrb[15].mxu1 }
 0x176   :  { %18586 = vst [vmem:[#allocation31_spill] sm:$0xff] %v9542_v10  ;;  %vm2006_vm6 = vcmp.ge.f32.partialorder %v9542_v10, %v9383_v39  ;;  %vm2147_vm7 = vcmp.lt.f32.partialorder %v9542_v10, %v9386_v17  ;;  %vm2274_vm9 = vmand %vm2005_vm4, %vm2146_vm5  ;;  %v9593_v27 = vmul.f32 %v3071_v61, %v2398_v38  ;;  %v2934_v38 = vsub.f32 %v9509_v55, %v9352_v15 }
 0x177   :  { %7936 = vrot.lane.b32.xlu1 %v7935_v42, %s8557_s20  ;;  %vm2275_vm8 = vmand %vm2006_vm6, %vm2147_vm7  ;;  %18589 = vst [vmem:[#allocation34_spill] sm:$0xff] %v9568_v44  ;;  %v2402_v9 = vsel %vm2274_vm9, 1.0, %v17817_v3  ;;  %v2936_v55 = vsub.f32 %v9537_v52, %v9352_v15  ;;  %v2937_v54 = vsub.f32 %v9542_v10, %v9389_v47 }
 0x178   :  { %v9562_v57 = vpop.f32.mrb[14].mxu0  ;;  %v9566_v32 = vsel %vm2275_vm8, 1.0, %v17817_v3  ;;  %v9587_v22 = vpop.f32.mrb[16].mxu1  ;;  %18592 = vst [vmem:[#allocation37_spill] sm:$0xff] %v9593_v27  ;;  %v18596_v27 = vmov 0.0   ;;  %v3073_v63 = vmul.f32 %v9356_v26, %v2934_v38 }
 0x179   :  { %18588 = vst [vmem:[#allocation33_spill] sm:$0xff] %v9562_v57  ;;  %v9570_v58 = vpop.f32.mrb[15].mxu0  ;;  %v7940_v16 = vpack.i.bf16 %v9566_v32, %v2401_v20  ;;  %vm2007_vm10 = vcmp.ge.f32.partialorder %v9562_v57, %v9346_v5  ;;  %vm2148_vm11 = vcmp.lt.f32.partialorder %v9562_v57, %v9349_v6  ;;  %v9601_v36 = vpop.f32.mrb[17].mxu1  ;;  %v3075_v50 = vmul.f32 %v9356_v26, %v2936_v55 }
 0x17a   :  { %18590 = vst [vmem:[#allocation35_spill] sm:$0xff] %v9570_v58  ;;  %vm2276_vm12 = vmand %vm2007_vm10, %vm2148_vm11  ;;  %vm2008_vm13 = vcmp.ge.f32.partialorder %v9570_v58, %v9383_v39  ;;  %vm2149_vm14 = vcmp.lt.f32.partialorder %v9570_v58, %v9386_v17  ;;  %v9641_v38 = vmul.f32 %v3073_v63, %v9532_v21  ;;  %v2938_v63 = vsub.f32 %v9562_v57, %v9352_v15 }
 0x17b   :  { %7941 = vrot.lane.b32.xlu1 %v7940_v16, %s8557_s20  ;;  %v2404_v42 = vsel %vm2276_vm12, 1.0, %v17817_v3  ;;  %vm2277_vm15 = vmand %vm2008_vm13, %vm2149_vm14  ;;  %v3074_v16 = vmul.f32 %v9414_v13, %v2935_v8  ;;  %v9667_v55 = vmul.f32 %v3075_v50, %v2402_v9  ;;  %v2939_v0 = vsub.f32 %v9570_v58, %v9389_v47 }
 0x17c   :  { %v9591_v33 = vpop.f32.mrb[16].mxu0  ;;  %v7945_v4 = vpack.i.bf16 %v2404_v42, %v2402_v9  ;;  %v9611_v61 = vpop.f32.mrb[18].mxu1  ;;  %v9618_v8 = vsel %vm2277_vm15, 1.0, %v18596_v27  ;;  %18598 = vst [vmem:[#allocation42_spill] sm:$0xff] %v9641_v38  ;;  %v3077_v57 = vmul.f32 %v9356_v26, %v2938_v63 }
 0x17d   :  { %18591 = vst [vmem:[#allocation36_spill] sm:$0xff] %v9591_v33  ;;  %v9595_v53 = vpop.f32.mrb[17].mxu0  ;;  %vm2009_vm1 = vcmp.ge.f32.partialorder %v9591_v33, %v9346_v5  ;;  %vm2150_vm2 = vcmp.lt.f32.partialorder %v9591_v33, %v9349_v6  ;;  %v9613_v3 = vmul.f32 %v3074_v16, %v2401_v20  ;;  %v9634_v16 = vpop.f32.mrb[19].mxu1  ;;  %18602 = vst [vmem:[#allocation46_spill] sm:$0xff] %v9667_v55 }
 0x17e   :  { %18593 = vst [vmem:[#allocation38_spill] sm:$0xff] %v9595_v53  ;;  %vm2010_vm3 = vcmp.ge.f32.partialorder %v9595_v53, %v9383_v39  ;;  %vm2151_vm4 = vcmp.lt.f32.partialorder %v9595_v53, %v9386_v17  ;;  %vm2278_vm6 = vmand %vm2009_vm1, %vm2150_vm2  ;;  %v9687_v55 = vmul.f32 %v3077_v57, %v2404_v42  ;;  %v3076_v57 = vmul.f32 %v9414_v13, %v2937_v54 }
 0x17f   :  { %7946 = vrot.lane.b32.xlu1 %v7945_v4, %s8557_s20  ;;  %vm2279_vm5 = vmand %vm2010_vm3, %vm2151_vm4  ;;  %18594 = vst [vmem:[#allocation39_spill] sm:$0xff] %v9613_v3  ;;  %v9645_v3 = vsel %vm2278_vm6, 1.0, %v18596_v27  ;;  %v3078_v58 = vmul.f32 %v9414_v13, %v2939_v0 }
 0x180   :  { %v9615_v12 = vpop.f32.mrb[18].mxu0  ;;  %v9621_v44 = vsel %vm2279_vm5, 1.0, %v18596_v27  ;;  %v9650_v51 = vpop.f32.mrb[20].mxu1  ;;  %18605 = vst [vmem:[#allocation49_spill] sm:$0xff] %v9687_v55  ;;  %v9720_v54 = vmul.f32 %v3076_v57, %v9566_v32  ;;  %v2941_v32 = vsub.f32 %v9595_v53, %v9389_v47 }
 0x181   :  { %18595 = vst [vmem:[#allocation40_spill] sm:$0xff] %v9615_v12  ;;  %v9626_v4 = vpop.f32.mrb[19].mxu0  ;;  %v7950_v20 = vpack.i.bf16 %v9621_v44, %v9618_v8  ;;  %vm2011_vm7 = vcmp.ge.f32.partialorder %v9615_v12, %v9346_v5  ;;  %vm2152_vm8 = vcmp.lt.f32.partialorder %v9615_v12, %v9349_v6 }
 0x182   :  { %18597 = vst [vmem:[#allocation41_spill] sm:$0xff] %v9626_v4  ;;  %vm2280_vm9 = vmand %vm2011_vm7, %vm2152_vm8  ;;  %vm2012_vm10 = vcmp.ge.f32.partialorder %v9626_v4, %v9383_v39  ;;  %vm2153_vm11 = vcmp.lt.f32.partialorder %v9626_v4, %v9386_v17  ;;  %v3080_v14 = vmul.f32 %v9414_v13, %v2941_v32 }
 0x183   :  { %7951 = vrot.lane.b32.xlu0 %v7950_v20, %s8557_s20  ;;  %v9648_v52 = vsel %vm2280_vm9, 1.0, %v18596_v27  ;;  %vm2281_vm12 = vmand %vm2012_vm10, %vm2153_vm11  ;;  %v9665_v20 = vpop.f32.mrb[21].mxu1  ;;  %18610 = vst [vmem:[#allocation54_spill] sm:$0xff] %v9720_v54  ;;  %v9741_v54 = vmul.f32 %v3078_v58, %v9618_v8 }
 0x184   :  { %v9653_v11 = vpop.f32.mrb[20].mxu0  ;;  %v7955_v19 = vpack.i.bf16 %v9648_v52, %v9645_v3  ;;  %18601 = vst [vmem:[#allocation45_spill] sm:$0xff] %v9665_v20  ;;  %v9675_v38 = vpop.f32.mrb[22].mxu1  ;;  %v9682_v50 = vsel %vm2281_vm12, 1.0, %v18596_v27  ;;  %v9769_v32 = vmul.f32 %v3080_v14, %v9621_v44  ;;  %v2943_v14 = vsub.f32 %v9626_v4, %v9389_v47 }
 0x185   :  { %18599 = vst [vmem:[#allocation43_spill] sm:$0xff] %v9653_v11  ;;  %v9659_v21 = vpop.f32.mrb[21].mxu0  ;;  %vm2013_vm13 = vcmp.ge.f32.partialorder %v9653_v11, %v9346_v5  ;;  %vm2154_vm14 = vcmp.lt.f32.partialorder %v9653_v11, %v9349_v6  ;;  %18603 = vst [vmem:[#allocation47_spill] sm:$0xff] %v9675_v38  ;;  %v9697_v10 = vpop.f32.mrb[23].mxu1 }
 0x186   :  { %18600 = vst [vmem:[#allocation44_spill] sm:$0xff] %v9659_v21  ;;  %vm2014_vm15 = vcmp.ge.f32.partialorder %v9659_v21, %v9383_v39  ;;  %vm2155_vm1 = vcmp.lt.f32.partialorder %v9659_v21, %v9386_v17  ;;  %vm2282_vm3 = vmand %vm2013_vm13, %vm2154_vm14 }
 0x187   :  { %7956 = vrot.lane.b32.xlu0 %v7955_v19, %s8557_s20  ;;  %vm2283_vm2 = vmand %vm2014_vm15, %vm2155_vm1  ;;  %18607 = vst [vmem:[#allocation51_spill] sm:$0xff] %v9697_v10  ;;  %v9706_v42 = vsel %vm2282_vm3, 1.0, %v18596_v27 }
 0x188   :  { %v9679_v35 = vpop.f32.mrb[22].mxu0  ;;  %v9685_v9 = vsel %vm2283_vm2, 1.0, %v18596_v27  ;;  %v9711_v7 = vpop.f32.mrb[24].mxu1  ;;  %18614 = vst [vmem:[#allocation58_spill] sm:$0xff] %v9741_v54  ;;  %18618 = vst [vmem:[#allocation62_spill] sm:$0xff] %v9769_v32  ;;  %v3082_v32 = vmul.f32 %v9414_v13, %v2943_v14 }
 0x189   :  { %18604 = vst [vmem:[#allocation48_spill] sm:$0xff] %v9679_v35  ;;  %v9689_v63 = vpop.f32.mrb[23].mxu0  ;;  %v7960_v19 = vpack.i.bf16 %v9685_v9, %v9682_v50  ;;  %vm2015_vm4 = vcmp.ge.f32.partialorder %v9679_v35, %v9346_v5  ;;  %vm2156_vm5 = vcmp.lt.f32.partialorder %v9679_v35, %v9349_v6  ;;  %18608 = vst [vmem:[#allocation52_spill] sm:$0xff] %v9711_v7  ;;  %v9728_v7 = vpop.f32.mrb[25].mxu1 }
 0x18a   :  { %18606 = vst [vmem:[#allocation50_spill] sm:$0xff] %v9689_v63  ;;  %vm2284_vm6 = vmand %vm2015_vm4, %vm2156_vm5  ;;  %vm2016_vm7 = vcmp.ge.f32.partialorder %v9689_v63, %v9383_v39  ;;  %vm2157_vm8 = vcmp.lt.f32.partialorder %v9689_v63, %v9386_v17 }
 0x18b   :  { %7961 = vrot.lane.b32.xlu1 %v7960_v19, %s8557_s20  ;;  %v9709_v55 = vsel %vm2284_vm6, 1.0, %v18596_v27  ;;  %vm2285_vm9 = vmand %vm2016_vm7, %vm2157_vm8  ;;  %18612 = vst [vmem:[#allocation56_spill] sm:$0xff] %v9728_v7 }
 0x18c   :  { %v9715_v45 = vpop.f32.mrb[24].mxu0  ;;  %v7965_v10 = vpack.i.bf16 %v9709_v55, %v9706_v42  ;;  %v9738_v57 = vpop.f32.mrb[26].mxu1  ;;  %v9746_v0 = vsel %vm2285_vm9, 1.0, %v18596_v27 }
 0x18d   :  { %18609 = vst [vmem:[#allocation53_spill] sm:$0xff] %v9715_v45  ;;  %v9722_v19 = vpop.f32.mrb[25].mxu0  ;;  %vm2017_vm10 = vcmp.ge.f32.partialorder %v9715_v45, %v9346_v5  ;;  %vm2158_vm11 = vcmp.lt.f32.partialorder %v9715_v45, %v9349_v6  ;;  %18613 = vst [vmem:[#allocation57_spill] sm:$0xff] %v9738_v57  ;;  %v9762_v8 = vpop.f32.mrb[27].mxu1 }
 0x18e   :  { %18611 = vst [vmem:[#allocation55_spill] sm:$0xff] %v9722_v19  ;;  %vm2018_vm12 = vcmp.ge.f32.partialorder %v9722_v19, %v9383_v39  ;;  %vm2159_vm13 = vcmp.lt.f32.partialorder %v9722_v19, %v9386_v17  ;;  %vm2286_vm15 = vmand %vm2017_vm10, %vm2158_vm11 }
 0x18f   :  { %7966 = vrot.lane.b32.xlu1 %v7965_v10, %s8557_s20  ;;  %vm2287_vm14 = vmand %vm2018_vm12, %vm2159_vm13  ;;  %v2940_v10 = vsub.f32 %v9591_v33, %v9352_v15  ;;  %18617 = vst [vmem:[#allocation61_spill] sm:$0xff] %v9762_v8  ;;  %v9773_v54 = vsel %vm2286_vm15, 1.0, %v18596_v27 }
 0x190   :  { %v9743_v7 = vpop.f32.mrb[26].mxu0  ;;  %v9749_v38 = vsel %vm2287_vm14, 1.0, %v18596_v27  ;;  %v9778_v57 = vpop.f32.mrb[28].mxu1 }
 0x191   :  { %18615 = vst [vmem:[#allocation59_spill] sm:$0xff] %v9743_v7  ;;  %v9754_v53 = vpop.f32.mrb[27].mxu0  ;;  %v7970_v58 = vpack.i.bf16 %v9749_v38, %v9746_v0  ;;  %vm2019_vm1 = vcmp.ge.f32.partialorder %v9743_v7, %v9346_v5  ;;  %vm2160_vm2 = vcmp.lt.f32.partialorder %v9743_v7, %v9349_v6  ;;  %v3079_v8 = vmul.f32 %v9356_v26, %v2940_v10 }
 0x192   :  { %18616 = vst [vmem:[#allocation60_spill] sm:$0xff] %v9754_v53  ;;  %vm2288_vm3 = vmand %vm2019_vm1, %vm2160_vm2  ;;  %vm2020_vm4 = vcmp.ge.f32.partialorder %v9754_v53, %v9383_v39  ;;  %vm2161_vm5 = vcmp.lt.f32.partialorder %v9754_v53, %v9386_v17 }
 0x193   :  { %7971 = vrot.lane.b32.xlu0 %v7970_v58, %s8557_s20  ;;  %v9776_v33 = vsel %vm2288_vm3, 1.0, %v18596_v27  ;;  %vm2289_vm6 = vmand %vm2020_vm4, %vm2161_vm5  ;;  %v9793_v58 = vpop.f32.mrb[29].mxu1  ;;  %v9796_v10 = vmul.f32 %v3079_v8, %v9645_v3 }
 0x194   :  { %v9781_v2 = vpop.f32.mrb[28].mxu0  ;;  %v7975_v20 = vpack.i.bf16 %v9776_v33, %v9773_v54  ;;  %18621 = vst [vmem:[#allocation65_spill] sm:$0xff] %v9793_v58  ;;  %v9804_v4 = vpop.f32.mrb[30].mxu1  ;;  %v9811_v3 = vsel %vm2289_vm6, 1.0, %v18596_v27 }
 0x195   :  { %18619 = vst [vmem:[#allocation63_spill] sm:$0xff] %v9781_v2  ;;  %v9787_v44 = vpop.f32.mrb[29].mxu0  ;;  %vm2021_vm7 = vcmp.ge.f32.partialorder %v9781_v2, %v9346_v5  ;;  %vm2162_vm8 = vcmp.lt.f32.partialorder %v9781_v2, %v9349_v6  ;;  %18622 = vst [vmem:[#allocation66_spill] sm:$0xff] %v9796_v10  ;;  %v2942_v2 = vsub.f32 %v9615_v12, %v9352_v15  ;;  %v9829_v12 = vpop.f32.mrb[31].mxu1 }
 0x196   :  { %18620 = vst [vmem:[#allocation64_spill] sm:$0xff] %v9787_v44  ;;  %vm2022_vm9 = vcmp.ge.f32.partialorder %v9787_v44, %v9383_v39  ;;  %vm2163_vm10 = vcmp.lt.f32.partialorder %v9787_v44, %v9386_v17  ;;  %vm2290_vm12 = vmand %vm2021_vm7, %vm2162_vm8  ;;  %v9817_v44 = vmul.f32 %v3082_v32, %v9682_v50 }
 0x197   :  { %7976 = vrot.lane.b32.xlu0 %v7975_v20, %s8557_s20  ;;  %vm2291_vm11 = vmand %vm2022_vm9, %vm2163_vm10  ;;  %v2944_v20 = vsub.f32 %v9653_v11, %v9352_v15  ;;  %18627 = vst [vmem:[#allocation71_spill] sm:$0xff] %v9829_v12  ;;  %v3081_v50 = vmul.f32 %v9356_v26, %v2942_v2  ;;  %v9838_v32 = vsel %vm2290_vm12, 1.0, %v18596_v27 }
 0x198   :  { %v9808_v58 = vpop.f32.mrb[30].mxu0  ;;  %v9814_v8 = vsel %vm2291_vm11, 1.0, %v18596_v27  ;;  %18625 = vst [vmem:[#allocation69_spill] sm:$0xff] %v9817_v44  ;;  %18628 = vst [vmem:[#allocation72_spill] sm:$0xff] %v9838_v32 }
 0x199   :  { %18623 = vst [vmem:[#allocation67_spill] sm:$0xff] %v9808_v58  ;;  %18624 = vst [vmem:[#allocation68_spill] sm:$0xff] %v9814_v8  ;;  %v9821_v14 = vpop.f32.mrb[31].mxu0  ;;  %v7980_v10 = vpack.i.bf16 %v9814_v8, %v9811_v3  ;;  %vm2023_vm13 = vcmp.ge.f32.partialorder %v9808_v58, %v9346_v5  ;;  %vm2164_vm14 = vcmp.lt.f32.partialorder %v9808_v58, %v9349_v6  ;;  %v9843_v58 = vpop.f32.mrb[32].mxu1 }
 0x19a   :  { %18626 = vst [vmem:[#allocation70_spill] sm:$0xff] %v9821_v14  ;;  %vm2292_vm15 = vmand %vm2023_vm13, %vm2164_vm14  ;;  %vm2024_vm1 = vcmp.ge.f32.partialorder %v9821_v14, %v9383_v39  ;;  %vm2165_vm2 = vcmp.lt.f32.partialorder %v9821_v14, %v9386_v17  ;;  %v3083_v44 = vmul.f32 %v9356_v26, %v2944_v20  ;;  %v9851_v14 = vmul.f32 %v3081_v50, %v9648_v52 }
 0x19b   :  { %7981 = vrot.lane.b32.xlu1 %v7980_v10, %s8557_s20  ;;  %v9841_v8 = vsel %vm2292_vm15, 1.0, %v18596_v27  ;;  %vm2293_vm3 = vmand %vm2024_vm1, %vm2165_vm2  ;;  %v9859_v10 = vpop.f32.mrb[33].mxu1  ;;  %v2946_v52 = vsub.f32 %v9679_v35, %v9352_v15 }
 0x19c   :  { %18629 = vst [vmem:[#allocation73_spill] sm:$0xff] %v9841_v8  ;;  %v9846_v11 = vpop.f32.mrb[32].mxu0  ;;  %v7985_v12 = vpack.i.bf16 %v9841_v8, %v9838_v32  ;;  %18631 = vst [vmem:[#allocation75_spill] sm:$0xff] %v9851_v14  ;;  %v9862_v20 = vmul.f32 %v3083_v44, %v9706_v42  ;;  %v9871_v50 = vpop.f32.mrb[34].mxu1  ;;  %v9878_v42 = vsel %vm2293_vm3, 1.0, %v18596_v27 }
 0x19d   :  { %18630 = vst [vmem:[#allocation74_spill] sm:$0xff] %v9846_v11  ;;  %v9853_v2 = vpop.f32.mrb[33].mxu0  ;;  %vm2025_vm4 = vcmp.ge.f32.partialorder %v9846_v11, %v9346_v5  ;;  %vm2166_vm5 = vcmp.lt.f32.partialorder %v9846_v11, %v9349_v6  ;;  %v2945_v11 = vsub.f32 %v9659_v21, %v9389_v47  ;;  %18635 = vst [vmem:[#allocation79_spill] sm:$0xff] %v9878_v42 }
 0x19e   :  { %18632 = vst [vmem:[#allocation76_spill] sm:$0xff] %v9853_v2  ;;  %18633 = vst [vmem:[#allocation77_spill] sm:$0xff] %v9862_v20  ;;  %vm2026_vm6 = vcmp.ge.f32.partialorder %v9853_v2, %v9383_v39  ;;  %vm2167_vm7 = vcmp.lt.f32.partialorder %v9853_v2, %v9386_v17  ;;  %v3085_v2 = vmul.f32 %v9356_v26, %v2946_v52  ;;  %v9892_v20 = vpop.f32.mrb[35].mxu1 }
 0x19f   :  { %7986 = vrot.lane.b32.xlu1 %v7985_v12, %s8557_s20  ;;  %vm2295_vm8 = vmand %vm2026_vm6, %vm2167_vm7  ;;  %v3084_v21 = vmul.f32 %v9414_v13, %v2945_v11 }
 0x1a0   :  { %v9875_v8 = vpop.f32.mrb[34].mxu0  ;;  %v9881_v44 = vsel %vm2295_vm8, 1.0, %v18596_v27  ;;  %vm2294_vm9 = vmand %vm2025_vm4, %vm2166_vm5  ;;  %v9899_v52 = vmul.f32 %v3085_v2, %v9709_v55  ;;  %v2947_v55 = vsub.f32 %v9689_v63, %v9389_v47 }
 0x1a1   :  { %18634 = vst [vmem:[#allocation78_spill] sm:$0xff] %v9875_v8  ;;  %18636 = vst [vmem:[#allocation80_spill] sm:$0xff] %v9881_v44  ;;  %v9884_v32 = vpop.f32.mrb[35].mxu0  ;;  %v7990_v12 = vpack.i.bf16 %v9881_v44, %v9878_v42  ;;  %vm2027_vm10 = vcmp.ge.f32.partialorder %v9875_v8, %v9346_v5  ;;  %vm2168_vm11 = vcmp.lt.f32.partialorder %v9875_v8, %v9349_v6  ;;  %v9903_v44 = vsel %vm2294_vm9, 1.0, %v18596_v27  ;;  %v9908_v8 = vpop.f32.mrb[36].mxu1 }
 0x1a2   :  { %18637 = vst [vmem:[#allocation81_spill] sm:$0xff] %v9884_v32  ;;  %vm2296_vm12 = vmand %vm2027_vm10, %vm2168_vm11  ;;  %vm2028_vm13 = vcmp.ge.f32.partialorder %v9884_v32, %v9383_v39  ;;  %vm2169_vm14 = vcmp.lt.f32.partialorder %v9884_v32, %v9386_v17  ;;  %v9926_v11 = vmul.f32 %v3084_v21, %v9685_v9 }
 0x1a3   :  { %18638 = vst [vmem:[#allocation82_spill] sm:$0xff] %v9899_v52  ;;  %7991 = vrot.lane.b32.xlu0 %v7990_v12, %s8557_s20  ;;  %18639 = vst [vmem:[#allocation83_spill] sm:$0xff] %v9903_v44  ;;  %v9906_v42 = vsel %vm2296_vm12, 1.0, %v18596_v27  ;;  %v9923_v12 = vpop.f32.mrb[37].mxu1 }
 0x1a4   :  { %18640 = vst [vmem:[#allocation84_spill] sm:$0xff] %v9906_v42  ;;  %v9911_v14 = vpop.f32.mrb[36].mxu0  ;;  %v7995_v32 = vpack.i.bf16 %v9906_v42, %v9903_v44  ;;  %vm2297_vm15 = vmand %vm2028_vm13, %vm2169_vm14  ;;  %v3086_v42 = vmul.f32 %v9414_v13, %v2947_v55  ;;  %v9934_v44 = vpop.f32.mrb[38].mxu1 }
 0x1a5   :  { %18641 = vst [vmem:[#allocation85_spill] sm:$0xff] %v9911_v14  ;;  %v9917_v2 = vpop.f32.mrb[37].mxu0  ;;  %vm2029_vm1 = vcmp.ge.f32.partialorder %v9911_v14, %v9346_v5  ;;  %vm2170_vm2 = vcmp.lt.f32.partialorder %v9911_v14, %v9349_v6  ;;  %18643 = vst [vmem:[#allocation87_spill] sm:$0xff] %v9926_v11  ;;  %v2949_v14 = vsub.f32 %v9722_v19, %v9389_v47  ;;  %v9941_v21 = vsel %vm2297_vm15, 1.0, %v18596_v27  ;;  %v9959_v19 = vpop.f32.mrb[39].mxu1 }
 0x1a6   :  { %18642 = vst [vmem:[#allocation86_spill] sm:$0xff] %v9917_v2  ;;  %vm2030_vm3 = vcmp.ge.f32.partialorder %v9917_v2, %v9383_v39  ;;  %vm2171_vm4 = vcmp.lt.f32.partialorder %v9917_v2, %v9386_v17  ;;  %18645 = vst [vmem:[#allocation89_spill] sm:$0xff] %v9941_v21  ;;  %v9947_v2 = vmul.f32 %v3086_v42, %v9746_v0 }
 0x1a7   :  { %7996 = vrot.lane.b32.xlu0 %v7995_v32, %s8557_s20  ;;  %vm2299_vm5 = vmand %vm2030_vm3, %vm2171_vm4  ;;  %v2948_v32 = vsub.f32 %v9715_v45, %v9352_v15  ;;  %v3088_v63 = vmul.f32 %v9414_v13, %v2949_v14 }
 0x1a8   :  { %v9938_v52 = vpop.f32.mrb[38].mxu0  ;;  %v9944_v9 = vsel %vm2299_vm5, 1.0, %v18596_v27  ;;  %vm2298_vm6 = vmand %vm2029_vm1, %vm2170_vm2  ;;  %18647 = vst [vmem:[#allocation91_spill] sm:$0xff] %v9947_v2 }
 0x1a9   :  { %18644 = vst [vmem:[#allocation88_spill] sm:$0xff] %v9938_v52  ;;  %18646 = vst [vmem:[#allocation90_spill] sm:$0xff] %v9944_v9  ;;  %v9951_v55 = vpop.f32.mrb[39].mxu0  ;;  %v8000_v11 = vpack.i.bf16 %v9944_v9, %v9941_v21  ;;  %vm2031_vm7 = vcmp.ge.f32.partialorder %v9938_v52, %v9346_v5  ;;  %vm2172_vm8 = vcmp.lt.f32.partialorder %v9938_v52, %v9349_v6  ;;  %v9968_v0 = vsel %vm2298_vm6, 1.0, %v18596_v27  ;;  %v9973_v9 = vpop.f32.mrb[40].mxu1 }
 0x1aa   :  { %18648 = vst [vmem:[#allocation92_spill] sm:$0xff] %v9951_v55  ;;  %vm2300_vm9 = vmand %vm2031_vm7, %vm2172_vm8  ;;  %vm2032_vm10 = vcmp.ge.f32.partialorder %v9951_v55, %v9383_v39  ;;  %vm2173_vm11 = vcmp.lt.f32.partialorder %v9951_v55, %v9386_v17  ;;  %v9976_v52 = vmul.f32 %v3088_v63, %v9749_v38  ;;  %v3087_v14 = vmul.f32 %v9356_v26, %v2948_v32  ;;  %v9991_v38 = vpop.f32.mrb[41].mxu1 }
 0x1ab   :  { %8001 = vrot.lane.b32.xlu1 %v8000_v11, %s8557_s20  ;;  %18649 = vst [vmem:[#allocation93_spill] sm:$0xff] %v9968_v0  ;;  %v9971_v42 = vsel %vm2300_vm9, 1.0, %v18596_v27  ;;  %v2951_v11 = vsub.f32 %v9754_v53, %v9389_v47  ;;  %vm2301_vm12 = vmand %vm2032_vm10, %vm2173_vm11 }
 0x1ac   :  { %18650 = vst [vmem:[#allocation94_spill] sm:$0xff] %v9971_v42  ;;  %18651 = vst [vmem:[#allocation95_spill] sm:$0xff] %v9976_v52  ;;  %v9979_v21 = vpop.f32.mrb[40].mxu0  ;;  %v8005_v55 = vpack.i.bf16 %v9971_v42, %v9968_v0  ;;  %v9994_v63 = vmul.f32 %v3087_v14, %v9773_v54  ;;  %v2950_v14 = vsub.f32 %v9743_v7, %v9352_v15 }
 0x1ad   :  { %18652 = vst [vmem:[#allocation96_spill] sm:$0xff] %v9979_v21  ;;  %v9985_v2 = vpop.f32.mrb[41].mxu0  ;;  %vm2033_vm13 = vcmp.ge.f32.partialorder %v9979_v21, %v9346_v5  ;;  %vm2174_vm14 = vcmp.lt.f32.partialorder %v9979_v21, %v9349_v6  ;;  %v3090_v32 = vmul.f32 %v9414_v13, %v2951_v11  ;;  %v10005_v21 = vsel %vm2301_vm12, 1.0, %v18596_v27  ;;  %v10023_v11 = vpop.f32.mrb[42].mxu1 }
 0x1ae   :  { %18653 = vst [vmem:[#allocation97_spill] sm:$0xff] %v9985_v2  ;;  %18654 = vst [vmem:[#allocation98_spill] sm:$0xff] %v9994_v63  ;;  %vm2034_vm15 = vcmp.ge.f32.partialorder %v9985_v2, %v9383_v39  ;;  %vm2175_vm1 = vcmp.lt.f32.partialorder %v9985_v2, %v9386_v17  ;;  %v3089_v52 = vmul.f32 %v9356_v26, %v2950_v14 }
 0x1af   :  { %8006 = vrot.lane.b32.xlu1 %v8005_v55, %s8557_s20  ;;  %vm2303_vm2 = vmand %vm2034_vm15, %vm2175_vm1  ;;  %18656 = vst [vmem:[#allocation100_spill] sm:$0xff] %v10005_v21  ;;  %v10011_v54 = vmul.f32 %v3090_v32, %v9811_v3  ;;  %v10029_v3 = vpop.f32.mrb[43].mxu1 }
 0x1b0   :  { %v10002_v42 = vpop.f32.mrb[42].mxu0  ;;  %v10008_v0 = vsel %vm2303_vm2, 1.0, %v18596_v27  ;;  %vm2302_vm3 = vmand %vm2033_vm13, %vm2174_vm14  ;;  %18660 = vst [vmem:[#allocation104_spill] sm:$0xff] %v10029_v3  ;;  %v10055_v53 = vpop.f32.mrb[44].mxu1 }
 0x1b1   :  { %18655 = vst [vmem:[#allocation99_spill] sm:$0xff] %v10002_v42  ;;  %18657 = vst [vmem:[#allocation101_spill] sm:$0xff] %v10008_v0  ;;  %v10015_v2 = vpop.f32.mrb[43].mxu0  ;;  %v8010_v55 = vpack.i.bf16 %v10008_v0, %v10005_v21  ;;  %vm2035_vm4 = vcmp.ge.f32.partialorder %v10002_v42, %v9346_v5  ;;  %vm2176_vm5 = vcmp.lt.f32.partialorder %v10002_v42, %v9349_v6  ;;  %v10033_v32 = vsel %vm2302_vm3, 1.0, %v18596_v27  ;;  %v10061_v14 = vpop.f32.mrb[45].mxu1 }
 0x1b2   :  { %18658 = vst [vmem:[#allocation102_spill] sm:$0xff] %v10011_v54  ;;  %18659 = vst [vmem:[#allocation103_spill] sm:$0xff] %v10015_v2  ;;  %vm2036_vm7 = vcmp.ge.f32.partialorder %v10015_v2, %v9383_v39  ;;  %vm2177_vm8 = vcmp.lt.f32.partialorder %v10015_v2, %v9386_v17  ;;  %v2967_v42 = vsub.f32 %v10015_v2, %v9389_v47 }
 0x1b3   :  { %vm2304_vm6 = vmand %vm2035_vm4, %vm2176_vm5  ;;  %8011 = vrot.lane.b32.xlu0 %v8010_v55, %s8557_s20  ;;  %18661 = vst [vmem:[#allocation105_spill] sm:$0xff] %v10033_v32 }
 0x1b4   :  { %v10036_v0 = vsel %vm2304_vm6, 1.0, %v18596_v27  ;;  %vm2305_vm9 = vmand %vm2036_vm7, %vm2177_vm8  ;;  %v10040_v21 = vpop.f32.mrb[44].mxu0  ;;  %v3106_v7 = vmul.f32 %v9414_v13, %v2967_v42  ;;  %18665 = vst [vmem:[#allocation109_spill] sm:$0xff] %v10055_v53  ;;  %v10074_v53 = vmul.f32 %v3089_v52, %v9776_v33 }
 0x1b5   :  { %18662 = vst [vmem:[#allocation106_spill] sm:$0xff] %v10036_v0  ;;  %18663 = vst [vmem:[#allocation107_spill] sm:$0xff] %v10040_v21  ;;  %v8015_v54 = vpack.i.bf16 %v10036_v0, %v10033_v32  ;;  %v2433_v63 = vsel %vm2305_vm9, 1.0, %v18596_v27  ;;  %v10046_v55 = vpop.f32.mrb[45].mxu0  ;;  %vm2037_vm10 = vcmp.ge.f32.partialorder %v10040_v21, %v9346_v5  ;;  %vm2178_vm11 = vcmp.lt.f32.partialorder %v10040_v21, %v9349_v6 }
 0x1b6   :  { %18664 = vst [vmem:[#allocation108_spill] sm:$0xff] %v10046_v55  ;;  %v2968_v2 = vsub.f32 %v10040_v21, %v9352_v15  ;;  %vm2038_vm12 = vcmp.ge.f32.partialorder %v10046_v55, %v9383_v39  ;;  %vm2179_vm13 = vcmp.lt.f32.partialorder %v10046_v55, %v9386_v17  ;;  %vm2306_vm14 = vmand %vm2037_vm10, %vm2178_vm11  ;;  %v2969_v42 = vsub.f32 %v10046_v55, %v9389_v47 }
 0x1b7   :  { %18666 = vst [vmem:[#allocation110_spill] sm:$0xff] %v10061_v14  ;;  %8016 = vrot.lane.b32.xlu0 %v8015_v54, %s8557_s20  ;;  %vm2307_vm15 = vmand %vm2038_vm12, %vm2179_vm13  ;;  %v10066_v0 = vmul.f32 %v3106_v7, %v2433_v63  ;;  %v2434_v32 = vsel %vm2306_vm14, 1.0, %v18596_v27 }
 0x1b8   :  { %v3107_v21 = vmul.f32 %v9356_v26, %v2968_v2  ;;  %v10070_v45 = vpop.f32.mrb[46].mxu0  ;;  %v2435_v35 = vsel %vm2307_vm15, 1.0, %v18596_v27  ;;  %18669 = vst [vmem:[#allocation113_spill] sm:$0xff] %v10074_v53  ;;  %v3108_v54 = vmul.f32 %v9414_v13, %v2969_v42 }
 0x1b9   :  { %18667 = vst [vmem:[#allocation111_spill] sm:$0xff] %v10066_v0  ;;  %18668 = vst [vmem:[#allocation112_spill] sm:$0xff] %v10070_v45  ;;  %v10076_v14 = vpop.f32.mrb[47].mxu0  ;;  %v8020_v3 = vpack.i.bf16 %v2435_v35, %v2433_v63  ;;  %vm2039_vm1 = vcmp.ge.f32.partialorder %v10070_v45, %v9346_v5  ;;  %vm2180_vm2 = vcmp.lt.f32.partialorder %v10070_v45, %v9349_v6  ;;  %v10087_v0 = vpop.f32.mrb[46].mxu1 }
 0x1ba   :  { %18670 = vst [vmem:[#allocation114_spill] sm:$0xff] %v10076_v14  ;;  %vm2308_vm3 = vmand %vm2039_vm1, %vm2180_vm2  ;;  %v2970_v7 = vsub.f32 %v10070_v45, %v9352_v15  ;;  %v10085_v2 = vmul.f32 %v3107_v21, %v2434_v32  ;;  %v10090_v33 = vmul.f32 %v3108_v54, %v2435_v35  ;;  %vm2040_vm4 = vcmp.ge.f32.partialorder %v10076_v14, %v9383_v39  ;;  %v10097_v63 = vpop.f32.mrb[47].mxu1 }
 0x1bb   :  { %8021 = vrot.lane.b32.xlu1 %v8020_v3, %s8557_s20  ;;  %v2436_v52 = vsel %vm2308_vm3, 1.0, %v18596_v27  ;;  %vm2181_vm5 = vcmp.lt.f32.partialorder %v10076_v14, %v9386_v17  ;;  %18673 = vst [vmem:[#allocation117_spill] sm:$0xff] %v10097_v63  ;;  %v2971_v35 = vsub.f32 %v10076_v14, %v9389_v47 }
 0x1bc   :  { %18671 = vst [vmem:[#allocation115_spill] sm:$0xff] %v10085_v2  ;;  %18672 = vst [vmem:[#allocation116_spill] sm:$0xff] %v10090_v33  ;;  %v10099_v42 = vpop.f32.mrb[48].mxu0  ;;  %v3109_v21 = vmul.f32 %v9356_v26, %v2970_v7  ;;  %v8025_v2 = vpack.i.bf16 %v2436_v52, %v2434_v32  ;;  %v10117_v7 = vpop.f32.mrb[48].mxu1 }
 0x1bd   :  { %18674 = vst [vmem:[#allocation118_spill] sm:$0xff] %v10099_v42  ;;  %vm2309_vm6 = vmand %vm2040_vm4, %vm2181_vm5  ;;  %v10104_v3 = vpop.f32.mrb[49].mxu0  ;;  %vm2041_vm7 = vcmp.ge.f32.partialorder %v10099_v42, %v9346_v5  ;;  %vm2182_vm8 = vcmp.lt.f32.partialorder %v10099_v42, %v9349_v6  ;;  %v2972_v54 = vsub.f32 %v10099_v42, %v9352_v15  ;;  %v3110_v42 = vmul.f32 %v9414_v13, %v2971_v35 }
 0x1be   :  { %18675 = vst [vmem:[#allocation119_spill] sm:$0xff] %v10104_v3  ;;  %v10112_v33 = vmul.f32 %v3109_v21, %v2436_v52  ;;  %vm2042_vm9 = vcmp.ge.f32.partialorder %v10104_v3, %v9383_v39  ;;  %v2437_v32 = vsel %vm2309_vm6, 1.0, %v18596_v27  ;;  %vm2310_vm10 = vmand %vm2041_vm7, %vm2182_vm8  ;;  %vm2183_vm11 = vcmp.lt.f32.partialorder %v10104_v3, %v9386_v17  ;;  %v10125_v52 = vpop.f32.mrb[49].mxu1 }
 0x1bf   :  { %18677 = vst [vmem:[#allocation121_spill] sm:$0xff] %v10117_v7  ;;  %8026 = vrot.lane.b32.xlu1 %v8025_v2, %s8557_s20  ;;  %v2973_v45 = vsub.f32 %v10104_v3, %v9389_v47  ;;  %18678 = vst [vmem:[#allocation122_spill] sm:$0xff] %v10125_v52  ;;  %v3111_v14 = vmul.f32 %v9356_v26, %v2972_v54  ;;  %v10135_v7 = vmul.f32 %v3110_v42, %v2437_v32 }
 0x1c0   :  { %18676 = vst [vmem:[#allocation120_spill] sm:$0xff] %v10112_v33  ;;  %v10127_v21 = vpop.f32.mrb[50].mxu0  ;;  %vm2311_vm12 = vmand %vm2042_vm9, %vm2183_vm11  ;;  %v2438_v33 = vsel %vm2310_vm10, 1.0, %v18596_v27 }
 0x1c1   :  { %18679 = vst [vmem:[#allocation123_spill] sm:$0xff] %v10127_v21  ;;  %v10131_v55 = vpop.f32.mrb[51].mxu0  ;;  %v2439_v2 = vsel %vm2311_vm12, 1.0, %v18596_v27  ;;  %v3112_v53 = vmul.f32 %v9414_v13, %v2973_v45  ;;  %18681 = vst [vmem:[#allocation125_spill] sm:$0xff] %v10135_v7  ;;  %vm2043_vm13 = vcmp.ge.f32.partialorder %v10127_v21, %v9346_v5  ;;  %vm2184_vm14 = vcmp.lt.f32.partialorder %v10127_v21, %v9349_v6 }
 0x1c2   :  { %18680 = vst [vmem:[#allocation124_spill] sm:$0xff] %v10131_v55  ;;  %v8030_v35 = vpack.i.bf16 %v2439_v2, %v2437_v32  ;;  %vm2312_vm15 = vmand %vm2043_vm13, %vm2184_vm14  ;;  %v2974_v54 = vsub.f32 %v10127_v21, %v9352_v15  ;;  %v10145_v52 = vmul.f32 %v3111_v14, %v2438_v33  ;;  %vm2044_vm1 = vcmp.ge.f32.partialorder %v10131_v55, %v9383_v39 }
 0x1c3   :  { %v10141_v3 = vmul.f32 %v3112_v53, %v2439_v2  ;;  %v2440_v42 = vsel %vm2312_vm15, 1.0, %v18596_v27  ;;  %vm2185_vm2 = vcmp.lt.f32.partialorder %v10131_v55, %v9386_v17  ;;  %v2975_v53 = vsub.f32 %v10131_v55, %v9389_v47 }
 0x1c4   :  { %18683 = vst [vmem:[#allocation127_spill] sm:$0xff] %v10145_v52  ;;  %8031 = vrot.lane.b32.xlu0 %v8030_v35, %s8557_s20  ;;  %v10150_v45 = vpop.f32.mrb[52].mxu0  ;;  %v3113_v14 = vmul.f32 %v9356_v26, %v2974_v54  ;;  %v8035_v2 = vpack.i.bf16 %v2440_v42, %v2438_v33  ;;  %vm2313_vm3 = vmand %vm2044_vm1, %vm2185_vm2 }
 0x1c5   :  { %18682 = vst [vmem:[#allocation126_spill] sm:$0xff] %v10141_v3  ;;  %18684 = vst [vmem:[#allocation128_spill] sm:$0xff] %v10150_v45  ;;  %v10157_v32 = vpop.f32.mrb[53].mxu0  ;;  %vm2045_vm4 = vcmp.ge.f32.partialorder %v10150_v45, %v9346_v5  ;;  %vm2186_vm5 = vcmp.lt.f32.partialorder %v10150_v45, %v9349_v6  ;;  %v2441_v33 = vsel %vm2313_vm3, 1.0, %v18596_v27  ;;  %v3114_v7 = vmul.f32 %v9414_v13, %v2975_v53 }
 0x1c6   :  { %18685 = vst [vmem:[#allocation129_spill] sm:$0xff] %v10157_v32  ;;  %vm2046_vm6 = vcmp.ge.f32.partialorder %v10157_v32, %v9383_v39  ;;  %vm2187_vm7 = vcmp.lt.f32.partialorder %v10157_v32, %v9386_v17  ;;  %vm10168_vm8 = vmand %vm2045_vm4, %vm2186_vm5  ;;  %v10172_v52 = vmul.f32 %v3113_v14, %v2440_v42  ;;  %v2977_v54 = vsub.f32 %v10157_v32, %v9389_v47 }
 0x1c7   :  { %vm2315_vm9 = vmand %vm2046_vm6, %vm2187_vm7  ;;  %v2976_v55 = vsub.f32 %v10150_v45, %v9352_v15  ;;  %v10187_v14 = vmul.f32 %v3114_v7, %v2441_v33  ;;  %v2442_v53 = vsel %vm10168_vm8, 1.0, %v18596_v27 }
 0x1c8   :  { %18688 = vst [vmem:[#allocation130_spill] sm:$0xff] %v10172_v52  ;;  %8036 = vrot.lane.b32.xlu0 %v8035_v2, %s8557_s20  ;;  %v10179_v3 = vpop.f32.mrb[54].mxu0  ;;  %v2443_v21 = vsel %vm2315_vm9, 1.0, %v18596_v27  ;;  %v3116_v42 = vmul.f32 %v9414_v13, %v2977_v54 }
 0x1c9   :  { %18689 = vst [vmem:[#allocation131_spill] sm:$0xff] %v10179_v3  ;;  %v10184_v63 = vpop.f32.mrb[55].mxu0  ;;  %18691 = vst [vmem:[#allocation133_spill] sm:$0xff] %v10187_v14  ;;  %v8040_v52 = vpack.i.bf16 %v2443_v21, %v2441_v33  ;;  %vm2047_vm10 = vcmp.ge.f32.partialorder %v10179_v3, %v9346_v5  ;;  %vm2188_vm11 = vcmp.lt.f32.partialorder %v10179_v3, %v9349_v6 }
 0x1ca   :  { %18690 = vst [vmem:[#allocation132_spill] sm:$0xff] %v10184_v63  ;;  %v2978_v2 = vsub.f32 %v10179_v3, %v9352_v15  ;;  %v10199_v45 = vmul.f32 %v3116_v42, %v2443_v21  ;;  %vm2316_vm12 = vmand %vm2047_vm10, %vm2188_vm11  ;;  %v3115_v7 = vmul.f32 %v9356_v26, %v2976_v55  ;;  %vm2048_vm13 = vcmp.ge.f32.partialorder %v10184_v63, %v9383_v39 }
 0x1cb   :  { %8041 = vrot.lane.b32.xlu1 %v8040_v52, %s8557_s20  ;;  %vm2189_vm14 = vcmp.lt.f32.partialorder %v10184_v63, %v9386_v17  ;;  %v2444_v35 = vsel %vm2316_vm12, 1.0, %v18596_v27  ;;  %v2979_v52 = vsub.f32 %v10184_v63, %v9389_v47 }
 0x1cc   :  { %18692 = vst [vmem:[#allocation134_spill] sm:$0xff] %v10199_v45  ;;  %v10206_v33 = vpop.f32.mrb[56].mxu0  ;;  %v3117_v54 = vmul.f32 %v9356_v26, %v2978_v2  ;;  %vm2317_vm15 = vmand %vm2048_vm13, %vm2189_vm14  ;;  %v10214_v42 = vmul.f32 %v3115_v7, %v2442_v53  ;;  %v8045_v55 = vpack.i.bf16 %v2444_v35, %v2442_v53 }
 0x1cd   :  { %18693 = vst [vmem:[#allocation135_spill] sm:$0xff] %v10206_v33  ;;  %v10212_v21 = vpop.f32.mrb[57].mxu0  ;;  %v2445_v14 = vsel %vm2317_vm15, 1.0, %v18596_v27  ;;  %vm2049_vm2 = vcmp.ge.f32.partialorder %v10206_v33, %v9346_v5  ;;  %v3118_v53 = vmul.f32 %v9414_v13, %v2979_v52  ;;  %vm2190_vm4 = vcmp.lt.f32.partialorder %v10206_v33, %v9349_v6 }
 0x1ce   :  { %18694 = vst [vmem:[#allocation136_spill] sm:$0xff] %v10212_v21  ;;  %18695 = vst [vmem:[#allocation137_spill] sm:$0xff] %v10214_v42  ;;  %v10216_v45 = vmul.f32 %v3117_v54, %v2444_v35  ;;  %vm2050_vm1 = vcmp.ge.f32.partialorder %v10212_v21, %v9383_v39  ;;  %vm2191_vm3 = vcmp.lt.f32.partialorder %v10212_v21, %v9386_v17 }
 0x1cf   :  { %8046 = vrot.lane.b32.xlu1 %v8045_v55, %s8557_s20  ;;  %v2981_v2 = vsub.f32 %v10212_v21, %v9389_v47  ;;  %vm2319_vm5 = vmand %vm2050_vm1, %vm2191_vm3  ;;  %v2980_v35 = vsub.f32 %v10206_v33, %v9352_v15  ;;  %v10239_v42 = vmul.f32 %v3118_v53, %v2445_v14 }
 0x1d0   :  { %18696 = vst [vmem:[#allocation138_spill] sm:$0xff] %v10216_v45  ;;  %v10231_v7 = vpop.f32.mrb[58].mxu0  ;;  %v2447_v55 = vsel %vm2319_vm5, 1.0, %v18596_v27  ;;  %vm2318_vm7 = vmand %vm2049_vm2, %vm2190_vm4 }
 0x1d1   :  { %18697 = vst [vmem:[#allocation139_spill] sm:$0xff] %v10231_v7  ;;  %v10235_v54 = vpop.f32.mrb[59].mxu0  ;;  %v3120_v45 = vmul.f32 %v9414_v13, %v2981_v2  ;;  %18699 = vst [vmem:[#allocation141_spill] sm:$0xff] %v10239_v42  ;;  %vm2051_vm6 = vcmp.ge.f32.partialorder %v10231_v7, %v9346_v5  ;;  %v8050_v52 = vpack.i.bf16 %v2447_v55, %v2445_v14  ;;  %v2446_v33 = vsel %vm2318_vm7, 1.0, %v18596_v27 }
 0x1d2   :  { %18698 = vst [vmem:[#allocation140_spill] sm:$0xff] %v10235_v54  ;;  %vm2192_vm8 = vcmp.lt.f32.partialorder %v10231_v7, %v9349_v6  ;;  %v2982_v21 = vsub.f32 %v10231_v7, %v9352_v15  ;;  %v3119_v2 = vmul.f32 %v9356_v26, %v2980_v35  ;;  %vm2052_vm10 = vcmp.ge.f32.partialorder %v10235_v54, %v9383_v39 }
 0x1d3   :  { %v10245_v3 = vmul.f32 %v3120_v45, %v2447_v55  ;;  %vm2320_vm9 = vmand %vm2051_vm6, %vm2192_vm8  ;;  %8051 = vrot.lane.b32.xlu0 %v8050_v52, %s8557_s20  ;;  %vm2193_vm11 = vcmp.lt.f32.partialorder %v10235_v54, %v9386_v17  ;;  %v2983_v45 = vsub.f32 %v10235_v54, %v9389_v47 }
 0x1d4   :  { %v10252_v53 = vpop.f32.mrb[60].mxu0  ;;  %v2448_v42 = vsel %vm2320_vm9, 1.0, %v18596_v27  ;;  %v3121_v55 = vmul.f32 %v9356_v26, %v2982_v21  ;;  %v10264_v35 = vmul.f32 %v3119_v2, %v2446_v33  ;;  %vm2321_vm12 = vmand %vm2052_vm10, %vm2193_vm11 }
 0x1d5   :  { %18700 = vst [vmem:[#allocation142_spill] sm:$0xff] %v10245_v3  ;;  %18701 = vst [vmem:[#allocation143_spill] sm:$0xff] %v10252_v53  ;;  %v10261_v14 = vpop.f32.mrb[61].mxu0  ;;  %v8055_v52 = vpack.i.bf16 %v2448_v42, %v2446_v33  ;;  %vm2053_vm15 = vcmp.ge.f32.partialorder %v10252_v53, %v9346_v5  ;;  %v2449_v7 = vsel %vm2321_vm12, 1.0, %v18596_v27  ;;  %v3122_v33 = vmul.f32 %v9414_v13, %v2983_v45 }
 0x1d6   :  { %18702 = vst [vmem:[#allocation144_spill] sm:$0xff] %v10261_v14  ;;  %18703 = vst [vmem:[#allocation145_spill] sm:$0xff] %v10264_v35  ;;  %vm2054_vm13 = vcmp.ge.f32.partialorder %v10261_v14, %v9383_v39  ;;  %vm2195_vm14 = vcmp.lt.f32.partialorder %v10261_v14, %v9386_v17  ;;  %v10272_v3 = vmul.f32 %v3121_v55, %v2448_v42 }
 0x1d7   :  { %vm2323_vm1 = vmand %vm2054_vm13, %vm2195_vm14  ;;  %v2985_v21 = vsub.f32 %v10261_v14, %v9389_v47  ;;  %8056 = vrot.lane.b32.xlu0 %v8055_v52, %s8557_s20  ;;  %vm2194_vm2 = vcmp.lt.f32.partialorder %v10252_v53, %v9349_v6  ;;  %v2984_v42 = vsub.f32 %v10252_v53, %v9352_v15  ;;  %v10289_v54 = vmul.f32 %v3122_v33, %v2449_v7 }
 0x1d8   :  { %18704 = vst [vmem:[#allocation146_spill] sm:$0xff] %v10272_v3  ;;  %v10279_v2 = vpop.f32.mrb[62].mxu0  ;;  %v2451_v35 = vsel %vm2323_vm1, 1.0, %v18596_v27  ;;  %vm2322_vm3 = vmand %vm2053_vm15, %vm2194_vm2 }
 0x1d9   :  { %18705 = vst [vmem:[#allocation147_spill] sm:$0xff] %v10279_v2  ;;  %v10286_v55 = vpop.f32.mrb[63].mxu0  ;;  %v3124_v3 = vmul.f32 %v9414_v13, %v2985_v21  ;;  %18707 = vst [vmem:[#allocation149_spill] sm:$0xff] %v10289_v54  ;;  %v8060_v45 = vpack.i.bf16 %v2451_v35, %v2449_v7  ;;  %vm2055_vm4 = vcmp.ge.f32.partialorder %v10279_v2, %v9346_v5  ;;  %v2450_v14 = vsel %vm2322_vm3, 1.0, %v18596_v27 }
 0x1da   :  { %18706 = vst [vmem:[#allocation148_spill] sm:$0xff] %v10286_v55  ;;  %vm2196_vm5 = vcmp.lt.f32.partialorder %v10279_v2, %v9349_v6  ;;  %v2986_v53 = vsub.f32 %v10279_v2, %v9352_v15  ;;  %v3123_v33 = vmul.f32 %v9356_v26, %v2984_v42  ;;  %vm2056_vm7 = vcmp.ge.f32.partialorder %v10286_v55, %v9383_v39 }
 0x1db   :  { %v10293_v52 = vmul.f32 %v3124_v3, %v2451_v35  ;;  %8061 = vrot.lane.b32.xlu1 %v8060_v45, %s8557_s20  ;;  %vm2324_vm6 = vmand %vm2055_vm4, %vm2196_vm5  ;;  %vm2197_vm8 = vcmp.lt.f32.partialorder %v10286_v55, %v9386_v17  ;;  %v2987_v3 = vsub.f32 %v10286_v55, %v9389_v47 }
 0x1dc   :  { %v1790_v21 = vpop.f32.mrb[64].mxu0  ;;  %v3125_v45 = vmul.f32 %v9356_v26, %v2986_v53  ;;  %vm2325_vm9 = vmand %vm2056_vm7, %vm2197_vm8  ;;  %v10316_v54 = vmul.f32 %v3123_v33, %v2450_v14 }
 0x1dd   :  { %18708 = vst [vmem:[#allocation150_spill] sm:$0xff] %v10293_v52  ;;  %v10309_v7 = vadd.f32 %v1790_v21, %v9362_v40  ;;  %v1792_v35 = vpop.f32.mrb[65].mxu0  ;;  %v2452_v52 = vsel %vm2324_vm6, 1.0, %v18596_v27  ;;  %v2453_v63 = vsel %vm2325_vm9, 1.0, %v18596_v27  ;;  %v3126_v55 = vmul.f32 %v9414_v13, %v2987_v3 }
 0x1de   :  { %v10314_v42 = vadd.f32 %v1792_v35, %v9375_v62  ;;  %18711 = vst [vmem:[#allocation153_spill] sm:$0xff] %v10316_v54  ;;  %v8065_v2 = vpack.i.bf16 %v2452_v52, %v2450_v14  ;;  %v10318_v15 = vmul.f32 %v3125_v45, %v2452_v52 }
 0x1df   :  { %18709 = vst [vmem:[#allocation151_spill] sm:$0xff] %v10309_v7  ;;  %vm2057_vm12 = vcmp.ge.f32.partialorder %v10309_v7, %v9346_v5  ;;  %v10332_v14 = vmul.f32 %v3126_v55, %v2453_v63  ;;  %vm2198_vm14 = vcmp.lt.f32.partialorder %v10309_v7, %v9349_v6 }
 0x1e0   :  { %18710 = vst [vmem:[#allocation152_spill] sm:$0xff] %v10314_v42  ;;  %18712 = vst [vmem:[#allocation154_spill] sm:$0xff] %v10318_v15  ;;  %v1796_v40 = vpop.f32.mrb[66].mxu0  ;;  %vm2058_vm10 = vcmp.ge.f32.partialorder %v10314_v42, %v9383_v39  ;;  %vm2199_vm11 = vcmp.lt.f32.partialorder %v10314_v42, %v9386_v17  ;;  %8066 = vrot.lane.b32.xlu1 %v8065_v2, %s8557_s20 }
 0x1e1   :  { %v10330_v62 = vadd.f32 %v1796_v40, %v9404_v18  ;;  %v1798_v53 = vpop.f32.mrb[67].mxu0  ;;  %vm2327_vm13 = vmand %vm2058_vm10, %vm2199_vm11  ;;  %18714 = vst [vmem:[#allocation156_spill] sm:$0xff] %v10332_v14  ;;  %v79_v14 = vld [vmem:[%s17808_s0 + $0x1d8] sm:$0xff] }
 0x1e2   :  { %v10335_v52 = vadd.f32 %v1798_v53, %v9416_v41  ;;  %v10338_v21 = vsel %vm2327_vm13, 1.0, %v18596_v27  ;;  %vm2326_vm2 = vmand %vm2057_vm12, %vm2198_vm14 }
 0x1e3   :  { %18713 = vst [vmem:[#allocation155_spill] sm:$0xff] %v10330_v62  ;;  %18716 = vst [vmem:[#allocation158_spill] sm:$0xff] %v10338_v21  ;;  %v8070_v33 = vpack.i.bf16 %v10338_v21, %v2453_v63  ;;  %vm2059_vm15 = vcmp.ge.f32.partialorder %v10330_v62, %v9346_v5  ;;  %vm2200_vm1 = vcmp.lt.f32.partialorder %v10330_v62, %v9349_v6  ;;  %v10358_v3 = vsel %vm2326_vm2, 1.0, %v18596_v27 }
 0x1e4   :  { %18715 = vst [vmem:[#allocation157_spill] sm:$0xff] %v10335_v52  ;;  %v1802_v18 = vpop.f32.mrb[68].mxu0  ;;  %vm2328_vm3 = vmand %vm2059_vm15, %vm2200_vm1 }
 0x1e5   :  { %v10348_v41 = vadd.f32 %v1802_v18, %v9420_v1  ;;  %v1804_v2 = vpop.f32.mrb[69].mxu0  ;;  %8071 = vrot.lane.b32.xlu0 %v8070_v33, %s8557_s20  ;;  %v10352_v55 = vsel %vm2328_vm3, 1.0, %v18596_v27  ;;  %18720 = vst [vmem:[#allocation162_spill] sm:$0xff] %v10358_v3 }
 0x1e6   :  { %18718 = vst [vmem:[#allocation160_spill] sm:$0xff] %v10352_v55  ;;  %v10355_v63 = vadd.f32 %v1804_v2, %v9437_v59  ;;  %v8075_v35 = vpack.i.bf16 %v10352_v55, %v10358_v3 }
 0x1e7   :  { %18717 = vst [vmem:[#allocation159_spill] sm:$0xff] %v10348_v41  ;;  %vm2061_vm4 = vcmp.ge.f32.partialorder %v10348_v41, %v9346_v5  ;;  %vm2202_vm5 = vcmp.lt.f32.partialorder %v10348_v41, %v9349_v6 }
 0x1e8   :  { %18719 = vst [vmem:[#allocation161_spill] sm:$0xff] %v10355_v63  ;;  %v1808_v1 = vpop.f32.mrb[70].mxu0  ;;  %vm2330_vm6 = vmand %vm2061_vm4, %vm2202_vm5 }
 0x1e9   :  { %v10367_v45 = vadd.f32 %v1808_v1, %v9453_v49  ;;  %v1810_v40 = vpop.f32.mrb[71].mxu0  ;;  %8076 = vrot.lane.b32.xlu0 %v8075_v35, %s8557_s20  ;;  %v10381_v18 = vsel %vm2330_vm6, 1.0, %v18596_v27 }
 0x1ea   :  { %v10371_v59 = vadd.f32 %v1810_v40, %v9468_v56  ;;  %18724 = vst [vmem:[#allocation166_spill] sm:$0xff] %v10381_v18 }
 0x1eb   :  { %18721 = vst [vmem:[#allocation163_spill] sm:$0xff] %v10367_v45  ;;  %vm2063_vm7 = vcmp.ge.f32.partialorder %v10367_v45, %v9346_v5  ;;  %vm2204_vm8 = vcmp.lt.f32.partialorder %v10367_v45, %v9349_v6 }
 0x1ec   :  { %18722 = vst [vmem:[#allocation164_spill] sm:$0xff] %v10371_v59  ;;  %v1814_v53 = vpop.f32.mrb[72].mxu0  ;;  %vm2332_vm9 = vmand %vm2063_vm7, %vm2204_vm8  ;;  %v18734_v59 = vlaneseq }
 0x1ed   :  { %v10378_v33 = vadd.f32 %v1814_v53, %v9484_v25  ;;  %v1816_v49 = vpop.f32.mrb[73].mxu0  ;;  %v10384_v2 = vsel %vm2332_vm9, 1.0, %v18596_v27 }
 0x1ee   :  { %18725 = vst [vmem:[#allocation167_spill] sm:$0xff] %v10384_v2  ;;  %v10387_v56 = vadd.f32 %v1816_v49, %v9497_v37  ;;  %v8080_v35 = vpack.i.bf16 %v10384_v2, %v10381_v18  ;;  %v627_v49 = vunpack.c.h.bf16 %v9202_v43  ;;  %v18862_v18 = vld [vmem:[#allocation62_spill] sm:$0xff] }
 0x1ef   :  { %18723 = vst [vmem:[#allocation165_spill] sm:$0xff] %v10378_v33  ;;  %vm2065_vm10 = vcmp.ge.f32.partialorder %v10378_v33, %v9346_v5  ;;  %vm2206_vm11 = vcmp.lt.f32.partialorder %v10378_v33, %v9349_v6 }
 0x1f0   :  { %18726 = vst [vmem:[#allocation168_spill] sm:$0xff] %v10387_v56  ;;  %v1820_v25 = vpop.f32.mrb[74].mxu0  ;;  %8081 = vrot.lane.b32.xlu1 %v8080_v35, %s8557_s20  ;;  %vm2334_vm12 = vmand %vm2065_vm10, %vm2206_vm11  ;;  %7217 = vmatmul.mubr.msk.f32.gmra.mrb[114].mxu0 %vm698_vm0, %v627_v49  ;;  %v10446_v56 = vand.u32 127, %v18734_v59 }
 0x1f1   :  { %v10397_v1 = vadd.f32 %v1820_v25, %v9507_v46  ;;  %v1822_v40 = vpop.f32.mrb[75].mxu0  ;;  %v10411_v25 = vsel %vm2334_vm12, 1.0, %v18596_v27  ;;  %1944 = vmatprep.mubr.f32.mxu0 %v18596_v27 }
 0x1f2   :  { %v10400_v53 = vadd.f32 %v1822_v40, %v9523_v31  ;;  %18730 = vst [vmem:[#allocation172_spill] sm:$0xff] %v10411_v25  ;;  %v78_v40 = vld [vmem:[%s17808_s0 + $0x1d0] sm:$0xff]  ;;  %vm2784_vm7 = vcmp.lt.s32.totalorder %v10446_v56, 112 }
 0x1f3   :  { %18727 = vst [vmem:[#allocation169_spill] sm:$0xff] %v10397_v1  ;;  %vm2067_vm13 = vcmp.ge.f32.partialorder %v10397_v1, %v9346_v5  ;;  %vm2208_vm14 = vcmp.lt.f32.partialorder %v10397_v1, %v9349_v6  ;;  %v567_v54 = vpack.c.bf16 %v79_v14, %v78_v40 }
 0x1f4   :  { %18728 = vst [vmem:[#allocation170_spill] sm:$0xff] %v10400_v53  ;;  %v1826_v37 = vpop.f32.mrb[76].mxu0  ;;  %vm2336_vm15 = vmand %vm2067_vm13, %vm2208_vm14  ;;  %v10440_v53 = vpop.permute.xlu1 %7921 }
 0x1f5   :  { %v10408_v35 = vadd.f32 %v1826_v37, %v9534_v28  ;;  %v1828_v46 = vpop.f32.mrb[77].mxu0  ;;  %v10414_v31 = vsel %vm2336_vm15, 1.0, %v18596_v27  ;;  %v7227_v37 = vld [vmem:[%s17809_s1 + $0x4] ss:$8 sm:$0x3]  ;;  %v7923_v59 = vunpack.i.l.bf16 %v10440_v53 }
 0x1f6   :  { %18731 = vst [vmem:[#allocation173_spill] sm:$0xff] %v10414_v31  ;;  %v10423_v43 = vadd.f32 %v1828_v46, %v9548_v29  ;;  %v8085_v28 = vpack.i.bf16 %v10414_v31, %v10411_v25  ;;  %v8491_v29 = vld [vmem:[%s17808_s0 + $0x1c8] sm:$0xff] }
 0x1f7   :  { %18729 = vst [vmem:[#allocation171_spill] sm:$0xff] %v10408_v35  ;;  %vm2069_vm1 = vcmp.ge.f32.partialorder %v10408_v35, %v9346_v5  ;;  %vm2210_vm2 = vcmp.lt.f32.partialorder %v10408_v35, %v9349_v6  ;;  %v691_v46 = vsub.f32 %v8491_v29, %v627_v49  ;;  %v628_v49 = vunpack.c.l.bf16 %v567_v54 }
 0x1f8   :  { %18732 = vst [vmem:[#allocation174_spill] sm:$0xff] %v10423_v43  ;;  %v1832_v15 = vpop.f32.mrb[78].mxu0  ;;  %8086 = vrot.lane.b32.xlu0 %v8085_v28, %s8557_s20  ;;  %vm10451_vm3 = vmand %vm2069_vm1, %vm2210_vm2  ;;  %v10457_v29 = vrot.slane %v7227_v37, %v9360_v34 }
 0x1f9   :  { %v10443_v43 = vadd.f32 %v1832_v15, %v9558_v30  ;;  %v1834_v31 = vpop.f32.mrb[79].mxu0  ;;  %7153 = vmatmul.mubr.msk.f32.gmra.mrb[50].mxu1 %vm698_vm0, %v691_v46  ;;  %v80_v15 = vld [vmem:[%s17808_s0 + $0x1e0] sm:$0xff]  ;;  %v10470_v30 = vld [vmem:[%s17808_s0 + $0x1e8] sm:$0xff]  ;;  %v10476_v46 = vrot.slane %v7227_v37, %v9330_v48  ;;  %7218 = vmatmul.mubr.msk.f32.gmra.mrb[116].mxu0 %vm698_vm0, %v628_v49  ;;  %v10485_v1 = vsel %vm10451_vm3, 1.0, %v18596_v27 }
 0x1fa   :  { %v10449_v25 = vadd.f32 %v1834_v31, %v9577_v24  ;;  %18738 = vst [vmem:[#allocation177_spill] sm:$0xff] %v10457_v29  ;;  %1303 = vmatprep.mubr.f32.mxu1 %v18596_v27  ;;  %v10472_v24 = vpop.permute.xlu0 %7916  ;;  %18742 = vst [vmem:[#allocation181_spill] sm:$0xff] %v10485_v1  ;;  %v7228_v37 = vld [vmem:[%s17809_s1 + $0x5] ss:$8 sm:$0x3]  ;;  %1950 = vmatprep.mubr.f32.mxu0 %v18596_v27  ;;  %v3333_v28 = vsub.f32 %v10457_v29, %v9391_v60 }
 0x1fb   :  { %18733 = vst [vmem:[#allocation175_spill] sm:$0xff] %v10443_v43  ;;  %vm2071_vm4 = vcmp.ge.f32.partialorder %v10443_v43, %v9346_v5  ;;  %vm2212_vm5 = vcmp.lt.f32.partialorder %v10443_v43, %v9349_v6  ;;  %18739 = vst [vmem:[#allocation178_spill] sm:$0xff] %v10472_v24  ;;  %v629_v43 = vunpack.c.h.bf16 %v567_v54  ;;  %v568_v54 = vpack.c.bf16 %v10470_v30, %v80_v15 }
 0x1fc   :  { %18735 = vst [vmem:[#allocation176_spill] sm:$0xff] %v10449_v25  ;;  %v1838_v31 = vpop.f32.mrb[80].mxu0  ;;  %vm2340_vm6 = vmand %vm2071_vm4, %vm2212_vm5  ;;  %v692_v25 = vsub.f32 %v78_v40, %v628_v49  ;;  %v7919_v49 = vunpack.i.h.bf16 %v10472_v24  ;;  %v10521_v2 = vrot.slane %v7228_v37, %v9330_v48 }
 0x1fd   :  { %18740 = vst [vmem:[#allocation179_spill] sm:$0xff] %v10476_v46  ;;  %v10480_v52 = vadd.f32 %v1838_v31, %v9587_v22  ;;  %v1840_v35 = vpop.f32.mrb[81].mxu0  ;;  %v10488_v63 = vsel %vm2340_vm6, 1.0, %v18596_v27  ;;  %v693_v31 = vsub.f32 %v79_v14, %v629_v43  ;;  %7219 = vmatmul.mubr.msk.f32.gmra.mrb[118].mxu0 %vm698_vm0, %v629_v43 }
 0x1fe   :  { %18743 = vst [vmem:[#allocation182_spill] sm:$0xff] %v10488_v63  ;;  %v10497_v22 = vadd.f32 %v1840_v35, %v9601_v36  ;;  %v8090_v40 = vpack.i.bf16 %v10488_v63, %v10485_v1  ;;  %7154 = vmatmul.mubr.msk.f32.gmra.mrb[52].mxu1 %vm698_vm0, %v692_v25  ;;  %v3332_v36 = vsub.f32 %v10476_v46, %v9380_v23  ;;  %18747 = vst [vmem:[#allocation186_spill] sm:$0xff] %v10521_v2 }
 0x1ff   :  { %18741 = vst [vmem:[#allocation180_spill] sm:$0xff] %v10480_v52  ;;  %vm2073_vm8 = vcmp.ge.f32.partialorder %v10480_v52, %v9346_v5  ;;  %vm2214_vm9 = vcmp.lt.f32.partialorder %v10480_v52, %v9349_v6  ;;  %1309 = vmatprep.mubr.f32.mxu1 %v18596_v27  ;;  %v10514_v25 = vrot.slane %v7228_v37, %v9360_v34  ;;  %v631_v37 = vunpack.c.h.bf16 %v568_v54 }
 0x200   :  { %18744 = vst [vmem:[#allocation183_spill] sm:$0xff] %v10497_v22  ;;  %v1844_v35 = vpop.f32.mrb[82].mxu0  ;;  %8091 = vrot.lane.b32.xlu1 %v8090_v40, %s8557_s20  ;;  %v630_v22 = vunpack.c.l.bf16 %v568_v54  ;;  %1956 = vmatprep.mubr.f32.mxu0 %v18596_v27  ;;  %v2850_v33 = vsel %vm2784_vm7, %v7923_v59, %v7919_v49  ;;  %vm10535_vm10 = vmand %vm2073_vm8, %vm2214_vm9  ;;  %v10562_v54 = vpop.permute.xlu0 %7926 }
 0x201   :  { %18745 = vst [vmem:[#allocation184_spill] sm:$0xff] %v10514_v25  ;;  %v10518_v63 = vadd.f32 %v1844_v35, %v9611_v61  ;;  %v1846_v1 = vpop.f32.mrb[83].mxu0  ;;  %v3472_v43 = vmul.f32 %v10514_v25, %v3333_v28  ;;  %v18756_v61 = vld [vmem:[#allocation20_spill] sm:$0xff] }
 0x202   :  { %v10527_v40 = vadd.f32 %v1846_v1, %v9634_v16  ;;  %7155 = vmatmul.mubr.msk.f32.gmra.mrb[54].mxu1 %vm698_vm0, %v693_v31  ;;  %v694_v14 = vsub.f32 %v80_v15, %v630_v22  ;;  %v3471_v16 = vmul.f32 %v10521_v2, %v3332_v36  ;;  %7220 = vmatmul.mubr.msk.f32.gmra.mrb[120].mxu0 %vm698_vm0, %v630_v22 }
 0x203   :  { %18746 = vst [vmem:[#allocation185_spill] sm:$0xff] %v10518_v63  ;;  %vm2075_vm11 = vcmp.ge.f32.partialorder %v10518_v63, %v9346_v5  ;;  %vm2216_vm12 = vcmp.lt.f32.partialorder %v10518_v63, %v9349_v6  ;;  %1315 = vmatprep.mubr.f32.mxu1 %v18596_v27  ;;  %v3600_v35 = vmul.f32 %v3472_v43, %v2850_v33  ;;  %v18754_v33 = vld [vmem:[#allocation45_spill] sm:$0xff] }
 0x204   :  { %18748 = vst [vmem:[#allocation187_spill] sm:$0xff] %v10527_v40  ;;  %v1850_v1 = vpop.f32.mrb[84].mxu0  ;;  %vm2344_vm13 = vmand %vm2075_vm11, %vm2216_vm12  ;;  %v2786_v15 = vsel %vm2784_vm7, %v7919_v49, %v7923_v59  ;;  %v10556_v40 = vsel %vm10535_vm10, 1.0, %v18596_v27  ;;  %1962 = vmatprep.mubr.f32.mxu0 %v18596_v27  ;;  %v695_v49 = vsub.f32 %v10470_v30, %v631_v37  ;;  %v18764_v30 = vld [vmem:[#allocation17_spill] sm:$0xff] }
 0x205   :  { %v10551_v28 = vadd.f32 %v1850_v1, %v9650_v51  ;;  %v1852_v31 = vpop.f32.mrb[85].mxu0  ;;  %18752 = vst [vmem:[#allocation189_spill] sm:$0xff] %v10556_v40  ;;  %v10559_v36 = vsel %vm2344_vm13, 1.0, %v18596_v27  ;;  %v3599_v22 = vmul.f32 %v3471_v16, %v2786_v15  ;;  %v10579_v16 = vadd.f32 %v3600_v35, %v18756_v61  ;;  %v18758_v1 = vld [vmem:[#allocation19_spill] sm:$0xff] }
 0x206   :  { %18753 = vst [vmem:[#allocation190_spill] sm:$0xff] %v10559_v36  ;;  %v10565_v43 = vadd.f32 %v1852_v31, %v18754_v33  ;;  %v8095_v51 = vpack.i.bf16 %v10559_v36, %v10556_v40  ;;  %7156 = vmatmul.mubr.msk.f32.gmra.mrb[56].mxu1 %vm698_vm0, %v694_v14  ;;  %7221 = vmatmul.mubr.msk.f32.gmra.mrb[122].mxu0 %vm698_vm0, %v631_v37  ;;  %v18760_v31 = vld [vmem:[#allocation47_spill] sm:$0xff]  ;;  %v17988_v35 = vunpack.i.h.bf16 %v10440_v53 }
 0x207   :  { %18751 = vst [vmem:[#allocation188_spill] sm:$0xff] %v10551_v28  ;;  %vm2077_vm14 = vcmp.ge.f32.partialorder %v10551_v28, %v9346_v5  ;;  %vm2218_vm15 = vcmp.lt.f32.partialorder %v10551_v28, %v9349_v6  ;;  %1321 = vmatprep.mubr.f32.mxu1 %v18596_v27  ;;  %18757 = vst [vmem:[#allocation20_spill] sm:$0xff] %v10579_v16  ;;  %v10582_v14 = vadd.f32 %v3599_v22, %v18758_v1  ;;  %v18762_v36 = vld [vmem:[#allocation51_spill] sm:$0xff]  ;;  %v83_v22 = vld [vmem:[%s17808_s0 + $0x1f8] sm:$0xff] }
 0x208   :  { %18755 = vst [vmem:[#allocation45_spill] sm:$0xff] %v10565_v43  ;;  %v1856_v59 = vpop.f32.mrb[86].mxu0  ;;  %8096 = vrot.lane.b32.xlu0 %v8095_v51, %s8557_s20  ;;  %1968 = vmatprep.mubr.f32.mxu0 %v18596_v27  ;;  %vm2346_vm1 = vmand %vm2077_vm14, %vm2218_vm15  ;;  %v3334_v37 = vsub.f32 %v10476_v46, %v18764_v30 }
 0x209   :  { %18759 = vst [vmem:[#allocation19_spill] sm:$0xff] %v10582_v14  ;;  %v10586_v33 = vadd.f32 %v1856_v59, %v18760_v31  ;;  %v1858_v43 = vpop.f32.mrb[87].mxu0  ;;  %v10611_v31 = vsel %vm2346_vm1, 1.0, %v18596_v27 }
 0x20a   :  { %v10590_v51 = vadd.f32 %v1858_v43, %v18762_v36  ;;  %7157 = vmatmul.mubr.msk.f32.gmra.mrb[58].mxu1 %vm698_vm0, %v695_v49  ;;  %v82_v36 = vld [vmem:[%s17808_s0 + $0x1f0] sm:$0xff]  ;;  %18767 = vst [vmem:[#allocation191_spill] sm:$0xff] %v10611_v31 }
 0x20b   :  { %18761 = vst [vmem:[#allocation47_spill] sm:$0xff] %v10586_v33  ;;  %vm2079_vm2 = vcmp.ge.f32.partialorder %v10586_v33, %v9346_v5  ;;  %vm2220_vm3 = vcmp.lt.f32.partialorder %v10586_v33, %v9349_v6  ;;  %1327 = vmatprep.mubr.f32.mxu1 %v18596_v27  ;;  %v569_v59 = vpack.c.bf16 %v83_v22, %v82_v36  ;;  %v18765_v49 = vld [vmem:[#allocation52_spill] sm:$0xff] }
 0x20c   :  { %18763 = vst [vmem:[#allocation51_spill] sm:$0xff] %v10590_v51  ;;  %v1862_v43 = vpop.f32.mrb[88].mxu0  ;;  %vm2348_vm4 = vmand %vm2079_vm2, %vm2220_vm3  ;;  %v18769_v51 = vunpack.i.l.bf16 %v10562_v54  ;;  %v18770_v33 = vld [vmem:[#allocation56_spill] sm:$0xff] }
 0x20d   :  { %v10608_v61 = vadd.f32 %v1862_v43, %v18765_v49  ;;  %v1864_v1 = vpop.f32.mrb[89].mxu0  ;;  %v10614_v15 = vsel %vm2348_vm4, 1.0, %v18596_v27  ;;  %v3473_v49 = vmul.f32 %v10521_v2, %v3334_v37  ;;  %v632_v14 = vunpack.c.l.bf16 %v569_v59 }
 0x20e   :  { %18768 = vst [vmem:[#allocation192_spill] sm:$0xff] %v10614_v15  ;;  %v2787_v40 = vsel %vm2784_vm7, %v18769_v51, %v17988_v35  ;;  %v10623_v28 = vadd.f32 %v1864_v1, %v18770_v33  ;;  %v8100_v43 = vpack.i.bf16 %v10614_v15, %v10611_v31  ;;  %v18772_v51 = vld [vmem:[#allocation57_spill] sm:$0xff]  ;;  %v7929_v15 = vunpack.i.h.bf16 %v10562_v54 }
 0x20f   :  { %18766 = vst [vmem:[#allocation52_spill] sm:$0xff] %v10608_v61  ;;  %vm2081_vm5 = vcmp.ge.f32.partialorder %v10608_v61, %v9346_v5  ;;  %vm2222_vm6 = vcmp.lt.f32.partialorder %v10608_v61, %v9349_v6  ;;  %v3601_v16 = vmul.f32 %v3473_v49, %v2787_v40  ;;  %v18774_v1 = vld [vmem:[#allocation61_spill] sm:$0xff]  ;;  %v696_v37 = vsub.f32 %v82_v36, %v632_v14 }
 0x210   :  { %18771 = vst [vmem:[#allocation56_spill] sm:$0xff] %v10623_v28  ;;  %v1868_v63 = vpop.f32.mrb[90].mxu0  ;;  %8101 = vrot.lane.b32.xlu1 %v8100_v43, %s8557_s20  ;;  %vm2350_vm8 = vmand %vm2081_vm5, %vm2222_vm6  ;;  %7222 = vmatmul.mubr.msk.f32.gmra.mrb[124].mxu0 %vm698_vm0, %v632_v14  ;;  %v18776_v43 = vld [vmem:[#allocation26_spill] sm:$0xff]  ;;  %v18848_v61 = vld [vmem:[#allocation33_spill] sm:$0xff] }
 0x211   :  { %v10634_v35 = vadd.f32 %v1868_v63, %v18772_v51  ;;  %v1870_v33 = vpop.f32.mrb[91].mxu0  ;;  %1974 = vmatprep.mubr.f32.mxu0 %v18596_v27  ;;  %7158 = vmatmul.mubr.msk.f32.gmra.mrb[60].mxu1 %vm698_vm0, %v696_v37  ;;  %v633_v63 = vunpack.c.h.bf16 %v569_v59  ;;  %v10647_v49 = vadd.f32 %v3601_v16, %v18776_v43  ;;  %v10653_v51 = vsel %vm2350_vm8, 1.0, %v18596_v27 }
 0x212   :  { %v10637_v28 = vadd.f32 %v1870_v33, %v18774_v1  ;;  %18779 = vst [vmem:[#allocation194_spill] sm:$0xff] %v10653_v51  ;;  %1333 = vmatprep.mubr.f32.mxu1 %v18596_v27  ;;  %v10659_v1 = vpop.permute.xlu0 %7931 }
 0x213   :  { %18773 = vst [vmem:[#allocation57_spill] sm:$0xff] %v10634_v35  ;;  %vm2083_vm9 = vcmp.ge.f32.partialorder %v10634_v35, %v9346_v5  ;;  %vm2224_vm10 = vcmp.lt.f32.partialorder %v10634_v35, %v9349_v6  ;;  %18777 = vst [vmem:[#allocation26_spill] sm:$0xff] %v10647_v49  ;;  %v697_v59 = vsub.f32 %v83_v22, %v633_v63 }
 0x214   :  { %18775 = vst [vmem:[#allocation61_spill] sm:$0xff] %v10637_v28  ;;  %v1874_v40 = vpop.f32.mrb[92].mxu0  ;;  %vm2352_vm11 = vmand %vm2083_vm9, %vm2224_vm10  ;;  %v18781_v28 = vld [vmem:[#allocation65_spill] sm:$0xff]  ;;  %7223 = vmatmul.mubr.msk.f32.gmra.mrb[126].mxu0 %vm698_vm0, %v633_v63 }
 0x215   :  { %v10650_v36 = vadd.f32 %v1874_v40, %v9778_v57  ;;  %v1876_v14 = vpop.f32.mrb[93].mxu0  ;;  %v10656_v33 = vsel %vm2352_vm11, 1.0, %v18596_v27  ;;  %v7933_v40 = vunpack.i.l.bf16 %v10659_v1  ;;  %7159 = vmatmul.mubr.msk.f32.gmra.mrb[62].mxu1 %vm698_vm0, %v697_v59 }
 0x216   :  { %18780 = vst [vmem:[#allocation195_spill] sm:$0xff] %v10656_v33  ;;  %v10662_v37 = vadd.f32 %v1876_v14, %v18781_v28  ;;  %v8105_v16 = vpack.i.bf16 %v10656_v33, %v10653_v51  ;;  %v18784_v14 = vld [vmem:[#allocation71_spill] sm:$0xff]  ;;  %v18786_v33 = vld [vmem:[#allocation21_spill] sm:$0xff] }
 0x217   :  { %18778 = vst [vmem:[#allocation193_spill] sm:$0xff] %v10650_v36  ;;  %vm2085_vm12 = vcmp.ge.f32.partialorder %v10650_v36, %v9346_v5  ;;  %vm2226_vm13 = vcmp.lt.f32.partialorder %v10650_v36, %v9349_v6  ;;  %v3336_v51 = vsub.f32 %v10476_v46, %v18786_v33 }
 0x218   :  { %18782 = vst [vmem:[#allocation65_spill] sm:$0xff] %v10662_v37  ;;  %v1880_v57 = vpop.f32.mrb[94].mxu0  ;;  %8106 = vrot.lane.b32.xlu0 %v8105_v16, %s8557_s20  ;;  %vm2354_vm14 = vmand %vm2085_vm12, %vm2226_vm13 }
 0x219   :  { %v10674_v28 = vadd.f32 %v1880_v57, %v9804_v4  ;;  %v1882_v43 = vpop.f32.mrb[95].mxu0  ;;  %v18787_v4 = vld [vmem:[#allocation18_spill] sm:$0xff]  ;;  %v10693_v59 = vsel %vm2354_vm14, 1.0, %v18596_v27  ;;  %v3475_v36 = vmul.f32 %v10521_v2, %v3336_v51 }
 0x21a   :  { %v10677_v37 = vadd.f32 %v1882_v43, %v18784_v14  ;;  %v3335_v22 = vsub.f32 %v10457_v29, %v18787_v4  ;;  %18789 = vst [vmem:[#allocation198_spill] sm:$0xff] %v10693_v59  ;;  %v2788_v14 = vsel %vm2784_vm7, %v7929_v15, %v7933_v40 }
 0x21b   :  { %18783 = vst [vmem:[#allocation196_spill] sm:$0xff] %v10674_v28  ;;  %vm2087_vm15 = vcmp.ge.f32.partialorder %v10674_v28, %v9346_v5  ;;  %vm2228_vm1 = vcmp.lt.f32.partialorder %v10674_v28, %v9349_v6  ;;  %v3603_v35 = vmul.f32 %v3475_v36, %v2788_v14 }
 0x21c   :  { %18785 = vst [vmem:[#allocation71_spill] sm:$0xff] %v10677_v37  ;;  %v1886_v63 = vpop.f32.mrb[96].mxu0  ;;  %vm2356_vm2 = vmand %vm2087_vm15, %vm2228_vm1 }
 0x21d   :  { %v10690_v16 = vadd.f32 %v1886_v63, %v9843_v58  ;;  %v1888_v57 = vpop.f32.mrb[97].mxu0  ;;  %v10696_v43 = vsel %vm2356_vm2, 1.0, %v18596_v27  ;;  %v3474_v58 = vmul.f32 %v10514_v25, %v3335_v22  ;;  %v18796_v22 = vld [vmem:[#allocation28_spill] sm:$0xff] }
 0x21e   :  { %18790 = vst [vmem:[#allocation199_spill] sm:$0xff] %v10696_v43  ;;  %v10701_v37 = vadd.f32 %v1888_v57, %v9859_v10  ;;  %v8110_v28 = vpack.i.bf16 %v10696_v43, %v10693_v59  ;;  %v18792_v10 = vunpack.i.l.bf16 %v10562_v54  ;;  %v18793_v57 = vunpack.i.h.bf16 %v10440_v53  ;;  %v18798_v54 = vld [vmem:[#allocation23_spill] sm:$0xff] }
 0x21f   :  { %18788 = vst [vmem:[#allocation197_spill] sm:$0xff] %v10690_v16  ;;  %vm2089_vm3 = vcmp.ge.f32.partialorder %v10690_v16, %v9346_v5  ;;  %vm2230_vm4 = vcmp.lt.f32.partialorder %v10690_v16, %v9349_v6  ;;  %v10725_v31 = vadd.f32 %v3603_v35, %v18796_v22  ;;  %v2852_v22 = vsel %vm2784_vm7, %v7933_v40, %v7929_v15  ;;  %v18811_v40 = vld [vmem:[#allocation32_spill] sm:$0xff] }
 0x220   :  { %18791 = vst [vmem:[#allocation200_spill] sm:$0xff] %v10701_v37  ;;  %v1892_v63 = vpop.f32.mrb[98].mxu0  ;;  %8111 = vrot.lane.b32.xlu1 %v8110_v28, %s8557_s20  ;;  %v2851_v37 = vsel %vm2784_vm7, %v18793_v57, %v18792_v10  ;;  %vm2358_vm5 = vmand %vm2089_vm3, %vm2230_vm4 }
 0x221   :  { %v10719_v51 = vadd.f32 %v1892_v63, %v9871_v50  ;;  %v1894_v43 = vpop.f32.mrb[99].mxu0  ;;  %v3602_v59 = vmul.f32 %v3474_v58, %v2851_v37  ;;  %18797 = vst [vmem:[#allocation28_spill] sm:$0xff] %v10725_v31  ;;  %v10738_v37 = vsel %vm2358_vm5, 1.0, %v18596_v27  ;;  %v18856_v31 = vld [vmem:[#allocation36_spill] sm:$0xff] }
 0x222   :  { %v10722_v16 = vadd.f32 %v1894_v43, %v9892_v20  ;;  %18801 = vst [vmem:[#allocation204_spill] sm:$0xff] %v10738_v37 }
 0x223   :  { %18794 = vst [vmem:[#allocation201_spill] sm:$0xff] %v10719_v51  ;;  %vm2091_vm6 = vcmp.ge.f32.partialorder %v10719_v51, %v9346_v5  ;;  %vm2232_vm8 = vcmp.lt.f32.partialorder %v10719_v51, %v9349_v6  ;;  %v10732_v50 = vadd.f32 %v3602_v59, %v18798_v54 }
 0x224   :  { %18795 = vst [vmem:[#allocation202_spill] sm:$0xff] %v10722_v16  ;;  %v1898_v53 = vpop.f32.mrb[100].mxu0  ;;  %vm2360_vm9 = vmand %vm2091_vm6, %vm2232_vm8  ;;  %v18817_v16 = vld [vmem:[#allocation24_spill] sm:$0xff] }
 0x225   :  { %18799 = vst [vmem:[#allocation23_spill] sm:$0xff] %v10732_v50  ;;  %v10735_v36 = vadd.f32 %v1898_v53, %v9908_v8  ;;  %v1900_v20 = vpop.f32.mrb[101].mxu0  ;;  %v10741_v35 = vsel %vm2360_vm9, 1.0, %v18596_v27  ;;  %v18804_v8 = vld [vmem:[#allocation22_spill] sm:$0xff]  ;;  %v18849_v50 = vld [vmem:[#allocation31_spill] sm:$0xff] }
 0x226   :  { %18802 = vst [vmem:[#allocation205_spill] sm:$0xff] %v10741_v35  ;;  %v10744_v28 = vadd.f32 %v1900_v20, %v9923_v12  ;;  %v8115_v43 = vpack.i.bf16 %v10741_v35, %v10738_v37  ;;  %v3337_v59 = vsub.f32 %v10457_v29, %v18804_v8 }
 0x227   :  { %18800 = vst [vmem:[#allocation203_spill] sm:$0xff] %v10735_v36  ;;  %vm2093_vm10 = vcmp.ge.f32.partialorder %v10735_v36, %v9346_v5  ;;  %vm2234_vm11 = vcmp.lt.f32.partialorder %v10735_v36, %v9349_v6 }
 0x228   :  { %18803 = vst [vmem:[#allocation206_spill] sm:$0xff] %v10744_v28  ;;  %v1904_v14 = vpop.f32.mrb[102].mxu0  ;;  %8116 = vrot.lane.b32.xlu0 %v8115_v43, %s8557_s20  ;;  %vm2362_vm12 = vmand %vm2093_vm10, %vm2234_vm11  ;;  %v3476_v10 = vmul.f32 %v10514_v25, %v3337_v59  ;;  %v3338_v28 = vsub.f32 %v10476_v46, %v18817_v16 }
 0x229   :  { %v10756_v58 = vadd.f32 %v1904_v14, %v9934_v44  ;;  %v1906_v12 = vpop.f32.mrb[103].mxu0  ;;  %v10768_v44 = vpop.permute.xlu1 %7936  ;;  %v10774_v54 = vsel %vm2362_vm12, 1.0, %v18596_v27 }
 0x22a   :  { %v10759_v63 = vadd.f32 %v1906_v12, %v9959_v19  ;;  %18808 = vst [vmem:[#allocation210_spill] sm:$0xff] %v10774_v54  ;;  %v3604_v43 = vmul.f32 %v3476_v10, %v2852_v22  ;;  %v18813_v10 = vld [vmem:[#allocation25_spill] sm:$0xff] }
 0x22b   :  { %18805 = vst [vmem:[#allocation207_spill] sm:$0xff] %v10756_v58  ;;  %vm2095_vm13 = vcmp.ge.f32.partialorder %v10756_v58, %v9346_v5  ;;  %vm2236_vm14 = vcmp.lt.f32.partialorder %v10756_v58, %v9349_v6  ;;  %v7939_v58 = vunpack.i.h.bf16 %v10768_v44 }
 0x22c   :  { %18806 = vst [vmem:[#allocation208_spill] sm:$0xff] %v10759_v63  ;;  %v1910_v57 = vpop.f32.mrb[104].mxu0  ;;  %vm2364_vm15 = vmand %vm2095_vm13, %vm2236_vm14  ;;  %v10791_v12 = vadd.f32 %v3604_v43, %v18811_v40  ;;  %v18815_v63 = vld [vmem:[#allocation104_spill] sm:$0xff] }
 0x22d   :  { %v10771_v53 = vadd.f32 %v1910_v57, %v9973_v9  ;;  %v1912_v19 = vpop.f32.mrb[105].mxu0  ;;  %v10777_v20 = vsel %vm2364_vm15, 1.0, %v18596_v27  ;;  %v7938_v9 = vunpack.i.l.bf16 %v10768_v44 }
 0x22e   :  { %18809 = vst [vmem:[#allocation211_spill] sm:$0xff] %v10777_v20  ;;  %v10780_v59 = vadd.f32 %v1912_v19, %v9991_v38  ;;  %v8120_v14 = vpack.i.bf16 %v10777_v20, %v10774_v54  ;;  %18812 = vst [vmem:[#allocation32_spill] sm:$0xff] %v10791_v12  ;;  %v3339_v38 = vsub.f32 %v10457_v29, %v18813_v10  ;;  %v7934_v19 = vunpack.i.h.bf16 %v10659_v1  ;;  %v10822_v54 = vpop.permute.xlu1 %7941  ;;  %v18822_v20 = vld [vmem:[#allocation110_spill] sm:$0xff] }
 0x22f   :  { %18807 = vst [vmem:[#allocation209_spill] sm:$0xff] %v10771_v53  ;;  %vm2097_vm1 = vcmp.ge.f32.partialorder %v10771_v53, %v9346_v5  ;;  %vm2238_vm2 = vcmp.lt.f32.partialorder %v10771_v53, %v9349_v6  ;;  %v7944_v36 = vunpack.i.h.bf16 %v10822_v54 }
 0x230   :  { %18810 = vst [vmem:[#allocation212_spill] sm:$0xff] %v10780_v59  ;;  %v1916_v15 = vpop.f32.mrb[106].mxu0  ;;  %8121 = vrot.lane.b32.xlu1 %v8120_v14, %s8557_s20  ;;  %vm2366_vm3 = vmand %vm2097_vm1, %vm2238_vm2  ;;  %v3478_v1 = vmul.f32 %v10514_v25, %v3339_v38  ;;  %v18818_v14 = vld [vmem:[#allocation109_spill] sm:$0xff] }
 0x231   :  { %v10796_v57 = vadd.f32 %v1916_v15, %v10023_v11  ;;  %v1918_v22 = vpop.f32.mrb[107].mxu0  ;;  %v2853_v11 = vsel %vm2784_vm7, %v7934_v19, %v7938_v9  ;;  %v10815_v40 = vsel %vm2366_vm3, 1.0, %v18596_v27 }
 0x232   :  { %v10800_v59 = vadd.f32 %v1918_v22, %v18815_v63  ;;  %18820 = vst [vmem:[#allocation214_spill] sm:$0xff] %v10815_v40 }
 0x233   :  { %18814 = vst [vmem:[#allocation213_spill] sm:$0xff] %v10796_v57  ;;  %vm2099_vm4 = vcmp.ge.f32.partialorder %v10796_v57, %v9346_v5  ;;  %vm2240_vm5 = vcmp.lt.f32.partialorder %v10796_v57, %v9349_v6 }
 0x234   :  { %18816 = vst [vmem:[#allocation104_spill] sm:$0xff] %v10800_v59  ;;  %v1922_v43 = vpop.f32.mrb[108].mxu0  ;;  %vm2368_vm6 = vmand %vm2099_vm4, %vm2240_vm5  ;;  %v2789_v59 = vsel %vm2784_vm7, %v7938_v9, %v7934_v19  ;;  %v18824_v9 = vld [vmem:[#allocation34_spill] sm:$0xff] }
 0x235   :  { %v10812_v63 = vadd.f32 %v1922_v43, %v18818_v14  ;;  %v1924_v15 = vpop.f32.mrb[109].mxu0  ;;  %v10818_v22 = vsel %vm2368_vm6, 1.0, %v18596_v27  ;;  %v3606_v43 = vmul.f32 %v3478_v1, %v2853_v11  ;;  %v3477_v14 = vmul.f32 %v10521_v2, %v3338_v28  ;;  %v18827_v11 = vld [vmem:[#allocation117_spill] sm:$0xff] }
 0x236   :  { %18821 = vst [vmem:[#allocation215_spill] sm:$0xff] %v10818_v22  ;;  %v10825_v35 = vadd.f32 %v1924_v15, %v18822_v20  ;;  %v8125_v38 = vpack.i.bf16 %v10818_v22, %v10815_v40  ;;  %v18829_v28 = vld [vmem:[#allocation9_spill] sm:$0xff]  ;;  %v7943_v22 = vunpack.i.l.bf16 %v10822_v54 }
 0x237   :  { %18819 = vst [vmem:[#allocation109_spill] sm:$0xff] %v10812_v63  ;;  %vm2101_vm8 = vcmp.ge.f32.partialorder %v10812_v63, %v9346_v5  ;;  %vm2242_vm9 = vcmp.lt.f32.partialorder %v10812_v63, %v9349_v6  ;;  %v10836_v19 = vadd.f32 %v3606_v43, %v18824_v9  ;;  %v3605_v20 = vmul.f32 %v3477_v14, %v2789_v59  ;;  %v10852_v59 = vpop.permute.xlu1 %7946  ;;  %v18839_v63 = vld [vmem:[#allocation122_spill] sm:$0xff] }
 0x238   :  { %18823 = vst [vmem:[#allocation110_spill] sm:$0xff] %v10825_v35  ;;  %v1928_v57 = vpop.f32.mrb[110].mxu0  ;;  %8126 = vrot.lane.b32.xlu0 %v8125_v38, %s8557_s20  ;;  %vm2370_vm12 = vmand %vm2101_vm8, %vm2242_vm9  ;;  %vm1994_vm13 = vcmp.ge.f32.partialorder %v18829_v28, %v9383_v39  ;;  %vm2135_vm14 = vcmp.lt.f32.partialorder %v18829_v28, %v9386_v17  ;;  %v18832_v38 = vld [vmem:[#allocation121_spill] sm:$0xff]  ;;  %v2854_v54 = vsel %vm2784_vm7, %v7943_v22, %v7939_v58 }
 0x239   :  { %18825 = vst [vmem:[#allocation34_spill] sm:$0xff] %v10836_v19  ;;  %v10839_v15 = vadd.f32 %v1928_v57, %v10087_v0  ;;  %v1930_v35 = vpop.f32.mrb[111].mxu0  ;;  %v18830_v57 = vld [vmem:[#allocation37_spill] sm:$0xff]  ;;  %v10867_v40 = vsel %vm2370_vm12, 1.0, %v18596_v27  ;;  %vm2263_vm1 = vmand %vm1994_vm13, %vm2135_vm14  ;;  %v18846_v19 = vld [vmem:[#allocation46_spill] sm:$0xff] }
 0x23a   :  { %v10842_v1 = vadd.f32 %v1930_v35, %v18827_v11  ;;  %v10855_v35 = vadd.f32 %v3605_v20, %v18830_v57  ;;  %v18835_v11 = vld [vmem:[#allocation29_spill] sm:$0xff]  ;;  %18836 = vst [vmem:[#allocation218_spill] sm:$0xff] %v10867_v40  ;;  %v18838_v57 = vld [vmem:[#allocation30_spill] sm:$0xff]  ;;  %v10887_v51 = vsel %vm2263_vm1, 1.0, %v18596_v27 }
 0x23b   :  { %18826 = vst [vmem:[#allocation216_spill] sm:$0xff] %v10839_v15  ;;  %vm2103_vm10 = vcmp.ge.f32.partialorder %v10839_v15, %v9346_v5  ;;  %vm2244_vm11 = vcmp.lt.f32.partialorder %v10839_v15, %v9349_v6  ;;  %v18837_v15 = vld [vmem:[#allocation27_spill] sm:$0xff] }
 0x23c   :  { %18828 = vst [vmem:[#allocation117_spill] sm:$0xff] %v10842_v1  ;;  %v1934_v0 = vpop.f32.mrb[112].mxu0  ;;  %vm2372_vm15 = vmand %vm2103_vm10, %vm2244_vm11  ;;  %v3341_v1 = vsub.f32 %v10457_v29, %v18835_v11  ;;  %v3340_v20 = vsub.f32 %v10476_v46, %v18837_v15 }
 0x23d   :  { %18831 = vst [vmem:[#allocation37_spill] sm:$0xff] %v10855_v35  ;;  %v10858_v43 = vadd.f32 %v1934_v0, %v18832_v38  ;;  %v1936_v14 = vpop.f32.mrb[113].mxu0  ;;  %v10861_v9 = vsel %vm2372_vm15, 1.0, %v18596_v27  ;;  %v3342_v0 = vsub.f32 %v10476_v46, %v18838_v57  ;;  %v7948_v38 = vunpack.i.l.bf16 %v10852_v59  ;;  %v18844_v35 = vld [vmem:[#allocation42_spill] sm:$0xff] }
 0x23e   :  { %18834 = vst [vmem:[#allocation217_spill] sm:$0xff] %v10861_v9  ;;  %v10875_v53 = vadd.f32 %v1936_v14, %v18839_v63  ;;  %v8130_v37 = vpack.i.bf16 %v10861_v9, %v10867_v40  ;;  %v3480_v14 = vmul.f32 %v10514_v25, %v3341_v1  ;;  %v7952_v40 = vpop.permute.xlu0 %7951 }
 0x23f   :  { %18833 = vst [vmem:[#allocation121_spill] sm:$0xff] %v10858_v43  ;;  %vm2105_vm2 = vcmp.ge.f32.partialorder %v10858_v43, %v9346_v5  ;;  %vm2246_vm3 = vcmp.lt.f32.partialorder %v10858_v43, %v9349_v6  ;;  %v3479_v5 = vmul.f32 %v10521_v2, %v3340_v20  ;;  %v2791_v6 = vsel %vm2784_vm7, %v7948_v38, %v7944_v36  ;;  %v18842_v43 = vld [vmem:[#allocation39_spill] sm:$0xff] }
 0x240   :  { %18840 = vst [vmem:[#allocation122_spill] sm:$0xff] %v10875_v53  ;;  %8131 = vrot.lane.b32.xlu1 %v8130_v37, %s8557_s20  ;;  %vm2374_vm4 = vmand %vm2105_vm2, %vm2246_vm3  ;;  %v3481_v53 = vmul.f32 %v10521_v2, %v3342_v0  ;;  %v2790_v37 = vsel %vm2784_vm7, %v7939_v58, %v7943_v22  ;;  %v3608_v9 = vmul.f32 %v3480_v14, %v2854_v54  ;;  %v7953_v22 = vunpack.i.l.bf16 %v7952_v40 }
 0x241   :  { %v10890_v63 = vsel %vm2374_vm4, 1.0, %v18596_v27  ;;  %v3607_v1 = vmul.f32 %v3479_v5, %v2790_v37  ;;  %v3344_v58 = vsub.f32 %v10476_v46, %v18848_v61  ;;  %v3343_v14 = vsub.f32 %v10457_v29, %v18849_v50  ;;  %v18850_v37 = vld [vmem:[#allocation35_spill] sm:$0xff] }
 0x242   :  { %18841 = vst [vmem:[#allocation219_spill] sm:$0xff] %v10890_v63  ;;  %v8135_v44 = vpack.i.bf16 %v10887_v51, %v10890_v63  ;;  %v3609_v20 = vmul.f32 %v3481_v53, %v2791_v6  ;;  %v10905_v0 = vadd.f32 %v3608_v9, %v18842_v43  ;;  %v7962_v6 = vpop.permute.xlu1 %7961  ;;  %v7957_v9 = vpop.permute.xlu0 %7956 }
 0x243   :  { %v10908_v63 = vadd.f32 %v3607_v1, %v18844_v35  ;;  %v3483_v5 = vmul.f32 %v10521_v2, %v3344_v58  ;;  %v2855_v35 = vsel %vm2784_vm7, %v7944_v36, %v7948_v38  ;;  %v3345_v1 = vsub.f32 %v10457_v29, %v18850_v37 }
 0x244   :  { %8136 = vrot.lane.b32.xlu0 %v8135_v44, %s8557_s20  ;;  %18843 = vst [vmem:[#allocation39_spill] sm:$0xff] %v10905_v0  ;;  %v10911_v12 = vadd.f32 %v3609_v20, %v18846_v19  ;;  %v7949_v44 = vunpack.i.h.bf16 %v10852_v59  ;;  %v3482_v19 = vmul.f32 %v10514_v25, %v3343_v14  ;;  %v18851_v20 = vld [vmem:[#allocation49_spill] sm:$0xff]  ;;  %v18853_v59 = vld [vmem:[#allocation54_spill] sm:$0xff]  ;;  %v3346_v36 = vsub.f32 %v10476_v46, %v18856_v31 }
 0x245   :  { %18845 = vst [vmem:[#allocation42_spill] sm:$0xff] %v10908_v63  ;;  %v18855_v63 = vld [vmem:[#allocation38_spill] sm:$0xff]  ;;  %v7958_v38 = vunpack.i.l.bf16 %v7957_v9  ;;  %v7959_v52 = vunpack.i.h.bf16 %v7957_v9 }
 0x246   :  { %18847 = vst [vmem:[#allocation46_spill] sm:$0xff] %v10911_v12  ;;  %v2792_v53 = vsel %vm2784_vm7, %v7949_v44, %v7953_v22  ;;  %v3610_v54 = vmul.f32 %v3482_v19, %v2855_v35  ;;  %v3347_v0 = vsub.f32 %v10457_v29, %v18855_v63  ;;  %v7967_v14 = vpop.permute.xlu1 %7966  ;;  %v7963_v35 = vunpack.i.l.bf16 %v7962_v6 }
 0x247   :  { %v3611_v43 = vmul.f32 %v3483_v5, %v2792_v53  ;;  %v3484_v5 = vmul.f32 %v10514_v25, %v3345_v1  ;;  %v7954_v53 = vunpack.i.h.bf16 %v7952_v40  ;;  %v2856_v19 = vsel %vm2784_vm7, %v7953_v22, %v7949_v44  ;;  %v18859_v22 = vld [vmem:[#allocation58_spill] sm:$0xff] }
 0x248   :  { %v10930_v58 = vadd.f32 %v3610_v54, %v18853_v59  ;;  %v3486_v59 = vmul.f32 %v10514_v25, %v3347_v0  ;;  %v7968_v27 = vunpack.i.l.bf16 %v7967_v14  ;;  %v2858_v39 = vsel %vm2784_vm7, %v7963_v35, %v7959_v52 }
 0x249   :  { %v10927_v12 = vadd.f32 %v3611_v43, %v18851_v20  ;;  %v18857_v43 = vld [vmem:[#allocation41_spill] sm:$0xff]  ;;  %v3612_v54 = vmul.f32 %v3484_v5, %v2856_v19  ;;  %v2857_v40 = vsel %vm2784_vm7, %v7954_v53, %v7958_v38  ;;  %v2793_v1 = vsel %vm2784_vm7, %v7958_v38, %v7954_v53  ;;  %v18861_v5 = vld [vmem:[#allocation43_spill] sm:$0xff]  ;;  %v7972_v38 = vpop.permute.xlu0 %7971  ;;  %v18864_v53 = vld [vmem:[#allocation66_spill] sm:$0xff] }
 0x24a   :  { %18854 = vst [vmem:[#allocation54_spill] sm:$0xff] %v10930_v58  ;;  %v3349_v20 = vsub.f32 %v10457_v29, %v18857_v43  ;;  %v3485_v58 = vmul.f32 %v10521_v2, %v3346_v36  ;;  %v3614_v17 = vmul.f32 %v3486_v59, %v2857_v40  ;;  %v3350_v0 = vsub.f32 %v10476_v46, %v18861_v5 }
 0x24b   :  { %18852 = vst [vmem:[#allocation49_spill] sm:$0xff] %v10927_v12  ;;  %v18858_v12 = vld [vmem:[#allocation40_spill] sm:$0xff]  ;;  %v10950_v44 = vadd.f32 %v3612_v54, %v18859_v22  ;;  %v7964_v19 = vunpack.i.h.bf16 %v7962_v6  ;;  %v2794_v40 = vsel %vm2784_vm7, %v7959_v52, %v7963_v35  ;;  %v7969_v35 = vunpack.i.h.bf16 %v7967_v14 }
 0x24c   :  { %v3348_v49 = vsub.f32 %v10476_v46, %v18858_v12  ;;  %v3613_v36 = vmul.f32 %v3485_v58, %v2793_v1  ;;  %v3488_v9 = vmul.f32 %v10514_v25, %v3349_v20  ;;  %v10958_v55 = vadd.f32 %v3614_v17, %v18862_v18  ;;  %v18866_v20 = vld [vmem:[#allocation69_spill] sm:$0xff]  ;;  %v18868_v17 = vld [vmem:[#allocation48_spill] sm:$0xff] }
 0x24d   :  { %18860 = vst [vmem:[#allocation58_spill] sm:$0xff] %v10950_v44  ;;  %v2795_v6 = vsel %vm2784_vm7, %v7968_v27, %v7964_v19  ;;  %v3489_v1 = vmul.f32 %v10521_v2, %v3350_v0  ;;  %v3352_v18 = vsub.f32 %v10476_v46, %v18868_v17  ;;  %v7974_v44 = vunpack.i.h.bf16 %v7972_v38 }
 0x24e   :  { %18863 = vst [vmem:[#allocation62_spill] sm:$0xff] %v10958_v55  ;;  %v3487_v3 = vmul.f32 %v10521_v2, %v3348_v49  ;;  %v10962_v54 = vadd.f32 %v3613_v36, %v18864_v53  ;;  %v3616_v59 = vmul.f32 %v3488_v9, %v2858_v39  ;;  %v7973_v49 = vunpack.i.l.bf16 %v7972_v38  ;;  %v18869_v55 = vld [vmem:[#allocation75_spill] sm:$0xff]  ;;  %v18871_v9 = vld [vmem:[#allocation44_spill] sm:$0xff]  ;;  %v18872_v53 = vld [vmem:[#allocation77_spill] sm:$0xff] }
 0x24f   :  { %v3617_v39 = vmul.f32 %v3489_v1, %v2795_v6  ;;  %v3351_v52 = vsub.f32 %v10457_v29, %v18871_v9  ;;  %v3491_v0 = vmul.f32 %v10521_v2, %v3352_v18  ;;  %v2859_v6 = vsel %vm2784_vm7, %v7964_v19, %v7968_v27  ;;  %v18876_v1 = vld [vmem:[#allocation55_spill] sm:$0xff]  ;;  %v18877_v18 = vld [vmem:[#allocation82_spill] sm:$0xff]  ;;  %v18882_v27 = vld [vmem:[#allocation60_spill] sm:$0xff] }
 0x250   :  { %18865 = vst [vmem:[#allocation66_spill] sm:$0xff] %v10962_v54  ;;  %v3615_v58 = vmul.f32 %v3487_v3, %v2794_v40  ;;  %v10970_v22 = vadd.f32 %v3616_v59, %v18866_v20  ;;  %v7977_v3 = vpop.permute.xlu0 %7976  ;;  %v2796_v59 = vsel %vm2784_vm7, %v7969_v35, %v7973_v49  ;;  %v10986_v20 = vpop.permute.xlu1 %7981  ;;  %v3357_v19 = vsub.f32 %v10457_v29, %v18882_v27  ;;  %v18883_v38 = vld [vmem:[#allocation59_spill] sm:$0xff] }
 0x251   :  { %v10980_v54 = vadd.f32 %v3617_v39, %v18872_v53  ;;  %v3490_v40 = vmul.f32 %v10514_v25, %v3351_v52  ;;  %18874 = vst [vmem:[#allocation220_spill] sm:$0xff] %v10986_v20  ;;  %v3355_v39 = vsub.f32 %v10457_v29, %v18876_v1  ;;  %v7978_v53 = vunpack.i.l.bf16 %v7977_v3 }
 0x252   :  { %18867 = vst [vmem:[#allocation69_spill] sm:$0xff] %v10970_v22  ;;  %v10975_v36 = vadd.f32 %v3615_v58, %v18869_v55  ;;  %v3619_v55 = vmul.f32 %v3491_v0, %v2796_v59  ;;  %v18875_v58 = vld [vmem:[#allocation50_spill] sm:$0xff]  ;;  %v18879_v22 = vld [vmem:[#allocation53_spill] sm:$0xff]  ;;  %v7983_v0 = vunpack.i.l.bf16 %v10986_v20  ;;  %v18880_v59 = vld [vmem:[#allocation87_spill] sm:$0xff] }
 0x253   :  { %18873 = vst [vmem:[#allocation77_spill] sm:$0xff] %v10980_v54  ;;  %v3353_v14 = vsub.f32 %v10457_v29, %v18875_v58  ;;  %v3618_v54 = vmul.f32 %v3490_v40, %v2859_v6  ;;  %v3354_v52 = vsub.f32 %v10476_v46, %v18879_v22  ;;  %v3494_v24 = vmul.f32 %v10514_v25, %v3355_v39  ;;  %v18884_v39 = vld [vmem:[#allocation91_spill] sm:$0xff] }
 0x254   :  { %18870 = vst [vmem:[#allocation75_spill] sm:$0xff] %v10975_v36  ;;  %v10995_v36 = vadd.f32 %v3619_v55, %v18877_v18  ;;  %v7979_v40 = vunpack.i.h.bf16 %v7977_v3  ;;  %v2860_v55 = vsel %vm2784_vm7, %v7973_v49, %v7969_v35  ;;  %v2861_v6 = vsel %vm2784_vm7, %v7974_v44, %v7978_v53  ;;  %v18886_v20 = vld [vmem:[#allocation95_spill] sm:$0xff] }
 0x255   :  { %v11001_v45 = vadd.f32 %v3618_v54, %v18880_v59  ;;  %v3492_v21 = vmul.f32 %v10514_v25, %v3353_v14  ;;  %v3356_v18 = vsub.f32 %v10476_v46, %v18883_v38  ;;  %v3493_v54 = vmul.f32 %v10521_v2, %v3354_v52  ;;  %v18888_v52 = vld [vmem:[#allocation98_spill] sm:$0xff] }
 0x256   :  { %18878 = vst [vmem:[#allocation82_spill] sm:$0xff] %v10995_v36  ;;  %v3622_v59 = vmul.f32 %v3494_v24, %v2861_v6  ;;  %v2862_v14 = vsel %vm2784_vm7, %v7983_v0, %v7979_v40  ;;  %v3496_v3 = vmul.f32 %v10514_v25, %v3357_v19  ;;  %v18892_v6 = vld [vmem:[#allocation113_spill] sm:$0xff] }
 0x257   :  { %18881 = vst [vmem:[#allocation87_spill] sm:$0xff] %v11001_v45  ;;  %v3620_v36 = vmul.f32 %v3492_v21, %v2860_v55  ;;  %v2797_v45 = vsel %vm2784_vm7, %v7978_v53, %v7974_v44  ;;  %v2798_v21 = vsel %vm2784_vm7, %v7979_v40, %v7983_v0  ;;  %v3495_v24 = vmul.f32 %v10521_v2, %v3356_v18  ;;  %v18890_v53 = vld [vmem:[#allocation102_spill] sm:$0xff]  ;;  %v11045_v0 = vpop.permute.xlu1 %7986 }
 0x258   :  { %v3621_v35 = vmul.f32 %v3493_v54, %v2797_v45  ;;  %v11023_v41 = vadd.f32 %v3622_v59, %v18886_v20  ;;  %v3624_v26 = vmul.f32 %v3496_v3, %v2862_v14  ;;  %v11037_v45 = vpop.permute.xlu0 %7991  ;;  %v2925_v3 = vsub.f32 %v18829_v28, %v9389_v47 }
 0x259   :  { %v11020_v49 = vadd.f32 %v3620_v36, %v18884_v39  ;;  %v3623_v19 = vmul.f32 %v3495_v24, %v2798_v21  ;;  %v18898_v21 = vld [vmem:[#allocation7_spill] sm:$0xff] }
 0x25a   :  { %18887 = vst [vmem:[#allocation95_spill] sm:$0xff] %v11023_v41  ;;  %v11029_v44 = vadd.f32 %v3621_v35, %v18888_v52  ;;  %v11032_v55 = vadd.f32 %v3624_v26, %v18890_v53  ;;  %v7229_v26 = vld [vmem:[%s17809_s1 + $0x6] ss:$8 sm:$0x3]  ;;  %v3330_v24 = vsub.f32 %v10476_v46, %v18898_v21  ;;  %v3331_v53 = vsub.f32 %v10457_v29, %v18829_v28 }
 0x25b   :  { %18885 = vst [vmem:[#allocation91_spill] sm:$0xff] %v11020_v49  ;;  %v11035_v36 = vadd.f32 %v3623_v19, %v18892_v6  ;;  %v11052_v18 = vpop.permute.xlu1 %8001  ;;  %v11055_v14 = vrot.slane %v7229_v26, %v9360_v34  ;;  %v7230_v35 = vld [vmem:[%s17809_s1 + $0x7] ss:$8 sm:$0x3]  ;;  %v11067_v52 = vrot.slane %v7229_v26, %v9330_v48  ;;  %v3064_v19 = vmul.f32 %v9414_v13, %v2925_v3 }
 0x25c   :  { %18889 = vst [vmem:[#allocation98_spill] sm:$0xff] %v11029_v44  ;;  %18891 = vst [vmem:[#allocation102_spill] sm:$0xff] %v11032_v55  ;;  %v11039_v20 = vpop.permute.xlu0 %7996  ;;  %v11082_v44 = vrot.slane %v7230_v35, %v9330_v48  ;;  %v11085_v26 = vmul.f32 %v10521_v2, %v3330_v24 }
 0x25d   :  { %18893 = vst [vmem:[#allocation113_spill] sm:$0xff] %v11035_v36  ;;  %18896 = vst [vmem:[#allocation223_spill] sm:$0xff] %v11052_v18  ;;  %v4257_v6 = vsub.f32 %v18829_v28, %v11055_v14  ;;  %v4256_v41 = vsub.f32 %v18898_v21, %v11067_v52  ;;  %v4259_v3 = vsub.f32 %v9391_v60, %v11055_v14 }
 0x25e   :  { %18897 = vst [vmem:[#allocation224_spill] sm:$0xff] %v11055_v14  ;;  %18899 = vst [vmem:[#allocation225_spill] sm:$0xff] %v11067_v52  ;;  %v4258_v28 = vsub.f32 %v9380_v23, %v11067_v52  ;;  %v4260_v49 = vsub.f32 %v18764_v30, %v11067_v52  ;;  %v4261_v24 = vsub.f32 %v18787_v4, %v11055_v14 }
 0x25f   :  { %v11077_v36 = vpop.permute.xlu1 %8006  ;;  %18902 = vst [vmem:[#allocation228_spill] sm:$0xff] %v11082_v44  ;;  %v11103_v21 = vmul.f32 %v3064_v19, %v10887_v51  ;;  %v4263_v23 = vsub.f32 %v18804_v8, %v11055_v14  ;;  %v4267_v4 = vsub.f32 %v18835_v11, %v11055_v14  ;;  %v4266_v51 = vsub.f32 %v18837_v15, %v11067_v52 }
 0x260   :  { %v11041_v54 = vpop.permute.xlu0 %8011  ;;  %18901 = vst [vmem:[#allocation227_spill] sm:$0xff] %v11077_v36  ;;  %v4268_v19 = vsub.f32 %v18838_v57, %v11067_v52  ;;  %v11136_v11 = vmul.f32 %v11082_v44, %v4260_v49  ;;  %v4273_v49 = vsub.f32 %v18855_v63, %v11055_v14  ;;  %v4275_v63 = vsub.f32 %v18857_v43, %v11055_v14 }
 0x261   :  { %18894 = vst [vmem:[#allocation221_spill] sm:$0xff] %v11041_v54  ;;  %v11075_v54 = vrot.slane %v7230_v35, %v9360_v34  ;;  %v11094_v34 = vmul.f32 %v10514_v25, %v3331_v53  ;;  %v4262_v35 = vsub.f32 %v18786_v33, %v11067_v52  ;;  %v4265_v53 = vsub.f32 %v18813_v10, %v11055_v14 }
 0x262   :  { %v4264_v33 = vsub.f32 %v18817_v16, %v11067_v52  ;;  %v11129_v10 = vmul.f32 %v11082_v44, %v4258_v28  ;;  %v4270_v16 = vsub.f32 %v18848_v61, %v11067_v52  ;;  %v4271_v61 = vsub.f32 %v18850_v37, %v11055_v14 }
 0x263   :  { %18900 = vst [vmem:[#allocation226_spill] sm:$0xff] %v11075_v54  ;;  %v11106_v60 = vmul.f32 %v11075_v54, %v4257_v6  ;;  %v11112_v48 = vpop.permute.xlu1 %8021  ;;  %v11123_v6 = vmul.f32 %v11082_v44, %v4256_v41  ;;  %v11126_v8 = vmul.f32 %v11075_v54, %v4259_v3  ;;  %v11139_v15 = vmul.f32 %v11082_v44, %v4262_v35 }
 0x264   :  { %v11043_v59 = vpop.permute.xlu0 %8016  ;;  %18903 = vst [vmem:[#allocation229_spill] sm:$0xff] %v11112_v48  ;;  %v11142_v41 = vmul.f32 %v11075_v54, %v4261_v24  ;;  %v4269_v3 = vsub.f32 %v18849_v50, %v11055_v14  ;;  %v11147_v28 = vmul.f32 %v11075_v54, %v4263_v23  ;;  %v11150_v57 = vmul.f32 %v11075_v54, %v4265_v53 }
 0x265   :  { %18895 = vst [vmem:[#allocation222_spill] sm:$0xff] %v11043_v59  ;;  %18904 = vst [vmem:[#allocation230_spill] sm:$0xff] %v11139_v15  ;;  %v11157_v35 = vmul.f32 %v11082_v44, %v4264_v33  ;;  %v11160_v24 = vmul.f32 %v11075_v54, %v4267_v4  ;;  %v11163_v50 = vmul.f32 %v11082_v44, %v4266_v51 }
 0x266   :  { %18905 = vst [vmem:[#allocation231_spill] sm:$0xff] %v11142_v41  ;;  %18906 = vst [vmem:[#allocation232_spill] sm:$0xff] %v11147_v28  ;;  %v11166_v23 = vmul.f32 %v11082_v44, %v4268_v19  ;;  %v11169_v53 = vmul.f32 %v11082_v44, %v4270_v16  ;;  %v4272_v37 = vsub.f32 %v18856_v31, %v11067_v52  ;;  %v18957_v28 = vld [vmem:[#allocation178_spill] sm:$0xff] }
 0x267   :  { %18907 = vst [vmem:[#allocation233_spill] sm:$0xff] %v11150_v57  ;;  %18908 = vst [vmem:[#allocation234_spill] sm:$0xff] %v11157_v35  ;;  %v4274_v33 = vsub.f32 %v18858_v12, %v11067_v52  ;;  %v11178_v36 = vpop.permute.xlu1 %8026  ;;  %v11183_v19 = vmul.f32 %v11075_v54, %v4269_v3  ;;  %v4276_v16 = vsub.f32 %v18861_v5, %v11067_v52  ;;  %v18124_v3 = vunpack.i.h.bf16 %v11043_v59 }
 0x268   :  { %v11047_v40 = vpop.permute.xlu0 %8031  ;;  %18909 = vst [vmem:[#allocation235_spill] sm:$0xff] %v11160_v24  ;;  %18910 = vst [vmem:[#allocation236_spill] sm:$0xff] %v11163_v50  ;;  %v4278_v31 = vsub.f32 %v18868_v17, %v11067_v52  ;;  %v11192_v12 = vmul.f32 %v11075_v54, %v4271_v61  ;;  %v11195_v4 = vmul.f32 %v11075_v54, %v4273_v49  ;;  %v8028_v61 = vunpack.i.l.bf16 %v11178_v36  ;;  %v18953_v24 = vld [vmem:[#allocation120_spill] sm:$0xff] }
 0x269   :  { %18911 = vst [vmem:[#allocation237_spill] sm:$0xff] %v11166_v23  ;;  %18912 = vst [vmem:[#allocation238_spill] sm:$0xff] %v11169_v53  ;;  %v18915_v53 = vld [vmem:[#allocation103_spill] sm:$0xff]  ;;  %v4277_v23 = vsub.f32 %v18871_v9, %v11055_v14  ;;  %v4279_v5 = vsub.f32 %v18875_v58, %v11055_v14  ;;  %v4281_v17 = vsub.f32 %v18876_v1, %v11055_v14  ;;  %v18921_v58 = vunpack.i.l.bf16 %v11112_v48 }
 0x26a   :  { %18914 = vst [vmem:[#allocation240_spill] sm:$0xff] %v11183_v19  ;;  %v3373_v43 = vsub.f32 %v10457_v29, %v18915_v53  ;;  %18916 = vst [vmem:[#allocation241_spill] sm:$0xff] %v11192_v12  ;;  %v4280_v19 = vsub.f32 %v18879_v22, %v11067_v52  ;;  %v11208_v12 = vmul.f32 %v11082_v44, %v4272_v37  ;;  %v18952_v53 = vld [vmem:[#allocation159_spill] sm:$0xff]  ;;  %v7918_v18 = vunpack.i.l.bf16 %v18957_v28 }
 0x26b   :  { %18917 = vst [vmem:[#allocation242_spill] sm:$0xff] %v11195_v4  ;;  %v11211_v49 = vmul.f32 %v11075_v54, %v4275_v63  ;;  %v11214_v9 = vmul.f32 %v11082_v44, %v4274_v33  ;;  %v2870_v1 = vsel %vm2784_vm7, %v18921_v58, %v18124_v3  ;;  %v18922_v4 = vld [vmem:[#allocation107_spill] sm:$0xff]  ;;  %v11225_v50 = vmul.f32 %v11082_v44, %v4276_v16  ;;  %v18925_v63 = vld [vmem:[#allocation108_spill] sm:$0xff] }
 0x26c   :  { %v11059_v39 = vpop.permute.xlu0 %8036  ;;  %18918 = vst [vmem:[#allocation243_spill] sm:$0xff] %v11208_v12  ;;  %v3374_v22 = vsub.f32 %v10476_v46, %v18922_v4  ;;  %v11228_v37 = vmul.f32 %v11082_v44, %v4278_v31  ;;  %v3375_v33 = vsub.f32 %v10457_v29, %v18925_v63  ;;  %v4283_v12 = vsub.f32 %v18882_v27, %v11055_v14  ;;  %v18946_v4 = vld [vmem:[#allocation123_spill] sm:$0xff] }
 0x26d   :  { %18919 = vst [vmem:[#allocation244_spill] sm:$0xff] %v11211_v49  ;;  %18920 = vst [vmem:[#allocation245_spill] sm:$0xff] %v11214_v9  ;;  %v3512_v9 = vmul.f32 %v10514_v25, %v3373_v43  ;;  %v8024_v49 = vunpack.i.h.bf16 %v11112_v48  ;;  %v11239_v3 = vmul.f32 %v11075_v54, %v4277_v23  ;;  %v11242_v16 = vmul.f32 %v11075_v54, %v4279_v5  ;;  %v18931_v43 = vld [vmem:[#allocation114_spill] sm:$0xff] }
 0x26e   :  { %18923 = vst [vmem:[#allocation246_spill] sm:$0xff] %v11225_v50  ;;  %18924 = vst [vmem:[#allocation247_spill] sm:$0xff] %v11228_v37  ;;  %v11245_v31 = vmul.f32 %v11075_v54, %v4281_v17  ;;  %v11248_v37 = vmul.f32 %v11082_v44, %v4280_v19  ;;  %v3377_v50 = vsub.f32 %v10457_v29, %v18931_v43  ;;  %v18932_v17 = vld [vmem:[#allocation112_spill] sm:$0xff]  ;;  %v8033_v19 = vunpack.i.l.bf16 %v11047_v40 }
 0x26f   :  { %18927 = vst [vmem:[#allocation249_spill] sm:$0xff] %v11239_v3  ;;  %18928 = vst [vmem:[#allocation250_spill] sm:$0xff] %v11242_v16  ;;  %v3640_v48 = vmul.f32 %v3512_v9, %v2870_v1  ;;  %v2807_v27 = vsel %vm2784_vm7, %v8028_v61, %v8024_v49  ;;  %v3513_v16 = vmul.f32 %v10521_v2, %v3374_v22  ;;  %v18933_v1 = vld [vmem:[#allocation118_spill] sm:$0xff]  ;;  %v18935_v22 = vld [vmem:[#allocation119_spill] sm:$0xff]  ;;  %v8039_v41 = vunpack.i.h.bf16 %v11059_v39 }
 0x270   :  { %v11079_v55 = vpop.permute.xlu0 %8051  ;;  %18929 = vst [vmem:[#allocation251_spill] sm:$0xff] %v11245_v31  ;;  %18930 = vst [vmem:[#allocation252_spill] sm:$0xff] %v11248_v37  ;;  %v3376_v31 = vsub.f32 %v10476_v46, %v18932_v17  ;;  %v3514_v9 = vmul.f32 %v10514_v25, %v3375_v33  ;;  %v3378_v3 = vsub.f32 %v10476_v46, %v18933_v1  ;;  %v18937_v37 = vld [vmem:[#allocation124_spill] sm:$0xff] }
 0x271   :  { %v11268_v23 = vmul.f32 %v11075_v54, %v4283_v12  ;;  %v3379_v38 = vsub.f32 %v10457_v29, %v18935_v22  ;;  %v3641_v59 = vmul.f32 %v3513_v16, %v2807_v27  ;;  %v3381_v1 = vsub.f32 %v10457_v29, %v18937_v37  ;;  %v18943_v22 = vld [vmem:[#allocation115_spill] sm:$0xff] }
 0x272   :  { %v3516_v12 = vmul.f32 %v10514_v25, %v3377_v50  ;;  %v3515_v27 = vmul.f32 %v10521_v2, %v3376_v31  ;;  %v3383_v33 = vsub.f32 %v10457_v29, %v10157_v32  ;;  %v18941_v31 = vld [vmem:[#allocation5_spill] sm:$0xff]  ;;  %v18945_v50 = vld [vmem:[#allocation136_spill] sm:$0xff]  ;;  %v3380_v52 = vsub.f32 %v10476_v46, %v18946_v4 }
 0x273   :  { %18934 = vst [vmem:[#allocation253_spill] sm:$0xff] %v11268_v23  ;;  %v18938_v23 = vld [vmem:[#allocation111_spill] sm:$0xff]  ;;  %v2988_v5 = vsub.f32 %v10309_v7, %v18941_v31  ;;  %v11310_v43 = vadd.f32 %v3641_v59, %v18943_v22  ;;  %v3387_v32 = vsub.f32 %v10457_v29, %v18945_v50  ;;  %v11322_v59 = vpop.permute.xlu1 %8041  ;;  %v18947_v22 = vld [vmem:[#allocation140_spill] sm:$0xff]  ;;  %v18950_v50 = vld [vmem:[#allocation6_spill] sm:$0xff] }
 0x274   :  { %v11133_v30 = vpop.permute.xlu0 %8056  ;;  %v11283_v63 = vadd.f32 %v3640_v48, %v18938_v23  ;;  %v11299_v23 = vmul.f32 %v10521_v2, %v3378_v3  ;;  %v3522_v28 = vmul.f32 %v10514_v25, %v3383_v33 }
 0x275   :  { %18944 = vst [vmem:[#allocation115_spill] sm:$0xff] %v11310_v43  ;;  %v3389_v43 = vsub.f32 %v10457_v29, %v18947_v22  ;;  %v3127_v4 = vmul.f32 %v18950_v50, %v2988_v5  ;;  %v8034_v22 = vunpack.i.h.bf16 %v11047_v40  ;;  %v18958_v5 = vld [vmem:[#allocation131_spill] sm:$0xff] }
 0x276   :  { %18939 = vst [vmem:[#allocation111_spill] sm:$0xff] %v11283_v63  ;;  %v3518_v63 = vmul.f32 %v10514_v25, %v3379_v38  ;;  %v8038_v38 = vunpack.i.l.bf16 %v11059_v39 }
 0x278   :  { %v11180_v51 = vpop.permute.xlu0 %8071 }
 0x279   :  { %18913 = vst [vmem:[#allocation239_spill] sm:$0xff] %v11180_v51 }
 0x27c   :  { %v11236_v58 = vpop.permute.xlu0 %8076 }
 0x27d   :  { %18926 = vst [vmem:[#allocation248_spill] sm:$0xff] %v11236_v58  ;;  %v8029_v58 = vunpack.i.h.bf16 %v11178_v36  ;;  %v2871_v36 = vsel %vm2784_vm7, %v8024_v49, %v8028_v61  ;;  %v2989_v49 = vsub.f32 %v10314_v42, %v9389_v47 }
 0x27e   :  { %v3642_v44 = vmul.f32 %v3514_v9, %v2871_v36  ;;  %v18948_v36 = vld [vmem:[#allocation128_spill] sm:$0xff]  ;;  %v2992_v9 = vsub.f32 %v18952_v53, %v18941_v31  ;;  %v11368_v53 = vpop.permute.xlu1 %8046 }
 0x27f   :  { %v2808_v16 = vsel %vm2784_vm7, %v8029_v58, %v8033_v19  ;;  %v2872_v40 = vsel %vm2784_vm7, %v8033_v19, %v8029_v58  ;;  %v18964_v58 = vld [vmem:[#allocation162_spill] sm:$0xff] }
 0x280   :  { %v11275_v17 = vpop.permute.xlu0 %8086  ;;  %v3643_v3 = vmul.f32 %v3515_v27, %v2808_v16  ;;  %v3382_v27 = vsub.f32 %v10476_v46, %v18948_v36  ;;  %v18949_v16 = vld [vmem:[#allocation144_spill] sm:$0xff]  ;;  %v11373_v19 = vmul.f32 %v3127_v4, %v18964_v58  ;;  %v18968_v58 = vld [vmem:[#allocation135_spill] sm:$0xff] }
 0x281   :  { %18936 = vst [vmem:[#allocation254_spill] sm:$0xff] %v11275_v17  ;;  %v18940_v17 = vld [vmem:[#allocation132_spill] sm:$0xff]  ;;  %v3391_v61 = vsub.f32 %v10457_v29, %v18949_v16  ;;  %v3386_v39 = vsub.f32 %v10476_v46, %v18968_v58 }
 0x282   :  { %v3385_v48 = vsub.f32 %v10457_v29, %v18940_v17  ;;  %v2990_v17 = vsub.f32 %v10330_v62, %v18941_v31  ;;  %v11343_v35 = vadd.f32 %v3643_v3, %v18953_v24  ;;  %v18955_v36 = vld [vmem:[#allocation116_spill] sm:$0xff]  ;;  %v2873_v24 = vsel %vm2784_vm7, %v8034_v22, %v8038_v38  ;;  %18965 = vst [vmem:[#allocation162_spill] sm:$0xff] %v11373_v19 }
 0x283   :  { %v11346_v57 = vadd.f32 %v3642_v44, %v18955_v36  ;;  %v18959_v16 = vld [vmem:[#allocation148_spill] sm:$0xff]  ;;  %v8043_v44 = vunpack.i.l.bf16 %v11322_v59  ;;  %v8044_v19 = vunpack.i.h.bf16 %v11322_v59  ;;  %v11422_v59 = vmul.f32 %v10521_v2, %v3386_v39 }
 0x284   :  { %v11307_v37 = vpop.permute.xlu0 %8096  ;;  %18954 = vst [vmem:[#allocation120_spill] sm:$0xff] %v11343_v35  ;;  %v3129_v62 = vmul.f32 %v18950_v50, %v2990_v17  ;;  %v18960_v17 = vld [vmem:[#allocation158_spill] sm:$0xff]  ;;  %v3394_v39 = vsub.f32 %v10476_v46, %v10309_v7  ;;  %v18985_v7 = vld [vmem:[#allocation161_spill] sm:$0xff] }
 0x285   :  { %18942 = vst [vmem:[#allocation255_spill] sm:$0xff] %v11307_v37  ;;  %v3520_v37 = vmul.f32 %v10514_v25, %v3381_v1  ;;  %v3128_v1 = vmul.f32 %v9414_v13, %v2989_v49  ;;  %18956 = vst [vmem:[#allocation116_spill] sm:$0xff] %v11346_v57  ;;  %v3519_v49 = vmul.f32 %v10521_v2, %v3380_v52  ;;  %v18962_v52 = vld [vmem:[#allocation163_spill] sm:$0xff] }
 0x286   :  { %v2994_v36 = vsub.f32 %v18962_v52, %v18941_v31  ;;  %v3131_v57 = vmul.f32 %v18950_v50, %v2992_v9  ;;  %v3646_v52 = vmul.f32 %v3518_v63, %v2873_v24  ;;  %v2874_v4 = vsel %vm2784_vm7, %v8043_v44, %v8039_v41  ;;  %v18969_v63 = vld [vmem:[#allocation139_spill] sm:$0xff] }
 0x287   :  { %v11363_v3 = vmul.f32 %v3128_v1, %v18960_v17  ;;  %v18966_v1 = vld [vmem:[#allocation160_spill] sm:$0xff]  ;;  %v8048_v9 = vunpack.i.l.bf16 %v11368_v53  ;;  %v3648_v58 = vmul.f32 %v3520_v37, %v2874_v4  ;;  %v18980_v4 = vld [vmem:[#allocation147_spill] sm:$0xff] }
 0x288   :  { %v11379_v17 = vmul.f32 %v3129_v62, %v18966_v1  ;;  %v3133_v33 = vmul.f32 %v18950_v50, %v2994_v36  ;;  %v11393_v62 = vmul.f32 %v10514_v25, %v3385_v48  ;;  %v18974_v1 = vld [vmem:[#allocation165_spill] sm:$0xff]  ;;  %v11408_v36 = vmul.f32 %v10514_v25, %v3387_v32 }
 0x289   :  { %18961 = vst [vmem:[#allocation178_spill] sm:$0xff] %v11363_v3  ;;  %v3644_v3 = vmul.f32 %v3516_v12, %v2872_v40  ;;  %v18970_v12 = vld [vmem:[#allocation143_spill] sm:$0xff]  ;;  %v11425_v32 = vmul.f32 %v10514_v25, %v3389_v43  ;;  %v3392_v43 = vsub.f32 %v10476_v46, %v18980_v4 }
 0x28a   :  { %v11337_v54 = vpop.permute.xlu0 %8106  ;;  %18967 = vst [vmem:[#allocation160_spill] sm:$0xff] %v11379_v17  ;;  %v3390_v40 = vsub.f32 %v10476_v46, %v18970_v12  ;;  %v2996_v17 = vsub.f32 %v18974_v1, %v18941_v31  ;;  %v18976_v12 = vld [vmem:[#allocation125_spill] sm:$0xff] }
 0x28b   :  { %18951 = vst [vmem:[#allocation256_spill] sm:$0xff] %v11337_v54  ;;  %v3384_v54 = vsub.f32 %v10476_v46, %v18958_v5  ;;  %v3521_v5 = vmul.f32 %v10521_v2, %v3382_v27  ;;  %v11415_v15 = vadd.f32 %v3644_v3, %v18976_v12  ;;  %v18981_v12 = vld [vmem:[#allocation133_spill] sm:$0xff] }
 0x28c   :  { %v11434_v3 = vmul.f32 %v10521_v2, %v3390_v40  ;;  %v11448_v40 = vadd.f32 %v3648_v58, %v18981_v12  ;;  %v18988_v12 = vld [vmem:[#allocation171_spill] sm:$0xff] }
 0x28d   :  { %v11382_v27 = vmul.f32 %v10521_v2, %v3384_v54  ;;  %v3388_v54 = vsub.f32 %v10476_v46, %v18969_v63  ;;  %v18975_v63 = vld [vmem:[#allocation126_spill] sm:$0xff] }
 0x28e   :  { %v11412_v14 = vadd.f32 %v3646_v52, %v18975_v63  ;;  %v3135_v52 = vmul.f32 %v18950_v50, %v2996_v17 }
 0x29a   :  { %v11370_v35 = vpop.permute.xlu0 %8116 }
 0x29b   :  { %18963 = vst [vmem:[#allocation158_spill] sm:$0xff] %v11370_v35  ;;  %v2809_v35 = vsel %vm2784_vm7, %v8038_v38, %v8034_v22  ;;  %v18972_v38 = vld [vmem:[#allocation166_spill] sm:$0xff] }
 0x29c   :  { %v11402_v24 = vmul.f32 %v3131_v57, %v18972_v38  ;;  %v3645_v48 = vmul.f32 %v11299_v23, %v2809_v35  ;;  %v2810_v57 = vsel %vm2784_vm7, %v8039_v41, %v8043_v44  ;;  %v2811_v38 = vsel %vm2784_vm7, %v8048_v9, %v8044_v19  ;;  %v18977_v35 = vld [vmem:[#allocation167_spill] sm:$0xff] }
 0x29d   :  { %v11428_v37 = vmul.f32 %v3133_v33, %v18977_v35  ;;  %v11431_v23 = vmul.f32 %v10521_v2, %v3388_v54  ;;  %v11437_v41 = vmul.f32 %v10514_v25, %v3391_v61  ;;  %v3647_v63 = vmul.f32 %v3519_v49, %v2810_v57  ;;  %18982 = vst [vmem:[#allocation167_spill] sm:$0xff] %v11448_v40  ;;  %v18983_v35 = vld [vmem:[#allocation127_spill] sm:$0xff]  ;;  %v18987_v57 = vld [vmem:[#allocation169_spill] sm:$0xff]  ;;  %v19018_v40 = vld [vmem:[#allocation26_spill] sm:$0xff] }
 0x29e   :  { %18973 = vst [vmem:[#allocation166_spill] sm:$0xff] %v11402_v24  ;;  %v3649_v54 = vmul.f32 %v3521_v5, %v2811_v38  ;;  %v11451_v61 = vadd.f32 %v3645_v48, %v18983_v35  ;;  %v18984_v24 = vld [vmem:[#allocation11_spill] sm:$0xff]  ;;  %v2875_v49 = vsel %vm2784_vm7, %v8044_v19, %v8048_v9  ;;  %v18986_v48 = vld [vmem:[#allocation12_spill] sm:$0xff]  ;;  %v2998_v38 = vsub.f32 %v18987_v57, %v18941_v31 }
 0x29f   :  { %18978 = vst [vmem:[#allocation126_spill] sm:$0xff] %v11428_v37  ;;  %vm2062_vm5 = vcmp.ge.f32.partialorder %v18985_v7, %v18984_v24  ;;  %vm2203_vm6 = vcmp.lt.f32.partialorder %v18985_v7, %v18986_v48  ;;  %v3000_v35 = vsub.f32 %v18988_v12, %v18941_v31  ;;  %v18990_v9 = vld [vmem:[#allocation15_spill] sm:$0xff]  ;;  %v3650_v1 = vmul.f32 %v3522_v28, %v2875_v49 }
 0x2a0   :  { %v8058_v12 = vunpack.i.l.bf16 %v11133_v30  ;;  %vm11489_vm10 = vmand %vm2062_vm5, %vm2203_vm6 }
 0x2aa   :  { %v11399_v22 = vpop.permute.xlu0 %8126 }
 0x2ab   :  { %18971 = vst [vmem:[#allocation257_spill] sm:$0xff] %v11399_v22  ;;  %v8053_v22 = vunpack.i.l.bf16 %v11079_v55 }
 0x2b6   :  { %v11439_v44 = vpop.permute.xlu0 %8136 }
 0x2b7   :  { %18979 = vst [vmem:[#allocation125_spill] sm:$0xff] %v11439_v44  ;;  %v8139_v33 = vunpack.i.h.bf16 %v11439_v44 }
 0x2b9   :  { %v2849_v17 = vsel %vm2784_vm7, %v8139_v33, %v7918_v18  ;;  %v2785_v37 = vsel %vm2784_vm7, %v7918_v18, %v8139_v33  ;;  %v8049_v18 = vunpack.i.h.bf16 %v11368_v53  ;;  %v18989_v33 = vld [vmem:[#allocation157_spill] sm:$0xff] }
 0x2ba   :  { %v3598_v5 = vmul.f32 %v11094_v34, %v2849_v17  ;;  %v3597_v58 = vmul.f32 %v11085_v26, %v2785_v37  ;;  %vm2060_vm8 = vcmp.ge.f32.partialorder %v18989_v33, %v18984_v24  ;;  %v18991_v17 = vld [vmem:[#allocation137_spill] sm:$0xff]  ;;  %v18993_v37 = vld [vmem:[#allocation130_spill] sm:$0xff]  ;;  %vm2201_vm9 = vcmp.lt.f32.partialorder %v18989_v33, %v18986_v48 }
 0x2bb   :  { %v11476_v26 = vadd.f32 %v3649_v54, %v18991_v17  ;;  %v11479_v44 = vadd.f32 %v3647_v63, %v18993_v37  ;;  %v2812_v57 = vsel %vm2784_vm7, %v8049_v18, %v8053_v22  ;;  %v2876_v53 = vsel %vm2784_vm7, %v8053_v22, %v8049_v18  ;;  %v18999_v54 = vld [vmem:[#allocation172_spill] sm:$0xff]  ;;  %vm2329_vm11 = vmand %vm2060_vm8, %vm2201_vm9  ;;  %v19006_v37 = vld [vmem:[#allocation175_spill] sm:$0xff] }
 0x2bc   :  { %v3726_v19 = vadd.f32 %v3598_v5, %v11103_v21  ;;  %v3725_v34 = vadd.f32 %v3597_v58, %v18990_v9  ;;  %v11504_v49 = vmul.f32 %v3135_v52, %v18999_v54  ;;  %v8054_v5 = vunpack.i.h.bf16 %v11079_v55 }
 0x2bd   :  { %18992 = vst [vmem:[#allocation133_spill] sm:$0xff] %v11476_v26  ;;  %18994 = vst [vmem:[#allocation127_spill] sm:$0xff] %v11479_v44  ;;  %v11508_v58 = vmul.f32 %v10521_v2, %v3392_v43  ;;  %v19001_v22 = vsub.f32 %v10457_v29, %v18959_v16  ;;  %v11522_v52 = vmul.f32 %v10521_v2, %v3394_v39  ;;  %v19003_v55 = vmov 0.0   ;;  %v19013_v16 = vld [vmem:[#allocation141_spill] sm:$0xff]  ;;  %v19083_v44 = vld [vmem:[#allocation46_spill] sm:$0xff] }
 0x2be   :  { %3989 = vrot.lane.b32.xlu0 %v3726_v19, %s8557_s20  ;;  %v11497_v28 = vmul.f32 %v11106_v60, %v3726_v19  ;;  %3861 = vrot.lane.b32.xlu1 %v3725_v34, %s8557_s20  ;;  %v11501_v63 = vmul.f32 %v11123_v6, %v3725_v34  ;;  %19000 = vst [vmem:[#allocation15_spill] sm:$0xff] %v11504_v49  ;;  %v11517_v19 = vpop.permute.xlu1 %8061  ;;  %v11533_v43 = vsel %vm11489_vm10, 1.0, %v19003_v55  ;;  %v19004_v34 = vld [vmem:[#allocation134_spill] sm:$0xff]  ;;  %v19008_v49 = vld [vmem:[#allocation20_spill] sm:$0xff] }
 0x2bf   :  { %v11514_v18 = vmul.f32 %v10514_v25, %v19001_v22  ;;  %v3137_v60 = vmul.f32 %v18950_v50, %v2998_v38  ;;  %v3395_v6 = vsub.f32 %v10457_v29, %v10314_v42  ;;  %19002 = vst [vmem:[#allocation137_spill] sm:$0xff] %v11522_v52  ;;  %v3651_v38 = vmul.f32 %v11382_v27, %v2812_v57  ;;  %v19007_v42 = vld [vmem:[#allocation180_spill] sm:$0xff]  ;;  %v19009_v27 = vld [vmem:[#allocation19_spill] sm:$0xff] }
 0x2c0   :  { %18997 = vst [vmem:[#allocation11_spill] sm:$0xff] %v11497_v28  ;;  %18998 = vst [vmem:[#allocation12_spill] sm:$0xff] %v11501_v63  ;;  %v3652_v9 = vmul.f32 %v11393_v62, %v2876_v53  ;;  %v2813_v39 = vsel %vm2784_vm7, %v8058_v12, %v8054_v5  ;;  %v11540_v17 = vadd.f32 %v3650_v1, %v19004_v34  ;;  %v19010_v62 = vld [vmem:[#allocation185_spill] sm:$0xff]  ;;  %v11554_v1 = vsel %vm2329_vm11, 1.0, %v19003_v55  ;;  %v19011_v53 = vld [vmem:[#allocation168_spill] sm:$0xff] }
 0x2c1   :  { %v3002_v54 = vsub.f32 %v19006_v37, %v18941_v31  ;;  %v3139_v22 = vmul.f32 %v18950_v50, %v3000_v35  ;;  %v3004_v21 = vsub.f32 %v19007_v42, %v18941_v31  ;;  %v3006_v57 = vsub.f32 %v19010_v62, %v18941_v31  ;;  %v19012_v42 = vld [vmem:[#allocation164_spill] sm:$0xff]  ;;  %v19015_v28 = vld [vmem:[#allocation138_spill] sm:$0xff] }
 0x2c2   :  { %19005 = vst [vmem:[#allocation130_spill] sm:$0xff] %v11540_v17  ;;  %3991 = vrot.lane.b32.xlu0 %v19008_v49, %s8557_s20  ;;  %3863 = vrot.lane.b32.xlu1 %v19009_v27, %s8557_s20  ;;  %vm2066_vm12 = vcmp.ge.f32.partialorder %v19011_v53, %v18984_v24  ;;  %vm2207_vm13 = vcmp.lt.f32.partialorder %v19011_v53, %v18986_v48  ;;  %v8063_v37 = vunpack.i.l.bf16 %v11517_v19  ;;  %v19017_v52 = vld [vmem:[#allocation188_spill] sm:$0xff]  ;;  %v11580_v26 = vpop.permute.xlu1 %8066 }
 0x2c3   :  { %v3653_v35 = vmul.f32 %v11422_v59, %v2813_v39  ;;  %v8140_v34 = vpack.i.bf16 %v11533_v43, %v11554_v1  ;;  %vm2064_vm14 = vcmp.ge.f32.partialorder %v19012_v42, %v18984_v24  ;;  %vm2205_vm15 = vcmp.lt.f32.partialorder %v19012_v42, %v18986_v48  ;;  %vm2335_vm1 = vmand %vm2066_vm12, %vm2207_vm13 }
 0x2c4   :  { %v2877_v62 = vsel %vm2784_vm7, %v8054_v5, %v8058_v12  ;;  %v11571_v4 = vadd.f32 %v3652_v9, %v19013_v16  ;;  %v11574_v63 = vadd.f32 %v3651_v38, %v19015_v28  ;;  %v3141_v59 = vmul.f32 %v18950_v50, %v3002_v54  ;;  %v19019_v16 = vld [vmem:[#allocation173_spill] sm:$0xff]  ;;  %vm11611_vm2 = vmand %vm2064_vm14, %vm2205_vm15 }
 0x2c5   :  { %v3143_v39 = vmul.f32 %v18950_v50, %v3004_v21  ;;  %v3008_v17 = vsub.f32 %v19017_v52, %v18941_v31  ;;  %v11592_v12 = vmul.f32 %v3137_v60, %v19019_v16  ;;  %v3145_v28 = vmul.f32 %v18950_v50, %v3006_v57  ;;  %v19022_v9 = vld [vmem:[#allocation181_spill] sm:$0xff]  ;;  %v19024_v21 = vld [vmem:[#allocation47_spill] sm:$0xff] }
 0x2c6   :  { %19014 = vst [vmem:[#allocation172_spill] sm:$0xff] %v11571_v4  ;;  %19016 = vst [vmem:[#allocation134_spill] sm:$0xff] %v11574_v63  ;;  %3865 = vrot.lane.b32.xlu0 %v19018_v40, %s8557_s20  ;;  %8141 = vrot.lane.b32.xlu1 %v8140_v34, %s8557_s20  ;;  %v8059_v5 = vunpack.i.h.bf16 %v11133_v30  ;;  %v11597_v38 = vmul.f32 %v10514_v25, %v3395_v6  ;;  %v11600_v54 = vmul.f32 %v3139_v22, %v19022_v9  ;;  %v1940_v30 = vpop.f32.mrb[114].mxu0  ;;  %v19027_v6 = vld [vmem:[#allocation145_spill] sm:$0xff]  ;;  %v19037_v4 = vld [vmem:[#allocation52_spill] sm:$0xff] }
 0x2c7   :  { %19020 = vst [vmem:[#allocation20_spill] sm:$0xff] %v11592_v12  ;;  %v3010_v34 = vsub.f32 %v19024_v21, %v18941_v31  ;;  %v3654_v52 = vmul.f32 %v11408_v36, %v2877_v62  ;;  %v11616_v57 = vadd.f32 %v3653_v35, %v19027_v6  ;;  %v8068_v62 = vunpack.i.l.bf16 %v11580_v26  ;;  %v1942_v9 = vpop.f32.mrb[115].mxu0  ;;  %v19031_v21 = vld [vmem:[#allocation189_spill] sm:$0xff]  ;;  %v19033_v6 = vld [vmem:[#allocation28_spill] sm:$0xff] }
 0x2c8   :  { %19021 = vst [vmem:[#allocation19_spill] sm:$0xff] %v11597_v38  ;;  %19023 = vst [vmem:[#allocation141_spill] sm:$0xff] %v11600_v54  ;;  %v2814_v22 = vsel %vm2784_vm7, %v8059_v5, %v8063_v37  ;;  %v2878_v36 = vsel %vm2784_vm7, %v8063_v37, %v8059_v5  ;;  %v11624_v16 = vsel %vm2335_vm1, 1.0, %v19003_v55  ;;  %v19029_v54 = vld [vmem:[#allocation182_spill] sm:$0xff]  ;;  %v11630_v38 = vmul.f32 %v3143_v39, %v19031_v21 }
 0x2c9   :  { %19028 = vst [vmem:[#allocation138_spill] sm:$0xff] %v11616_v57  ;;  %v11627_v12 = vmul.f32 %v3141_v59, %v19029_v54  ;;  %v3147_v35 = vmul.f32 %v18950_v50, %v3008_v17  ;;  %v19034_v57 = vld [vmem:[#allocation23_spill] sm:$0xff]  ;;  %v19035_v37 = vld [vmem:[#allocation190_spill] sm:$0xff]  ;;  %v3012_v63 = vsub.f32 %v19037_v4, %v18941_v31  ;;  %v8064_v59 = vunpack.i.h.bf16 %v11517_v19 }
 0x2ca   :  { %19032 = vst [vmem:[#allocation173_spill] sm:$0xff] %v11630_v38  ;;  %3867 = vrot.lane.b32.xlu0 %v19033_v6, %s8557_s20  ;;  %3993 = vrot.lane.b32.xlu1 %v19034_v57, %s8557_s20  ;;  %v11638_v5 = vmul.f32 %v3145_v28, %v19035_v37  ;;  %v11646_v39 = vsel %vm11611_vm2, 1.0, %v19003_v55  ;;  %v3655_v17 = vmul.f32 %v11431_v23, %v2814_v22  ;;  %v19038_v28 = vld [vmem:[#allocation142_spill] sm:$0xff] }
 0x2cb   :  { %19030 = vst [vmem:[#allocation26_spill] sm:$0xff] %v11627_v12  ;;  %v3656_v54 = vmul.f32 %v11425_v32, %v2878_v36  ;;  %v8145_v21 = vpack.i.bf16 %v11624_v16, %v11646_v39  ;;  %v11653_v37 = vadd.f32 %v3654_v52, %v19038_v28  ;;  %v2815_v19 = vsel %vm2784_vm7, %v8068_v62, %v8064_v59  ;;  %v19042_v32 = vld [vmem:[#allocation191_spill] sm:$0xff]  ;;  %v19045_v52 = vld [vmem:[#allocation32_spill] sm:$0xff] }
 0x2cc   :  { %19036 = vst [vmem:[#allocation181_spill] sm:$0xff] %v11638_v5  ;;  %v1299_v38 = vpop.f32.mrb[50].mxu1  ;;  %v3149_v5 = vmul.f32 %v18950_v50, %v3010_v34  ;;  %v11660_v60 = vmul.f32 %v11126_v8, %v19008_v49  ;;  %v11665_v22 = vmul.f32 %v3147_v35, %v19042_v32  ;;  %v11669_v36 = vmul.f32 %v11129_v10, %v19009_v27  ;;  %v1946_v28 = vpop.f32.mrb[116].mxu0  ;;  %v19047_v8 = vld [vmem:[#allocation57_spill] sm:$0xff] }
 0x2cd   :  { %19039 = vst [vmem:[#allocation145_spill] sm:$0xff] %v11653_v37  ;;  %v11662_v12 = vadd.f32 %v1940_v30, %v1299_v38  ;;  %v1301_v23 = vpop.f32.mrb[51].mxu1  ;;  %v3014_v49 = vsub.f32 %v19047_v8, %v18941_v31  ;;  %v3151_v38 = vmul.f32 %v18950_v50, %v3012_v63  ;;  %v19048_v30 = vld [vmem:[#allocation174_spill] sm:$0xff]  ;;  %v1948_v10 = vpop.f32.mrb[117].mxu0  ;;  %v19049_v27 = vld [vmem:[#allocation193_spill] sm:$0xff]  ;;  %v19054_v63 = vld [vmem:[#allocation192_spill] sm:$0xff] }
 0x2ce   :  { %19040 = vst [vmem:[#allocation182_spill] sm:$0xff] %v11660_v60  ;;  %19043 = vst [vmem:[#allocation28_spill] sm:$0xff] %v11665_v22  ;;  %8146 = vrot.lane.b32.xlu0 %v8145_v21, %s8557_s20  ;;  %3995 = vrot.lane.b32.xlu1 %v19045_v52, %s8557_s20  ;;  %v11674_v34 = vadd.f32 %v1942_v9, %v1301_v23  ;;  %vm2070_vm3 = vcmp.ge.f32.partialorder %v19048_v30, %v18984_v24  ;;  %v19050_v23 = vld [vmem:[#allocation149_spill] sm:$0xff]  ;;  %v19052_v22 = vld [vmem:[#allocation146_spill] sm:$0xff] }
 0x2cf   :  { %19041 = vst [vmem:[#allocation189_spill] sm:$0xff] %v11662_v12  ;;  %19044 = vst [vmem:[#allocation23_spill] sm:$0xff] %v11669_v36  ;;  %vm2211_vm4 = vcmp.lt.f32.partialorder %v19048_v30, %v18986_v48  ;;  %v3016_v35 = vsub.f32 %v19049_v27, %v18941_v31  ;;  %v3657_v21 = vmul.f32 %v11434_v3, %v2815_v19  ;;  %v19056_v60 = vld [vmem:[#allocation170_spill] sm:$0xff]  ;;  %v19058_v3 = vld [vmem:[#allocation220_spill] sm:$0xff] }
 0x2d0   :  { %19046 = vst [vmem:[#allocation190_spill] sm:$0xff] %v11674_v34  ;;  %v11687_v32 = vadd.f32 %v3656_v54, %v19050_v23  ;;  %v11690_v8 = vadd.f32 %v3655_v17, %v19052_v22  ;;  %v11693_v4 = vmul.f32 %v3149_v5, %v19054_v63  ;;  %vm2068_vm5 = vcmp.ge.f32.partialorder %v19056_v60, %v18984_v24  ;;  %v19059_v5 = vld [vmem:[#allocation34_spill] sm:$0xff]  ;;  %v19060_v22 = vld [vmem:[#allocation37_spill] sm:$0xff]  ;;  %vm11716_vm8 = vmand %vm2070_vm3, %vm2211_vm4 }
 0x2d1   :  { %v1305_v9 = vpop.f32.mrb[52].mxu1  ;;  %vm2209_vm6 = vcmp.lt.f32.partialorder %v19056_v60, %v18986_v48  ;;  %v2879_v54 = vsel %vm2784_vm7, %v8064_v59, %v8068_v62  ;;  %v2993_v17 = vsub.f32 %v18985_v7, %v9389_v47  ;;  %v1952_v59 = vpop.f32.mrb[118].mxu0  ;;  %v3153_v63 = vmul.f32 %v18950_v50, %v3014_v49  ;;  %v19064_v19 = vld [vmem:[#allocation194_spill] sm:$0xff] }
 0x2d2   :  { %19051 = vst [vmem:[#allocation142_spill] sm:$0xff] %v11687_v32  ;;  %19053 = vst [vmem:[#allocation191_spill] sm:$0xff] %v11690_v8  ;;  %v11699_v36 = vadd.f32 %v1946_v28, %v1305_v9  ;;  %v1307_v27 = vpop.f32.mrb[53].mxu1  ;;  %3997 = vrot.lane.b32.xlu0 %v19059_v5, %s8557_s20  ;;  %3869 = vrot.lane.b32.xlu1 %v19060_v22, %s8557_s20  ;;  %v1954_v7 = vpop.f32.mrb[119].mxu0  ;;  %v3155_v12 = vmul.f32 %v18950_v50, %v3016_v35  ;;  %v8073_v35 = vunpack.i.l.bf16 %v11180_v51 }
 0x2d3   :  { %19055 = vst [vmem:[#allocation32_spill] sm:$0xff] %v11693_v4  ;;  %v11720_v62 = vadd.f32 %v1948_v10, %v1307_v27  ;;  %v11726_v4 = vmul.f32 %v3151_v38, %v19064_v19  ;;  %v2991_v10 = vsub.f32 %v18989_v33, %v9389_v47  ;;  %vm11739_vm9 = vmand %vm2068_vm5, %vm2209_vm6  ;;  %v19069_v27 = vld [vmem:[#allocation153_spill] sm:$0xff]  ;;  %v3658_v9 = vmul.f32 %v11437_v41, %v2879_v54  ;;  %v19075_v41 = vld [vmem:[#allocation42_spill] sm:$0xff] }
 0x2d4   :  { %19057 = vst [vmem:[#allocation149_spill] sm:$0xff] %v11699_v36  ;;  %v19066_v36 = vld [vmem:[#allocation196_spill] sm:$0xff]  ;;  %v11744_v19 = vadd.f32 %v3657_v21, %v19069_v27  ;;  %v11751_v23 = vsel %vm11716_vm8, 1.0, %v19003_v55  ;;  %v3132_v21 = vmul.f32 %v9414_v13, %v2993_v17  ;;  %v19074_v27 = vld [vmem:[#allocation39_spill] sm:$0xff] }
 0x2d5   :  { %19063 = vst [vmem:[#allocation146_spill] sm:$0xff] %v11720_v62  ;;  %19065 = vst [vmem:[#allocation192_spill] sm:$0xff] %v11726_v4  ;;  %v3018_v34 = vsub.f32 %v19066_v36, %v18941_v31  ;;  %v1311_v38 = vpop.f32.mrb[54].mxu1  ;;  %v19073_v62 = vld [vmem:[#allocation197_spill] sm:$0xff]  ;;  %v1958_v28 = vpop.f32.mrb[120].mxu0  ;;  %v19078_v33 = vld [vmem:[#allocation183_spill] sm:$0xff]  ;;  %v3130_v37 = vmul.f32 %v9414_v13, %v2991_v10 }
 0x2d6   :  { %19070 = vst [vmem:[#allocation220_spill] sm:$0xff] %v11744_v19  ;;  %19071 = vst [vmem:[#allocation34_spill] sm:$0xff] %v11751_v23  ;;  %v11753_v36 = vadd.f32 %v1952_v59, %v1311_v38  ;;  %v1313_v4 = vpop.f32.mrb[55].mxu1  ;;  %v3020_v32 = vsub.f32 %v19073_v62, %v18941_v31  ;;  %3999 = vrot.lane.b32.xlu0 %v19074_v27, %s8557_s20  ;;  %3871 = vrot.lane.b32.xlu1 %v19075_v41, %s8557_s20  ;;  %v8069_v59 = vunpack.i.h.bf16 %v11580_v26  ;;  %v1960_v17 = vpop.f32.mrb[121].mxu0  ;;  %v19087_v10 = vld [vmem:[#allocation203_spill] sm:$0xff] }
 0x2d7   :  { %v11763_v54 = vadd.f32 %v1954_v7, %v1313_v4  ;;  %v11769_v38 = vsel %vm11739_vm9, 1.0, %v19003_v55  ;;  %vm2074_vm10 = vcmp.ge.f32.partialorder %v19078_v33, %v18984_v24  ;;  %vm2215_vm11 = vcmp.lt.f32.partialorder %v19078_v33, %v18986_v48  ;;  %v19079_v4 = vld [vmem:[#allocation176_spill] sm:$0xff] }
 0x2d8   :  { %19072 = vst [vmem:[#allocation37_spill] sm:$0xff] %v11753_v36  ;;  %19077 = vst [vmem:[#allocation153_spill] sm:$0xff] %v11769_v38  ;;  %v3157_v62 = vmul.f32 %v18950_v50, %v3018_v34  ;;  %v8150_v7 = vpack.i.bf16 %v11751_v23, %v11769_v38  ;;  %vm2072_vm12 = vcmp.ge.f32.partialorder %v19079_v4, %v18984_v24  ;;  %v19081_v34 = vld [vmem:[#allocation150_spill] sm:$0xff]  ;;  %v19082_v23 = vld [vmem:[#allocation201_spill] sm:$0xff] }
 0x2d9   :  { %19076 = vst [vmem:[#allocation194_spill] sm:$0xff] %v11763_v54  ;;  %vm2213_vm13 = vcmp.lt.f32.partialorder %v19079_v4, %v18986_v48  ;;  %v1317_v26 = vpop.f32.mrb[56].mxu1  ;;  %v2816_v49 = vsel %vm2784_vm7, %v8069_v59, %v8073_v35  ;;  %v2880_v54 = vsel %vm2784_vm7, %v8073_v35, %v8069_v59  ;;  %v11789_v19 = vadd.f32 %v3658_v9, %v19081_v34  ;;  %vm2343_vm14 = vmand %vm2074_vm10, %vm2215_vm11  ;;  %v19085_v35 = vld [vmem:[#allocation195_spill] sm:$0xff]  ;;  %v19089_v34 = vld [vmem:[#allocation198_spill] sm:$0xff] }
 0x2da   :  { %v11786_v36 = vadd.f32 %v1958_v28, %v1317_v26  ;;  %v1319_v51 = vpop.f32.mrb[57].mxu1  ;;  %v3022_v8 = vsub.f32 %v19082_v23, %v18941_v31  ;;  %3873 = vrot.lane.b32.xlu0 %v19083_v44, %s8557_s20  ;;  %8151 = vrot.lane.b32.xlu1 %v8150_v7, %s8557_s20  ;;  %v11807_v28 = vmul.f32 %v3153_v63, %v19085_v35  ;;  %v19091_v23 = vld [vmem:[#allocation207_spill] sm:$0xff]  ;;  %vm11829_vm15 = vmand %vm2072_vm12, %vm2213_vm13 }
 0x2db   :  { %v11804_v9 = vadd.f32 %v1960_v17, %v1319_v51  ;;  %v3159_v59 = vmul.f32 %v18950_v50, %v3020_v32  ;;  %v3024_v26 = vsub.f32 %v19087_v10, %v18941_v31  ;;  %v11814_v7 = vmul.f32 %v11136_v11, %v19018_v40  ;;  %v1964_v40 = vpop.f32.mrb[122].mxu0  ;;  %v19109_v32 = vld [vmem:[#allocation213_spill] sm:$0xff] }
 0x2dc   :  { %19080 = vst [vmem:[#allocation39_spill] sm:$0xff] %v11786_v36  ;;  %19086 = vst [vmem:[#allocation150_spill] sm:$0xff] %v11807_v28  ;;  %v11817_v38 = vmul.f32 %v3155_v12, %v19089_v34  ;;  %v3026_v36 = vsub.f32 %v19091_v23, %v18941_v31  ;;  %v3659_v51 = vmul.f32 %v11508_v58, %v2816_v49  ;;  %v19094_v12 = vld [vmem:[#allocation199_spill] sm:$0xff]  ;;  %v11840_v58 = vsel %vm2343_vm14, 1.0, %v19003_v55  ;;  %v1966_v10 = vpop.f32.mrb[123].mxu0 }
 0x2dd   :  { %19084 = vst [vmem:[#allocation42_spill] sm:$0xff] %v11804_v9  ;;  %19088 = vst [vmem:[#allocation46_spill] sm:$0xff] %v11814_v7  ;;  %v3660_v63 = vmul.f32 %v11514_v18, %v2880_v54  ;;  %v1323_v11 = vpop.f32.mrb[58].mxu1  ;;  %v11834_v17 = vmul.f32 %v3157_v62, %v19094_v12  ;;  %v11837_v35 = vmul.f32 %v3132_v21, %v11533_v43  ;;  %v19099_v62 = vld [vmem:[#allocation49_spill] sm:$0xff]  ;;  %v19100_v43 = vld [vmem:[#allocation54_spill] sm:$0xff] }
 0x2de   :  { %19090 = vst [vmem:[#allocation195_spill] sm:$0xff] %v11817_v38  ;;  %v11842_v18 = vadd.f32 %v1964_v40, %v1323_v11  ;;  %v3161_v49 = vmul.f32 %v18950_v50, %v3022_v8  ;;  %v11847_v34 = vmul.f32 %v3130_v37, %v11554_v1  ;;  %v2997_v23 = vsub.f32 %v19011_v53, %v9389_v47  ;;  %v19101_v21 = vld [vmem:[#allocation204_spill] sm:$0xff]  ;;  %v1325_v54 = vpop.f32.mrb[59].mxu1  ;;  %v19119_v53 = vld [vmem:[#allocation45_spill] sm:$0xff]  ;;  %v19126_v7 = vld [vmem:[#allocation187_spill] sm:$0xff] }
 0x2df   :  { %19095 = vst [vmem:[#allocation198_spill] sm:$0xff] %v11834_v17  ;;  %19096 = vst [vmem:[#allocation199_spill] sm:$0xff] %v11837_v35  ;;  %3875 = vrot.lane.b32.xlu0 %v19099_v62, %s8557_s20  ;;  %4001 = vrot.lane.b32.xlu1 %v19100_v43, %s8557_s20  ;;  %v11856_v12 = vmul.f32 %v3159_v59, %v19101_v21  ;;  %v3163_v11 = vmul.f32 %v18950_v50, %v3024_v26  ;;  %v11864_v1 = vsel %vm11829_vm15, 1.0, %v19003_v55  ;;  %v19104_v17 = vld [vmem:[#allocation154_spill] sm:$0xff]  ;;  %v19106_v21 = vld [vmem:[#allocation156_spill] sm:$0xff] }
 0x2e0   :  { %19097 = vst [vmem:[#allocation258_spill] sm:$0xff] %v11842_v18  ;;  %19098 = vst [vmem:[#allocation259_spill] sm:$0xff] %v11847_v34  ;;  %v2995_v8 = vsub.f32 %v19012_v42, %v9389_v47  ;;  %v3165_v37 = vmul.f32 %v18950_v50, %v3026_v36  ;;  %v8155_v40 = vpack.i.bf16 %v11840_v58, %v11864_v1  ;;  %v19110_v35 = vld [vmem:[#allocation230_spill] sm:$0xff]  ;;  %v19113_v42 = vld [vmem:[#allocation205_spill] sm:$0xff] }
 0x2e1   :  { %19102 = vst [vmem:[#allocation49_spill] sm:$0xff] %v11856_v12  ;;  %19103 = vst [vmem:[#allocation54_spill] sm:$0xff] %v11864_v1  ;;  %v11870_v59 = vadd.f32 %v3659_v51, %v19104_v17  ;;  %v11873_v26 = vadd.f32 %v3660_v63, %v19106_v21  ;;  %v19108_v12 = vld [vmem:[#allocation209_spill] sm:$0xff]  ;;  %v3030_v28 = vsub.f32 %v19109_v32, %v18941_v31  ;;  %v19116_v32 = vld [vmem:[#allocation58_spill] sm:$0xff] }
 0x2e2   :  { %v3028_v38 = vsub.f32 %v19108_v12, %v18941_v31  ;;  %v11881_v36 = vmul.f32 %v19110_v35, %v19033_v6  ;;  %v11883_v34 = vadd.f32 %v1966_v10, %v1325_v54  ;;  %v11887_v51 = vmul.f32 %v3161_v49, %v19113_v42  ;;  %v19115_v63 = vld [vmem:[#allocation109_spill] sm:$0xff]  ;;  %v19117_v6 = vld [vmem:[#allocation216_spill] sm:$0xff]  ;;  %v19120_v42 = vld [vmem:[#allocation211_spill] sm:$0xff] }
 0x2e3   :  { %19105 = vst [vmem:[#allocation204_spill] sm:$0xff] %v11870_v59  ;;  %19107 = vst [vmem:[#allocation154_spill] sm:$0xff] %v11873_v26  ;;  %v3032_v17 = vsub.f32 %v19115_v63, %v18941_v31  ;;  %v3136_v21 = vmul.f32 %v9414_v13, %v2997_v23  ;;  %8156 = vrot.lane.b32.xlu0 %v8155_v40, %s8557_s20  ;;  %4003 = vrot.lane.b32.xlu1 %v19116_v32, %s8557_s20  ;;  %v19118_v10 = vld [vmem:[#allocation121_spill] sm:$0xff]  ;;  %v19122_v23 = vld [vmem:[#allocation210_spill] sm:$0xff]  ;;  %v1970_v12 = vpop.f32.mrb[124].mxu0 }
 0x2e4   :  { %19111 = vst [vmem:[#allocation156_spill] sm:$0xff] %v11881_v36  ;;  %19112 = vst [vmem:[#allocation230_spill] sm:$0xff] %v11883_v34  ;;  %v3034_v35 = vsub.f32 %v19117_v6, %v18941_v31  ;;  %v3036_v54 = vsub.f32 %v19118_v10, %v18941_v31  ;;  %vm2078_vm1 = vcmp.ge.f32.partialorder %v19119_v53, %v18984_v24  ;;  %v19163_v18 = vld [vmem:[#allocation63_spill] sm:$0xff] }
 0x2e5   :  { %19114 = vst [vmem:[#allocation205_spill] sm:$0xff] %v11887_v51  ;;  %vm2219_vm2 = vcmp.lt.f32.partialorder %v19119_v53, %v18986_v48  ;;  %v11904_v49 = vmul.f32 %v3165_v37, %v19120_v42  ;;  %v11907_v40 = vmul.f32 %v3163_v11, %v19122_v23  ;;  %v19124_v51 = vld [vmem:[#allocation231_spill] sm:$0xff]  ;;  %v3134_v6 = vmul.f32 %v9414_v13, %v2995_v8  ;;  %v1972_v37 = vpop.f32.mrb[125].mxu0  ;;  %v19129_v8 = vld [vmem:[#allocation66_spill] sm:$0xff] }
 0x2e6   :  { %v11911_v63 = vmul.f32 %v19124_v51, %v19034_v57  ;;  %v3167_v10 = vmul.f32 %v18950_v50, %v3028_v38  ;;  %v3169_v36 = vmul.f32 %v18950_v50, %v3030_v28  ;;  %vm2076_vm3 = vcmp.ge.f32.partialorder %v19126_v7, %v18984_v24  ;;  %v19127_v11 = vld [vmem:[#allocation223_spill] sm:$0xff]  ;;  %v19128_v57 = vld [vmem:[#allocation62_spill] sm:$0xff]  ;;  %vm11932_vm5 = vmand %vm2078_vm1, %vm2219_vm2  ;;  %v1329_v51 = vpop.f32.mrb[60].mxu1 }
 0x2e7   :  { %19121 = vst [vmem:[#allocation211_spill] sm:$0xff] %v11904_v49  ;;  %19123 = vst [vmem:[#allocation210_spill] sm:$0xff] %v11907_v40  ;;  %vm2217_vm4 = vcmp.lt.f32.partialorder %v19126_v7, %v18986_v48  ;;  %v3171_v23 = vmul.f32 %v18950_v50, %v3032_v17  ;;  %4005 = vrot.lane.b32.xlu0 %v19128_v57, %s8557_s20  ;;  %3877 = vrot.lane.b32.xlu1 %v19129_v8, %s8557_s20  ;;  %v19132_v28 = vld [vmem:[#allocation56_spill] sm:$0xff] }
 0x2e8   :  { %19125 = vst [vmem:[#allocation231_spill] sm:$0xff] %v11911_v63  ;;  %vm2082_vm6 = vcmp.ge.f32.partialorder %v19132_v28, %v18984_v24  ;;  %vm2223_vm8 = vcmp.lt.f32.partialorder %v19132_v28, %v18986_v48  ;;  %v3173_v17 = vmul.f32 %v18950_v50, %v3034_v35  ;;  %v3175_v42 = vmul.f32 %v18950_v50, %v3036_v54  ;;  %v1331_v63 = vpop.f32.mrb[61].mxu1  ;;  %vm11956_vm9 = vmand %vm2076_vm3, %vm2217_vm4  ;;  %v19138_v35 = vld [vmem:[#allocation51_spill] sm:$0xff] }
 0x2e9   :  { %v11943_v49 = vmul.f32 %v3136_v21, %v11624_v16  ;;  %v11945_v40 = vadd.f32 %v1970_v12, %v1329_v51  ;;  %v11948_v34 = vmul.f32 %v3134_v6, %v11646_v39  ;;  %vm2080_vm10 = vcmp.ge.f32.partialorder %v19138_v35, %v18984_v24  ;;  %v19140_v39 = vld [vmem:[#allocation214_spill] sm:$0xff]  ;;  %v19142_v21 = vld [vmem:[#allocation232_spill] sm:$0xff]  ;;  %vm2351_vm12 = vmand %vm2082_vm6, %vm2223_vm8 }
 0x2ea   :  { %vm2221_vm11 = vcmp.lt.f32.partialorder %v19138_v35, %v18986_v48  ;;  %v11964_v16 = vadd.f32 %v1972_v37, %v1331_v63  ;;  %v11967_v12 = vmul.f32 %v3167_v10, %v19140_v39  ;;  %v11971_v6 = vmul.f32 %v19142_v21, %v19045_v52  ;;  %v19145_v10 = vld [vmem:[#allocation215_spill] sm:$0xff]  ;;  %v19147_v37 = vld [vmem:[#allocation218_spill] sm:$0xff]  ;;  %v19149_v21 = vld [vmem:[#allocation233_spill] sm:$0xff] }
 0x2eb   :  { %19133 = vst [vmem:[#allocation223_spill] sm:$0xff] %v11943_v49  ;;  %19134 = vst [vmem:[#allocation260_spill] sm:$0xff] %v11945_v40  ;;  %v2999_v54 = vsub.f32 %v19056_v60, %v9389_v47  ;;  %v11978_v51 = vsel %vm11932_vm5, 1.0, %v19003_v55  ;;  %v11988_v52 = vmul.f32 %v3169_v36, %v19145_v10  ;;  %v11991_v39 = vmul.f32 %v3171_v23, %v19147_v37  ;;  %v19152_v49 = vld [vmem:[#allocation75_spill] sm:$0xff]  ;;  %v19157_v36 = vld [vmem:[#allocation234_spill] sm:$0xff] }
 0x2ec   :  { %19135 = vst [vmem:[#allocation261_spill] sm:$0xff] %v11948_v34  ;;  %19139 = vst [vmem:[#allocation262_spill] sm:$0xff] %v11964_v16  ;;  %v11995_v38 = vmul.f32 %v19149_v21, %v19059_v5  ;;  %3879 = vrot.lane.b32.xlu1 %v19152_v49, %s8557_s20  ;;  %v19153_v34 = vld [vmem:[#allocation217_spill] sm:$0xff]  ;;  %v19155_v63 = vld [vmem:[#allocation219_spill] sm:$0xff]  ;;  %v12009_v23 = vmul.f32 %v19157_v36, %v19060_v22  ;;  %v12014_v5 = vsel %vm11956_vm9, 1.0, %v19003_v55  ;;  %v19173_v16 = vunpack.i.h.bf16 %v19058_v3 }
 0x2ed   :  { %19141 = vst [vmem:[#allocation214_spill] sm:$0xff] %v11967_v12  ;;  %19143 = vst [vmem:[#allocation232_spill] sm:$0xff] %v11971_v6  ;;  %v19151_v12 = vld [vmem:[#allocation69_spill] sm:$0xff]  ;;  %v12002_v6 = vmul.f32 %v3173_v17, %v19153_v34  ;;  %v12005_v60 = vmul.f32 %v3175_v42, %v19155_v63  ;;  %v19160_v34 = vld [vmem:[#allocation235_spill] sm:$0xff]  ;;  %v8160_v22 = vpack.i.bf16 %v11978_v51, %v12014_v5  ;;  %v12029_v17 = vsel %vm2351_vm12, 1.0, %v19003_v55 }
 0x2ee   :  { %19144 = vst [vmem:[#allocation263_spill] sm:$0xff] %v11978_v51  ;;  %19146 = vst [vmem:[#allocation215_spill] sm:$0xff] %v11988_v52  ;;  %4007 = vrot.lane.b32.xlu0 %v19151_v12, %s8557_s20  ;;  %v12024_v42 = vmul.f32 %v19160_v34, %v19074_v27  ;;  %v2952_v63 = vsub.f32 %v19163_v18, %v18941_v31  ;;  %v19164_v10 = vld [vmem:[#allocation236_spill] sm:$0xff]  ;;  %v12040_v36 = vmul.f32 %v9414_v13, %v2999_v54  ;;  %v1335_v34 = vpop.f32.mrb[62].mxu1 }
 0x2ef   :  { %19148 = vst [vmem:[#allocation218_spill] sm:$0xff] %v11991_v39  ;;  %19150 = vst [vmem:[#allocation233_spill] sm:$0xff] %v11995_v38  ;;  %v12035_v37 = vmul.f32 %v19164_v10, %v19075_v41  ;;  %v19166_v39 = vld [vmem:[#allocation77_spill] sm:$0xff]  ;;  %v19168_v10 = vld [vmem:[#allocation67_spill] sm:$0xff]  ;;  %v3358_v52 = vsub.f32 %v10476_v46, %v19163_v18  ;;  %v19174_v40 = vunpack.i.l.bf16 %v11045_v0 }
 0x2f0   :  { %19154 = vst [vmem:[#allocation217_spill] sm:$0xff] %v12002_v6  ;;  %19156 = vst [vmem:[#allocation219_spill] sm:$0xff] %v12005_v60  ;;  %v1976_v60 = vpop.f32.mrb[126].mxu0  ;;  %8161 = vrot.lane.b32.xlu1 %v8160_v22, %s8557_s20  ;;  %v2954_v54 = vsub.f32 %v19168_v10, %v18941_v31  ;;  %v19170_v6 = vld [vmem:[#allocation64_spill] sm:$0xff]  ;;  %v3091_v38 = vmul.f32 %v18950_v50, %v2952_v63  ;;  %v19176_v18 = vld [vmem:[#allocation227_spill] sm:$0xff] }
 0x2f1   :  { %19158 = vst [vmem:[#allocation234_spill] sm:$0xff] %v12009_v23  ;;  %19159 = vst [vmem:[#allocation264_spill] sm:$0xff] %v12014_v5  ;;  %v12054_v21 = vadd.f32 %v1976_v60, %v1335_v34  ;;  %v19172_v23 = vld [vmem:[#allocation65_spill] sm:$0xff]  ;;  %v3360_v60 = vsub.f32 %v10476_v46, %v19168_v10  ;;  %v1337_v34 = vpop.f32.mrb[63].mxu1  ;;  %v2799_v26 = vsel %vm2784_vm7, %v19174_v40, %v19173_v16  ;;  %v19177_v10 = vld [vmem:[#allocation82_spill] sm:$0xff] }
 0x2f2   :  { %vm2349_vm13 = vmand %vm2080_vm10, %vm2221_vm11  ;;  %19161 = vst [vmem:[#allocation235_spill] sm:$0xff] %v12024_v42  ;;  %3881 = vrot.lane.b32.xlu0 %v19166_v39, %s8557_s20  ;;  %v2953_v42 = vsub.f32 %v19170_v6, %v9389_v47  ;;  %vm2086_vm14 = vcmp.ge.f32.partialorder %v19172_v23, %v18984_v24  ;;  %vm2227_vm15 = vcmp.lt.f32.partialorder %v19172_v23, %v18986_v48  ;;  %v19179_v5 = vld [vmem:[#allocation61_spill] sm:$0xff]  ;;  %v19184_v23 = vunpack.i.h.bf16 %v19058_v3  ;;  %v19188_v3 = vld [vmem:[#allocation91_spill] sm:$0xff] }
 0x2f3   :  { %19162 = vst [vmem:[#allocation265_spill] sm:$0xff] %v12029_v17  ;;  %19165 = vst [vmem:[#allocation236_spill] sm:$0xff] %v12035_v37  ;;  %v12050_v41 = vsel %vm2349_vm13, 1.0, %v19003_v55  ;;  %v19171_v37 = vld [vmem:[#allocation70_spill] sm:$0xff]  ;;  %v3359_v63 = vsub.f32 %v10457_v29, %v19170_v6  ;;  %vm2084_vm1 = vcmp.ge.f32.partialorder %v19179_v5, %v18984_v24  ;;  %vm2225_vm2 = vcmp.lt.f32.partialorder %v19179_v5, %v18986_v48  ;;  %v19227_v35 = vld [vmem:[#allocation228_spill] sm:$0xff] }
 0x2f4   :  { %19167 = vst [vmem:[#allocation266_spill] sm:$0xff] %v12050_v41  ;;  %19169 = vst [vmem:[#allocation267_spill] sm:$0xff] %v12054_v21  ;;  %v8165_v27 = vpack.i.bf16 %v12029_v17, %v12050_v41  ;;  %v2955_v22 = vsub.f32 %v19171_v37, %v9389_v47  ;;  %v1978_v21 = vpop.f32.mrb[127].mxu0  ;;  %v3361_v59 = vsub.f32 %v10457_v29, %v19171_v37  ;;  %v19178_v17 = vld [vmem:[#allocation87_spill] sm:$0xff]  ;;  %v19182_v37 = vld [vmem:[#allocation72_spill] sm:$0xff] }
 0x2f5   :  { %v12081_v9 = vadd.f32 %v1978_v21, %v1337_v34  ;;  %4009 = vrot.lane.b32.xlu1 %v19178_v17, %s8557_s20  ;;  %v3093_v40 = vmul.f32 %v18950_v50, %v2954_v54  ;;  %v3497_v16 = vmul.f32 %v10521_v2, %v3358_v52  ;;  %vm2355_vm3 = vmand %vm2086_vm14, %vm2227_vm15  ;;  %v19180_v21 = vunpack.i.l.bf16 %v11037_v45 }
 0x2f6   :  { %3883 = vrot.lane.b32.xlu0 %v19177_v10, %s8557_s20  ;;  %v19181_v34 = vunpack.i.h.bf16 %v11045_v0  ;;  %v3094_v54 = vmul.f32 %v9414_v13, %v2955_v22  ;;  %v3219_v52 = vmul.f32 %v3091_v38, %v19182_v37  ;;  %v3499_v6 = vmul.f32 %v10521_v2, %v3360_v60  ;;  %v19187_v37 = vld [vmem:[#allocation76_spill] sm:$0xff]  ;;  %vm2353_vm4 = vmand %vm2084_vm1, %vm2225_vm2 }
 0x2f7   :  { %19175 = vst [vmem:[#allocation268_spill] sm:$0xff] %v12081_v9  ;;  %v3092_v9 = vmul.f32 %v9414_v13, %v2953_v42  ;;  %v19183_v17 = vunpack.i.l.bf16 %v11045_v0  ;;  %v19186_v39 = vmov %v19180_v21  ;;  %v3498_v22 = vmul.f32 %v10514_v25, %v3359_v63 }
 0x2f8   :  { %v2800_v41 = vsel %vm2784_vm7, %v19181_v34, %v19180_v21  ;;  %v19185_v51 = vmov %v19181_v34  ;;  %v3625_v21 = vmul.f32 %v3497_v16, %v2799_v26  ;;  %v3500_v38 = vmul.f32 %v10514_v25, %v3361_v59  ;;  %v19191_v59 = vld [vmem:[#allocation68_spill] sm:$0xff] }
 0x2f9   :  { %v2863_v10 = vsel %vm2784_vm7, %v19184_v23, %v19183_v17  ;;  %v2864_v42 = vsel %vm2784_vm7, %v19186_v39, %v19185_v51  ;;  %v2957_v60 = vsub.f32 %v19187_v37, %v9389_v47  ;;  %4011 = vrot.lane.b32.xlu1 %v19188_v3, %s8557_s20  ;;  %v12130_v0 = vsel %vm2355_vm3, 1.0, %v19003_v55  ;;  %v19190_v23 = vld [vmem:[#allocation73_spill] sm:$0xff]  ;;  %v19193_v3 = vld [vmem:[#allocation71_spill] sm:$0xff] }
 0x2fa   :  { %8166 = vrot.lane.b32.xlu0 %v8165_v27, %s8557_s20  ;;  %19189 = vst [vmem:[#allocation227_spill] sm:$0xff] %v12130_v0  ;;  %v3221_v17 = vmul.f32 %v3093_v40, %v19190_v23  ;;  %v3627_v34 = vmul.f32 %v3499_v6, %v2800_v41  ;;  %v3363_v26 = vsub.f32 %v10457_v29, %v19187_v37  ;;  %v19192_v27 = vld [vmem:[#allocation79_spill] sm:$0xff]  ;;  %v19194_v6 = vunpack.i.l.bf16 %v11039_v20  ;;  %v19196_v23 = vld [vmem:[#allocation74_spill] sm:$0xff] }
 0x2fb   :  { %v3220_v51 = vmul.f32 %v3092_v9, %v19191_v59  ;;  %v3626_v39 = vmul.f32 %v3498_v22, %v2863_v10  ;;  %v3222_v63 = vmul.f32 %v3094_v54, %v19192_v27  ;;  %v3628_v16 = vmul.f32 %v3500_v38, %v2864_v42  ;;  %v19197_v10 = vld [vmem:[#allocation200_spill] sm:$0xff]  ;;  %v19198_v22 = vld [vmem:[#allocation95_spill] sm:$0xff]  ;;  %v19199_v38 = vld [vmem:[#allocation98_spill] sm:$0xff] }
 0x2fc   :  { %vm2088_vm5 = vcmp.ge.f32.partialorder %v19193_v3, %v18984_v24  ;;  %vm2229_vm6 = vcmp.lt.f32.partialorder %v19193_v3, %v18986_v48  ;;  %v19195_v41 = vunpack.i.h.bf16 %v11037_v45  ;;  %v2956_v9 = vsub.f32 %v19196_v23, %v18941_v31  ;;  %v19214_v3 = vld [vmem:[#allocation225_spill] sm:$0xff] }
 0x2fd   :  { %vm2090_vm8 = vcmp.ge.f32.partialorder %v19197_v10, %v18984_v24  ;;  %vm2231_vm9 = vcmp.lt.f32.partialorder %v19197_v10, %v18986_v48  ;;  %v3096_v54 = vmul.f32 %v9414_v13, %v2957_v60  ;;  %v3362_v42 = vsub.f32 %v10476_v46, %v19196_v23  ;;  %3885 = vrot.lane.b32.xlu1 %v19199_v38, %s8557_s20  ;;  %vm2357_vm10 = vmand %vm2088_vm5, %vm2229_vm6 }
 0x2fe   :  { %v2865_v40 = vsel %vm2784_vm7, %v19195_v41, %v19194_v6  ;;  %4013 = vrot.lane.b32.xlu0 %v19198_v22, %s8557_s20  ;;  %v12167_v59 = vsel %vm2353_vm4, 1.0, %v19003_v55  ;;  %v3502_v27 = vmul.f32 %v10514_v25, %v3363_v26  ;;  %v19201_v6 = vld [vmem:[#allocation81_spill] sm:$0xff]  ;;  %v12174_v37 = vadd.f32 %v3625_v21, %v3219_v52  ;;  %vm2359_vm11 = vmand %vm2090_vm8, %vm2231_vm9 }
 0x2ff   :  { %19200 = vst [vmem:[#allocation72_spill] sm:$0xff] %v12167_v59  ;;  %v2959_v41 = vsub.f32 %v19201_v6, %v9389_v47  ;;  %v3365_v60 = vsub.f32 %v10457_v29, %v19201_v6  ;;  %v8170_v23 = vpack.i.bf16 %v12130_v0, %v12167_v59  ;;  %v12178_v22 = vadd.f32 %v3627_v34, %v3221_v17  ;;  %v19215_v59 = vld [vmem:[#allocation107_spill] sm:$0xff] }
 0x300   :  { %19202 = vst [vmem:[#allocation73_spill] sm:$0xff] %v12174_v37  ;;  %v12180_v5 = vadd.f32 %v3626_v39, %v3220_v51  ;;  %v12191_v52 = vadd.f32 %v3628_v16, %v3222_v63  ;;  %v3630_v21 = vmul.f32 %v3502_v27, %v2865_v40  ;;  %v19206_v26 = vunpack.i.h.bf16 %v11037_v45  ;;  %v19210_v16 = vld [vmem:[#allocation103_spill] sm:$0xff]  ;;  %v19211_v40 = vld [vmem:[#allocation224_spill] sm:$0xff]  ;;  %v19213_v45 = vld [vmem:[#allocation226_spill] sm:$0xff] }
 0x301   :  { %19203 = vst [vmem:[#allocation68_spill] sm:$0xff] %v12178_v22  ;;  %v19207_v17 = vunpack.i.l.bf16 %v11039_v20  ;;  %v3095_v51 = vmul.f32 %v18950_v50, %v2956_v9  ;;  %v3501_v39 = vmul.f32 %v10521_v2, %v3362_v42  ;;  %v19208_v6 = vunpack.i.h.bf16 %v11039_v20  ;;  %v19217_v9 = vld [vmem:[#allocation113_spill] sm:$0xff] }
 0x302   :  { %19204 = vst [vmem:[#allocation79_spill] sm:$0xff] %v12180_v5  ;;  %19205 = vst [vmem:[#allocation269_spill] sm:$0xff] %v12191_v52  ;;  %v19209_v0 = vunpack.i.l.bf16 %v19127_v11  ;;  %v19212_v27 = vsub.f32 %v19210_v16, %v19211_v40  ;;  %v4300_v38 = vsub.f32 %v19215_v59, %v19214_v3  ;;  %3887 = vrot.lane.b32.xlu1 %v19217_v9, %s8557_s20  ;;  %v12218_v42 = vsel %vm2357_vm10, 1.0, %v19003_v55  ;;  %v19221_v59 = vld [vmem:[#allocation78_spill] sm:$0xff] }
 0x303   :  { %v2801_v34 = vsel %vm2784_vm7, %v19207_v17, %v19206_v26  ;;  %v19216_v26 = vld [vmem:[#allocation102_spill] sm:$0xff]  ;;  %19218 = vst [vmem:[#allocation270_spill] sm:$0xff] %v12218_v42  ;;  %v19219_v17 = vld [vmem:[#allocation80_spill] sm:$0xff]  ;;  %v2958_v12 = vsub.f32 %v19221_v59, %v18941_v31 }
 0x304   :  { %v2866_v63 = vsel %vm2784_vm7, %v19209_v0, %v19208_v6  ;;  %v4438_v10 = vmul.f32 %v19213_v45, %v19212_v27  ;;  %4015 = vrot.lane.b32.xlu0 %v19216_v26, %s8557_s20  ;;  %v3224_v49 = vmul.f32 %v3096_v54, %v19219_v17  ;;  %v3098_v0 = vmul.f32 %v9414_v13, %v2959_v41  ;;  %v19222_v26 = vld [vmem:[#allocation111_spill] sm:$0xff]  ;;  %v19225_v41 = vld [vmem:[#allocation85_spill] sm:$0xff] }
 0x305   :  { %v3504_v6 = vmul.f32 %v10514_v25, %v3365_v60  ;;  %v12224_v27 = vsel %vm2359_vm11, 1.0, %v19003_v55  ;;  %v3629_v16 = vmul.f32 %v3501_v39, %v2801_v34  ;;  %v3364_v54 = vsub.f32 %v10476_v46, %v19221_v59  ;;  %v19226_v60 = vld [vmem:[#allocation83_spill] sm:$0xff]  ;;  %v19228_v34 = vld [vmem:[#allocation108_spill] sm:$0xff] }
 0x306   :  { %19220 = vst [vmem:[#allocation80_spill] sm:$0xff] %v12224_v27  ;;  %v12229_v8 = vmul.f32 %v4438_v10, %v19222_v26  ;;  %v12231_v9 = vadd.f32 %v3630_v21, %v3224_v49  ;;  %v2960_v17 = vsub.f32 %v19225_v41, %v18941_v31  ;;  %v3223_v32 = vmul.f32 %v3095_v51, %v19226_v60  ;;  %v19230_v10 = vld [vmem:[#allocation112_spill] sm:$0xff]  ;;  %v19231_v21 = vld [vmem:[#allocation221_spill] sm:$0xff] }
 0x307   :  { %v3632_v57 = vmul.f32 %v3504_v6, %v2866_v63  ;;  %v4439_v1 = vmul.f32 %v19227_v35, %v4300_v38  ;;  %v19229_v39 = vsub.f32 %v19228_v34, %v19211_v40  ;;  %v4302_v49 = vsub.f32 %v19230_v10, %v19214_v3  ;;  %8171 = vrot.lane.b32.xlu1 %v8170_v23, %s8557_s20  ;;  %v19232_v6 = vld [vmem:[#allocation89_spill] sm:$0xff]  ;;  %v19236_v34 = vld [vmem:[#allocation115_spill] sm:$0xff]  ;;  %v19238_v23 = vld [vmem:[#allocation116_spill] sm:$0xff] }
 0x308   :  { %19223 = vst [vmem:[#allocation111_spill] sm:$0xff] %v12229_v8  ;;  %19224 = vst [vmem:[#allocation271_spill] sm:$0xff] %v12231_v9  ;;  %3889 = vrot.lane.b32.xlu0 %v12174_v37, %s8557_s20  ;;  %v8175_v51 = vpack.i.bf16 %v12224_v27, %v12218_v42  ;;  %v3226_v38 = vmul.f32 %v3098_v0, %v19232_v6  ;;  %v19233_v60 = vunpack.i.l.bf16 %v19127_v11  ;;  %v19234_v8 = vunpack.i.h.bf16 %v11039_v20 }
 0x309   :  { %v4440_v28 = vmul.f32 %v19213_v45, %v19229_v39  ;;  %v12258_v10 = vadd.f32 %v3629_v16, %v3223_v32  ;;  %v3097_v63 = vmul.f32 %v18950_v50, %v2958_v12  ;;  %v12262_v59 = vmul.f32 %v4439_v1, %v19236_v34  ;;  %v19241_v32 = vld [vmem:[#allocation88_spill] sm:$0xff]  ;;  %v19242_v16 = vld [vmem:[#allocation114_spill] sm:$0xff] }
 0x30a   :  { %v2802_v39 = vsel %vm2784_vm7, %v19234_v8, %v19233_v60  ;;  %v12267_v27 = vadd.f32 %v3632_v57, %v3226_v38  ;;  %v3503_v0 = vmul.f32 %v10521_v2, %v3364_v54  ;;  %v3099_v6 = vmul.f32 %v18950_v50, %v2960_v17  ;;  %v19244_v57 = vld [vmem:[#allocation118_spill] sm:$0xff]  ;;  %v19246_v60 = vld [vmem:[#allocation84_spill] sm:$0xff] }
 0x30b   :  { %19235 = vst [vmem:[#allocation83_spill] sm:$0xff] %v12258_v10  ;;  %19237 = vst [vmem:[#allocation221_spill] sm:$0xff] %v12262_v59  ;;  %v12265_v37 = vmul.f32 %v4440_v28, %v19238_v23  ;;  %v3366_v20 = vsub.f32 %v10476_v46, %v19225_v41  ;;  %v2962_v8 = vsub.f32 %v19241_v32, %v18941_v31  ;;  %v8009_v54 = vunpack.i.h.bf16 %v19176_v18  ;;  %v19245_v17 = vld [vmem:[#allocation206_spill] sm:$0xff] }
 0x30c   :  { %19240 = vst [vmem:[#allocation115_spill] sm:$0xff] %v12267_v27  ;;  %v4441_v12 = vmul.f32 %v19227_v35, %v4302_v49  ;;  %v19243_v1 = vsub.f32 %v19242_v16, %v19211_v40  ;;  %v4304_v38 = vsub.f32 %v19244_v57, %v19214_v3  ;;  %3891 = vrot.lane.b32.xlu0 %v12178_v22, %s8557_s20  ;;  %v19248_v59 = vunpack.i.l.bf16 %v19176_v18  ;;  %v19249_v16 = vld [vmem:[#allocation120_spill] sm:$0xff] }
 0x30d   :  { %19239 = vst [vmem:[#allocation89_spill] sm:$0xff] %v12265_v37  ;;  %4017 = vrot.lane.b32.xlu1 %v12180_v5, %s8557_s20  ;;  %vm2094_vm12 = vcmp.ge.f32.partialorder %v19245_v17, %v18984_v24  ;;  %vm2235_vm13 = vcmp.lt.f32.partialorder %v19245_v17, %v18986_v48  ;;  %v3368_v49 = vsub.f32 %v10476_v46, %v19241_v32  ;;  %v19247_v37 = vunpack.i.h.bf16 %v19127_v11  ;;  %v19252_v32 = vld [vmem:[#allocation202_spill] sm:$0xff] }
 0x30e   :  { %v4442_v28 = vmul.f32 %v19213_v45, %v19243_v1  ;;  %v3225_v1 = vmul.f32 %v3097_v63, %v19246_v60  ;;  %v12301_v42 = vmul.f32 %v4441_v12, %v19249_v16  ;;  %v3631_v5 = vmul.f32 %v3503_v0, %v2802_v39  ;;  %vm12311_vm1 = vmand %vm2094_vm12, %vm2235_vm13  ;;  %v19256_v39 = vld [vmem:[#allocation119_spill] sm:$0xff] }
 0x30f   :  { %v2803_v57 = vsel %vm2784_vm7, %v19248_v59, %v19247_v37  ;;  %v3505_v17 = vmul.f32 %v10521_v2, %v3366_v20  ;;  %vm2092_vm14 = vcmp.ge.f32.partialorder %v19252_v32, %v18984_v24  ;;  %vm2233_vm15 = vcmp.lt.f32.partialorder %v19252_v32, %v18986_v48  ;;  %v19259_v32 = vld [vmem:[#allocation93_spill] sm:$0xff] }
 0x310   :  { %19250 = vst [vmem:[#allocation116_spill] sm:$0xff] %v12301_v42  ;;  %v12304_v41 = vmul.f32 %v4442_v28, %v11415_v15  ;;  %v19255_v37 = vunpack.i.l.bf16 %v19231_v21  ;;  %v4443_v12 = vmul.f32 %v19227_v35, %v4304_v38  ;;  %v19257_v0 = vsub.f32 %v19256_v39, %v19211_v40  ;;  %v19258_v28 = vld [vmem:[#allocation123_spill] sm:$0xff]  ;;  %8176 = vrot.lane.b32.xlu0 %v8175_v51, %s8557_s20  ;;  %vm2361_vm2 = vmand %vm2092_vm14, %vm2233_vm15 }
 0x311   :  { %v4306_v60 = vsub.f32 %v19258_v28, %v19214_v3  ;;  %4019 = vrot.lane.b32.xlu1 %v12191_v52, %s8557_s20  ;;  %v3633_v42 = vmul.f32 %v3505_v17, %v2803_v57  ;;  %v3507_v38 = vmul.f32 %v10521_v2, %v3368_v49  ;;  %v3227_v22 = vmul.f32 %v3099_v6, %v19259_v32  ;;  %v19265_v32 = vld [vmem:[#allocation92_spill] sm:$0xff] }
 0x312   :  { %19251 = vst [vmem:[#allocation84_spill] sm:$0xff] %v12304_v41  ;;  %v2804_v59 = vsel %vm2784_vm7, %v8009_v54, %v19255_v37  ;;  %v4444_v20 = vmul.f32 %v19213_v45, %v19257_v0  ;;  %v3101_v37 = vmul.f32 %v18950_v50, %v2962_v8  ;;  %v19260_v0 = vld [vmem:[#allocation86_spill] sm:$0xff]  ;;  %v12336_v28 = vmul.f32 %v4443_v12, %v11451_v61  ;;  %v19266_v12 = vld [vmem:[#allocation124_spill] sm:$0xff] }
 0x313   :  { %v2961_v39 = vsub.f32 %v19260_v0, %v9389_v47  ;;  %v12341_v51 = vadd.f32 %v3631_v5, %v3225_v1  ;;  %v12346_v8 = vsel %vm12311_vm1, 1.0, %v19003_v55  ;;  %v3635_v57 = vmul.f32 %v3507_v38, %v2804_v59  ;;  %v19268_v1 = vld [vmem:[#allocation128_spill] sm:$0xff] }
 0x314   :  { %19261 = vst [vmem:[#allocation120_spill] sm:$0xff] %v12336_v28  ;;  %v12339_v41 = vmul.f32 %v4444_v20, %v11412_v14  ;;  %19264 = vst [vmem:[#allocation273_spill] sm:$0xff] %v12346_v8  ;;  %v3367_v6 = vsub.f32 %v10457_v29, %v19260_v0  ;;  %v2963_v17 = vsub.f32 %v19265_v32, %v9389_v47  ;;  %4021 = vrot.lane.b32.xlu0 %v12231_v9, %s8557_s20  ;;  %v19274_v9 = vld [vmem:[#allocation167_spill] sm:$0xff] }
 0x315   :  { %19263 = vst [vmem:[#allocation272_spill] sm:$0xff] %v12341_v51  ;;  %v4445_v49 = vmul.f32 %v19227_v35, %v4306_v60  ;;  %v19267_v20 = vsub.f32 %v19266_v12, %v19211_v40  ;;  %3893 = vrot.lane.b32.xlu1 %v12258_v10, %s8557_s20  ;;  %v12363_v63 = vadd.f32 %v3633_v42, %v3227_v22  ;;  %v12366_v59 = vsel %vm2361_vm2, 1.0, %v19003_v55  ;;  %v19271_v60 = vld [vmem:[#allocation94_spill] sm:$0xff]  ;;  %v19272_v12 = vld [vmem:[#allocation127_spill] sm:$0xff] }
 0x316   :  { %19262 = vst [vmem:[#allocation93_spill] sm:$0xff] %v12339_v41  ;;  %v4308_v41 = vsub.f32 %v19268_v1, %v19214_v3  ;;  %19270 = vst [vmem:[#allocation275_spill] sm:$0xff] %v12366_v59  ;;  %v3229_v38 = vmul.f32 %v3101_v37, %v19271_v60  ;;  %v3369_v28 = vsub.f32 %v10457_v29, %v19265_v32  ;;  %v19277_v42 = vunpack.i.l.bf16 %v19176_v18 }
 0x317   :  { %v4446_v5 = vmul.f32 %v19213_v45, %v19267_v20  ;;  %19269 = vst [vmem:[#allocation274_spill] sm:$0xff] %v12363_v63  ;;  %v8180_v20 = vpack.i.bf16 %v12346_v8, %v12366_v59  ;;  %v3100_v1 = vmul.f32 %v9414_v13, %v2961_v39  ;;  %v12375_v0 = vmul.f32 %v4445_v49, %v19272_v12  ;;  %v19290_v8 = vld [vmem:[#allocation208_spill] sm:$0xff]  ;;  %v19301_v12 = vld [vmem:[#allocation134_spill] sm:$0xff] }
 0x318   :  { %v12380_v22 = vadd.f32 %v3635_v57, %v3229_v38  ;;  %v19278_v37 = vunpack.i.h.bf16 %v19127_v11  ;;  %v3506_v32 = vmul.f32 %v10514_v25, %v3367_v6  ;;  %v19279_v59 = vunpack.i.l.bf16 %v19231_v21  ;;  %v19280_v57 = vld [vmem:[#allocation129_spill] sm:$0xff]  ;;  %v19282_v11 = vld [vmem:[#allocation131_spill] sm:$0xff]  ;;  %4023 = vrot.lane.b32.xlu0 %v12267_v27, %s8557_s20  ;;  %v19285_v6 = vld [vmem:[#allocation90_spill] sm:$0xff] }
 0x319   :  { %19273 = vst [vmem:[#allocation94_spill] sm:$0xff] %v12375_v0  ;;  %v12378_v10 = vmul.f32 %v4446_v5, %v19274_v9  ;;  %v3102_v49 = vmul.f32 %v9414_v13, %v2963_v17  ;;  %v4447_v5 = vmul.f32 %v19227_v35, %v4308_v41  ;;  %v19281_v38 = vsub.f32 %v19280_v57, %v19211_v40 }
 0x31a   :  { %19276 = vst [vmem:[#allocation276_spill] sm:$0xff] %v12380_v22  ;;  %v2867_v60 = vsel %vm2784_vm7, %v19278_v37, %v19277_v42  ;;  %v2868_v39 = vsel %vm2784_vm7, %v19279_v59, %v8009_v54  ;;  %v19283_v42 = vld [vmem:[#allocation222_spill] sm:$0xff]  ;;  %3895 = vrot.lane.b32.xlu1 %v12341_v51, %s8557_s20  ;;  %v19284_v54 = vld [vmem:[#allocation212_spill] sm:$0xff]  ;;  %v3508_v41 = vmul.f32 %v10514_v25, %v3369_v28  ;;  %v19291_v51 = vld [vmem:[#allocation97_spill] sm:$0xff] }
 0x31b   :  { %19275 = vst [vmem:[#allocation167_spill] sm:$0xff] %v12378_v10  ;;  %v4448_v18 = vmul.f32 %v19213_v45, %v19281_v38  ;;  %v4310_v10 = vsub.f32 %v19282_v11, %v19214_v3  ;;  %v8018_v37 = vunpack.i.l.bf16 %v19283_v42  ;;  %vm2098_vm3 = vcmp.ge.f32.partialorder %v19284_v54, %v18984_v24  ;;  %v19286_v38 = vld [vmem:[#allocation133_spill] sm:$0xff]  ;;  %v19288_v11 = vld [vmem:[#allocation130_spill] sm:$0xff]  ;;  %v19292_v28 = vld [vmem:[#allocation96_spill] sm:$0xff] }
 0x31c   :  { %vm2239_vm4 = vcmp.lt.f32.partialorder %v19284_v54, %v18986_v48  ;;  %v3228_v17 = vmul.f32 %v3100_v1, %v19285_v6  ;;  %v3634_v59 = vmul.f32 %v3506_v32, %v2867_v60  ;;  %v12413_v0 = vmul.f32 %v4447_v5, %v19286_v38  ;;  %v19295_v60 = vld [vmem:[#allocation132_spill] sm:$0xff]  ;;  %v19297_v6 = vld [vmem:[#allocation135_spill] sm:$0xff]  ;;  %3897 = vrot.lane.b32.xlu0 %v12363_v63, %s8557_s20 }
 0x31d   :  { %v12416_v57 = vmul.f32 %v4448_v18, %v19288_v11  ;;  %vm2096_vm5 = vcmp.ge.f32.partialorder %v19290_v8, %v18984_v24  ;;  %v2965_v27 = vsub.f32 %v19291_v51, %v9389_v47  ;;  %v3371_v54 = vsub.f32 %v10457_v29, %v19291_v51  ;;  %vm12428_vm8 = vmand %vm2098_vm3, %vm2239_vm4  ;;  %v19303_v38 = vld [vmem:[#allocation172_spill] sm:$0xff] }
 0x31e   :  { %19287 = vst [vmem:[#allocation222_spill] sm:$0xff] %v12413_v0  ;;  %v2964_v52 = vsub.f32 %v19292_v28, %v18941_v31  ;;  %vm2237_vm6 = vcmp.lt.f32.partialorder %v19290_v8, %v18986_v48  ;;  %v4449_v1 = vmul.f32 %v19227_v35, %v4310_v10  ;;  %v19296_v5 = vsub.f32 %v19295_v60, %v19211_v40  ;;  %v19298_v0 = vld [vmem:[#allocation100_spill] sm:$0xff] }
 0x31f   :  { %19289 = vst [vmem:[#allocation90_spill] sm:$0xff] %v12416_v57  ;;  %v4312_v57 = vsub.f32 %v19297_v6, %v19214_v3  ;;  %8181 = vrot.lane.b32.xlu1 %v8180_v20, %s8557_s20  ;;  %v3230_v29 = vmul.f32 %v3102_v49, %v19298_v0  ;;  %v3636_v51 = vmul.f32 %v3508_v41, %v2868_v39  ;;  %v19300_v60 = vunpack.i.h.bf16 %v19231_v21  ;;  %v12457_v20 = vpop.permute.xlu1 %8081  ;;  %vm2365_vm9 = vmand %vm2096_vm5, %vm2237_vm6 }
 0x320   :  { %v4450_v18 = vmul.f32 %v19213_v45, %v19296_v5  ;;  %v3370_v11 = vsub.f32 %v10476_v46, %v19292_v28  ;;  %v12445_v10 = vadd.f32 %v3634_v59, %v3228_v17  ;;  %v12452_v6 = vmul.f32 %v4449_v1, %v19301_v12  ;;  %19305 = vst [vmem:[#allocation277_spill] sm:$0xff] %v12457_v20 }
 0x321   :  { %v2869_v5 = vsel %vm2784_vm7, %v19300_v60, %v8018_v37  ;;  %v12468_v0 = vsel %vm12428_vm8, 1.0, %v19003_v55  ;;  %v3104_v39 = vmul.f32 %v9414_v13, %v2965_v27  ;;  %v3510_v49 = vmul.f32 %v10514_v25, %v3371_v54  ;;  %3899 = vrot.lane.b32.xlu0 %v12380_v22, %s8557_s20 }
 0x322   :  { %19299 = vst [vmem:[#allocation100_spill] sm:$0xff] %v12445_v10  ;;  %19302 = vst [vmem:[#allocation134_spill] sm:$0xff] %v12452_v6  ;;  %v12455_v63 = vmul.f32 %v4450_v18, %v19303_v38  ;;  %v19307_v41 = vmov %v19300_v60  ;;  %v3103_v59 = vmul.f32 %v18950_v50, %v2964_v52  ;;  %v4451_v1 = vmul.f32 %v19227_v35, %v4312_v57  ;;  %v19308_v60 = vld [vmem:[#allocation136_spill] sm:$0xff]  ;;  %v19311_v52 = vld [vmem:[#allocation99_spill] sm:$0xff] }
 0x323   :  { %19306 = vst [vmem:[#allocation278_spill] sm:$0xff] %v12468_v0  ;;  %v2805_v17 = vsel %vm2784_vm7, %v8018_v37, %v19307_v41  ;;  %v19309_v18 = vsub.f32 %v19308_v60, %v19211_v40  ;;  %4025 = vrot.lane.b32.xlu1 %v12445_v10, %s8557_s20  ;;  %v3509_v27 = vmul.f32 %v10521_v2, %v3370_v11  ;;  %v12494_v37 = vsel %vm2365_vm9, 1.0, %v19003_v55  ;;  %v19312_v41 = vld [vmem:[#allocation138_spill] sm:$0xff]  ;;  %v12504_v20 = vpop.permute.xlu1 %8091 }
 0x324   :  { %19304 = vst [vmem:[#allocation172_spill] sm:$0xff] %v12455_v63  ;;  %v19310_v63 = vld [vmem:[#allocation139_spill] sm:$0xff]  ;;  %v2966_v21 = vsub.f32 %v19311_v52, %v18941_v31  ;;  %v3372_v57 = vsub.f32 %v10476_v46, %v19311_v52  ;;  %v12496_v54 = vadd.f32 %v3636_v51, %v3230_v29  ;;  %19316 = vst [vmem:[#allocation279_spill] sm:$0xff] %v12504_v20  ;;  %v19317_v31 = vld [vmem:[#allocation101_spill] sm:$0xff]  ;;  %v19320_v29 = vunpack.i.h.bf16 %v19283_v42 }
 0x325   :  { %v4452_v32 = vmul.f32 %v19213_v45, %v19309_v18  ;;  %v4314_v6 = vsub.f32 %v19310_v63, %v19214_v3  ;;  %v12499_v18 = vmul.f32 %v4451_v1, %v19312_v41  ;;  %v19314_v63 = vld [vmem:[#allocation145_spill] sm:$0xff]  ;;  %v8185_v11 = vpack.i.bf16 %v12468_v0, %v12494_v37  ;;  %v19323_v20 = vld [vmem:[#allocation143_spill] sm:$0xff] }
 0x326   :  { %v3232_v25 = vmul.f32 %v3104_v39, %v19317_v31  ;;  %v3638_v10 = vmul.f32 %v3510_v49, %v2869_v5  ;;  %v3637_v46 = vmul.f32 %v3509_v27, %v2805_v17  ;;  %v19318_v52 = vld [vmem:[#allocation229_spill] sm:$0xff]  ;;  %v4316_v0 = vsub.f32 %v19323_v20, %v19214_v3  ;;  %v19326_v39 = vld [vmem:[#allocation191_spill] sm:$0xff]  ;;  %v19328_v17 = vld [vmem:[#allocation142_spill] sm:$0xff] }
 0x327   :  { %19313 = vst [vmem:[#allocation138_spill] sm:$0xff] %v12499_v18  ;;  %v12502_v60 = vmul.f32 %v4452_v32, %v19314_v63  ;;  %v19319_v22 = vunpack.i.l.bf16 %v19318_v52  ;;  %v4453_v1 = vmul.f32 %v19227_v35, %v4314_v6  ;;  %v19321_v32 = vld [vmem:[#allocation140_spill] sm:$0xff]  ;;  %8186 = vrot.lane.b32.xlu0 %v8185_v11, %s8557_s20  ;;  %4027 = vrot.lane.b32.xlu1 %v12496_v54, %s8557_s20  ;;  %v19324_v31 = vld [vmem:[#allocation105_spill] sm:$0xff]  ;;  %v19325_v6 = vld [vmem:[#allocation110_spill] sm:$0xff]  ;;  %v12538_v27 = vpop.permute.xlu1 %8101 }
 0x328   :  { %v3231_v42 = vmul.f32 %v3103_v59, %v19324_v31  ;;  %v3105_v5 = vmul.f32 %v18950_v50, %v2966_v21  ;;  %vm2102_vm10 = vcmp.ge.f32.partialorder %v19325_v6, %v18984_v24  ;;  %vm2243_vm11 = vcmp.lt.f32.partialorder %v19325_v6, %v18986_v48  ;;  %19330 = vst [vmem:[#allocation105_spill] sm:$0xff] %v12538_v27  ;;  %v19347_v6 = vld [vmem:[#allocation153_spill] sm:$0xff]  ;;  %v19349_v20 = vld [vmem:[#allocation238_spill] sm:$0xff] }
 0x329   :  { %19315 = vst [vmem:[#allocation145_spill] sm:$0xff] %v12502_v60  ;;  %v2806_v51 = vsel %vm2784_vm7, %v19320_v29, %v19319_v22  ;;  %v19322_v60 = vsub.f32 %v19321_v32, %v19211_v40  ;;  %v3511_v22 = vmul.f32 %v10521_v2, %v3372_v57  ;;  %v12533_v49 = vmul.f32 %v4453_v1, %v19326_v39  ;;  %v19332_v29 = vld [vmem:[#allocation104_spill] sm:$0xff]  ;;  %vm2371_vm14 = vmand %vm2102_vm10, %vm2243_vm11 }
 0x32a   :  { %v19331_v59 = vsub.f32 %v19048_v30, %v9389_v47  ;;  %v12544_v21 = vadd.f32 %v3638_v10, %v3232_v25  ;;  %v12546_v57 = vadd.f32 %v3637_v46, %v3231_v42  ;;  %vm2100_vm12 = vcmp.ge.f32.partialorder %v19332_v29, %v18984_v24  ;;  %v19333_v1 = vld [vmem:[#allocation144_spill] sm:$0xff] }
 0x32b   :  { %v4454_v18 = vmul.f32 %v19213_v45, %v19322_v60  ;;  %19327 = vst [vmem:[#allocation101_spill] sm:$0xff] %v12533_v49  ;;  %v3639_v11 = vmul.f32 %v3511_v22, %v2806_v51  ;;  %vm2241_vm13 = vcmp.lt.f32.partialorder %v19332_v29, %v18986_v48  ;;  %v19334_v31 = vsub.f32 %v19333_v1, %v19211_v40 }
 0x32c   :  { %v3140_v52 = vmul.f32 %v9414_v13, %v19331_v59  ;;  %v19335_v59 = vld [vmem:[#allocation237_spill] sm:$0xff]  ;;  %v19337_v46 = vsub.f32 %v19078_v33, %v9389_v47  ;;  %4029 = vrot.lane.b32.xlu0 %v12544_v21, %s8557_s20  ;;  %3901 = vrot.lane.b32.xlu1 %v12546_v57, %s8557_s20  ;;  %v19340_v22 = vsub.f32 %v19079_v4, %v9389_v47  ;;  %vm2369_vm15 = vmand %vm2100_vm12, %vm2241_vm13  ;;  %v19397_v33 = vld [vmem:[#allocation87_spill] sm:$0xff] }
 0x32d   :  { %v12536_v60 = vmul.f32 %v4454_v18, %v19328_v17  ;;  %v4455_v18 = vmul.f32 %v19227_v35, %v4316_v0  ;;  %v4456_v50 = vmul.f32 %v19213_v45, %v19334_v31  ;;  %v12559_v25 = vmul.f32 %v19335_v59, %v19083_v44  ;;  %v19338_v0 = vld [vmem:[#allocation106_spill] sm:$0xff]  ;;  %v19339_v44 = vld [vmem:[#allocation248_spill] sm:$0xff]  ;;  %v19400_v4 = vld [vmem:[#allocation265_spill] sm:$0xff] }
 0x32e   :  { %v3144_v10 = vmul.f32 %v9414_v13, %v19337_v46  ;;  %v3233_v51 = vmul.f32 %v3105_v5, %v19338_v0  ;;  %v8078_v42 = vunpack.i.l.bf16 %v19339_v44  ;;  %v3142_v31 = vmul.f32 %v9414_v13, %v19340_v22  ;;  %v19341_v59 = vld [vmem:[#allocation220_spill] sm:$0xff]  ;;  %v12587_v5 = vpop.permute.xlu1 %8111  ;;  %v19345_v0 = vld [vmem:[#allocation34_spill] sm:$0xff] }
 0x32f   :  { %19329 = vst [vmem:[#allocation229_spill] sm:$0xff] %v12536_v60  ;;  %19336 = vst [vmem:[#allocation191_spill] sm:$0xff] %v12559_v25  ;;  %v12582_v46 = vmul.f32 %v4455_v18, %v19341_v59  ;;  %v12585_v60 = vmul.f32 %v4456_v50, %v11789_v19  ;;  %v12590_v49 = vmul.f32 %v3140_v52, %v19345_v0  ;;  %v19351_v50 = vld [vmem:[#allocation239_spill] sm:$0xff]  ;;  %v19356_v0 = vld [vmem:[#allocation56_spill] sm:$0xff] }
 0x330   :  { %19344 = vst [vmem:[#allocation106_spill] sm:$0xff] %v12587_v5  ;;  %v12594_v1 = vmul.f32 %v12040_v36, %v19347_v6  ;;  %v12598_v32 = vmul.f32 %v19349_v20, %v19099_v62  ;;  %v12600_v22 = vadd.f32 %v3639_v11, %v3233_v51  ;;  %v8074_v52 = vunpack.i.h.bf16 %v19351_v50  ;;  %v7231_v20 = vld [vmem:[%s17809_s1 + $0x10] ss:$8 sm:$0x3]  ;;  %4031 = vrot.lane.b32.xlu0 %v19222_v26, %s8557_s20 }
 0x331   :  { %19342 = vst [vmem:[#allocation142_spill] sm:$0xff] %v12582_v46  ;;  %19343 = vst [vmem:[#allocation237_spill] sm:$0xff] %v12585_v60  ;;  %v3007_v18 = vsub.f32 %v19126_v7, %v9389_v47  ;;  %v3009_v36 = vsub.f32 %v19119_v53, %v9389_v47  ;;  %v12614_v62 = vsel %vm2371_vm14, 1.0, %v19003_v55  ;;  %v19353_v6 = vld [vmem:[#allocation240_spill] sm:$0xff]  ;;  %v12624_v51 = vmul.f32 %v3144_v10, %v11840_v58  ;;  %v19357_v60 = vld [vmem:[#allocation54_spill] sm:$0xff] }
 0x332   :  { %19346 = vst [vmem:[#allocation220_spill] sm:$0xff] %v12590_v49  ;;  %19348 = vst [vmem:[#allocation34_spill] sm:$0xff] %v12594_v1  ;;  %v12621_v11 = vmul.f32 %v19353_v6, %v19100_v43  ;;  %v3013_v50 = vsub.f32 %v19356_v0, %v9389_v47  ;;  %3903 = vrot.lane.b32.xlu1 %v12600_v22, %s8557_s20  ;;  %v2817_v29 = vsel %vm2784_vm7, %v8078_v42, %v8074_v52  ;;  %v19359_v43 = vld [vmem:[#allocation51_spill] sm:$0xff]  ;;  %v12644_v5 = vpop.permute.xlu1 %8121  ;;  %v19363_v49 = vld [vmem:[#allocation8_spill] sm:$0xff] }
 0x333   :  { %19350 = vst [vmem:[#allocation153_spill] sm:$0xff] %v12598_v32  ;;  %19352 = vst [vmem:[#allocation238_spill] sm:$0xff] %v12614_v62  ;;  %v12635_v46 = vmul.f32 %v3142_v31, %v19357_v60  ;;  %v3011_v6 = vsub.f32 %v19359_v43, %v9389_v47  ;;  %v12640_v58 = vsel %vm2369_vm15, 1.0, %v19003_v55  ;;  %v2881_v10 = vsel %vm2784_vm7, %v8074_v52, %v8078_v42  ;;  %v19364_v31 = vld [vmem:[#allocation58_spill] sm:$0xff]  ;;  %v19373_v43 = vld [vmem:[#allocation69_spill] sm:$0xff] }
 0x334   :  { %19354 = vst [vmem:[#allocation239_spill] sm:$0xff] %v12621_v11  ;;  %19355 = vst [vmem:[#allocation240_spill] sm:$0xff] %v12624_v51  ;;  %v8190_v26 = vpack.i.bf16 %v12614_v62, %v12640_v58  ;;  %v19362_v51 = vld [vmem:[#allocation2_spill] sm:$0xff]  ;;  %v12652_v60 = vrot.slane %v7231_v20, %v19363_v49  ;;  %v3146_v42 = vmul.f32 %v9414_v13, %v3007_v18  ;;  %v7232_v62 = vld [vmem:[%s17809_s1 + $0x11] ss:$8 sm:$0x3]  ;;  %3905 = vrot.lane.b32.xlu0 %v19236_v34, %s8557_s20 }
 0x335   :  { %19358 = vst [vmem:[#allocation54_spill] sm:$0xff] %v12635_v46  ;;  %19360 = vst [vmem:[#allocation280_spill] sm:$0xff] %v12640_v58  ;;  %v12649_v27 = vrot.slane %v7231_v20, %v19362_v51  ;;  %v19365_v46 = vld [vmem:[#allocation241_spill] sm:$0xff]  ;;  %v19367_v0 = vld [vmem:[#allocation62_spill] sm:$0xff]  ;;  %v3148_v52 = vmul.f32 %v9414_v13, %v3009_v36 }
 0x336   :  { %19361 = vst [vmem:[#allocation281_spill] sm:$0xff] %v12644_v5  ;;  %v12656_v1 = vmul.f32 %v19365_v46, %v19364_v31  ;;  %v19368_v32 = vld [vmem:[#allocation242_spill] sm:$0xff]  ;;  %v19371_v5 = vld [vmem:[#allocation243_spill] sm:$0xff]  ;;  %v19374_v53 = vld [vmem:[#allocation244_spill] sm:$0xff]  ;;  %v3152_v31 = vmul.f32 %v9414_v13, %v3013_v50  ;;  %8191 = vrot.lane.b32.xlu1 %v8190_v26, %s8557_s20 }
 0x337   :  { %v12660_v11 = vmul.f32 %v19368_v32, %v19367_v0  ;;  %v19370_v58 = vld [vmem:[#allocation66_spill] sm:$0xff]  ;;  %v12673_v46 = vmul.f32 %v19374_v53, %v19373_v43  ;;  %v19376_v32 = vld [vmem:[#allocation137_spill] sm:$0xff]  ;;  %v19378_v36 = vld [vmem:[#allocation19_spill] sm:$0xff]  ;;  %v3150_v53 = vmul.f32 %v9414_v13, %v3011_v6  ;;  %v12690_v43 = vpop.permute.xlu1 %8131 }
 0x338   :  { %19366 = vst [vmem:[#allocation8_spill] sm:$0xff] %v12656_v1  ;;  %v12669_v20 = vmul.f32 %v19371_v5, %v19370_v58  ;;  %v12680_v18 = vmul.f32 %v19376_v32, %v2817_v29  ;;  %v12683_v0 = vmul.f32 %v19378_v36, %v2881_v10  ;;  %v19381_v5 = vld [vmem:[#allocation245_spill] sm:$0xff]  ;;  %19383 = vst [vmem:[#allocation69_spill] sm:$0xff] %v12690_v43  ;;  %v19384_v50 = vld [vmem:[#allocation7_spill] sm:$0xff]  ;;  %3907 = vrot.lane.b32.xlu0 %v19249_v16, %s8557_s20 }
 0x339   :  { %19369 = vst [vmem:[#allocation58_spill] sm:$0xff] %v12660_v11  ;;  %19375 = vst [vmem:[#allocation62_spill] sm:$0xff] %v12673_v46  ;;  %v19380_v11 = vld [vmem:[#allocation75_spill] sm:$0xff]  ;;  %v4662_v46 = vsub.f32 %v12649_v27, %v19384_v50  ;;  %v19385_v34 = vld [vmem:[#allocation9_spill] sm:$0xff]  ;;  %v12697_v29 = vrot.slane %v7232_v62, %v19362_v51  ;;  %v12700_v10 = vrot.slane %v7232_v62, %v19363_v49 }
 0x33a   :  { %19372 = vst [vmem:[#allocation241_spill] sm:$0xff] %v12669_v20  ;;  %19377 = vst [vmem:[#allocation242_spill] sm:$0xff] %v12680_v18  ;;  %v12687_v58 = vmul.f32 %v19381_v5, %v19380_v11  ;;  %v4663_v26 = vsub.f32 %v12652_v60, %v19385_v34  ;;  %v19386_v32 = vld [vmem:[#allocation77_spill] sm:$0xff]  ;;  %v19387_v36 = vld [vmem:[#allocation246_spill] sm:$0xff]  ;;  %4033 = vrot.lane.b32.xlu1 %v19238_v23, %s8557_s20 }
 0x33b   :  { %19379 = vst [vmem:[#allocation66_spill] sm:$0xff] %v12683_v0  ;;  %v12704_v11 = vmul.f32 %v19387_v36, %v19386_v32  ;;  %v19389_v5 = vld [vmem:[#allocation263_spill] sm:$0xff]  ;;  %v19391_v43 = vld [vmem:[#allocation264_spill] sm:$0xff]  ;;  %v19393_v20 = vld [vmem:[#allocation61_spill] sm:$0xff]  ;;  %v12723_v32 = vmul.f32 %v3152_v31, %v19400_v4 }
 0x33c   :  { %19382 = vst [vmem:[#allocation243_spill] sm:$0xff] %v12687_v58  ;;  %v12707_v6 = vmul.f32 %v3148_v52, %v19389_v5  ;;  %v12710_v58 = vmul.f32 %v3146_v42, %v19391_v43  ;;  %v3015_v1 = vsub.f32 %v19393_v20, %v9389_v47  ;;  %v19394_v34 = vld [vmem:[#allocation82_spill] sm:$0xff]  ;;  %v19395_v7 = vld [vmem:[#allocation247_spill] sm:$0xff]  ;;  %v19398_v49 = vld [vmem:[#allocation249_spill] sm:$0xff]  ;;  %4037 = vrot.lane.b32.xlu0 %v11412_v14, %s8557_s20 }
 0x33d   :  { %19388 = vst [vmem:[#allocation244_spill] sm:$0xff] %v12704_v11  ;;  %v12716_v25 = vmul.f32 %v19395_v7, %v19394_v34  ;;  %v12720_v62 = vmul.f32 %v19398_v49, %v19397_v33  ;;  %19401 = vst [vmem:[#allocation9_spill] sm:$0xff] %v12723_v32  ;;  %v19402_v42 = vld [vmem:[#allocation266_spill] sm:$0xff]  ;;  %v19404_v43 = vld [vmem:[#allocation91_spill] sm:$0xff] }
 0x33e   :  { %19390 = vst [vmem:[#allocation137_spill] sm:$0xff] %v12707_v6  ;;  %19392 = vst [vmem:[#allocation19_spill] sm:$0xff] %v12710_v58  ;;  %v12730_v52 = vmul.f32 %v3150_v53, %v19402_v42  ;;  %v19405_v36 = vld [vmem:[#allocation250_spill] sm:$0xff]  ;;  %v19407_v5 = vld [vmem:[#allocation59_spill] sm:$0xff]  ;;  %v3990_v42 = vpop.permute.xlu0 %3989  ;;  %4035 = vrot.lane.b32.xlu1 %v11415_v15, %s8557_s20 }
 0x33f   :  { %19396 = vst [vmem:[#allocation75_spill] sm:$0xff] %v12716_v25  ;;  %19399 = vst [vmem:[#allocation245_spill] sm:$0xff] %v12720_v62  ;;  %v12734_v7 = vmul.f32 %v19405_v36, %v19404_v43  ;;  %v19408_v33 = vsub.f32 %v19407_v5, %v19214_v3  ;;  %v19409_v4 = vld [vmem:[#allocation65_spill] sm:$0xff]  ;;  %v19410_v49 = vld [vmem:[#allocation95_spill] sm:$0xff]  ;;  %v4802_v43 = vmul.f32 %v12700_v10, %v4663_v26  ;;  %v3862_v36 = vpop.permute.xlu1 %3861 }
 0x340   :  { %19403 = vst [vmem:[#allocation77_spill] sm:$0xff] %v12730_v52  ;;  %v3017_v31 = vsub.f32 %v19409_v4, %v9389_v47  ;;  %v19411_v16 = vld [vmem:[#allocation251_spill] sm:$0xff]  ;;  %v4801_v52 = vmul.f32 %v12697_v29, %v4662_v46  ;;  %v19414_v6 = vld [vmem:[#allocation98_spill] sm:$0xff]  ;;  %v19415_v20 = vld [vmem:[#allocation252_spill] sm:$0xff]  ;;  %v4117_v4 = vsel %vm2784_vm7, %v3862_v36, %v3990_v42  ;;  %4039 = vrot.lane.b32.xlu0 %v19274_v9, %s8557_s20 }
 0x341   :  { %19406 = vst [vmem:[#allocation246_spill] sm:$0xff] %v12734_v7  ;;  %v4421_v34 = vmul.f32 %v19227_v35, %v19408_v33  ;;  %v12744_v32 = vmul.f32 %v19411_v16, %v19410_v49  ;;  %v19413_v23 = vld [vmem:[#allocation63_spill] sm:$0xff]  ;;  %v12752_v58 = vmul.f32 %v19415_v20, %v19414_v6  ;;  %v3154_v33 = vmul.f32 %v9414_v13, %v3015_v1  ;;  %v19418_v1 = vld [vmem:[#allocation64_spill] sm:$0xff]  ;;  %v19419_v6 = vld [vmem:[#allocation122_spill] sm:$0xff] }
 0x342   :  { %v4284_v53 = vsub.f32 %v19413_v23, %v19214_v3  ;;  %v4181_v49 = vsel %vm2784_vm7, %v3990_v42, %v3862_v36  ;;  %v19417_v16 = vld [vmem:[#allocation67_spill] sm:$0xff]  ;;  %v4929_v7 = vmul.f32 %v4801_v52, %v4117_v4  ;;  %v3156_v20 = vmul.f32 %v9414_v13, %v3017_v31  ;;  %v19420_v42 = vld [vmem:[#allocation102_spill] sm:$0xff]  ;;  %v19421_v52 = vld [vmem:[#allocation253_spill] sm:$0xff]  ;;  %3909 = vrot.lane.b32.xlu1 %v11451_v61, %s8557_s20 }
 0x343   :  { %19412 = vst [vmem:[#allocation263_spill] sm:$0xff] %v12744_v32  ;;  %19416 = vst [vmem:[#allocation264_spill] sm:$0xff] %v12752_v58  ;;  %v4286_v32 = vsub.f32 %v19417_v16, %v19214_v3  ;;  %v4930_v46 = vmul.f32 %v4802_v43, %v4181_v49  ;;  %v4285_v26 = vsub.f32 %v19418_v1, %v19211_v40  ;;  %v19423_v43 = vld [vmem:[#allocation12_spill] sm:$0xff]  ;;  %v19424_v15 = vld [vmem:[#allocation11_spill] sm:$0xff]  ;;  %v12783_v49 = vpop.permute.xlu0 %3991  ;;  %v12785_v58 = vpop.permute.xlu1 %3863 }
 0x344   :  { %vm2106_vm1 = vcmp.ge.f32.partialorder %v19419_v6, %v18984_v24  ;;  %vm2247_vm2 = vcmp.lt.f32.partialorder %v19419_v6, %v18986_v48  ;;  %v12774_v4 = vmul.f32 %v19421_v52, %v19420_v42  ;;  %v4423_v14 = vmul.f32 %v19227_v35, %v4284_v53  ;;  %v19425_v25 = vld [vmem:[#allocation113_spill] sm:$0xff]  ;;  %v19427_v11 = vld [vmem:[#allocation70_spill] sm:$0xff]  ;;  %v19431_v52 = vld [vmem:[#allocation71_spill] sm:$0xff] }
 0x345   :  { %v12778_v36 = vadd.f32 %v4929_v7, %v19423_v43  ;;  %v12781_v31 = vadd.f32 %v4930_v46, %v19424_v15  ;;  %v12788_v62 = vmul.f32 %v4421_v34, %v19425_v25  ;;  %v4287_v16 = vsub.f32 %v19427_v11, %v19211_v40  ;;  %v19428_v42 = vld [vmem:[#allocation117_spill] sm:$0xff]  ;;  %v19429_v7 = vld [vmem:[#allocation72_spill] sm:$0xff]  ;;  %vm2375_vm5 = vmand %vm2106_vm1, %vm2247_vm2 }
 0x346   :  { %19422 = vst [vmem:[#allocation82_spill] sm:$0xff] %v12774_v4  ;;  %vm2104_vm3 = vcmp.ge.f32.partialorder %v19428_v42, %v18984_v24  ;;  %vm2245_vm4 = vcmp.lt.f32.partialorder %v19428_v42, %v18986_v48  ;;  %v12797_v53 = vmul.f32 %v3154_v33, %v19429_v7  ;;  %v4425_v46 = vmul.f32 %v19227_v35, %v4286_v32  ;;  %v19432_v25 = vld [vmem:[#allocation73_spill] sm:$0xff]  ;;  %v19434_v32 = vld [vmem:[#allocation227_spill] sm:$0xff]  ;;  %v19436_v9 = vld [vmem:[#allocation76_spill] sm:$0xff] }
 0x347   :  { %19426 = vst [vmem:[#allocation247_spill] sm:$0xff] %v12788_v62  ;;  %v3019_v43 = vsub.f32 %v19431_v52, %v9389_v47  ;;  %v12813_v34 = vmul.f32 %v4423_v14, %v19432_v25  ;;  %v12816_v33 = vmul.f32 %v3156_v20, %v19434_v32  ;;  %v4424_v15 = vmul.f32 %v19213_v45, %v4285_v26  ;;  %v19437_v52 = vld [vmem:[#allocation68_spill] sm:$0xff]  ;;  %v12826_v62 = vpop.permute.xlu0 %3865  ;;  %v12828_v6 = vpop.permute.xlu1 %8141  ;;  %vm2373_vm6 = vmand %vm2104_vm3, %vm2245_vm4  ;;  %v19441_v20 = vld [vmem:[#allocation3_spill] sm:$0xff] }
 0x348   :  { %19430 = vst [vmem:[#allocation87_spill] sm:$0xff] %v12797_v53  ;;  %v4289_v7 = vsub.f32 %v19436_v9, %v19211_v40  ;;  %v12822_v61 = vmul.f32 %v4425_v46, %v19437_v52  ;;  %v19439_v53 = vld [vmem:[#allocation200_spill] sm:$0xff]  ;;  %19440 = vst [vmem:[#allocation91_spill] sm:$0xff] %v12828_v6  ;;  %v19442_v26 = vld [vmem:[#allocation189_spill] sm:$0xff]  ;;  %v4426_v46 = vmul.f32 %v19213_v45, %v4287_v16  ;;  %v12842_v52 = vsel %vm2375_vm5, 1.0, %v19003_v55 }
 0x349   :  { %19433 = vst [vmem:[#allocation249_spill] sm:$0xff] %v12813_v34  ;;  %19435 = vst [vmem:[#allocation265_spill] sm:$0xff] %v12816_v33  ;;  %v3021_v4 = vsub.f32 %v19439_v53, %v9389_v47  ;;  %vm2107_vm8 = vcmp.ge.f32.partialorder %v19442_v26, %v19441_v20  ;;  %v19443_v14 = vld [vmem:[#allocation4_spill] sm:$0xff]  ;;  %v19445_v25 = vld [vmem:[#allocation190_spill] sm:$0xff]  ;;  %v3158_v53 = vmul.f32 %v9414_v13, %v3019_v43 }
 0x34a   :  { %19438 = vst [vmem:[#allocation266_spill] sm:$0xff] %v12822_v61  ;;  %vm2248_vm9 = vcmp.lt.f32.partialorder %v19442_v26, %v19443_v14  ;;  %19444 = vst [vmem:[#allocation250_spill] sm:$0xff] %v12842_v52  ;;  %vm2108_vm10 = vcmp.ge.f32.partialorder %v19445_v25, %v18984_v24  ;;  %vm2249_vm11 = vcmp.lt.f32.partialorder %v19445_v25, %v18986_v48  ;;  %v19446_v32 = vld [vmem:[#allocation79_spill] sm:$0xff]  ;;  %v19448_v33 = vld [vmem:[#allocation74_spill] sm:$0xff] }
 0x34b   :  { %v12849_v42 = vmul.f32 %v4424_v15, %v19446_v32  ;;  %v4288_v61 = vsub.f32 %v19448_v33, %v19214_v3  ;;  %v19449_v34 = vld [vmem:[#allocation133_spill] sm:$0xff]  ;;  %v19450_v16 = vld [vmem:[#allocation127_spill] sm:$0xff]  ;;  %v4428_v1 = vmul.f32 %v19213_v45, %v4289_v7  ;;  %v12865_v32 = vsel %vm2373_vm6, 1.0, %v19003_v55  ;;  %vm12870_vm12 = vmand %vm2107_vm8, %vm2248_vm9 }
 0x34c   :  { %3913 = vrot.lane.b32.xlu0 %v19449_v34, %s8557_s20  ;;  %3911 = vrot.lane.b32.xlu1 %v19450_v16, %s8557_s20  ;;  %v19451_v9 = vld [vmem:[#allocation269_spill] sm:$0xff]  ;;  %19454 = vst [vmem:[#allocation98_spill] sm:$0xff] %v12865_v32  ;;  %v3160_v34 = vmul.f32 %v9414_v13, %v3021_v4  ;;  %v12875_v16 = vpop.permute.xlu0 %3867  ;;  %v8195_v7 = vpack.i.bf16 %v12842_v52, %v12865_v32  ;;  %vm12887_vm13 = vmand %vm2108_vm10, %vm2249_vm11  ;;  %v19461_v4 = vld [vmem:[#allocation78_spill] sm:$0xff]  ;;  %v12922_v44 = vsel %vm12870_vm12, 1.0, %v19003_v55 }
 0x34d   :  { %19447 = vst [vmem:[#allocation95_spill] sm:$0xff] %v12849_v42  ;;  %v12859_v11 = vmul.f32 %v4426_v46, %v19451_v9  ;;  %v19453_v23 = vld [vmem:[#allocation81_spill] sm:$0xff]  ;;  %19457 = vst [vmem:[#allocation252_spill] sm:$0xff] %v12875_v16  ;;  %v12877_v9 = vpop.permute.xlu1 %3993  ;;  %v19463_v42 = vld [vmem:[#allocation146_spill] sm:$0xff] }
 0x34e   :  { %v4291_v15 = vsub.f32 %v19453_v23, %v19211_v40  ;;  %v19460_v26 = vld [vmem:[#allocation149_spill] sm:$0xff]  ;;  %vm2110_vm1 = vcmp.ge.f32.partialorder %v19463_v42, %v18984_v24  ;;  %vm2251_vm2 = vcmp.lt.f32.partialorder %v19463_v42, %v18986_v48  ;;  %v5985_v25 = vld [vmem:[%s17810_s4] sm:$0xff]  ;;  %v5986_v23 = vld [vmem:[%s17810_s4 + $0x8] sm:$0xff]  ;;  %19468 = vst [vmem:[#allocation253_spill] sm:$0xff] %v12922_v44 }
 0x34f   :  { %19452 = vst [vmem:[#allocation251_spill] sm:$0xff] %v12859_v11  ;;  %vm2109_vm14 = vcmp.ge.f32.partialorder %v19460_v26, %v19441_v20  ;;  %vm2250_vm15 = vcmp.lt.f32.partialorder %v19460_v26, %v19443_v14  ;;  %v4290_v11 = vsub.f32 %v19461_v4, %v19214_v3  ;;  %v19462_v52 = vld [vmem:[#allocation85_spill] sm:$0xff]  ;;  %v19464_v33 = vld [vmem:[#allocation270_spill] sm:$0xff]  ;;  %v4427_v4 = vmul.f32 %v19227_v35, %v4288_v61  ;;  %v19472_v61 = vld [vmem:[#allocation80_spill] sm:$0xff] }
 0x350   :  { %v4292_v32 = vsub.f32 %v19462_v52, %v19214_v3  ;;  %v12910_v5 = vmul.f32 %v3158_v53, %v19464_v33  ;;  %v19466_v52 = vld [vmem:[#allocation202_spill] sm:$0xff]  ;;  %8196 = vrot.lane.b32.xlu0 %v8195_v7, %s8557_s20  ;;  %v4430_v0 = vmul.f32 %v19213_v45, %v4291_v15  ;;  %v12927_v53 = vsel %vm12887_vm13, 1.0, %v19003_v55  ;;  %vm12935_vm3 = vmand %vm2109_vm14, %vm2250_vm15  ;;  %v19474_v43 = vld [vmem:[#allocation271_spill] sm:$0xff]  ;;  %v12950_v16 = vpop.permute.xlu0 %8146 }
 0x351   :  { %v3023_v30 = vsub.f32 %v19466_v52, %v9389_v47  ;;  %v19467_v18 = vld [vmem:[#allocation130_spill] sm:$0xff]  ;;  %19469 = vst [vmem:[#allocation12_spill] sm:$0xff] %v12927_v53  ;;  %v7683_v33 = vpack.c.bf16 %v5986_v23, %v5985_v25  ;;  %v12940_v15 = vmul.f32 %v3160_v34, %v19472_v61  ;;  %v12943_v7 = vmul.f32 %v4428_v1, %v19474_v43  ;;  %v19476_v46 = vld [vmem:[#allocation83_spill] sm:$0xff]  ;;  %v12952_v26 = vpop.permute.xlu1 %3995  ;;  %vm12960_vm4 = vmand %vm2110_vm1, %vm2251_vm2 }
 0x352   :  { %19465 = vst [vmem:[#allocation102_spill] sm:$0xff] %v12910_v5  ;;  %4041 = vrot.lane.b32.xlu1 %v19467_v18, %s8557_s20  ;;  %v12946_v5 = vmul.f32 %v4427_v4, %v19476_v46  ;;  %v19478_v52 = vld [vmem:[#allocation206_spill] sm:$0xff]  ;;  %19479 = vst [vmem:[#allocation73_spill] sm:$0xff] %v12950_v16  ;;  %v5987_v1 = vld [vmem:[%s17810_s4 + $0x10] sm:$0xff]  ;;  %v4429_v61 = vmul.f32 %v19227_v35, %v4290_v11  ;;  %v4431_v43 = vmul.f32 %v19227_v35, %v4292_v32 }
 0x353   :  { %19473 = vst [vmem:[#allocation11_spill] sm:$0xff] %v12940_v15  ;;  %19475 = vst [vmem:[#allocation113_spill] sm:$0xff] %v12943_v7  ;;  %v3025_v6 = vsub.f32 %v19478_v52, %v9389_v47  ;;  %v5988_v25 = vld [vmem:[%s17810_s4 + $0x18] sm:$0xff]  ;;  %v19482_v34 = vld [vmem:[#allocation115_spill] sm:$0xff]  ;;  %7684 = vmatprep.subr.bf16.mxu1 %v7683_v33  ;;  %v3162_v15 = vmul.f32 %v9414_v13, %v3023_v30  ;;  %v3027_v32 = vsub.f32 %v19290_v8, %v9389_v47 }
 0x354   :  { %19477 = vst [vmem:[#allocation72_spill] sm:$0xff] %v12946_v5  ;;  %v12971_v4 = vmul.f32 %v4430_v0, %v19482_v34  ;;  %v19484_v46 = vld [vmem:[#allocation88_spill] sm:$0xff]  ;;  %4043 = vrot.lane.b32.xlu0 %v19303_v38, %s8557_s20  ;;  %v8200_v0 = vpack.i.bf16 %v12927_v53, %v12922_v44  ;;  %v7687_v34 = vpack.c.bf16 %v5988_v25, %v5987_v1  ;;  %v19485_v11 = vld [vmem:[#allocation86_spill] sm:$0xff]  ;;  %v12991_v30 = vsel %vm12935_vm3, 1.0, %v19003_v55  ;;  %v13001_v53 = vpop.permute.xlu0 %3997  ;;  %v19489_v8 = vld [vmem:[#allocation37_spill] sm:$0xff] }
 0x355   :  { %v4294_v42 = vsub.f32 %v19484_v46, %v19214_v3  ;;  %v4293_v52 = vsub.f32 %v19485_v11, %v19211_v40  ;;  %19486 = vst [vmem:[#allocation68_spill] sm:$0xff] %v12991_v30  ;;  %v12996_v38 = vsel %vm12960_vm4, 1.0, %v19003_v55  ;;  %7686 = vmatpush3.bf16.msra.mxu1 %v7683_v33  ;;  %v19488_v1 = vld [vmem:[#allocation92_spill] sm:$0xff]  ;;  %v13003_v44 = vpop.permute.xlu1 %3869  ;;  %vm2111_vm5 = vcmp.ge.f32.partialorder %v19489_v8, %v19441_v20  ;;  %v5989_v18 = vld [vmem:[%s17810_s4 + $0x20] sm:$0xff]  ;;  %v19496_v5 = vld [vmem:[#allocation97_spill] sm:$0xff] }
 0x356   :  { %19483 = vst [vmem:[#allocation227_spill] sm:$0xff] %v12971_v4  ;;  %3915 = vrot.lane.b32.xlu1 %v19301_v12, %s8557_s20  ;;  %19487 = vst [vmem:[#allocation3_spill] sm:$0xff] %v12996_v38  ;;  %v3164_v12 = vmul.f32 %v9414_v13, %v3025_v6  ;;  %v4295_v25 = vsub.f32 %v19488_v1, %v19211_v40  ;;  %vm2252_vm6 = vcmp.lt.f32.partialorder %v19489_v8, %v19443_v14  ;;  %v5990_v6 = vld [vmem:[%s17810_s4 + $0x28] sm:$0xff]  ;;  %v19490_v33 = vld [vmem:[#allocation272_spill] sm:$0xff] }
 0x357   :  { %7688 = vmatprep.subr.bf16.mxu1 %v7687_v34  ;;  %v13016_v23 = vmul.f32 %v4429_v61, %v19490_v33  ;;  %v19492_v4 = vld [vmem:[#allocation274_spill] sm:$0xff]  ;;  %v19495_v46 = vld [vmem:[#allocation212_spill] sm:$0xff]  ;;  %v4297_v16 = vsub.f32 %v19496_v5, %v19211_v40  ;;  %v4433_v61 = vmul.f32 %v19227_v35, %v4294_v42  ;;  %v3166_v33 = vmul.f32 %v9414_v13, %v3027_v32  ;;  %vm13043_vm10 = vmand %vm2111_vm5, %vm2252_vm6 }
 0x358   :  { %v13019_v7 = vmul.f32 %v4431_v43, %v19492_v4  ;;  %v19494_v1 = vld [vmem:[#allocation194_spill] sm:$0xff]  ;;  %v3029_v11 = vsub.f32 %v19495_v46, %v9389_v47  ;;  %3917 = vrot.lane.b32.xlu0 %v19312_v41, %s8557_s20  ;;  %v8205_v4 = vpack.i.bf16 %v12996_v38, %v12991_v30  ;;  %v4432_v43 = vmul.f32 %v19213_v45, %v4293_v52  ;;  %v19501_v42 = vld [vmem:[#allocation275_spill] sm:$0xff]  ;;  %v13056_v46 = vpop.permute.xlu0 %3999 }
 0x359   :  { %19491 = vst [vmem:[#allocation4_spill] sm:$0xff] %v13016_v23  ;;  %vm2112_vm8 = vcmp.ge.f32.partialorder %v19494_v1, %v18984_v24  ;;  %vm2253_vm9 = vcmp.lt.f32.partialorder %v19494_v1, %v18986_v48  ;;  %7690 = vmatpush3.bf16.msra.mxu1 %v7687_v34  ;;  %v7691_v41 = vpack.c.bf16 %v5990_v6, %v5989_v18  ;;  %v13058_v8 = vpop.permute.xlu1 %3871  ;;  %v19507_v6 = vld [vmem:[#allocation100_spill] sm:$0xff]  ;;  %v5993_v47 = vld [vmem:[%s17810_s4 + $0x40] sm:$0xff]  ;;  %v19540_v23 = vld [vmem:[#allocation177_spill] sm:$0xff] }
 0x35a   :  { %19493 = vst [vmem:[#allocation79_spill] sm:$0xff] %v13019_v7  ;;  %8201 = vrot.lane.b32.xlu1 %v8200_v0, %s8557_s20  ;;  %v19499_v0 = vld [vmem:[#allocation273_spill] sm:$0xff]  ;;  %v13051_v30 = vmul.f32 %v3162_v15, %v19501_v42  ;;  %v4434_v52 = vmul.f32 %v19213_v45, %v4295_v25  ;;  %v4296_v32 = vsub.f32 %v19292_v28, %v19214_v3  ;;  %vm13066_vm11 = vmand %vm2112_vm8, %vm2253_vm9  ;;  %v5991_v15 = vld [vmem:[%s17810_s4 + $0x30] sm:$0xff] }
 0x35b   :  { %v13048_v38 = vmul.f32 %v3164_v12, %v19499_v0  ;;  %v5992_v12 = vld [vmem:[%s17810_s4 + $0x38] sm:$0xff]  ;;  %v19505_v25 = vld [vmem:[#allocation276_spill] sm:$0xff]  ;;  %v13080_v0 = vmul.f32 %v4432_v43, %v19507_v6  ;;  %v19509_v42 = vld [vmem:[#allocation99_spill] sm:$0xff]  ;;  %7692 = vmatprep.subr.bf16.mxu1 %v7691_v41  ;;  %v4436_v5 = vmul.f32 %v19213_v45, %v4297_v16 }
 0x35c   :  { %19502 = vst [vmem:[#allocation127_spill] sm:$0xff] %v13051_v30  ;;  %v13077_v18 = vmul.f32 %v4433_v61, %v19505_v25  ;;  %v4298_v1 = vsub.f32 %v19509_v42, %v19214_v3  ;;  %v3168_v30 = vmul.f32 %v9414_v13, %v3029_v11  ;;  %v13086_v7 = vmul.f32 %v4434_v52, %v12496_v54  ;;  %v19512_v43 = vld [vmem:[#allocation10_spill] sm:$0xff]  ;;  %v19517_v52 = vld [vmem:[#allocation39_spill] sm:$0xff] }
 0x35d   :  { %19500 = vst [vmem:[#allocation133_spill] sm:$0xff] %v13048_v38  ;;  %19508 = vst [vmem:[#allocation270_spill] sm:$0xff] %v13080_v0  ;;  %v7695_v38 = vpack.c.bf16 %v5992_v12, %v5991_v15  ;;  %8206 = vrot.lane.b32.xlu0 %v8205_v4, %s8557_s20  ;;  %v13093_v61 = vmul.f32 %v3166_v33, %v12494_v37  ;;  %v4664_v25 = vsub.f32 %v12649_v27, %v19512_v43  ;;  %v13110_v4 = vpop.permute.xlu0 %3873  ;;  %v13112_v33 = vpop.permute.xlu1 %8151  ;;  %v19518_v34 = vld [vmem:[#allocation42_spill] sm:$0xff]  ;;  %v19537_v0 = vld [vmem:[#allocation148_spill] sm:$0xff] }
 0x35e   :  { %19506 = vst [vmem:[#allocation269_spill] sm:$0xff] %v13077_v18  ;;  %19510 = vst [vmem:[#allocation130_spill] sm:$0xff] %v13086_v7  ;;  %4045 = vrot.lane.b32.xlu1 %v19314_v63, %s8557_s20  ;;  %v13100_v11 = vsel %vm13043_vm10, 1.0, %v19003_v55  ;;  %v13105_v54 = vsel %vm13066_vm11, 1.0, %v19003_v55  ;;  %7694 = vmatpush3.bf16.msra.mxu1 %v7691_v41  ;;  %v4435_v16 = vmul.f32 %v19227_v35, %v4296_v32  ;;  %v19515_v63 = vld [vmem:[#allocation14_spill] sm:$0xff]  ;;  %v5994_v41 = vld [vmem:[%s17810_s4 + $0x48] sm:$0xff] }
 0x35f   :  { %19511 = vst [vmem:[#allocation80_spill] sm:$0xff] %v13093_v61  ;;  %19513 = vst [vmem:[#allocation271_spill] sm:$0xff] %v13100_v11  ;;  %v4665_v37 = vsub.f32 %v12652_v60, %v19515_v63  ;;  %vm2113_vm12 = vcmp.ge.f32.partialorder %v19517_v52, %v19441_v20  ;;  %vm2254_vm13 = vcmp.lt.f32.partialorder %v19517_v52, %v19443_v14  ;;  %7696 = vmatprep.subr.bf16.mxu1 %v7695_v38  ;;  %v19519_v12 = vld [vmem:[#allocation278_spill] sm:$0xff]  ;;  %v7233_v61 = vld [vmem:[%s17809_s1 + $0x12] ss:$8 sm:$0x3] }
 0x360   :  { %19514 = vst [vmem:[#allocation83_spill] sm:$0xff] %v13105_v54  ;;  %19516 = vst [vmem:[#allocation115_spill] sm:$0xff] %v13112_v33  ;;  %v4437_v32 = vmul.f32 %v19227_v35, %v4298_v1  ;;  %vm2114_vm14 = vcmp.ge.f32.partialorder %v19518_v34, %v18984_v24  ;;  %vm2255_vm15 = vcmp.lt.f32.partialorder %v19518_v34, %v18986_v48  ;;  %v19521_v1 = vld [vmem:[#allocation147_spill] sm:$0xff]  ;;  %v19595_v33 = vld [vmem:[#allocation165_spill] sm:$0xff] }
 0x361   :  { %v7699_v15 = vpack.c.bf16 %v5994_v41, %v5993_v47  ;;  %v13130_v6 = vmul.f32 %v3168_v30, %v19519_v12  ;;  %4047 = vrot.lane.b32.xlu0 %v19328_v17, %s8557_s20  ;;  %v8210_v63 = vpack.i.bf16 %v13105_v54, %v13100_v11  ;;  %v4318_v13 = vsub.f32 %v19521_v1, %v19214_v3  ;;  %vm13159_vm1 = vmand %vm2113_vm12, %vm2254_vm13  ;;  %v13172_v12 = vpop.permute.xlu0 %3875  ;;  %v13174_v54 = vpop.permute.xlu1 %4001  ;;  %v19532_v52 = vld [vmem:[#allocation155_spill] sm:$0xff]  ;;  %v19546_v41 = vld [vmem:[#allocation154_spill] sm:$0xff] }
 0x362   :  { %3919 = vrot.lane.b32.xlu1 %v19326_v39, %s8557_s20  ;;  %v13144_v47 = vmul.f32 %v4436_v5, %v12544_v21  ;;  %v13147_v30 = vmul.f32 %v4435_v16, %v12546_v57  ;;  %v13150_v17 = vmul.f32 %v4437_v32, %v12600_v22  ;;  %v4803_v39 = vmul.f32 %v12697_v29, %v4664_v25  ;;  %v19527_v57 = vld [vmem:[#allocation17_spill] sm:$0xff]  ;;  %v19528_v5 = vld [vmem:[#allocation18_spill] sm:$0xff]  ;;  %vm13182_vm2 = vmand %vm2114_vm14, %vm2255_vm15 }
 0x363   :  { %19520 = vst [vmem:[#allocation272_spill] sm:$0xff] %v13130_v6  ;;  %7698 = vmatpush3.bf16.msra.mxu1 %v7695_v38  ;;  %v13164_v21 = vmul.f32 %v12700_v10, %v4665_v37  ;;  %v4666_v22 = vsub.f32 %v12649_v27, %v19527_v57  ;;  %v4667_v25 = vsub.f32 %v12652_v60, %v19528_v5  ;;  %v19529_v16 = vld [vmem:[#allocation21_spill] sm:$0xff]  ;;  %v5995_v37 = vld [vmem:[%s17810_s4 + $0x50] sm:$0xff]  ;;  %v19533_v34 = vld [vmem:[#allocation179_spill] sm:$0xff] }
 0x364   :  { %19522 = vst [vmem:[#allocation274_spill] sm:$0xff] %v13144_v47  ;;  %19523 = vst [vmem:[#allocation273_spill] sm:$0xff] %v13147_v30  ;;  %v4668_v32 = vsub.f32 %v12649_v27, %v19529_v16  ;;  %7700 = vmatprep.subr.bf16.mxu1 %v7699_v15  ;;  %v5996_v5 = vld [vmem:[%s17810_s4 + $0x58] sm:$0xff]  ;;  %v4118_v11 = vsel %vm2784_vm7, %v12785_v58, %v12783_v49  ;;  %v3396_v6 = vsub.f32 %v19533_v34, %v19532_v52  ;;  %v19536_v30 = vld [vmem:[#allocation24_spill] sm:$0xff] }
 0x365   :  { %19524 = vst [vmem:[#allocation275_spill] sm:$0xff] %v13150_v17  ;;  %v19534_v17 = vld [vmem:[#allocation22_spill] sm:$0xff]  ;;  %v13201_v3 = vrot.slane %v7233_v61, %v19362_v51  ;;  %3921 = vrot.lane.b32.xlu0 %v19341_v59, %s8557_s20  ;;  %v4457_v18 = vmul.f32 %v19227_v35, %v4318_v13  ;;  %v19538_v42 = vsub.f32 %v19537_v0, %v19211_v40  ;;  %v7234_v61 = vld [vmem:[%s17809_s1 + $0x13] ss:$8 sm:$0x3]  ;;  %v13221_v59 = vsel %vm13159_vm1, 1.0, %v19003_v55  ;;  %v13231_v35 = vpop.permute.xlu1 %4003 }
 0x366   :  { %v4669_v47 = vsub.f32 %v12652_v60, %v19534_v17  ;;  %8211 = vrot.lane.b32.xlu1 %v8210_v63, %s8557_s20  ;;  %v19539_v17 = vld [vmem:[#allocation157_spill] sm:$0xff]  ;;  %19541 = vst [vmem:[#allocation100_spill] sm:$0xff] %v13221_v59  ;;  %v13226_v13 = vsel %vm13182_vm2, 1.0, %v19003_v55  ;;  %v7703_v63 = vpack.c.bf16 %v5996_v5, %v5995_v37  ;;  %v4805_v7 = vmul.f32 %v12697_v29, %v4666_v22  ;;  %v5997_v38 = vld [vmem:[%s17810_s4 + $0x60] sm:$0xff]  ;;  %v19549_v37 = vld [vmem:[#allocation184_spill] sm:$0xff] }
 0x367   :  { %19535 = vst [vmem:[#allocation276_spill] sm:$0xff] %v13201_v3  ;;  %v4458_v52 = vmul.f32 %v19213_v45, %v19538_v42  ;;  %v3397_v28 = vsub.f32 %v19540_v23, %v19539_v17  ;;  %19542 = vst [vmem:[#allocation14_spill] sm:$0xff] %v13226_v13  ;;  %7702 = vmatpush3.bf16.msra.mxu1 %v7699_v15  ;;  %v4931_v42 = vmul.f32 %v4803_v39, %v4118_v11  ;;  %v13229_v45 = vpop.permute.xlu0 %8156  ;;  %v19544_v17 = vld [vmem:[#allocation204_spill] sm:$0xff]  ;;  %v5998_v11 = vld [vmem:[%s17810_s4 + $0x68] sm:$0xff] }
 0x368   :  { %19543 = vst [vmem:[#allocation278_spill] sm:$0xff] %v13229_v45  ;;  %v13234_v40 = vmul.f32 %v4457_v18, %v19544_v17  ;;  %v13246_v15 = vmul.f32 %v10521_v2, %v3396_v6  ;;  %v13249_v39 = vmul.f32 %v12700_v10, %v4667_v25  ;;  %7704 = vmatprep.subr.bf16.mxu1 %v7703_v63  ;;  %v19551_v1 = vld [vmem:[#allocation23_spill] sm:$0xff]  ;;  %v19559_v45 = vld [vmem:[#allocation30_spill] sm:$0xff] }
 0x369   :  { %v13237_v0 = vmul.f32 %v4458_v52, %v19546_v41  ;;  %v5519_v18 = vsub.f32 %v19384_v50, %v13201_v3  ;;  %v13254_v52 = vrot.slane %v7234_v61, %v19362_v51  ;;  %5193 = vrot.lane.b32.xlu0 %v12778_v36, %s8557_s20  ;;  %v8215_v6 = vpack.i.bf16 %v13226_v13, %v13221_v59  ;;  %v19552_v13 = vld [vmem:[#allocation27_spill] sm:$0xff]  ;;  %v13280_v59 = vpop.permute.xlu1 %3877 }
 0x36a   :  { %19545 = vst [vmem:[#allocation18_spill] sm:$0xff] %v13234_v40  ;;  %4049 = vrot.lane.b32.xlu1 %v11789_v19, %s8557_s20  ;;  %v7707_v22 = vpack.c.bf16 %v5998_v11, %v5997_v38  ;;  %v5520_v25 = vsub.f32 %v19512_v43, %v13201_v3  ;;  %v13265_v5 = vmul.f32 %v19549_v37, %v3397_v28  ;;  %v19550_v19 = vld [vmem:[#allocation25_spill] sm:$0xff]  ;;  %v19555_v28 = vld [vmem:[#allocation258_spill] sm:$0xff]  ;;  %v19558_v43 = vld [vmem:[#allocation159_spill] sm:$0xff] }
 0x36b   :  { %19547 = vst [vmem:[#allocation22_spill] sm:$0xff] %v13237_v0  ;;  %19548 = vst [vmem:[#allocation204_spill] sm:$0xff] %v13254_v52  ;;  %v13268_v0 = vmul.f32 %v12697_v29, %v4668_v32  ;;  %v13271_v61 = vmul.f32 %v12700_v10, %v4669_v47  ;;  %v4671_v40 = vsub.f32 %v12652_v60, %v19550_v19  ;;  %7706 = vmatpush3.bf16.msra.mxu1 %v7703_v63  ;;  %v13278_v11 = vpop.permute.xlu0 %4005  ;;  %v5999_v63 = vld [vmem:[%s17810_s4 + $0x70] sm:$0xff] }
 0x36c   :  { %v5059_v50 = vadd.f32 %v4931_v42, %v19551_v1  ;;  %v4672_v38 = vsub.f32 %v12649_v27, %v19552_v13  ;;  %19553 = vst [vmem:[#allocation154_spill] sm:$0xff] %v13278_v11  ;;  %19554 = vst [vmem:[#allocation25_spill] sm:$0xff] %v13280_v59  ;;  %vm2115_vm3 = vcmp.ge.f32.partialorder %v19555_v28, %v19441_v20  ;;  %7708 = vmatprep.subr.bf16.mxu1 %v7707_v22  ;;  %v19556_v1 = vld [vmem:[#allocation230_spill] sm:$0xff]  ;;  %v6000_v42 = vld [vmem:[%s17810_s4 + $0x78] sm:$0xff] }
 0x36d   :  { %vm2256_vm4 = vcmp.lt.f32.partialorder %v19555_v28, %v19443_v14  ;;  %v4182_v47 = vsel %vm2784_vm7, %v12783_v49, %v12785_v58  ;;  %vm2116_vm5 = vcmp.ge.f32.partialorder %v19556_v1, %v18984_v24  ;;  %vm2257_vm6 = vcmp.lt.f32.partialorder %v19556_v1, %v18986_v48  ;;  %v19557_v49 = vld [vmem:[#allocation29_spill] sm:$0xff]  ;;  %8216 = vrot.lane.b32.xlu0 %v8215_v6, %s8557_s20  ;;  %v13333_v11 = vpop.permute.xlu1 %3879 }
 0x36e   :  { %v5589_v32 = vmul.f32 %v13254_v52, %v5519_v18  ;;  %v4119_v58 = vsel %vm2784_vm7, %v12826_v62, %v12877_v9  ;;  %v4673_v19 = vsub.f32 %v12652_v60, %v19557_v49  ;;  %5321 = vrot.lane.b32.xlu1 %v12781_v31, %s8557_s20  ;;  %v5590_v18 = vmul.f32 %v13254_v52, %v5520_v25  ;;  %vm13321_vm8 = vmand %vm2115_vm3, %vm2256_vm4  ;;  %v19562_v31 = vld [vmem:[#allocation260_spill] sm:$0xff] }
 0x36f   :  { %v3398_v51 = vsub.f32 %v19533_v34, %v19558_v43  ;;  %v4674_v59 = vsub.f32 %v12649_v27, %v19559_v45  ;;  %vm2117_vm9 = vcmp.ge.f32.partialorder %v19562_v31, %v19441_v20  ;;  %7710 = vmatpush3.bf16.msra.mxu1 %v7707_v22  ;;  %v4932_v25 = vmul.f32 %v13164_v21, %v4182_v47  ;;  %v13331_v43 = vpop.permute.xlu0 %4007  ;;  %vm2385_vm10 = vmand %vm2116_vm5, %vm2257_vm6  ;;  %v19567_v22 = vld [vmem:[#allocation161_spill] sm:$0xff] }
 0x370   :  { %v13328_v6 = vmul.f32 %v5589_v32, %v12778_v36  ;;  %19564 = vst [vmem:[#allocation29_spill] sm:$0xff] %v13331_v43  ;;  %19565 = vst [vmem:[#allocation282_spill] sm:$0xff] %v13333_v11  ;;  %vm2258_vm11 = vcmp.lt.f32.partialorder %v19562_v31, %v19443_v14  ;;  %v13343_v28 = vmul.f32 %v5590_v18, %v5059_v50  ;;  %v19568_v32 = vld [vmem:[#allocation262_spill] sm:$0xff]  ;;  %v19581_v43 = vld [vmem:[#allocation35_spill] sm:$0xff] }
 0x371   :  { %v7711_v36 = vpack.c.bf16 %v6000_v42, %v5999_v63  ;;  %v3399_v21 = vsub.f32 %v19540_v23, %v19567_v22  ;;  %v4933_v47 = vmul.f32 %v4805_v7, %v4119_v58  ;;  %vm2118_vm12 = vcmp.ge.f32.partialorder %v19568_v32, %v18984_v24  ;;  %v19570_v63 = vld [vmem:[#allocation31_spill] sm:$0xff]  ;;  %4051 = vrot.lane.b32.xlu0 %v19546_v41, %s8557_s20  ;;  %vm13383_vm14 = vmand %vm2117_vm9, %vm2258_vm11  ;;  %v19576_v22 = vld [vmem:[#allocation33_spill] sm:$0xff]  ;;  %v13400_v11 = vpop.permute.xlu1 %8161 }
 0x372   :  { %19563 = vst [vmem:[#allocation23_spill] sm:$0xff] %v13328_v6  ;;  %19566 = vst [vmem:[#allocation283_spill] sm:$0xff] %v13343_v28  ;;  %vm2259_vm13 = vcmp.lt.f32.partialorder %v19568_v32, %v18986_v48  ;;  %v19569_v1 = vsub.f32 %v12649_v27, %v19536_v30  ;;  %v13358_v18 = vmul.f32 %v12700_v10, %v4671_v40  ;;  %3923 = vrot.lane.b32.xlu1 %v19544_v17, %s8557_s20 }
 0x373   :  { %v4675_v42 = vsub.f32 %v12652_v60, %v19570_v63  ;;  %v13367_v7 = vmul.f32 %v12697_v29, %v4672_v38  ;;  %v13375_v40 = vsel %vm2385_vm10, 1.0, %v19003_v55  ;;  %7712 = vmatprep.subr.bf16.mxu1 %v7711_v36  ;;  %v5521_v41 = vsub.f32 %v19527_v57, %v13201_v3  ;;  %v19575_v38 = vld [vmem:[#allocation182_spill] sm:$0xff]  ;;  %v13398_v31 = vpop.permute.xlu0 %3881  ;;  %19578 = vst [vmem:[#allocation285_spill] sm:$0xff] %v13400_v11  ;;  %vm2387_vm15 = vmand %vm2118_vm12, %vm2259_vm13  ;;  %v19580_v11 = vld [vmem:[#allocation163_spill] sm:$0xff] }
 0x374   :  { %v13355_v6 = vmul.f32 %v12697_v29, %v19569_v1  ;;  %v13372_v1 = vsel %vm13321_vm8, 1.0, %v19003_v55  ;;  %19572 = vst [vmem:[#allocation284_spill] sm:$0xff] %v13375_v40  ;;  %v5060_v58 = vadd.f32 %v4932_v25, %v19575_v38  ;;  %v13391_v49 = vmul.f32 %v10521_v2, %v3398_v51  ;;  %19577 = vst [vmem:[#allocation182_spill] sm:$0xff] %v13398_v31  ;;  %v19579_v25 = vld [vmem:[#allocation46_spill] sm:$0xff] }
 0x375   :  { %19571 = vst [vmem:[#allocation31_spill] sm:$0xff] %v13372_v1  ;;  %v13394_v63 = vmul.f32 %v12700_v10, %v4673_v19  ;;  %v4676_v28 = vsub.f32 %v12649_v27, %v19576_v22  ;;  %7714 = vmatpush3.bf16.msra.mxu1 %v7711_v36  ;;  %v13409_v51 = vmul.f32 %v19549_v37, %v3399_v21  ;;  %v19582_v21 = vld [vmem:[#allocation164_spill] sm:$0xff]  ;;  %v13449_v17 = vpop.permute.xlu1 %4009 }
 0x376   :  { %v4183_v19 = vsel %vm2784_vm7, %v12877_v9, %v12826_v62  ;;  %v5061_v38 = vadd.f32 %v4933_v47, %v19579_v25  ;;  %v13417_v57 = vmul.f32 %v12697_v29, %v4674_v59  ;;  %v3400_v31 = vsub.f32 %v19533_v34, %v19580_v11  ;;  %5323 = vrot.lane.b32.xlu1 %v5060_v58, %s8557_s20  ;;  %v19587_v25 = vld [vmem:[#allocation36_spill] sm:$0xff]  ;;  %v19591_v11 = vld [vmem:[#allocation38_spill] sm:$0xff] }
 0x377   :  { %v4677_v32 = vsub.f32 %v12652_v60, %v19581_v43  ;;  %5195 = vrot.lane.b32.xlu0 %v5059_v50, %s8557_s20  ;;  %v8220_v36 = vpack.i.bf16 %v13375_v40, %v13372_v1  ;;  %v3401_v62 = vsub.f32 %v19540_v23, %v19582_v21  ;;  %v13432_v9 = vsel %vm13383_vm14, 1.0, %v19003_v55  ;;  %v13447_v1 = vpop.permute.xlu0 %3883  ;;  %19589 = vst [vmem:[#allocation289_spill] sm:$0xff] %v13449_v17  ;;  %v19590_v21 = vld [vmem:[#allocation252_spill] sm:$0xff] }
 0x378   :  { %19583 = vst [vmem:[#allocation46_spill] sm:$0xff] %v13432_v9  ;;  %v13435_v59 = vsel %vm2387_vm15, 1.0, %v19003_v55  ;;  %v5591_v43 = vmul.f32 %v13254_v52, %v5521_v41  ;;  %v4934_v47 = vmul.f32 %v13249_v39, %v4183_v19  ;;  %v13440_v50 = vmul.f32 %v12700_v10, %v4675_v42  ;;  %19588 = vst [vmem:[#allocation288_spill] sm:$0xff] %v13447_v1  ;;  %v19592_v42 = vld [vmem:[#allocation40_spill] sm:$0xff] }
 0x379   :  { %19584 = vst [vmem:[#allocation35_spill] sm:$0xff] %v13435_v59  ;;  %v13443_v58 = vmul.f32 %v12697_v29, %v4676_v28  ;;  %v4678_v40 = vsub.f32 %v12649_v27, %v19587_v25  ;;  %v4120_v41 = vsel %vm2784_vm7, %v19590_v21, %v12952_v26  ;;  %v4679_v39 = vsub.f32 %v12652_v60, %v19591_v11  ;;  %v19594_v25 = vld [vmem:[#allocation41_spill] sm:$0xff] }
 0x37a   :  { %19585 = vst [vmem:[#allocation286_spill] sm:$0xff] %v13440_v50  ;;  %v4680_v19 = vsub.f32 %v12649_v27, %v19592_v42  ;;  %v13459_v28 = vmul.f32 %v5591_v43, %v5061_v38  ;;  %v13462_v22 = vmul.f32 %v10521_v2, %v3400_v31  ;;  %v4681_v1 = vsub.f32 %v12652_v60, %v19594_v25  ;;  %v19597_v25 = vld [vmem:[#allocation231_spill] sm:$0xff]  ;;  %v13484_v50 = vpop.permute.xlu1 %4011 }
 0x37b   :  { %19586 = vst [vmem:[#allocation287_spill] sm:$0xff] %v13443_v58  ;;  %8221 = vrot.lane.b32.xlu1 %v8220_v36, %s8557_s20  ;;  %5197 = vrot.lane.b32.xlu0 %v5061_v38, %s8557_s20  ;;  %v8225_v17 = vpack.i.bf16 %v13435_v59, %v13432_v9  ;;  %v3402_v11 = vsub.f32 %v19533_v34, %v19595_v33  ;;  %v19596_v58 = vld [vmem:[#allocation168_spill] sm:$0xff]  ;;  %v13482_v38 = vpop.permute.xlu0 %8166  ;;  %19599 = vst [vmem:[#allocation41_spill] sm:$0xff] %v13484_v50  ;;  %v19600_v59 = vld [vmem:[#allocation267_spill] sm:$0xff] }
 0x37c   :  { %19593 = vst [vmem:[#allocation252_spill] sm:$0xff] %v13459_v28  ;;  %v3403_v43 = vsub.f32 %v19540_v23, %v19596_v58  ;;  %v13475_v28 = vmul.f32 %v19549_v37, %v3401_v62  ;;  %v13478_v31 = vmul.f32 %v12700_v10, %v4677_v32  ;;  %v5062_v42 = vadd.f32 %v4934_v47, %v19597_v25  ;;  %v19601_v9 = vld [vmem:[#allocation91_spill] sm:$0xff]  ;;  %v19602_v47 = vld [vmem:[#allocation268_spill] sm:$0xff]  ;;  %v19613_v50 = vld [vmem:[#allocation66_spill] sm:$0xff] }
 0x37d   :  { %v4935_v36 = vmul.f32 %v13268_v0, %v4120_v41  ;;  %19598 = vst [vmem:[#allocation38_spill] sm:$0xff] %v13482_v38  ;;  %vm2119_vm1 = vcmp.ge.f32.partialorder %v19600_v59, %v19441_v20  ;;  %vm2260_vm2 = vcmp.lt.f32.partialorder %v19600_v59, %v19443_v14  ;;  %v8143_v62 = vunpack.i.l.bf16 %v19601_v9  ;;  %v19603_v0 = vld [vmem:[#allocation248_spill] sm:$0xff]  ;;  %v19604_v58 = vld [vmem:[#allocation43_spill] sm:$0xff]  ;;  %v19615_v14 = vld [vmem:[#allocation162_spill] sm:$0xff] }
 0x37e   :  { %v4184_v32 = vsel %vm2784_vm7, %v12952_v26, %v19590_v21  ;;  %vm2120_vm3 = vcmp.ge.f32.partialorder %v19602_v47, %v18984_v24  ;;  %vm2261_vm4 = vcmp.lt.f32.partialorder %v19602_v47, %v18986_v48  ;;  %v8079_v41 = vunpack.i.h.bf16 %v19603_v0  ;;  %vm13527_vm5 = vmand %vm2119_vm1, %vm2260_vm2 }
 0x37f   :  { %v13501_v25 = vmul.f32 %v12697_v29, %v4678_v40  ;;  %v4682_v33 = vsub.f32 %v12649_v27, %v19604_v58  ;;  %5325 = vrot.lane.b32.xlu1 %v5062_v42, %s8557_s20  ;;  %8226 = vrot.lane.b32.xlu0 %v8225_v17, %s8557_s20  ;;  %v5522_v26 = vsub.f32 %v19529_v16, %v13201_v3  ;;  %v13533_v16 = vpop.permute.xlu0 %4013  ;;  %vm2389_vm6 = vmand %vm2120_vm3, %vm2261_vm4  ;;  %v13579_v47 = vsel %vm13527_vm5, 1.0, %v19003_v55 }
 0x380   :  { %v13510_v21 = vmul.f32 %v10521_v2, %v3402_v11  ;;  %v13513_v38 = vmul.f32 %v12700_v10, %v4679_v39  ;;  %v13516_v0 = vmul.f32 %v12697_v29, %v4680_v19  ;;  %v13519_v40 = vmul.f32 %v12700_v10, %v4681_v1  ;;  %v19609_v39 = vld [vmem:[#allocation156_spill] sm:$0xff]  ;;  %19610 = vst [vmem:[#allocation248_spill] sm:$0xff] %v13533_v16  ;;  %v13535_v19 = vpop.permute.xlu1 %3885  ;;  %v19612_v1 = vld [vmem:[#allocation178_spill] sm:$0xff] }
 0x381   :  { %v4936_v42 = vmul.f32 %v13271_v61, %v4184_v32  ;;  %v5063_v11 = vadd.f32 %v4935_v36, %v19609_v39  ;;  %19611 = vst [vmem:[#allocation156_spill] sm:$0xff] %v13535_v19  ;;  %v13539_v58 = vadd.f32 %v19613_v50, %v19612_v1  ;;  %v2818_v20 = vsel %vm2784_vm7, %v8079_v41, %v8143_v62  ;;  %v19618_v36 = vld [vmem:[#allocation169_spill] sm:$0xff]  ;;  %v19619_v32 = vld [vmem:[#allocation44_spill] sm:$0xff]  ;;  %v19620_v39 = vld [vmem:[#allocation170_spill] sm:$0xff] }
 0x382   :  { %19605 = vst [vmem:[#allocation231_spill] sm:$0xff] %v13516_v0  ;;  %19606 = vst [vmem:[#allocation91_spill] sm:$0xff] %v13519_v40  ;;  %v19616_v40 = vld [vmem:[#allocation242_spill] sm:$0xff]  ;;  %v13554_v61 = vmul.f32 %v19549_v37, %v3403_v43  ;;  %v3404_v50 = vsub.f32 %v19533_v34, %v19618_v36  ;;  %v4121_v48 = vsel %vm2784_vm7, %v13003_v44, %v13001_v53  ;;  %v8144_v17 = vunpack.i.h.bf16 %v19601_v9 }
 0x383   :  { %19614 = vst [vmem:[#allocation178_spill] sm:$0xff] %v13539_v58  ;;  %v13543_v0 = vadd.f32 %v19616_v40, %v19615_v14  ;;  %v4683_v40 = vsub.f32 %v12652_v60, %v19619_v32  ;;  %v13565_v24 = vmul.f32 %v12697_v29, %v4682_v33  ;;  %4053 = vrot.lane.b32.xlu1 %v13539_v58, %s8557_s20  ;;  %v19621_v14 = vld [vmem:[#allocation48_spill] sm:$0xff]  ;;  %19622 = vst [vmem:[#allocation162_spill] sm:$0xff] %v13579_v47  ;;  %v19625_v36 = vld [vmem:[#allocation50_spill] sm:$0xff]  ;;  %v13588_v19 = vpop.permute.xlu0 %4015 }
 0x384   :  { %v5592_v43 = vmul.f32 %v13254_v52, %v5522_v26  ;;  %v3405_v1 = vsub.f32 %v19540_v23, %v19620_v39  ;;  %v4684_v32 = vsub.f32 %v12649_v27, %v19621_v14  ;;  %v13582_v33 = vsel %vm2389_vm6, 1.0, %v19003_v55  ;;  %v19624_v58 = vld [vmem:[#allocation232_spill] sm:$0xff]  ;;  %19626 = vst [vmem:[#allocation44_spill] sm:$0xff] %v13588_v19  ;;  %v13590_v39 = vpop.permute.xlu1 %3887  ;;  %v19631_v19 = vld [vmem:[#allocation53_spill] sm:$0xff] }
 0x385   :  { %19617 = vst [vmem:[#allocation66_spill] sm:$0xff] %v13543_v0  ;;  %3925 = vrot.lane.b32.xlu0 %v13543_v0, %s8557_s20  ;;  %19623 = vst [vmem:[#allocation242_spill] sm:$0xff] %v13582_v33  ;;  %v3663_v59 = vmul.f32 %v13246_v15, %v2818_v20  ;;  %v5064_v0 = vadd.f32 %v4936_v42, %v19624_v58  ;;  %v4685_v26 = vsub.f32 %v12652_v60, %v19625_v36  ;;  %v19629_v58 = vld [vmem:[#allocation277_spill] sm:$0xff]  ;;  %v19630_v20 = vld [vmem:[#allocation171_spill] sm:$0xff] }
 0x386   :  { %19627 = vst [vmem:[#allocation232_spill] sm:$0xff] %v13590_v39  ;;  %v13592_v16 = vmul.f32 %v5592_v43, %v5063_v11  ;;  %v2882_v14 = vsel %vm2784_vm7, %v8143_v62, %v8079_v41  ;;  %v4937_v55 = vmul.f32 %v13355_v6, %v4121_v48  ;;  %v13599_v15 = vmul.f32 %v12700_v10, %v4683_v40  ;;  %v19632_v62 = vld [vmem:[#allocation174_spill] sm:$0xff] }
 0x387   :  { %v8083_v42 = vunpack.i.l.bf16 %v19629_v58  ;;  %v3406_v36 = vsub.f32 %v19533_v34, %v19630_v20  ;;  %v4686_v39 = vsub.f32 %v12649_v27, %v19631_v19  ;;  %5327 = vrot.lane.b32.xlu1 %v5064_v0, %s8557_s20  ;;  %v8230_v9 = vpack.i.bf16 %v13582_v33, %v13579_v47  ;;  %v13627_v33 = vpop.permute.xlu0 %3889  ;;  %v19638_v20 = vld [vmem:[#allocation55_spill] sm:$0xff] }
 0x388   :  { %19628 = vst [vmem:[#allocation50_spill] sm:$0xff] %v13592_v16  ;;  %v3407_v6 = vsub.f32 %v19540_v23, %v19632_v62  ;;  %v13613_v41 = vmul.f32 %v10521_v2, %v3404_v50  ;;  %v13616_v40 = vmul.f32 %v19549_v37, %v3405_v1  ;;  %v5523_v48 = vsub.f32 %v19536_v30, %v13201_v3  ;;  %v13629_v47 = vpop.permute.xlu1 %8171  ;;  %v19635_v50 = vld [vmem:[#allocation160_spill] sm:$0xff] }
 0x389   :  { %5199 = vrot.lane.b32.xlu0 %v5063_v11, %s8557_s20  ;;  %v3664_v43 = vmul.f32 %v13265_v5, %v2882_v14  ;;  %v13622_v0 = vmul.f32 %v12697_v29, %v4684_v32  ;;  %v13625_v11 = vmul.f32 %v12700_v10, %v4685_v26  ;;  %19633 = vst [vmem:[#allocation277_spill] sm:$0xff] %v13627_v33  ;;  %19634 = vst [vmem:[#allocation290_spill] sm:$0xff] %v13629_v47  ;;  %v19637_v14 = vld [vmem:[#allocation234_spill] sm:$0xff]  ;;  %v19644_v33 = vld [vmem:[#allocation259_spill] sm:$0xff] }
 0x38a   :  { %v13632_v62 = vadd.f32 %v3663_v59, %v19635_v50  ;;  %v2819_v1 = vsel %vm2784_vm7, %v8083_v42, %v8144_v17  ;;  %v4185_v5 = vsel %vm2784_vm7, %v13001_v53, %v13003_v44  ;;  %v5065_v32 = vadd.f32 %v4937_v55, %v19637_v14  ;;  %v19639_v59 = vld [vmem:[#allocation59_spill] sm:$0xff] }
 0x38b   :  { %v4687_v26 = vsub.f32 %v12652_v60, %v19638_v20  ;;  %v13644_v30 = vmul.f32 %v10521_v2, %v3406_v36  ;;  %v13647_v16 = vmul.f32 %v12697_v29, %v4686_v39  ;;  %v4688_v50 = vsub.f32 %v12649_v27, %v19639_v59  ;;  %8231 = vrot.lane.b32.xlu1 %v8230_v9, %s8557_s20  ;;  %v19640_v53 = vld [vmem:[#allocation175_spill] sm:$0xff]  ;;  %v19641_v20 = vld [vmem:[#allocation60_spill] sm:$0xff] }
 0x38c   :  { %19636 = vst [vmem:[#allocation160_spill] sm:$0xff] %v13632_v62  ;;  %v13655_v44 = vmul.f32 %v19549_v37, %v3407_v6  ;;  %v3408_v55 = vsub.f32 %v19533_v34, %v19640_v53  ;;  %v4689_v36 = vsub.f32 %v12652_v60, %v19641_v20  ;;  %v5593_v39 = vmul.f32 %v13254_v52, %v5523_v48  ;;  %v13670_v6 = vpop.permute.xlu1 %4017  ;;  %v19646_v48 = vld [vmem:[#allocation73_spill] sm:$0xff] }
 0x38d   :  { %3927 = vrot.lane.b32.xlu0 %v13632_v62, %s8557_s20  ;;  %v3665_v14 = vmul.f32 %v13391_v49, %v2819_v1  ;;  %v4938_v47 = vmul.f32 %v13358_v18, %v4185_v5  ;;  %v4122_v9 = vsel %vm2784_vm7, %v13058_v8, %v13056_v46  ;;  %v13668_v62 = vpop.permute.xlu0 %3891  ;;  %19643 = vst [vmem:[#allocation55_spill] sm:$0xff] %v13670_v6  ;;  %v8148_v59 = vunpack.i.l.bf16 %v19646_v48  ;;  %v19649_v5 = vld [vmem:[#allocation176_spill] sm:$0xff] }
 0x38e   :  { %19642 = vst [vmem:[#allocation234_spill] sm:$0xff] %v13668_v62  ;;  %v13673_v53 = vadd.f32 %v3664_v43, %v19644_v33  ;;  %v2883_v20 = vsel %vm2784_vm7, %v8144_v17, %v8083_v42  ;;  %v13679_v49 = vmul.f32 %v12700_v10, %v4687_v26  ;;  %v13681_v18 = vmul.f32 %v5593_v39, %v5065_v32  ;;  %v19651_v33 = vld [vmem:[#allocation63_spill] sm:$0xff]  ;;  %v19653_v26 = vld [vmem:[#allocation64_spill] sm:$0xff] }
 0x38f   :  { %v8084_v1 = vunpack.i.h.bf16 %v19629_v58  ;;  %v3409_v62 = vsub.f32 %v19540_v23, %v19649_v5  ;;  %v13687_v6 = vmul.f32 %v12697_v29, %v4688_v50  ;;  %v4690_v43 = vsub.f32 %v12649_v27, %v19651_v33  ;;  %v19654_v5 = vld [vmem:[#allocation233_spill] sm:$0xff] }
 0x390   :  { %19645 = vst [vmem:[#allocation60_spill] sm:$0xff] %v13673_v53  ;;  %19647 = vst [vmem:[#allocation259_spill] sm:$0xff] %v13679_v49  ;;  %4055 = vrot.lane.b32.xlu1 %v13673_v53, %s8557_s20  ;;  %v4939_v17 = vmul.f32 %v13367_v7, %v4122_v9  ;;  %v13696_v42 = vmul.f32 %v10521_v2, %v3408_v55  ;;  %v13699_v58 = vmul.f32 %v12700_v10, %v4689_v36  ;;  %v19656_v53 = vld [vmem:[#allocation67_spill] sm:$0xff]  ;;  %v19658_v7 = vld [vmem:[#allocation166_spill] sm:$0xff] }
 0x391   :  { %19648 = vst [vmem:[#allocation73_spill] sm:$0xff] %v13681_v18  ;;  %19650 = vst [vmem:[#allocation291_spill] sm:$0xff] %v13687_v6  ;;  %5201 = vrot.lane.b32.xlu0 %v5065_v32, %s8557_s20  ;;  %v4691_v50 = vsub.f32 %v12652_v60, %v19653_v26  ;;  %v3666_v39 = vmul.f32 %v13409_v51, %v2883_v20  ;;  %v5066_v18 = vadd.f32 %v4938_v47, %v19654_v5  ;;  %v13705_v33 = vpop.permute.xlu0 %8176  ;;  %v13709_v6 = vpop.permute.xlu1 %4019  ;;  %v19660_v20 = vld [vmem:[#allocation254_spill] sm:$0xff] }
 0x392   :  { %19652 = vst [vmem:[#allocation292_spill] sm:$0xff] %v13699_v58  ;;  %19655 = vst [vmem:[#allocation64_spill] sm:$0xff] %v13705_v33  ;;  %v4692_v32 = vsub.f32 %v12649_v27, %v19656_v53  ;;  %v13712_v55 = vadd.f32 %v3665_v14, %v19658_v7  ;;  %v2820_v36 = vsel %vm2784_vm7, %v8084_v1, %v8148_v59  ;;  %v8088_v5 = vunpack.i.l.bf16 %v19660_v20  ;;  %v19662_v7 = vld [vmem:[#allocation70_spill] sm:$0xff]  ;;  %v19664_v53 = vld [vmem:[#allocation180_spill] sm:$0xff] }
 0x393   :  { %19657 = vst [vmem:[#allocation233_spill] sm:$0xff] %v13709_v6  ;;  %v4186_v51 = vsel %vm2784_vm7, %v13056_v46, %v13058_v8  ;;  %v4123_v47 = vsel %vm2784_vm7, %v13110_v4, %v13174_v54  ;;  %v5524_v9 = vsub.f32 %v19552_v13, %v13201_v3  ;;  %v13728_v14 = vmul.f32 %v19549_v37, %v3409_v62  ;;  %v19663_v46 = vld [vmem:[#allocation236_spill] sm:$0xff]  ;;  %v19665_v62 = vld [vmem:[#allocation74_spill] sm:$0xff] }
 0x394   :  { %19659 = vst [vmem:[#allocation166_spill] sm:$0xff] %v13712_v55  ;;  %v13731_v26 = vmul.f32 %v12697_v29, %v4690_v43  ;;  %v4693_v33 = vsub.f32 %v12652_v60, %v19662_v7  ;;  %5329 = vrot.lane.b32.xlu1 %v5066_v18, %s8557_s20  ;;  %v8149_v8 = vunpack.i.h.bf16 %v19646_v48  ;;  %v5067_v13 = vadd.f32 %v4939_v17, %v19663_v46 }
 0x395   :  { %3929 = vrot.lane.b32.xlu0 %v13712_v55, %s8557_s20  ;;  %v3410_v6 = vsub.f32 %v19533_v34, %v19664_v53  ;;  %v4694_v58 = vsub.f32 %v12649_v27, %v19665_v62  ;;  %v3667_v43 = vmul.f32 %v13462_v22, %v2820_v36  ;;  %v4941_v7 = vmul.f32 %v13417_v57, %v4123_v47  ;;  %v13747_v18 = vpop.permute.xlu0 %4021  ;;  %v13749_v49 = vpop.permute.xlu1 %3893  ;;  %v19668_v55 = vld [vmem:[#allocation199_spill] sm:$0xff]  ;;  %v19681_v62 = vld [vmem:[#allocation126_spill] sm:$0xff] }
 0x396   :  { %19661 = vst [vmem:[#allocation254_spill] sm:$0xff] %v13731_v26  ;;  %v4940_v26 = vmul.f32 %v13394_v63, %v4186_v51  ;;  %19666 = vst [vmem:[#allocation70_spill] sm:$0xff] %v13747_v18  ;;  %v13752_v48 = vadd.f32 %v3666_v39, %v19668_v55  ;;  %v2884_v17 = vsel %vm2784_vm7, %v8148_v59, %v8084_v1  ;;  %v19672_v63 = vld [vmem:[#allocation183_spill] sm:$0xff] }
 0x397   :  { %19667 = vst [vmem:[#allocation236_spill] sm:$0xff] %v13749_v49  ;;  %v13757_v46 = vmul.f32 %v12700_v10, %v4691_v50  ;;  %v13760_v53 = vmul.f32 %v12697_v29, %v4692_v32  ;;  %v5594_v22 = vmul.f32 %v13254_v52, %v5524_v9  ;;  %v3411_v57 = vsub.f32 %v19540_v23, %v19672_v63  ;;  %v19674_v50 = vld [vmem:[#allocation76_spill] sm:$0xff]  ;;  %v19677_v51 = vld [vmem:[#allocation235_spill] sm:$0xff] }
 0x398   :  { %19669 = vst [vmem:[#allocation199_spill] sm:$0xff] %v13752_v48  ;;  %v13766_v36 = vmul.f32 %v12700_v10, %v4693_v33  ;;  %4057 = vrot.lane.b32.xlu1 %v13752_v48, %s8557_s20  ;;  %v5525_v59 = vsub.f32 %v19559_v45, %v13201_v3  ;;  %v2821_v1 = vsel %vm2784_vm7, %v8088_v5, %v8149_v8  ;;  %v19678_v9 = vld [vmem:[#allocation191_spill] sm:$0xff]  ;;  %v19732_v49 = vld [vmem:[#allocation20_spill] sm:$0xff] }
 0x399   :  { %19670 = vst [vmem:[#allocation293_spill] sm:$0xff] %v13757_v46  ;;  %19671 = vst [vmem:[#allocation294_spill] sm:$0xff] %v13760_v53  ;;  %5203 = vrot.lane.b32.xlu0 %v5067_v13, %s8557_s20  ;;  %v4695_v39 = vsub.f32 %v12652_v60, %v19674_v50  ;;  %v13778_v32 = vmul.f32 %v12697_v29, %v4694_v58  ;;  %v13780_v55 = vmul.f32 %v5594_v22, %v5067_v13  ;;  %v13785_v63 = vpop.permute.xlu0 %4023  ;;  %v13787_v45 = vpop.permute.xlu1 %3895  ;;  %v19686_v50 = vld [vmem:[#allocation187_spill] sm:$0xff] }
 0x39a   :  { %19673 = vst [vmem:[#allocation295_spill] sm:$0xff] %v13766_v36  ;;  %v3668_v33 = vmul.f32 %v13475_v28, %v2884_v17  ;;  %v5068_v47 = vadd.f32 %v4940_v26, %v19677_v51  ;;  %v5069_v48 = vadd.f32 %v4941_v7, %v19678_v9  ;;  %19679 = vst [vmem:[#allocation235_spill] sm:$0xff] %v13785_v63  ;;  %v19684_v17 = vld [vmem:[#allocation185_spill] sm:$0xff]  ;;  %v19687_v9 = vld [vmem:[#allocation188_spill] sm:$0xff] }
 0x39b   :  { %19675 = vst [vmem:[#allocation76_spill] sm:$0xff] %v13778_v32  ;;  %19676 = vst [vmem:[#allocation296_spill] sm:$0xff] %v13780_v55  ;;  %v13790_v36 = vadd.f32 %v3667_v43, %v19681_v62  ;;  %v4187_v58 = vsel %vm2784_vm7, %v13174_v54, %v13110_v4  ;;  %v13797_v13 = vmul.f32 %v10521_v2, %v3410_v6  ;;  %v19689_v55 = vld [vmem:[#allocation287_spill] sm:$0xff] }
 0x39c   :  { %19680 = vst [vmem:[#allocation191_spill] sm:$0xff] %v13787_v45  ;;  %v4124_v28 = vsel %vm2784_vm7, %v13172_v12, %v13231_v35  ;;  %v3412_v62 = vsub.f32 %v19533_v34, %v19684_v17  ;;  %5331 = vrot.lane.b32.xlu1 %v5068_v47, %s8557_s20  ;;  %v5595_v54 = vmul.f32 %v13254_v52, %v5525_v59  ;;  %v19688_v17 = vld [vmem:[#allocation286_spill] sm:$0xff]  ;;  %v19692_v59 = vld [vmem:[#allocation261_spill] sm:$0xff]  ;;  %v19716_v45 = vld [vmem:[#allocation103_spill] sm:$0xff] }
 0x39d   :  { %19682 = vst [vmem:[#allocation126_spill] sm:$0xff] %v13790_v36  ;;  %3931 = vrot.lane.b32.xlu0 %v13790_v36, %s8557_s20  ;;  %v2885_v4 = vsel %vm2784_vm7, %v8149_v8, %v8088_v5  ;;  %v3669_v6 = vmul.f32 %v13510_v21, %v2821_v1  ;;  %v3413_v51 = vsub.f32 %v19540_v23, %v19686_v50  ;;  %v13822_v43 = vpop.permute.xlu0 %3897  ;;  %v13824_v36 = vpop.permute.xlu1 %8181  ;;  %v19695_v21 = vld [vmem:[#allocation115_spill] sm:$0xff]  ;;  %v19696_v50 = vld [vmem:[#allocation45_spill] sm:$0xff] }
 0x39e   :  { %v3414_v7 = vsub.f32 %v19533_v34, %v19687_v9  ;;  %v4942_v22 = vmul.f32 %v19688_v17, %v4187_v58  ;;  %v4943_v47 = vmul.f32 %v19689_v55, %v4124_v28  ;;  %19690 = vst [vmem:[#allocation286_spill] sm:$0xff] %v13822_v43  ;;  %19691 = vst [vmem:[#allocation287_spill] sm:$0xff] %v13824_v36  ;;  %v8153_v8 = vunpack.i.l.bf16 %v19695_v21  ;;  %v19698_v17 = vld [vmem:[#allocation47_spill] sm:$0xff]  ;;  %v19703_v43 = vld [vmem:[#allocation153_spill] sm:$0xff] }
 0x39f   :  { %v13827_v26 = vadd.f32 %v3668_v33, %v19692_v59  ;;  %v13829_v5 = vmul.f32 %v5595_v54, %v5069_v48  ;;  %v13833_v1 = vmul.f32 %v19549_v37, %v3411_v57  ;;  %v3415_v9 = vsub.f32 %v19540_v23, %v19696_v50  ;;  %v19700_v57 = vld [vmem:[#allocation33_spill] sm:$0xff]  ;;  %v19702_v50 = vld [vmem:[#allocation239_spill] sm:$0xff] }
 0x3a0   :  { %v8089_v28 = vunpack.i.h.bf16 %v19660_v20  ;;  %v3416_v36 = vsub.f32 %v19533_v34, %v19698_v17  ;;  %v13843_v33 = vmul.f32 %v12700_v10, %v4695_v39  ;;  %v5526_v54 = vsub.f32 %v19700_v57, %v13201_v3  ;;  %v19701_v17 = vld [vmem:[#allocation51_spill] sm:$0xff] }
 0x3a1   :  { %19693 = vst [vmem:[#allocation261_spill] sm:$0xff] %v13827_v26  ;;  %19694 = vst [vmem:[#allocation297_spill] sm:$0xff] %v13829_v5  ;;  %4059 = vrot.lane.b32.xlu1 %v13827_v26, %s8557_s20  ;;  %5205 = vrot.lane.b32.xlu0 %v5069_v48, %s8557_s20  ;;  %v3670_v59 = vmul.f32 %v13554_v61, %v2885_v4  ;;  %v13852_v55 = vmul.f32 %v10521_v2, %v3412_v62  ;;  %v13864_v58 = vpop.permute.xlu0 %3899  ;;  %v13866_v57 = vpop.permute.xlu1 %4025  ;;  %v19706_v61 = vld [vmem:[#allocation15_spill] sm:$0xff] }
 0x3a2   :  { %19699 = vst [vmem:[#allocation115_spill] sm:$0xff] %v13843_v33  ;;  %v13855_v20 = vmul.f32 %v19549_v37, %v3413_v51  ;;  %v3417_v39 = vsub.f32 %v19540_v23, %v19701_v17  ;;  %v5070_v5 = vadd.f32 %v4942_v22, %v19702_v50  ;;  %v5071_v26 = vadd.f32 %v4943_v47, %v19703_v43  ;;  %v19708_v50 = vld [vmem:[#allocation154_spill] sm:$0xff]  ;;  %v19709_v43 = vld [vmem:[#allocation25_spill] sm:$0xff]  ;;  %v19710_v47 = vld [vmem:[#allocation279_spill] sm:$0xff] }
 0x3a3   :  { %v13862_v48 = vmul.f32 %v10521_v2, %v3414_v7  ;;  %19704 = vst [vmem:[#allocation239_spill] sm:$0xff] %v13864_v58  ;;  %19705 = vst [vmem:[#allocation153_spill] sm:$0xff] %v13866_v57  ;;  %v13869_v62 = vadd.f32 %v3669_v6, %v19706_v61  ;;  %v2822_v4 = vsel %vm2784_vm7, %v8089_v28, %v8153_v8  ;;  %v8093_v17 = vunpack.i.l.bf16 %v19710_v47  ;;  %v19711_v6 = vld [vmem:[#allocation52_spill] sm:$0xff]  ;;  %v19714_v57 = vld [vmem:[#allocation223_spill] sm:$0xff] }
 0x3a4   :  { %v4188_v22 = vsel %vm2784_vm7, %v13231_v35, %v13172_v12  ;;  %v4125_v7 = vsel %vm2784_vm7, %v19709_v43, %v19708_v50  ;;  %v13882_v51 = vmul.f32 %v19549_v37, %v3415_v9  ;;  %v3418_v61 = vsub.f32 %v19533_v34, %v19711_v6  ;;  %v19721_v32 = vld [vmem:[#allocation107_spill] sm:$0xff] }
 0x3a5   :  { %19707 = vst [vmem:[#allocation15_spill] sm:$0xff] %v13869_v62  ;;  %v13888_v58 = vmul.f32 %v10521_v2, %v3416_v36  ;;  %5333 = vrot.lane.b32.xlu1 %v5070_v5, %s8557_s20  ;;  %3933 = vrot.lane.b32.xlu0 %v13869_v62, %s8557_s20  ;;  %v5596_v35 = vmul.f32 %v13254_v52, %v5526_v54  ;;  %v8154_v12 = vunpack.i.h.bf16 %v19695_v21  ;;  %v13906_v62 = vpop.permute.xlu0 %8186  ;;  %v13908_v54 = vpop.permute.xlu1 %4027 }
 0x3a6   :  { %v13896_v9 = vmul.f32 %v19549_v37, %v3417_v39  ;;  %v13899_v33 = vadd.f32 %v3670_v59, %v19714_v57  ;;  %v4705_v6 = vsub.f32 %v12652_v60, %v19716_v45  ;;  %v3671_v36 = vmul.f32 %v13613_v41, %v2822_v4  ;;  %19717 = vst [vmem:[#allocation223_spill] sm:$0xff] %v13906_v62  ;;  %v19720_v57 = vld [vmem:[#allocation56_spill] sm:$0xff]  ;;  %v19727_v59 = vld [vmem:[#allocation114_spill] sm:$0xff]  ;;  %v19729_v62 = vld [vmem:[#allocation241_spill] sm:$0xff] }
 0x3a7   :  { %19712 = vst [vmem:[#allocation154_spill] sm:$0xff] %v13888_v58  ;;  %v4944_v5 = vmul.f32 %v13478_v31, %v4188_v22  ;;  %v4945_v63 = vmul.f32 %v13501_v25, %v4125_v7  ;;  %19718 = vst [vmem:[#allocation103_spill] sm:$0xff] %v13908_v54  ;;  %v13910_v21 = vmul.f32 %v5596_v35, %v5071_v26  ;;  %v19722_v41 = vld [vmem:[#allocation108_spill] sm:$0xff]  ;;  %v19726_v35 = vld [vmem:[#allocation57_spill] sm:$0xff] }
 0x3a8   :  { %19713 = vst [vmem:[#allocation25_spill] sm:$0xff] %v13896_v9  ;;  %19715 = vst [vmem:[#allocation279_spill] sm:$0xff] %v13899_v33  ;;  %v2886_v39 = vsel %vm2784_vm7, %v8153_v8, %v8089_v28  ;;  %v4706_v45 = vsub.f32 %v12649_v27, %v19721_v32  ;;  %v4707_v31 = vsub.f32 %v12652_v60, %v19722_v41  ;;  %v19724_v4 = vld [vmem:[#allocation112_spill] sm:$0xff] }
 0x3a9   :  { %19719 = vst [vmem:[#allocation298_spill] sm:$0xff] %v13910_v21  ;;  %v13921_v25 = vmul.f32 %v10521_v2, %v3418_v61  ;;  %4061 = vrot.lane.b32.xlu1 %v13899_v33, %s8557_s20  ;;  %5207 = vrot.lane.b32.xlu0 %v5071_v26, %s8557_s20  ;;  %v4708_v8 = vsub.f32 %v12649_v27, %v19724_v4  ;;  %v19725_v28 = vld [vmem:[#allocation36_spill] sm:$0xff]  ;;  %v13940_v54 = vpop.permute.xlu0 %4029 }
 0x3aa   :  { %v5527_v22 = vsub.f32 %v19725_v28, %v13201_v3  ;;  %v2823_v7 = vsel %vm2784_vm7, %v8093_v17, %v8154_v12  ;;  %v4844_v61 = vmul.f32 %v12700_v10, %v4705_v6  ;;  %v4709_v21 = vsub.f32 %v12652_v60, %v19727_v59  ;;  %v19728_v26 = vld [vmem:[#allocation8_spill] sm:$0xff]  ;;  %19730 = vst [vmem:[#allocation114_spill] sm:$0xff] %v13940_v54  ;;  %v13942_v28 = vpop.permute.xlu1 %3901 }
 0x3ab   :  { %19723 = vst [vmem:[#allocation108_spill] sm:$0xff] %v13921_v25  ;;  %v3672_v33 = vmul.f32 %v13616_v40, %v2886_v39  ;;  %v5072_v32 = vadd.f32 %v4944_v5, %v19728_v26  ;;  %v5073_v4 = vadd.f32 %v4945_v63, %v19729_v62  ;;  %19731 = vst [vmem:[#allocation8_spill] sm:$0xff] %v13942_v28  ;;  %v19734_v39 = vld [vmem:[#allocation118_spill] sm:$0xff]  ;;  %v19735_v63 = vld [vmem:[#allocation29_spill] sm:$0xff] }
 0x3ac   :  { %v13945_v18 = vadd.f32 %v3671_v36, %v19732_v49  ;;  %v4189_v6 = vsel %vm2784_vm7, %v19708_v50, %v19709_v43  ;;  %v4845_v59 = vmul.f32 %v12697_v29, %v4706_v45  ;;  %v4846_v40 = vmul.f32 %v12700_v10, %v4707_v31  ;;  %v19736_v62 = vld [vmem:[#allocation282_spill] sm:$0xff]  ;;  %v19737_v31 = vld [vmem:[#allocation119_spill] sm:$0xff] }
 0x3ad   :  { %v4710_v5 = vsub.f32 %v12649_v27, %v19734_v39  ;;  %v4126_v26 = vsel %vm2784_vm7, %v19736_v62, %v19735_v63  ;;  %5335 = vrot.lane.b32.xlu1 %v5072_v32, %s8557_s20  ;;  %v13963_v49 = vmul.f32 %v12697_v29, %v4708_v8  ;;  %v5597_v50 = vmul.f32 %v13254_v52, %v5527_v22  ;;  %v19738_v32 = vld [vmem:[#allocation278_spill] sm:$0xff]  ;;  %v13976_v28 = vpop.permute.xlu0 %4031 }
 0x3ae   :  { %19733 = vst [vmem:[#allocation241_spill] sm:$0xff] %v13945_v18  ;;  %3935 = vrot.lane.b32.xlu0 %v13945_v18, %s8557_s20  ;;  %v2887_v43 = vsel %vm2784_vm7, %v8154_v12, %v8093_v17  ;;  %v3673_v36 = vmul.f32 %v13644_v30, %v2823_v7  ;;  %v13970_v45 = vmul.f32 %v12700_v10, %v4709_v21  ;;  %v8158_v39 = vunpack.i.l.bf16 %v19738_v32  ;;  %v13978_v8 = vpop.permute.xlu1 %3903  ;;  %v19741_v22 = vld [vmem:[#allocation34_spill] sm:$0xff]  ;;  %v19744_v30 = vld [vmem:[#allocation231_spill] sm:$0xff] }
 0x3af   :  { %v4711_v41 = vsub.f32 %v12652_v60, %v19737_v31  ;;  %v4946_v18 = vmul.f32 %v13513_v38, %v4189_v6  ;;  %19739 = vst [vmem:[#allocation20_spill] sm:$0xff] %v13976_v28  ;;  %19740 = vst [vmem:[#allocation29_spill] sm:$0xff] %v13978_v8  ;;  %v13981_v54 = vadd.f32 %v3672_v33, %v19741_v22  ;;  %v19745_v38 = vld [vmem:[#allocation123_spill] sm:$0xff]  ;;  %v8094_v31 = vunpack.i.h.bf16 %v19710_v47  ;;  %v19746_v33 = vld [vmem:[#allocation124_spill] sm:$0xff] }
 0x3b0   :  { %v13983_v17 = vmul.f32 %v5597_v50, %v5073_v4  ;;  %v4947_v12 = vmul.f32 %v19744_v30, %v4126_v26  ;;  %v4202_v21 = vsel %vm2784_vm7, %v13976_v28, %v13978_v8  ;;  %v13991_v7 = vmul.f32 %v12697_v29, %v4710_v5  ;;  %v19747_v50 = vld [vmem:[#allocation128_spill] sm:$0xff]  ;;  %v19748_v30 = vld [vmem:[#allocation141_spill] sm:$0xff] }
 0x3b1   :  { %19742 = vst [vmem:[#allocation282_spill] sm:$0xff] %v13981_v54  ;;  %v4712_v6 = vsub.f32 %v12649_v27, %v19745_v38  ;;  %v4972_v53 = vmul.f32 %v4844_v61, %v4202_v21  ;;  %4063 = vrot.lane.b32.xlu1 %v13981_v54, %s8557_s20  ;;  %v4713_v26 = vsub.f32 %v12652_v60, %v19746_v33  ;;  %v19750_v38 = vld [vmem:[#allocation129_spill] sm:$0xff]  ;;  %v19751_v61 = vld [vmem:[#allocation40_spill] sm:$0xff]  ;;  %v19752_v54 = vld [vmem:[#allocation58_spill] sm:$0xff] }
 0x3b2   :  { %19743 = vst [vmem:[#allocation119_spill] sm:$0xff] %v13983_v17  ;;  %5209 = vrot.lane.b32.xlu0 %v5073_v4, %s8557_s20  ;;  %v4714_v22 = vsub.f32 %v12649_v27, %v19747_v50  ;;  %v3674_v5 = vmul.f32 %v13655_v44, %v2887_v43  ;;  %v14005_v17 = vadd.f32 %v3673_v36, %v19748_v30  ;;  %v19753_v44 = vld [vmem:[#allocation111_spill] sm:$0xff]  ;;  %v3906_v36 = vpop.permute.xlu0 %3905  ;;  %v14021_v30 = vpop.permute.xlu1 %8191  ;;  %v19757_v28 = vld [vmem:[#allocation289_spill] sm:$0xff] }
 0x3b3   :  { %v4715_v47 = vsub.f32 %v12652_v60, %v19750_v38  ;;  %v5528_v21 = vsub.f32 %v19751_v61, %v13201_v3  ;;  %v2824_v4 = vsel %vm2784_vm7, %v8094_v31, %v8158_v39  ;;  %v5074_v8 = vadd.f32 %v4946_v18, %v19752_v54  ;;  %19755 = vst [vmem:[#allocation231_spill] sm:$0xff] %v14021_v30  ;;  %v19756_v38 = vld [vmem:[#allocation243_spill] sm:$0xff]  ;;  %v19758_v61 = vld [vmem:[#allocation182_spill] sm:$0xff] }
 0x3b4   :  { %19749 = vst [vmem:[#allocation278_spill] sm:$0xff] %v14005_v17  ;;  %v4190_v33 = vsel %vm2784_vm7, %v19735_v63, %v19736_v62  ;;  %v14019_v43 = vadd.f32 %v4972_v53, %v19753_v44  ;;  %v5075_v50 = vadd.f32 %v4947_v12, %v19756_v38  ;;  %v4127_v46 = vsel %vm2784_vm7, %v19758_v61, %v19757_v28  ;;  %v19759_v63 = vld [vmem:[#allocation255_spill] sm:$0xff] }
 0x3b5   :  { %v14029_v18 = vmul.f32 %v12700_v10, %v4711_v41  ;;  %v14032_v54 = vmul.f32 %v12697_v29, %v4712_v6  ;;  %v8098_v62 = vunpack.i.l.bf16 %v19759_v63  ;;  %5337 = vrot.lane.b32.xlu1 %v5074_v8, %s8557_s20  ;;  %v14039_v53 = vmul.f32 %v12700_v10, %v4713_v26  ;;  %v19760_v44 = vld [vmem:[#allocation131_spill] sm:$0xff] }
 0x3b6   :  { %19754 = vst [vmem:[#allocation34_spill] sm:$0xff] %v14019_v43  ;;  %3937 = vrot.lane.b32.xlu0 %v14005_v17, %s8557_s20  ;;  %v14042_v12 = vmul.f32 %v12697_v29, %v4714_v22  ;;  %v4716_v41 = vsub.f32 %v12649_v27, %v19760_v44  ;;  %v8159_v38 = vunpack.i.h.bf16 %v19738_v32  ;;  %v3675_v6 = vmul.f32 %v13696_v42, %v2824_v4  ;;  %v19761_v30 = vld [vmem:[#allocation91_spill] sm:$0xff]  ;;  %v3908_v25 = vpop.permute.xlu0 %3907  ;;  %v4034_v9 = vpop.permute.xlu1 %4033  ;;  %v19762_v22 = vld [vmem:[#allocation220_spill] sm:$0xff] }
 0x3b7   :  { %v4948_v43 = vmul.f32 %v19761_v30, %v4190_v33  ;;  %v5598_v8 = vmul.f32 %v13254_v52, %v5528_v21  ;;  %v2888_v17 = vsel %vm2784_vm7, %v8158_v39, %v8094_v31  ;;  %v4949_v26 = vmul.f32 %v13565_v24, %v4127_v46  ;;  %v19764_v39 = vld [vmem:[#allocation43_spill] sm:$0xff]  ;;  %v19766_v33 = vld [vmem:[#allocation62_spill] sm:$0xff] }
 0x3b8   :  { %v14054_v58 = vadd.f32 %v3674_v5, %v19762_v22  ;;  %v14057_v44 = vmul.f32 %v12700_v10, %v4715_v47  ;;  %v4139_v42 = vsel %vm2784_vm7, %v3906_v36, %v4034_v9  ;;  %v4203_v32 = vsel %vm2784_vm7, %v4034_v9, %v3906_v36  ;;  %v19765_v5 = vld [vmem:[#allocation132_spill] sm:$0xff]  ;;  %v19767_v30 = vld [vmem:[#allocation26_spill] sm:$0xff]  ;;  %v19770_v22 = vld [vmem:[#allocation221_spill] sm:$0xff] }
 0x3b9   :  { %v14063_v21 = vmul.f32 %v5598_v8, %v5075_v50  ;;  %v5529_v31 = vsub.f32 %v19764_v39, %v13201_v3  ;;  %v4973_v24 = vmul.f32 %v4845_v59, %v4139_v42  ;;  %v4974_v46 = vmul.f32 %v4846_v40, %v4203_v32  ;;  %v19769_v40 = vld [vmem:[#allocation244_spill] sm:$0xff]  ;;  %v19771_v32 = vld [vmem:[#allocation89_spill] sm:$0xff] }
 0x3ba   :  { %19763 = vst [vmem:[#allocation124_spill] sm:$0xff] %v14054_v58  ;;  %4065 = vrot.lane.b32.xlu1 %v14054_v58, %s8557_s20  ;;  %5211 = vrot.lane.b32.xlu0 %v5075_v50, %s8557_s20  ;;  %v4717_v47 = vsub.f32 %v12652_v60, %v19765_v5  ;;  %v2825_v4 = vsel %vm2784_vm7, %v8098_v62, %v8159_v38  ;;  %v4038_v58 = vpop.permute.xlu0 %4037 }
 0x3bb   :  { %v3676_v9 = vmul.f32 %v13728_v14, %v2888_v17  ;;  %v5076_v36 = vadd.f32 %v4948_v43, %v19766_v33  ;;  %v14077_v8 = vadd.f32 %v3675_v6, %v19767_v30  ;;  %v4191_v59 = vsel %vm2784_vm7, %v19757_v28, %v19758_v61  ;;  %v4036_v14 = vpop.permute.xlu1 %4035  ;;  %v19772_v17 = vld [vmem:[#allocation41_spill] sm:$0xff]  ;;  %v19773_v43 = vld [vmem:[#allocation288_spill] sm:$0xff] }
 0x3bc   :  { %v5077_v50 = vadd.f32 %v4949_v26, %v19769_v40  ;;  %v14085_v42 = vadd.f32 %v4973_v24, %v19770_v22  ;;  %v14088_v5 = vadd.f32 %v4974_v46, %v19771_v32  ;;  %v4128_v6 = vsel %vm2784_vm7, %v19773_v43, %v19772_v17  ;;  %v19774_v22 = vld [vmem:[#allocation285_spill] sm:$0xff]  ;;  %v19775_v32 = vld [vmem:[#allocation54_spill] sm:$0xff] }
 0x3bd   :  { %19768 = vst [vmem:[#allocation141_spill] sm:$0xff] %v14077_v8  ;;  %v4140_v33 = vsel %vm2784_vm7, %v3908_v25, %v4036_v14  ;;  %v4204_v28 = vsel %vm2784_vm7, %v4036_v14, %v3908_v25  ;;  %v5599_v61 = vmul.f32 %v13254_v52, %v5529_v31  ;;  %v8099_v26 = vunpack.i.h.bf16 %v19759_v63 }
 0x3be   :  { %v2889_v24 = vsel %vm2784_vm7, %v8159_v38, %v8098_v62  ;;  %v4975_v46 = vmul.f32 %v13963_v49, %v4140_v33  ;;  %v4976_v30 = vmul.f32 %v13970_v45, %v4204_v28  ;;  %5339 = vrot.lane.b32.xlu1 %v5076_v36, %s8557_s20  ;;  %3939 = vrot.lane.b32.xlu0 %v14077_v8, %s8557_s20  ;;  %v8163_v25 = vunpack.i.l.bf16 %v19774_v22  ;;  %v19777_v38 = vld [vmem:[#allocation116_spill] sm:$0xff]  ;;  %v4040_v36 = vpop.permute.xlu0 %4039  ;;  %v19807_v8 = vld [vmem:[#allocation90_spill] sm:$0xff] }
 0x3bf   :  { %v3677_v40 = vmul.f32 %v13797_v13, %v2825_v4  ;;  %v4950_v31 = vmul.f32 %v13599_v15, %v4191_v59  ;;  %v14111_v63 = vadd.f32 %v3676_v9, %v19775_v32  ;;  %v4951_v62 = vmul.f32 %v13622_v0, %v4128_v6  ;;  %v19778_v45 = vld [vmem:[#allocation84_spill] sm:$0xff]  ;;  %v3910_v33 = vpop.permute.xlu1 %3909 }
 0x3c0   :  { %v14115_v49 = vadd.f32 %v4975_v46, %v19777_v38  ;;  %v14118_v14 = vadd.f32 %v4976_v30, %v19778_v45  ;;  %v14120_v28 = vmul.f32 %v5599_v61, %v5077_v50  ;;  %v4141_v13 = vsel %vm2784_vm7, %v3910_v33, %v4038_v58  ;;  %v19780_v0 = vld [vmem:[#allocation48_spill] sm:$0xff] }
 0x3c1   :  { %19776 = vst [vmem:[#allocation129_spill] sm:$0xff] %v14111_v63  ;;  %v4205_v15 = vsel %vm2784_vm7, %v4038_v58, %v3910_v33  ;;  %v4855_v4 = vmul.f32 %v12697_v29, %v4716_v41  ;;  %v5530_v9 = vsub.f32 %v19780_v0, %v13201_v3  ;;  %v3678_v59 = vmul.f32 %v13833_v1, %v2889_v24  ;;  %v19781_v58 = vld [vmem:[#allocation245_spill] sm:$0xff]  ;;  %v19785_v24 = vld [vmem:[#allocation120_spill] sm:$0xff] }
 0x3c2   :  { %19779 = vst [vmem:[#allocation58_spill] sm:$0xff] %v14120_v28  ;;  %v4977_v6 = vmul.f32 %v13991_v7, %v4141_v13  ;;  %v4978_v46 = vmul.f32 %v14029_v18, %v4205_v15  ;;  %4067 = vrot.lane.b32.xlu1 %v14111_v63, %s8557_s20  ;;  %5213 = vrot.lane.b32.xlu0 %v5077_v50, %s8557_s20  ;;  %v19782_v41 = vld [vmem:[#allocation173_spill] sm:$0xff]  ;;  %v19784_v7 = vld [vmem:[#allocation75_spill] sm:$0xff]  ;;  %v3914_v13 = vpop.permute.xlu0 %3913  ;;  %v19787_v15 = vld [vmem:[#allocation248_spill] sm:$0xff] }
 0x3c3   :  { %v2826_v61 = vsel %vm2784_vm7, %v8099_v26, %v8163_v25  ;;  %v5078_v30 = vadd.f32 %v4950_v31, %v19781_v58  ;;  %v14139_v32 = vadd.f32 %v3677_v40, %v19782_v41  ;;  %v4856_v38 = vmul.f32 %v12700_v10, %v4717_v47  ;;  %v19786_v50 = vld [vmem:[#allocation93_spill] sm:$0xff]  ;;  %v3912_v31 = vpop.permute.xlu1 %3911  ;;  %v19788_v40 = vld [vmem:[#allocation156_spill] sm:$0xff] }
 0x3c4   :  { %v4192_v1 = vsel %vm2784_vm7, %v19772_v17, %v19773_v43  ;;  %v5079_v18 = vadd.f32 %v4951_v62, %v19784_v7  ;;  %v14148_v45 = vadd.f32 %v4977_v6, %v19785_v24  ;;  %v14151_v33 = vadd.f32 %v4978_v46, %v19786_v50  ;;  %v19789_v62 = vld [vmem:[#allocation105_spill] sm:$0xff]  ;;  %v19790_v7 = vld [vmem:[#allocation240_spill] sm:$0xff] }
 0x3c5   :  { %19783 = vst [vmem:[#allocation111_spill] sm:$0xff] %v14139_v32  ;;  %v4129_v47 = vsel %vm2784_vm7, %v19788_v40, %v19787_v15  ;;  %v4142_v58 = vsel %vm2784_vm7, %v3912_v31, %v4040_v36  ;;  %v4206_v17 = vsel %vm2784_vm7, %v4040_v36, %v3912_v31  ;;  %v5600_v43 = vmul.f32 %v13254_v52, %v5530_v9 }
 0x3c6   :  { %v8103_v6 = vunpack.i.l.bf16 %v19789_v62  ;;  %v4979_v46 = vmul.f32 %v14032_v54, %v4142_v58  ;;  %v4980_v41 = vmul.f32 %v14039_v53, %v4206_v17  ;;  %5341 = vrot.lane.b32.xlu1 %v5078_v30, %s8557_s20  ;;  %3941 = vrot.lane.b32.xlu0 %v14139_v32, %s8557_s20  ;;  %v14169_v24 = vadd.f32 %v3678_v59, %v19790_v7  ;;  %v19792_v53 = vld [vmem:[#allocation94_spill] sm:$0xff]  ;;  %v19794_v30 = vld [vmem:[#allocation167_spill] sm:$0xff]  ;;  %v14183_v32 = vpop.permute.xlu0 %8196 }
 0x3c7   :  { %v8164_v50 = vunpack.i.h.bf16 %v19774_v22  ;;  %v2890_v36 = vsel %vm2784_vm7, %v8163_v25, %v8099_v26  ;;  %v3679_v9 = vmul.f32 %v13852_v55, %v2826_v61  ;;  %v4952_v31 = vmul.f32 %v13625_v11, %v4192_v1  ;;  %v4042_v59 = vpop.permute.xlu1 %4041  ;;  %v19797_v11 = vld [vmem:[#allocation135_spill] sm:$0xff]  ;;  %v19798_v22 = vld [vmem:[#allocation136_spill] sm:$0xff] }
 0x3c8   :  { %19791 = vst [vmem:[#allocation243_spill] sm:$0xff] %v14169_v24  ;;  %v4953_v54 = vmul.f32 %v13647_v16, %v4129_v47  ;;  %v14178_v58 = vadd.f32 %v4979_v46, %v19792_v53  ;;  %v14181_v17 = vadd.f32 %v4980_v41, %v19794_v30  ;;  %v14185_v7 = vmul.f32 %v5600_v43, %v5079_v18  ;;  %v19799_v41 = vld [vmem:[#allocation139_spill] sm:$0xff]  ;;  %v19800_v30 = vld [vmem:[#allocation140_spill] sm:$0xff] }
 0x3c9   :  { %v4143_v26 = vsel %vm2784_vm7, %v3914_v13, %v4042_v59  ;;  %v4207_v55 = vsel %vm2784_vm7, %v4042_v59, %v3914_v13  ;;  %v4718_v16 = vsub.f32 %v12649_v27, %v19797_v11  ;;  %v4719_v25 = vsub.f32 %v12652_v60, %v19798_v22  ;;  %v19836_v11 = vld [vmem:[#allocation247_spill] sm:$0xff] }
 0x3ca   :  { %19793 = vst [vmem:[#allocation289_spill] sm:$0xff] %v14178_v58  ;;  %19795 = vst [vmem:[#allocation182_spill] sm:$0xff] %v14181_v17  ;;  %v4981_v1 = vmul.f32 %v14042_v12, %v4143_v26  ;;  %v4982_v47 = vmul.f32 %v14057_v44, %v4207_v55  ;;  %4069 = vrot.lane.b32.xlu1 %v14169_v24, %s8557_s20  ;;  %5215 = vrot.lane.b32.xlu0 %v5079_v18, %s8557_s20  ;;  %v19801_v44 = vld [vmem:[#allocation246_spill] sm:$0xff]  ;;  %v19802_v26 = vld [vmem:[#allocation264_spill] sm:$0xff]  ;;  %v4044_v22 = vpop.permute.xlu0 %4043 }
 0x3cb   :  { %19796 = vst [vmem:[#allocation255_spill] sm:$0xff] %v14185_v7  ;;  %v5531_v13 = vsub.f32 %v19631_v19, %v13201_v3  ;;  %v2827_v43 = vsel %vm2784_vm7, %v8103_v6, %v8164_v50  ;;  %v3680_v46 = vmul.f32 %v13855_v20, %v2890_v36  ;;  %v4720_v53 = vsub.f32 %v12649_v27, %v19799_v41  ;;  %v3916_v61 = vpop.permute.xlu1 %3915  ;;  %v19803_v24 = vld [vmem:[#allocation181_spill] sm:$0xff]  ;;  %v19805_v20 = vld [vmem:[#allocation222_spill] sm:$0xff] }
 0x3cc   :  { %v4721_v12 = vsub.f32 %v12652_v60, %v19800_v30  ;;  %v5080_v59 = vadd.f32 %v4952_v31, %v19801_v44  ;;  %v4193_v18 = vsel %vm2784_vm7, %v19787_v15, %v19788_v40  ;;  %v5081_v55 = vadd.f32 %v4953_v54, %v19802_v26  ;;  %v19809_v15 = vld [vmem:[#allocation256_spill] sm:$0xff]  ;;  %v19812_v26 = vld [vmem:[#allocation19_spill] sm:$0xff]  ;;  %v19939_v17 = vld [vmem:[#allocation286_spill] sm:$0xff] }
 0x3cd   :  { %v14217_v63 = vadd.f32 %v3679_v9, %v19803_v24  ;;  %v14220_v36 = vadd.f32 %v4981_v1, %v19805_v20  ;;  %v14223_v41 = vadd.f32 %v4982_v47, %v19807_v8  ;;  %v4144_v31 = vsel %vm2784_vm7, %v3916_v61, %v4044_v22  ;;  %v19810_v1 = vld [vmem:[#allocation44_spill] sm:$0xff] }
 0x3ce   :  { %v4208_v30 = vsel %vm2784_vm7, %v4044_v22, %v3916_v61  ;;  %v4983_v54 = vmul.f32 %v4855_v4, %v4144_v31  ;;  %5343 = vrot.lane.b32.xlu1 %v5080_v59, %s8557_s20  ;;  %v5601_v24 = vmul.f32 %v13254_v52, %v5531_v13  ;;  %v2891_v8 = vsel %vm2784_vm7, %v8164_v50, %v8103_v6  ;;  %v19811_v47 = vld [vmem:[#allocation232_spill] sm:$0xff]  ;;  %v19815_v22 = vld [vmem:[#allocation259_spill] sm:$0xff]  ;;  %v19816_v31 = vld [vmem:[#allocation134_spill] sm:$0xff]  ;;  %v3918_v6 = vpop.permute.xlu0 %3917 }
 0x3cf   :  { %19804 = vst [vmem:[#allocation91_spill] sm:$0xff] %v14217_v63  ;;  %19806 = vst [vmem:[#allocation220_spill] sm:$0xff] %v14220_v36  ;;  %v4984_v44 = vmul.f32 %v4856_v38, %v4208_v30  ;;  %3943 = vrot.lane.b32.xlu0 %v14217_v63, %s8557_s20  ;;  %v3681_v9 = vmul.f32 %v13862_v48, %v2827_v43  ;;  %v4130_v61 = vsel %vm2784_vm7, %v19811_v47, %v19810_v1  ;;  %v19814_v38 = vld [vmem:[#allocation38_spill] sm:$0xff]  ;;  %v19818_v13 = vld [vmem:[#allocation172_spill] sm:$0xff]  ;;  %v14252_v48 = vpop.permute.xlu1 %8201 }
 0x3d0   :  { %19808 = vst [vmem:[#allocation43_spill] sm:$0xff] %v14223_v41  ;;  %v14242_v4 = vadd.f32 %v3680_v46, %v19812_v26  ;;  %v8168_v59 = vunpack.i.l.bf16 %v19814_v38  ;;  %v4954_v20 = vmul.f32 %v19815_v22, %v4193_v18  ;;  %v14247_v30 = vadd.f32 %v4983_v54, %v19816_v31  ;;  %19820 = vst [vmem:[#allocation244_spill] sm:$0xff] %v14252_v48  ;;  %v19822_v46 = vld [vmem:[#allocation61_spill] sm:$0xff]  ;;  %v19825_v31 = vld [vmem:[#allocation291_spill] sm:$0xff] }
 0x3d1   :  { %v14250_v40 = vadd.f32 %v4984_v44, %v19818_v13  ;;  %v19821_v50 = vsub.f32 %v19540_v23, %v19720_v57  ;;  %v19823_v18 = vsub.f32 %v19533_v34, %v19726_v35  ;;  %v14268_v44 = vmul.f32 %v5601_v24, %v5081_v55  ;;  %v19826_v35 = vld [vmem:[#allocation59_spill] sm:$0xff]  ;;  %v19838_v41 = vld [vmem:[#allocation154_spill] sm:$0xff]  ;;  %v19839_v48 = vld [vmem:[#allocation137_spill] sm:$0xff] }
 0x3d2   :  { %19813 = vst [vmem:[#allocation132_spill] sm:$0xff] %v14242_v4  ;;  %19817 = vst [vmem:[#allocation62_spill] sm:$0xff] %v14247_v30  ;;  %v4955_v13 = vmul.f32 %v19825_v31, %v4130_v61  ;;  %4071 = vrot.lane.b32.xlu1 %v14242_v4, %s8557_s20  ;;  %v4858_v26 = vmul.f32 %v12700_v10, %v4719_v25  ;;  %v3682_v63 = vmul.f32 %v13882_v51, %v2891_v8  ;;  %v19828_v4 = vld [vmem:[#allocation263_spill] sm:$0xff]  ;;  %v14287_v57 = vpop.permute.xlu0 %8206  ;;  %v19830_v25 = vld [vmem:[#allocation28_spill] sm:$0xff] }
 0x3d3   :  { %19819 = vst [vmem:[#allocation26_spill] sm:$0xff] %v14250_v40  ;;  %v14258_v43 = vmul.f32 %v19549_v37, %v19821_v50  ;;  %v14266_v54 = vmul.f32 %v10521_v2, %v19823_v18  ;;  %19824 = vst [vmem:[#allocation221_spill] sm:$0xff] %v14268_v44  ;;  %5217 = vrot.lane.b32.xlu0 %v5081_v55, %s8557_s20  ;;  %v4857_v50 = vmul.f32 %v12697_v29, %v4718_v16  ;;  %v4046_v16 = vpop.permute.xlu1 %4045  ;;  %v19832_v51 = vld [vmem:[#allocation143_spill] sm:$0xff]  ;;  %v19834_v44 = vld [vmem:[#allocation277_spill] sm:$0xff] }
 0x3d4   :  { %v4859_v18 = vmul.f32 %v12697_v29, %v4720_v53  ;;  %v4860_v24 = vmul.f32 %v12700_v10, %v4721_v12  ;;  %v5532_v22 = vsub.f32 %v19826_v35, %v13201_v3  ;;  %v19827_v61 = vunpack.i.h.bf16 %v19789_v62  ;;  %19829 = vst [vmem:[#allocation89_spill] sm:$0xff] %v14287_v57  ;;  %v19833_v8 = vld [vmem:[#allocation55_spill] sm:$0xff]  ;;  %v19937_v36 = vld [vmem:[#allocation4_spill] sm:$0xff]  ;;  %v19938_v35 = vld [vmem:[#allocation153_spill] sm:$0xff] }
 0x3d5   :  { %v5082_v55 = vadd.f32 %v4954_v20, %v19828_v4  ;;  %v14290_v40 = vadd.f32 %v3681_v9, %v19830_v25  ;;  %v4722_v53 = vsub.f32 %v12649_v27, %v19832_v51  ;;  %v4194_v12 = vsel %vm2784_vm7, %v19810_v1, %v19811_v47  ;;  %v19835_v20 = vld [vmem:[#allocation106_spill] sm:$0xff] }
 0x3d6   :  { %v2828_v31 = vsel %vm2784_vm7, %v19827_v61, %v8168_v59  ;;  %v4131_v61 = vsel %vm2784_vm7, %v19834_v44, %v19833_v8  ;;  %v4145_v4 = vsel %vm2784_vm7, %v3918_v6, %v4046_v16  ;;  %v4209_v9 = vsel %vm2784_vm7, %v4046_v16, %v3918_v6 }
 0x3d7   :  { %19831 = vst [vmem:[#allocation41_spill] sm:$0xff] %v14290_v40  ;;  %v5083_v51 = vadd.f32 %v4955_v13, %v19836_v11  ;;  %v4985_v57 = vmul.f32 %v4857_v50, %v4145_v4  ;;  %v4986_v30 = vmul.f32 %v4858_v26, %v4209_v9  ;;  %5345 = vrot.lane.b32.xlu1 %v5082_v55, %s8557_s20  ;;  %v19837_v1 = vunpack.i.h.bf16 %v19789_v62  ;;  %v19841_v11 = vld [vmem:[#allocation292_spill] sm:$0xff]  ;;  %v19842_v26 = vld [vmem:[#allocation254_spill] sm:$0xff]  ;;  %v19845_v9 = vld [vmem:[#allocation145_spill] sm:$0xff]  ;;  %v4048_v62 = vpop.permute.xlu0 %4047 }
 0x3d8   :  { %3945 = vrot.lane.b32.xlu0 %v14290_v40, %s8557_s20  ;;  %v3683_v7 = vmul.f32 %v19838_v41, %v2828_v31  ;;  %v14317_v6 = vadd.f32 %v3682_v63, %v19839_v48  ;;  %v5602_v16 = vmul.f32 %v13254_v52, %v5532_v22  ;;  %v4956_v13 = vmul.f32 %v19841_v11, %v4194_v12  ;;  %v19843_v55 = vld [vmem:[#allocation138_spill] sm:$0xff]  ;;  %v3920_v40 = vpop.permute.xlu1 %3919  ;;  %v7235_v41 = vld [vmem:[%s17809_s1 + $0x14] ss:$8 sm:$0x3] }
 0x3d9   :  { %v2892_v47 = vsel %vm2784_vm7, %v8168_v59, %v19837_v1  ;;  %v4957_v50 = vmul.f32 %v19842_v26, %v4131_v61  ;;  %v14323_v4 = vadd.f32 %v4985_v57, %v19843_v55  ;;  %v14326_v25 = vadd.f32 %v4986_v30, %v19845_v9  ;;  %v19847_v57 = vld [vmem:[#allocation63_spill] sm:$0xff]  ;;  %v19849_v1 = vld [vmem:[#allocation25_spill] sm:$0xff]  ;;  %v19850_v11 = vld [vmem:[#allocation32_spill] sm:$0xff] }
 0x3da   :  { %19840 = vst [vmem:[#allocation288_spill] sm:$0xff] %v14317_v6  ;;  %v8169_v63 = vunpack.i.h.bf16 %v19814_v38  ;;  %v4146_v59 = vsel %vm2784_vm7, %v3920_v40, %v4048_v62  ;;  %v4210_v48 = vsel %vm2784_vm7, %v4048_v62, %v3920_v40  ;;  %v5533_v22 = vsub.f32 %v19847_v57, %v13201_v3  ;;  %v7236_v38 = vld [vmem:[%s17809_s1 + $0x15] ss:$8 sm:$0x3]  ;;  %v19854_v62 = vld [vmem:[#allocation82_spill] sm:$0xff] }
 0x3db   :  { %19844 = vst [vmem:[#allocation285_spill] sm:$0xff] %v14323_v4  ;;  %19846 = vst [vmem:[#allocation54_spill] sm:$0xff] %v14326_v25  ;;  %v4987_v31 = vmul.f32 %v4859_v18, %v4146_v59  ;;  %v4988_v12 = vmul.f32 %v4860_v24, %v4210_v48  ;;  %4073 = vrot.lane.b32.xlu1 %v14317_v6, %s8557_s20  ;;  %v14345_v61 = vmul.f32 %v5602_v16, %v5083_v51  ;;  %v19852_v55 = vld [vmem:[#allocation144_spill] sm:$0xff]  ;;  %v19853_v24 = vld [vmem:[#allocation2_spill] sm:$0xff] }
 0x3dc   :  { %5219 = vrot.lane.b32.xlu0 %v5083_v51, %s8557_s20  ;;  %v3684_v40 = vmul.f32 %v19849_v1, %v2892_v47  ;;  %v14349_v26 = vadd.f32 %v3683_v7, %v19850_v11  ;;  %v4723_v18 = vsub.f32 %v12652_v60, %v19852_v55  ;;  %v14354_v9 = vrot.slane %v7235_v41, %v19853_v24  ;;  %v19855_v48 = vld [vmem:[#allocation249_spill] sm:$0xff]  ;;  %v3922_v47 = vpop.permute.xlu0 %3921  ;;  %v14364_v1 = vpop.permute.xlu1 %8211 }
 0x3dd   :  { %19848 = vst [vmem:[#allocation116_spill] sm:$0xff] %v14345_v61  ;;  %v5084_v59 = vadd.f32 %v4956_v13, %v19854_v62  ;;  %v5085_v30 = vadd.f32 %v4957_v50, %v19855_v48  ;;  %v19856_v6 = vld [vmem:[#allocation101_spill] sm:$0xff]  ;;  %19860 = vst [vmem:[#allocation75_spill] sm:$0xff] %v14364_v1  ;;  %v19861_v7 = vunpack.i.l.bf16 %v19809_v15  ;;  %v19862_v41 = vsub.f32 %v19540_v23, %v19822_v46  ;;  %v19865_v62 = vld [vmem:[#allocation234_spill] sm:$0xff] }
 0x3de   :  { %19851 = vst [vmem:[#allocation84_spill] sm:$0xff] %v14349_v26  ;;  %v14359_v25 = vadd.f32 %v4987_v31, %v19856_v6  ;;  %v19858_v51 = vld [vmem:[#allocation229_spill] sm:$0xff]  ;;  %v4195_v6 = vsel %vm2784_vm7, %v19833_v8, %v19834_v44  ;;  %v14381_v50 = vrot.slane %v7236_v38, %v19853_v24  ;;  %v19863_v31 = vld [vmem:[#allocation158_spill] sm:$0xff]  ;;  %v19866_v44 = vunpack.i.l.bf16 %v19809_v15  ;;  %v19867_v24 = vld [vmem:[#allocation7_spill] sm:$0xff] }
 0x3df   :  { %v14362_v16 = vadd.f32 %v4988_v12, %v19858_v51  ;;  %v2829_v11 = vsel %vm2784_vm7, %v19861_v7, %v8169_v63  ;;  %v14374_v13 = vmul.f32 %v19549_v37, %v19862_v41  ;;  %v19864_v55 = vld [vmem:[#allocation233_spill] sm:$0xff]  ;;  %5347 = vrot.lane.b32.xlu1 %v5084_v59, %s8557_s20  ;;  %v4861_v51 = vmul.f32 %v12697_v29, %v4722_v53  ;;  %v19868_v12 = vld [vmem:[#allocation147_spill] sm:$0xff]  ;;  %v19869_v46 = vld [vmem:[#allocation108_spill] sm:$0xff] }
 0x3e0   :  { %19857 = vst [vmem:[#allocation245_spill] sm:$0xff] %v14359_v25  ;;  %v4132_v48 = vsel %vm2784_vm7, %v19865_v62, %v19864_v55  ;;  %3947 = vrot.lane.b32.xlu0 %v14349_v26, %s8557_s20  ;;  %v5603_v7 = vmul.f32 %v13254_v52, %v5533_v22  ;;  %v2893_v8 = vsel %vm2784_vm7, %v8169_v63, %v19866_v44  ;;  %v19870_v26 = vld [vmem:[#allocation293_spill] sm:$0xff]  ;;  %v4050_v53 = vpop.permute.xlu1 %4049  ;;  %v5194_v61 = vpop.permute.xlu0 %5193  ;;  %v19875_v44 = vld [vmem:[#allocation294_spill] sm:$0xff]  ;;  %v19946_v28 = vunpack.i.h.bf16 %v19835_v20 }
 0x3e1   :  { %19859 = vst [vmem:[#allocation173_spill] sm:$0xff] %v14362_v16  ;;  %v4862_v38 = vmul.f32 %v12700_v10, %v4723_v18  ;;  %v5723_v41 = vsub.f32 %v14354_v9, %v19867_v24  ;;  %v4724_v59 = vsub.f32 %v12649_v27, %v19868_v12  ;;  %v3685_v16 = vmul.f32 %v19869_v46, %v2829_v11  ;;  %v19871_v22 = vld [vmem:[#allocation77_spill] sm:$0xff]  ;;  %v19876_v11 = vld [vmem:[#allocation290_spill] sm:$0xff] }
 0x3e2   :  { %v4958_v25 = vmul.f32 %v19870_v26, %v4195_v6  ;;  %v14405_v1 = vadd.f32 %v3684_v40, %v19871_v22  ;;  %v14407_v4 = vmul.f32 %v5603_v7, %v5085_v30  ;;  %v19874_v63 = vld [vmem:[#allocation193_spill] sm:$0xff]  ;;  %v4959_v57 = vmul.f32 %v19875_v44, %v4132_v48  ;;  %v19877_v40 = vld [vmem:[#allocation148_spill] sm:$0xff] }
 0x3e3   :  { %v3422_v18 = vsub.f32 %v19533_v34, %v19874_v63  ;;  %v4147_v24 = vsel %vm2784_vm7, %v3922_v47, %v4050_v53  ;;  %v4211_v46 = vsel %vm2784_vm7, %v4050_v53, %v3922_v47  ;;  %v8173_v26 = vunpack.i.l.bf16 %v19876_v11  ;;  %v19878_v47 = vld [vmem:[#allocation67_spill] sm:$0xff] }
 0x3e4   :  { %19872 = vst [vmem:[#allocation120_spill] sm:$0xff] %v14405_v1  ;;  %19873 = vst [vmem:[#allocation93_spill] sm:$0xff] %v14407_v4  ;;  %v4989_v6 = vmul.f32 %v4861_v51, %v4147_v24  ;;  %v4990_v12 = vmul.f32 %v4862_v38, %v4211_v46  ;;  %4075 = vrot.lane.b32.xlu1 %v14405_v1, %s8557_s20  ;;  %5221 = vrot.lane.b32.xlu0 %v5085_v30, %s8557_s20  ;;  %v19879_v63 = vld [vmem:[#allocation95_spill] sm:$0xff]  ;;  %v19880_v38 = vld [vmem:[#allocation142_spill] sm:$0xff]  ;;  %v5322_v30 = vpop.permute.xlu1 %5321  ;;  %v14434_v4 = vpop.permute.xlu0 %8216 }
 0x3e5   :  { %v4725_v7 = vsub.f32 %v12652_v60, %v19877_v40  ;;  %v3686_v48 = vmul.f32 %v14258_v43, %v2893_v8  ;;  %v5793_v22 = vmul.f32 %v14381_v50, %v5723_v41  ;;  %v4863_v44 = vmul.f32 %v12697_v29, %v4724_v59  ;;  %v19882_v46 = vld [vmem:[#allocation237_spill] sm:$0xff]  ;;  %19884 = vst [vmem:[#allocation105_spill] sm:$0xff] %v14434_v4  ;;  %v19885_v40 = vld [vmem:[#allocation192_spill] sm:$0xff]  ;;  %v19887_v41 = vld [vmem:[#allocation266_spill] sm:$0xff] }
 0x3e6   :  { %v5534_v53 = vsub.f32 %v19878_v47, %v13201_v3  ;;  %v5086_v51 = vadd.f32 %v4958_v25, %v19879_v63  ;;  %v14429_v24 = vadd.f32 %v4989_v6, %v19880_v38  ;;  %v14432_v1 = vadd.f32 %v4990_v12, %v19882_v46  ;;  %v19888_v25 = vld [vmem:[#allocation70_spill] sm:$0xff]  ;;  %v19889_v63 = vld [vmem:[#allocation236_spill] sm:$0xff] }
 0x3e7   :  { %v14437_v43 = vadd.f32 %v3685_v16, %v19885_v40  ;;  %v4196_v8 = vsel %vm2784_vm7, %v19864_v55, %v19865_v62  ;;  %v5087_v59 = vadd.f32 %v4959_v57, %v19887_v41  ;;  %v4133_v6 = vsel %vm2784_vm7, %v19889_v63, %v19888_v25  ;;  %v19891_v62 = vld [vmem:[#allocation9_spill] sm:$0xff] }
 0x3e8   :  { %19881 = vst [vmem:[#allocation248_spill] sm:$0xff] %v14429_v24  ;;  %19883 = vst [vmem:[#allocation156_spill] sm:$0xff] %v14432_v1  ;;  %v5449_v12 = vsel %vm2784_vm7, %v5194_v61, %v5322_v30  ;;  %v19890_v16 = vunpack.i.h.bf16 %v19809_v15  ;;  %5349 = vrot.lane.b32.xlu1 %v5086_v51, %s8557_s20  ;;  %v4864_v57 = vmul.f32 %v12700_v10, %v4725_v7  ;;  %v8174_v55 = vunpack.i.h.bf16 %v19876_v11  ;;  %v19893_v61 = vld [vmem:[#allocation10_spill] sm:$0xff]  ;;  %v19894_v51 = vld [vmem:[#allocation295_spill] sm:$0xff]  ;;  %v3924_v7 = vpop.permute.xlu1 %3923  ;;  %v4052_v24 = vpop.permute.xlu0 %4051 }
 0x3e9   :  { %19886 = vst [vmem:[#allocation240_spill] sm:$0xff] %v14437_v43  ;;  %v5857_v40 = vmul.f32 %v5793_v22, %v5449_v12  ;;  %3949 = vrot.lane.b32.xlu0 %v14437_v43, %s8557_s20  ;;  %v14461_v41 = vadd.f32 %v3686_v48, %v19891_v62  ;;  %v5724_v30 = vsub.f32 %v14354_v9, %v19893_v61  ;;  %v19895_v43 = vld [vmem:[#allocation76_spill] sm:$0xff]  ;;  %v19896_v11 = vld [vmem:[#allocation23_spill] sm:$0xff]  ;;  %v19898_v61 = vld [vmem:[#allocation281_spill] sm:$0xff] }
 0x3ea   :  { %v2830_v46 = vsel %vm2784_vm7, %v19890_v16, %v8173_v26  ;;  %v5604_v38 = vmul.f32 %v13254_v52, %v5534_v53  ;;  %v2894_v22 = vsel %vm2784_vm7, %v8173_v26, %v19890_v16  ;;  %v4960_v12 = vmul.f32 %v19894_v51, %v4196_v8  ;;  %v19903_v51 = vld [vmem:[#allocation72_spill] sm:$0xff] }
 0x3eb   :  { %19892 = vst [vmem:[#allocation94_spill] sm:$0xff] %v14461_v41  ;;  %v4961_v1 = vmul.f32 %v19895_v43, %v4133_v6  ;;  %v5921_v47 = vadd.f32 %v5857_v40, %v19896_v11  ;;  %v3687_v48 = vmul.f32 %v14266_v54, %v2830_v46  ;;  %v4148_v62 = vsel %vm2784_vm7, %v3924_v7, %v4052_v24  ;;  %v19899_v43 = vld [vmem:[#allocation74_spill] sm:$0xff]  ;;  %v19900_v54 = vld [vmem:[#allocation65_spill] sm:$0xff] }
 0x3ec   :  { %v4212_v53 = vsel %vm2784_vm7, %v4052_v24, %v3924_v7  ;;  %v14478_v15 = vmul.f32 %v5604_v38, %v5087_v59  ;;  %v4991_v16 = vmul.f32 %v4863_v44, %v4148_v62  ;;  %4077 = vrot.lane.b32.xlu1 %v14461_v41, %s8557_s20  ;;  %v5535_v6 = vsub.f32 %v19899_v43, %v13201_v3  ;;  %v19904_v11 = vld [vmem:[#allocation18_spill] sm:$0xff]  ;;  %v5324_v41 = vpop.permute.xlu1 %5323 }
 0x3ed   :  { %v4992_v8 = vmul.f32 %v4864_v57, %v4212_v53  ;;  %7479 = vmatprep.mubr.f32.mxu1 %v5921_v47  ;;  %v3423_v46 = vsub.f32 %v19540_v23, %v19900_v54  ;;  %v19901_v40 = vunpack.i.l.bf16 %v19835_v20  ;;  %v3688_v38 = vmul.f32 %v14374_v13, %v2894_v22  ;;  %5223 = vrot.lane.b32.xlu0 %v5087_v59, %s8557_s20  ;;  %v19902_v47 = vld [vmem:[#allocation251_spill] sm:$0xff]  ;;  %v19906_v53 = vld [vmem:[#allocation22_spill] sm:$0xff]  ;;  %v5196_v54 = vpop.permute.xlu0 %5195 }
 0x3ee   :  { %19897 = vst [vmem:[#allocation167_spill] sm:$0xff] %v14478_v15  ;;  %v5794_v44 = vmul.f32 %v14381_v50, %v5724_v30  ;;  %v5088_v57 = vadd.f32 %v4960_v12, %v19902_v47  ;;  %v5089_v7 = vadd.f32 %v4961_v1, %v19903_v51  ;;  %v14497_v62 = vadd.f32 %v4991_v16, %v19904_v11  ;;  %v19908_v30 = vld [vmem:[#allocation150_spill] sm:$0xff]  ;;  %v19910_v22 = vld [vmem:[#allocation235_spill] sm:$0xff] }
 0x3ef   :  { %v2831_v24 = vsel %vm2784_vm7, %v19901_v40, %v8174_v55  ;;  %v14500_v26 = vadd.f32 %v4992_v8, %v19906_v53  ;;  %v3561_v40 = vmul.f32 %v10521_v2, %v3422_v18  ;;  %v4197_v13 = vsel %vm2784_vm7, %v19888_v25, %v19889_v63  ;;  %v19911_v12 = vld [vmem:[#allocation191_spill] sm:$0xff]  ;;  %v19912_v8 = vld [vmem:[#allocation86_spill] sm:$0xff]  ;;  %v19916_v53 = vld [vmem:[#allocation17_spill] sm:$0xff] }
 0x3f0   :  { %19905 = vst [vmem:[#allocation136_spill] sm:$0xff] %v14497_v62  ;;  %v5450_v59 = vsel %vm2784_vm7, %v5196_v54, %v5324_v41  ;;  %v14510_v1 = vadd.f32 %v3687_v48, %v19908_v30  ;;  %v4134_v16 = vsel %vm2784_vm7, %v19911_v12, %v19910_v22  ;;  %v4699_v47 = vsub.f32 %v12652_v60, %v19912_v8  ;;  %v19914_v48 = vld [vmem:[#allocation78_spill] sm:$0xff]  ;;  %v14534_v8 = vpop.permute.xlu1 %8221 }
 0x3f1   :  { %19907 = vst [vmem:[#allocation140_spill] sm:$0xff] %v14500_v26  ;;  %v5858_v18 = vmul.f32 %v5794_v44, %v5450_v59  ;;  %5351 = vrot.lane.b32.xlu1 %v5088_v57, %s8557_s20  ;;  %v5605_v51 = vmul.f32 %v13254_v52, %v5535_v6  ;;  %v19913_v25 = vunpack.i.l.bf16 %v19835_v20  ;;  %v3689_v41 = vmul.f32 %v3561_v40, %v2831_v24  ;;  %v19917_v57 = vld [vmem:[#allocation115_spill] sm:$0xff]  ;;  %v5198_v26 = vpop.permute.xlu0 %5197 }
 0x3f2   :  { %19909 = vst [vmem:[#allocation246_spill] sm:$0xff] %v14510_v1  ;;  %v19915_v54 = vsub.f32 %v12649_v27, %v19914_v48  ;;  %3951 = vrot.lane.b32.xlu0 %v14510_v1, %s8557_s20  ;;  %v5725_v44 = vsub.f32 %v14354_v9, %v19916_v53  ;;  %v4962_v59 = vmul.f32 %v19917_v57, %v4197_v13  ;;  %v19918_v6 = vld [vmem:[#allocation283_spill] sm:$0xff]  ;;  %19919 = vst [vmem:[#allocation264_spill] sm:$0xff] %v14534_v8  ;;  %v19925_v13 = vld [vmem:[#allocation85_spill] sm:$0xff] }
 0x3f3   :  { %v2895_v63 = vsel %vm2784_vm7, %v8174_v55, %v19913_v25  ;;  %v5922_v30 = vadd.f32 %v5858_v18, %v19918_v6  ;;  %v19920_v55 = vld [vmem:[#allocation87_spill] sm:$0xff]  ;;  %v14539_v40 = vmul.f32 %v5605_v51, %v5089_v7  ;;  %v3562_v25 = vmul.f32 %v19549_v37, %v3423_v46  ;;  %v19927_v6 = vld [vmem:[#allocation196_spill] sm:$0xff]  ;;  %v19933_v8 = vld [vmem:[#allocation113_spill] sm:$0xff] }
 0x3f4   :  { %v4835_v11 = vmul.f32 %v12697_v29, %v19915_v54  ;;  %v14537_v24 = vadd.f32 %v3688_v38, %v19920_v55  ;;  %v19923_v54 = vld [vmem:[#allocation81_spill] sm:$0xff]  ;;  %v19926_v57 = vsub.f32 %v12649_v27, %v19925_v13  ;;  %v3424_v43 = vsub.f32 %v19533_v34, %v19927_v6  ;;  %v19928_v38 = vld [vmem:[#allocation64_spill] sm:$0xff]  ;;  %v19932_v6 = vld [vmem:[#allocation71_spill] sm:$0xff] }
 0x3f5   :  { %19922 = vst [vmem:[#allocation222_spill] sm:$0xff] %v14539_v40  ;;  %v19924_v1 = vsub.f32 %v12652_v60, %v19923_v54  ;;  %v8178_v55 = vunpack.i.l.bf16 %v19928_v38  ;;  %v14554_v51 = vmul.f32 %v12700_v10, %v4699_v47  ;;  %v19929_v46 = vld [vmem:[#allocation88_spill] sm:$0xff]  ;;  %7480 = vmatmul.mubr.f32.vlgmr.msra.gmra.mrb[64].mxu1 %v5922_v30  ;;  %v5536_v47 = vsub.f32 %v19914_v48, %v13201_v3 }
 0x3f6   :  { %19921 = vst [vmem:[#allocation181_spill] sm:$0xff] %v14537_v24  ;;  %v4963_v53 = vmul.f32 %v4835_v11, %v4134_v16  ;;  %v4837_v18 = vmul.f32 %v12697_v29, %v19926_v57  ;;  %v4700_v40 = vsub.f32 %v12649_v27, %v19929_v46  ;;  %4079 = vrot.lane.b32.xlu1 %v14537_v24, %s8557_s20  ;;  %v19930_v16 = vld [vmem:[#allocation92_spill] sm:$0xff]  ;;  %v5326_v24 = vpop.permute.xlu1 %5325 }
 0x3f7   :  { %v4836_v62 = vmul.f32 %v12700_v10, %v19924_v1  ;;  %v3690_v1 = vmul.f32 %v3562_v25, %v2895_v63  ;;  %v4701_v11 = vsub.f32 %v12652_v60, %v19930_v16  ;;  %v19931_v54 = vld [vmem:[#allocation96_spill] sm:$0xff]  ;;  %5225 = vrot.lane.b32.xlu0 %v5089_v7, %s8557_s20  ;;  %v3425_v15 = vsub.f32 %v19540_v23, %v19932_v6  ;;  %v14571_v63 = vpop.permute.xlu0 %8226  ;;  %v19935_v25 = vld [vmem:[#allocation195_spill] sm:$0xff]  ;;  %v19941_v6 = vld [vmem:[#allocation97_spill] sm:$0xff] }
 0x3f8   :  { %v4702_v57 = vsub.f32 %v12649_v27, %v19931_v54  ;;  %v5090_v30 = vadd.f32 %v4962_v59, %v19933_v8  ;;  %v5795_v4 = vmul.f32 %v14381_v50, %v5725_v44  ;;  %19934 = vst [vmem:[#allocation90_spill] sm:$0xff] %v14571_v63  ;;  %v14574_v16 = vadd.f32 %v3689_v41, %v19935_v25 }
 0x3f9   :  { %v4198_v7 = vsel %vm2784_vm7, %v19910_v22, %v19911_v12  ;;  %v5091_v48 = vadd.f32 %v4963_v53, %v19937_v36  ;;  %v4135_v59 = vsel %vm2784_vm7, %v19939_v17, %v19938_v35  ;;  %v5451_v44 = vsel %vm2784_vm7, %v5198_v26, %v5326_v24  ;;  %v19942_v36 = vld [vmem:[#allocation197_spill] sm:$0xff] }
 0x3fa   :  { %19936 = vst [vmem:[#allocation256_spill] sm:$0xff] %v14574_v16  ;;  %v3563_v8 = vmul.f32 %v10521_v2, %v3424_v43  ;;  %v19940_v41 = vunpack.i.h.bf16 %v19835_v20  ;;  %v4703_v22 = vsub.f32 %v12652_v60, %v19941_v6  ;;  %v5859_v12 = vmul.f32 %v5795_v4, %v5451_v44  ;;  %5353 = vrot.lane.b32.xlu1 %v5090_v30, %s8557_s20  ;;  %v19943_v26 = vld [vmem:[#allocation265_spill] sm:$0xff]  ;;  %v14609_v44 = vpop.permute.xlu1 %4053 }
 0x3fb   :  { %v3426_v53 = vsub.f32 %v19533_v34, %v19942_v36  ;;  %3953 = vrot.lane.b32.xlu0 %v14574_v16, %s8557_s20  ;;  %v14600_v24 = vadd.f32 %v3690_v1, %v19943_v26  ;;  %v19945_v43 = vld [vmem:[#allocation21_spill] sm:$0xff]  ;;  %v2896_v4 = vsel %vm2784_vm7, %v8178_v55, %v19946_v28  ;;  %v4964_v6 = vmul.f32 %v4836_v62, %v4198_v7  ;;  %v14611_v36 = vpop.permute.xlu0 %3925  ;;  %v19949_v16 = vld [vmem:[#allocation252_spill] sm:$0xff]  ;;  %v19954_v7 = vld [vmem:[#allocation79_spill] sm:$0xff] }
 0x3fc   :  { %v2832_v25 = vsel %vm2784_vm7, %v19940_v41, %v8178_v55  ;;  %v5726_v63 = vsub.f32 %v14354_v9, %v19945_v43  ;;  %v5606_v41 = vmul.f32 %v13254_v52, %v5536_v47  ;;  %v4965_v30 = vmul.f32 %v4837_v18, %v4135_v59  ;;  %19947 = vst [vmem:[#allocation232_spill] sm:$0xff] %v14609_v44  ;;  %v19951_v62 = vld [vmem:[#allocation200_spill] sm:$0xff] }
 0x3fd   :  { %19944 = vst [vmem:[#allocation44_spill] sm:$0xff] %v14600_v24  ;;  %19948 = vst [vmem:[#allocation19_spill] sm:$0xff] %v14611_v36  ;;  %v5923_v58 = vadd.f32 %v5859_v12, %v19949_v16  ;;  %v3564_v1 = vmul.f32 %v19549_v37, %v3425_v15  ;;  %v3691_v26 = vmul.f32 %v3563_v8, %v2832_v25  ;;  %v8179_v20 = vunpack.i.h.bf16 %v19928_v38  ;;  %v19952_v38 = vld [vmem:[#allocation99_spill] sm:$0xff] }
 0x3fe   :  { %v4839_v43 = vmul.f32 %v12697_v29, %v4700_v40  ;;  %v14616_v19 = vmul.f32 %v5606_v41, %v5091_v48  ;;  %v14620_v47 = vmul.f32 %v12700_v10, %v4701_v11  ;;  %v14623_v28 = vmul.f32 %v12697_v29, %v4702_v57  ;;  %4081 = vrot.lane.b32.xlu1 %v14600_v24, %s8557_s20  ;;  %v19953_v57 = vld [vmem:[#allocation227_spill] sm:$0xff]  ;;  %v5328_v8 = vpop.permute.xlu1 %5327  ;;  %v19961_v24 = vld [vmem:[#allocation202_spill] sm:$0xff] }
 0x3ff   :  { %7482 = vmatprep.mubr.f32.mxu1 %v5923_v58  ;;  %v5537_v15 = vsub.f32 %v19925_v13, %v13201_v3  ;;  %v3427_v40 = vsub.f32 %v19540_v23, %v19951_v62  ;;  %v3692_v18 = vmul.f32 %v3564_v1, %v2896_v4  ;;  %v14632_v55 = vmul.f32 %v12700_v10, %v4703_v22  ;;  %v5200_v12 = vpop.permute.xlu0 %5199  ;;  %v19955_v41 = vld [vmem:[#allocation103_spill] sm:$0xff] }
 0x400   :  { %19950 = vst [vmem:[#allocation38_spill] sm:$0xff] %v14616_v19  ;;  %v4704_v11 = vsub.f32 %v12649_v27, %v19952_v38  ;;  %5227 = vrot.lane.b32.xlu0 %v5091_v48, %s8557_s20  ;;  %v3565_v58 = vmul.f32 %v10521_v2, %v3426_v53  ;;  %v5092_v16 = vadd.f32 %v4964_v6, %v19953_v57  ;;  %v19956_v4 = vld [vmem:[#allocation239_spill] sm:$0xff]  ;;  %v19957_v6 = vld [vmem:[#allocation198_spill] sm:$0xff]  ;;  %v19960_v57 = vld [vmem:[#allocation201_spill] sm:$0xff] }
 0x401   :  { %v5093_v59 = vadd.f32 %v4965_v30, %v19954_v7  ;;  %v5796_v25 = vmul.f32 %v14381_v50, %v5726_v63  ;;  %v4199_v22 = vsel %vm2784_vm7, %v19938_v35, %v19939_v17  ;;  %v4136_v48 = vsel %vm2784_vm7, %v19956_v4, %v19955_v41  ;;  %v19988_v36 = vld [vmem:[#allocation11_spill] sm:$0xff] }
 0x402   :  { %v5452_v53 = vsel %vm2784_vm7, %v5200_v12, %v5328_v8  ;;  %v14652_v1 = vadd.f32 %v3691_v26, %v19957_v6  ;;  %v19959_v30 = vunpack.i.l.bf16 %v19863_v31  ;;  %v3428_v7 = vsub.f32 %v19533_v34, %v19960_v57  ;;  %5355 = vrot.lane.b32.xlu1 %v5092_v16, %s8557_s20  ;;  %v19962_v8 = vld [vmem:[#allocation203_spill] sm:$0xff]  ;;  %v19963_v12 = vld [vmem:[#allocation206_spill] sm:$0xff] }
 0x403   :  { %v5860_v35 = vmul.f32 %v5796_v25, %v5452_v53  ;;  %v5607_v17 = vmul.f32 %v13254_v52, %v5537_v15  ;;  %v3429_v62 = vsub.f32 %v19540_v23, %v19961_v24  ;;  %v3430_v26 = vsub.f32 %v19533_v34, %v19962_v8  ;;  %v14674_v53 = vpop.permute.xlu1 %8231  ;;  %v14676_v15 = vpop.permute.xlu0 %3927  ;;  %v19968_v24 = vld [vmem:[#allocation50_spill] sm:$0xff] }
 0x404   :  { %19958 = vst [vmem:[#allocation259_spill] sm:$0xff] %v14652_v1  ;;  %v2833_v63 = vsel %vm2784_vm7, %v19959_v30, %v8179_v20  ;;  %v3431_v6 = vsub.f32 %v19540_v23, %v19963_v12  ;;  %3955 = vrot.lane.b32.xlu0 %v14652_v1, %s8557_s20  ;;  %v19964_v30 = vld [vmem:[#allocation102_spill] sm:$0xff]  ;;  %v4966_v25 = vmul.f32 %v14554_v51, %v4199_v22  ;;  %19966 = vst [vmem:[#allocation172_spill] sm:$0xff] %v14674_v53  ;;  %v19971_v51 = vld [vmem:[#allocation287_spill] sm:$0xff] }
 0x405   :  { %v14671_v13 = vadd.f32 %v3692_v18, %v19964_v30  ;;  %v4967_v16 = vmul.f32 %v4839_v43, %v4136_v48  ;;  %19967 = vst [vmem:[#allocation291_spill] sm:$0xff] %v14676_v15  ;;  %v5924_v57 = vadd.f32 %v5860_v35, %v19968_v24  ;;  %v14679_v19 = vmul.f32 %v5607_v17, %v5093_v59  ;;  %v19972_v22 = vld [vmem:[#allocation207_spill] sm:$0xff]  ;;  %v19973_v15 = vld [vmem:[#allocation208_spill] sm:$0xff] }
 0x406   :  { %v3566_v8 = vmul.f32 %v19549_v37, %v3427_v40  ;;  %v19970_v12 = vunpack.i.l.bf16 %v19863_v31  ;;  %v3693_v18 = vmul.f32 %v3565_v58, %v2833_v63  ;;  %v14687_v30 = vmul.f32 %v12697_v29, %v4704_v11  ;;  %v19974_v63 = vld [vmem:[#allocation24_spill] sm:$0xff] }
 0x407   :  { %19965 = vst [vmem:[#allocation134_spill] sm:$0xff] %v14671_v13  ;;  %19969 = vst [vmem:[#allocation263_spill] sm:$0xff] %v14679_v19  ;;  %v8183_v43 = vunpack.i.l.bf16 %v19971_v51  ;;  %v3432_v48 = vsub.f32 %v19533_v34, %v19972_v22  ;;  %v3433_v24 = vsub.f32 %v19540_v23, %v19973_v15  ;;  %4083 = vrot.lane.b32.xlu1 %v14671_v13, %s8557_s20  ;;  %7483 = vmatmul.mubr.f32.gmra.mrb[66].mxu1 %v5924_v57  ;;  %v19975_v57 = vld [vmem:[#allocation270_spill] sm:$0xff]  ;;  %v19976_v15 = vld [vmem:[#allocation269_spill] sm:$0xff] }
 0x408   :  { %v2897_v1 = vsel %vm2784_vm7, %v8179_v20, %v19970_v12  ;;  %v5538_v40 = vsub.f32 %v19929_v46, %v13201_v3  ;;  %v3567_v20 = vmul.f32 %v10521_v2, %v3428_v7  ;;  %v3568_v11 = vmul.f32 %v19549_v37, %v3429_v62  ;;  %5229 = vrot.lane.b32.xlu0 %v5093_v59, %s8557_s20  ;;  %v14711_v46 = vpop.permute.xlu1 %4055  ;;  %v5202_v7 = vpop.permute.xlu0 %5201  ;;  %v19978_v62 = vld [vmem:[#allocation209_spill] sm:$0xff] }
 0x409   :  { %v14701_v58 = vmul.f32 %v10521_v2, %v3430_v26  ;;  %v5727_v35 = vsub.f32 %v14354_v9, %v19974_v63  ;;  %v3694_v17 = vmul.f32 %v3566_v8, %v2897_v1  ;;  %v14707_v12 = vmul.f32 %v19549_v37, %v3431_v6  ;;  %19977 = vst [vmem:[#allocation28_spill] sm:$0xff] %v14711_v46  ;;  %v19979_v63 = vld [vmem:[#allocation114_spill] sm:$0xff]  ;;  %v19980_v1 = vld [vmem:[#allocation8_spill] sm:$0xff]  ;;  %v19981_v6 = vld [vmem:[#allocation49_spill] sm:$0xff] }
 0x40a   :  { %v5094_v13 = vadd.f32 %v4966_v25, %v19975_v57  ;;  %v5095_v22 = vadd.f32 %v4967_v16, %v19976_v15  ;;  %v3434_v26 = vsub.f32 %v19533_v34, %v19978_v62  ;;  %v4200_v59 = vsel %vm2784_vm7, %v19955_v41, %v19956_v4  ;;  %v19984_v4 = vld [vmem:[#allocation212_spill] sm:$0xff] }
 0x40b   :  { %v4137_v8 = vsel %vm2784_vm7, %v19980_v1, %v19979_v63  ;;  %v14724_v25 = vadd.f32 %v3693_v18, %v19981_v6  ;;  %v19983_v16 = vunpack.i.h.bf16 %v19863_v31  ;;  %v14731_v57 = vmul.f32 %v10521_v2, %v3432_v48  ;;  %v19985_v18 = vld [vmem:[#allocation213_spill] sm:$0xff]  ;;  %v19986_v46 = vld [vmem:[#allocation104_spill] sm:$0xff] }
 0x40c   :  { %v14734_v62 = vmul.f32 %v19549_v37, %v3433_v24  ;;  %5357 = vrot.lane.b32.xlu1 %v5094_v13, %s8557_s20  ;;  %v5608_v41 = vmul.f32 %v13254_v52, %v5538_v40  ;;  %v3435_v19 = vsub.f32 %v19540_v23, %v19984_v4  ;;  %v3436_v6 = vsub.f32 %v19533_v34, %v19985_v18  ;;  %v14749_v40 = vpop.permute.xlu0 %3929 }
 0x40d   :  { %19982 = vst [vmem:[#allocation55_spill] sm:$0xff] %v14724_v25  ;;  %v2834_v15 = vsel %vm2784_vm7, %v19983_v16, %v8183_v43  ;;  %v3437_v53 = vsub.f32 %v19540_v23, %v19986_v46  ;;  %3957 = vrot.lane.b32.xlu0 %v14724_v25, %s8557_s20  ;;  %v5797_v48 = vmul.f32 %v14381_v50, %v5727_v35  ;;  %v5330_v16 = vpop.permute.xlu1 %5329  ;;  %19987 = vst [vmem:[#allocation277_spill] sm:$0xff] %v14749_v40 }
 0x40e   :  { %v4968_v24 = vmul.f32 %v14620_v47, %v4200_v59  ;;  %v4969_v13 = vmul.f32 %v14623_v28, %v4137_v8  ;;  %v14752_v4 = vadd.f32 %v3694_v17, %v19988_v36  ;;  %v14754_v44 = vmul.f32 %v5608_v41, %v5095_v22  ;;  %v19992_v59 = vld [vmem:[#allocation109_spill] sm:$0xff] }
 0x40f   :  { %v19991_v18 = vunpack.i.h.bf16 %v19863_v31  ;;  %v3695_v25 = vmul.f32 %v3567_v20, %v2834_v15  ;;  %v14761_v35 = vmul.f32 %v10521_v2, %v3434_v26  ;;  %v5453_v47 = vsel %vm2784_vm7, %v5202_v7, %v5330_v16  ;;  %v19994_v15 = vld [vmem:[#allocation130_spill] sm:$0xff] }
 0x410   :  { %19989 = vst [vmem:[#allocation106_spill] sm:$0xff] %v14752_v4  ;;  %19990 = vst [vmem:[#allocation247_spill] sm:$0xff] %v14754_v44  ;;  %v8184_v28 = vunpack.i.h.bf16 %v19971_v51  ;;  %v3438_v36 = vsub.f32 %v19533_v34, %v19992_v59  ;;  %v5861_v17 = vmul.f32 %v5797_v48, %v5453_v47  ;;  %4085 = vrot.lane.b32.xlu1 %v14752_v4, %s8557_s20  ;;  %v19993_v51 = vld [vmem:[#allocation27_spill] sm:$0xff]  ;;  %v19997_v47 = vld [vmem:[#allocation73_spill] sm:$0xff]  ;;  %v20011_v40 = vunpack.i.l.bf16 %v19898_v61 }
 0x411   :  { %v2898_v0 = vsel %vm2784_vm7, %v8183_v43, %v19991_v18  ;;  %v5539_v31 = vsub.f32 %v19931_v54, %v13201_v3  ;;  %v14773_v43 = vmul.f32 %v19549_v37, %v3435_v19  ;;  %v14776_v20 = vmul.f32 %v10521_v2, %v3436_v6  ;;  %5231 = vrot.lane.b32.xlu0 %v5095_v22, %s8557_s20  ;;  %v19995_v18 = vld [vmem:[#allocation273_spill] sm:$0xff]  ;;  %v14786_v16 = vpop.permute.xlu1 %4057  ;;  %v5204_v19 = vpop.permute.xlu0 %5203  ;;  %v19998_v6 = vld [vmem:[#allocation20_spill] sm:$0xff]  ;;  %v20008_v54 = vld [vmem:[#allocation127_spill] sm:$0xff] }
 0x412   :  { %v14779_v7 = vmul.f32 %v19549_v37, %v3437_v53  ;;  %v5728_v26 = vsub.f32 %v14354_v9, %v19993_v51  ;;  %v3696_v8 = vmul.f32 %v3568_v11, %v2898_v0  ;;  %v5096_v41 = vadd.f32 %v4968_v24, %v19994_v15  ;;  %19996 = vst [vmem:[#allocation154_spill] sm:$0xff] %v14786_v16  ;;  %v19999_v22 = vld [vmem:[#allocation29_spill] sm:$0xff]  ;;  %v20000_v0 = vld [vmem:[#allocation110_spill] sm:$0xff] }
 0x413   :  { %v5097_v48 = vadd.f32 %v4969_v13, %v19995_v18  ;;  %v5925_v59 = vadd.f32 %v5861_v17, %v19997_v47  ;;  %v4201_v53 = vsel %vm2784_vm7, %v19979_v63, %v19980_v1  ;;  %v4138_v51 = vsel %vm2784_vm7, %v19999_v22, %v19998_v6  ;;  %v20001_v24 = vld [vmem:[#allocation205_spill] sm:$0xff]  ;;  %v20004_v47 = vld [vmem:[#allocation216_spill] sm:$0xff] }
 0x414   :  { %v3439_v11 = vsub.f32 %v19540_v23, %v20000_v0  ;;  %v14800_v13 = vadd.f32 %v3695_v25, %v20001_v24  ;;  %v8124_v15 = vunpack.i.h.bf16 %v19898_v61  ;;  %v20003_v17 = vunpack.i.l.bf16 %v19898_v61  ;;  %5359 = vrot.lane.b32.xlu1 %v5096_v41, %s8557_s20  ;;  %v20005_v25 = vld [vmem:[#allocation117_spill] sm:$0xff] }
 0x415   :  { %v14808_v63 = vmul.f32 %v10521_v2, %v3438_v36  ;;  %7485 = vmatprep.mubr.f32.mxu1 %v5925_v59  ;;  %v5609_v1 = vmul.f32 %v13254_v52, %v5539_v31  ;;  %v3440_v6 = vsub.f32 %v19533_v34, %v20004_v47  ;;  %v3441_v22 = vsub.f32 %v19540_v23, %v20005_v25  ;;  %v20006_v24 = vld [vmem:[#allocation121_spill] sm:$0xff]  ;;  %v5332_v41 = vpop.permute.xlu1 %5331  ;;  %v14823_v31 = vpop.permute.xlu0 %3931 }
 0x416   :  { %20002 = vst [vmem:[#allocation137_spill] sm:$0xff] %v14800_v13  ;;  %v2835_v18 = vsel %vm2784_vm7, %v20003_v17, %v8184_v28  ;;  %v3442_v4 = vsub.f32 %v19533_v34, %v20006_v24  ;;  %3959 = vrot.lane.b32.xlu0 %v14800_v13, %s8557_s20  ;;  %v5798_v36 = vmul.f32 %v14381_v50, %v5728_v26  ;;  %20007 = vst [vmem:[#allocation292_spill] sm:$0xff] %v14823_v31  ;;  %v20012_v26 = vld [vmem:[#allocation122_spill] sm:$0xff]  ;;  %v20020_v31 = vld [vmem:[#allocation296_spill] sm:$0xff] }
 0x417   :  { %v4970_v17 = vmul.f32 %v14632_v55, %v4201_v53  ;;  %v4971_v59 = vmul.f32 %v14687_v30, %v4138_v51  ;;  %v14826_v47 = vadd.f32 %v3696_v8, %v20008_v54  ;;  %v14828_v44 = vmul.f32 %v5609_v1, %v5097_v48  ;;  %v20013_v53 = vld [vmem:[#allocation223_spill] sm:$0xff]  ;;  %v20023_v34 = vld [vmem:[#allocation152_spill] sm:$0xff] }
 0x418   :  { %v2899_v24 = vsel %vm2784_vm7, %v8184_v28, %v20011_v40  ;;  %v3697_v13 = vmul.f32 %v14701_v58, %v2835_v18  ;;  %v3443_v55 = vsub.f32 %v19540_v23, %v20012_v26  ;;  %v5454_v30 = vsel %vm2784_vm7, %v5204_v19, %v5332_v41  ;;  %v20014_v28 = vld [vmem:[#allocation225_spill] sm:$0xff]  ;;  %v20015_v19 = vld [vmem:[#allocation151_spill] sm:$0xff]  ;;  %v20017_v41 = vld [vmem:[#allocation274_spill] sm:$0xff] }
 0x419   :  { %20009 = vst [vmem:[#allocation254_spill] sm:$0xff] %v14826_v47  ;;  %20010 = vst [vmem:[#allocation138_spill] sm:$0xff] %v14828_v44  ;;  %v8188_v51 = vunpack.i.l.bf16 %v20013_v53  ;;  %v14841_v54 = vmul.f32 %v19549_v37, %v3439_v11  ;;  %v5862_v8 = vmul.f32 %v5798_v36, %v5454_v30  ;;  %4087 = vrot.lane.b32.xlu1 %v14826_v47, %s8557_s20  ;;  %v20016_v11 = vld [vmem:[#allocation30_spill] sm:$0xff]  ;;  %v20018_v47 = vld [vmem:[#allocation275_spill] sm:$0xff]  ;;  %v14861_v44 = vpop.permute.xlu1 %4059 }
 0x41a   :  { %v5540_v61 = vsub.f32 %v19952_v38, %v13201_v3  ;;  %v14848_v58 = vmul.f32 %v10521_v2, %v3440_v6  ;;  %v14851_v40 = vmul.f32 %v19549_v37, %v3441_v22  ;;  %v4320_v18 = vsub.f32 %v20015_v19, %v20014_v28  ;;  %5233 = vrot.lane.b32.xlu0 %v5097_v48, %s8557_s20  ;;  %v5206_v6 = vpop.permute.xlu0 %5205  ;;  %v20022_v48 = vld [vmem:[#allocation224_spill] sm:$0xff]  ;;  %v20024_v26 = vld [vmem:[#allocation210_spill] sm:$0xff] }
 0x41b   :  { %v5729_v1 = vsub.f32 %v14354_v9, %v20016_v11  ;;  %v3698_v36 = vmul.f32 %v14707_v12, %v2899_v24  ;;  %v5098_v30 = vadd.f32 %v4970_v17, %v20017_v41  ;;  %v5099_v38 = vadd.f32 %v4971_v59, %v20018_v47  ;;  %20019 = vst [vmem:[#allocation145_spill] sm:$0xff] %v14861_v44  ;;  %v20026_v24 = vld [vmem:[#allocation257_spill] sm:$0xff] }
 0x41c   :  { %v5926_v22 = vadd.f32 %v5862_v8, %v20020_v31  ;;  %v14865_v16 = vmul.f32 %v10521_v2, %v3442_v4  ;;  %v14868_v23 = vmul.f32 %v19549_v37, %v3443_v55  ;;  %v4321_v11 = vsub.f32 %v20023_v34, %v20022_v48  ;;  %v20027_v31 = vld [vmem:[#allocation228_spill] sm:$0xff]  ;;  %v20030_v41 = vld [vmem:[#allocation157_spill] sm:$0xff] }
 0x41d   :  { %v14873_v12 = vadd.f32 %v3697_v13, %v20024_v26  ;;  %v8128_v17 = vunpack.i.l.bf16 %v20026_v24  ;;  %v2836_v47 = vsel %vm2784_vm7, %v8124_v15, %v8188_v51  ;;  %v4726_v59 = vsub.f32 %v12649_v27, %v20015_v19  ;;  %5361 = vrot.lane.b32.xlu1 %v5098_v30, %s8557_s20  ;;  %v20029_v26 = vld [vmem:[#allocation155_spill] sm:$0xff]  ;;  %v20032_v19 = vld [vmem:[#allocation133_spill] sm:$0xff] }
 0x41e   :  { %20021 = vst [vmem:[#allocation25_spill] sm:$0xff] %v14868_v23  ;;  %7486 = vmatmul.mubr.f32.gmra.mrb[68].mxu1 %v5926_v22  ;;  %v5610_v4 = vmul.f32 %v13254_v52, %v5540_v61  ;;  %v14883_v55 = vmul.f32 %v20027_v31, %v4320_v18  ;;  %v4727_v13 = vsub.f32 %v12652_v60, %v20023_v34  ;;  %v5334_v22 = vpop.permute.xlu1 %5333  ;;  %v14896_v18 = vpop.permute.xlu0 %3933 }
 0x41f   :  { %20025 = vst [vmem:[#allocation32_spill] sm:$0xff] %v14873_v12  ;;  %v4322_v8 = vsub.f32 %v20029_v26, %v20014_v28  ;;  %v4323_v44 = vsub.f32 %v20030_v41, %v20022_v48  ;;  %3961 = vrot.lane.b32.xlu0 %v14873_v12, %s8557_s20  ;;  %v4728_v30 = vsub.f32 %v12649_v27, %v20029_v26  ;;  %20031 = vst [vmem:[#allocation2_spill] sm:$0xff] %v14896_v18  ;;  %v20035_v18 = vld [vmem:[#allocation159_spill] sm:$0xff] }
 0x420   :  { %20028 = vst [vmem:[#allocation144_spill] sm:$0xff] %v14883_v55  ;;  %v5799_v61 = vmul.f32 %v14381_v50, %v5729_v1  ;;  %v14899_v55 = vadd.f32 %v3698_v36, %v20032_v19  ;;  %v14901_v34 = vmul.f32 %v5610_v4, %v5099_v38  ;;  %v2900_v37 = vsel %vm2784_vm7, %v8188_v51, %v8124_v15  ;;  %v20036_v36 = vld [vmem:[#allocation107_spill] sm:$0xff]  ;;  %v20037_v51 = vld [vmem:[#allocation226_spill] sm:$0xff] }
 0x421   :  { %v3699_v2 = vmul.f32 %v14731_v57, %v2836_v47  ;;  %v4729_v12 = vsub.f32 %v12652_v60, %v20030_v41  ;;  %v5455_v26 = vsel %vm2784_vm7, %v5206_v6, %v5334_v22  ;;  %v8189_v1 = vunpack.i.h.bf16 %v20013_v53 }
 0x422   :  { %20033 = vst [vmem:[#allocation82_spill] sm:$0xff] %v14899_v55  ;;  %20034 = vst [vmem:[#allocation249_spill] sm:$0xff] %v14901_v34  ;;  %v4324_v23 = vsub.f32 %v20035_v18, %v20014_v28  ;;  %v5863_v19 = vmul.f32 %v5799_v61, %v5455_v26  ;;  %4089 = vrot.lane.b32.xlu1 %v14899_v55, %s8557_s20  ;;  %v5541_v15 = vsub.f32 %v20036_v36, %v13201_v3  ;;  %v14934_v41 = vpop.permute.xlu1 %4061  ;;  %v20040_v61 = vld [vmem:[#allocation297_spill] sm:$0xff]  ;;  %v20050_v34 = vld [vmem:[#allocation164_spill] sm:$0xff] }
 0x423   :  { %v14918_v57 = vmul.f32 %v20037_v51, %v4321_v11  ;;  %v14921_v47 = vmul.f32 %v12697_v29, %v4726_v59  ;;  %v14924_v6 = vmul.f32 %v12700_v10, %v4727_v13  ;;  %v14927_v53 = vmul.f32 %v20027_v31, %v4322_v8  ;;  %5235 = vrot.lane.b32.xlu0 %v5099_v38, %s8557_s20  ;;  %v5208_v11 = vpop.permute.xlu0 %5207  ;;  %v20041_v59 = vld [vmem:[#allocation33_spill] sm:$0xff] }
 0x424   :  { %v3700_v4 = vmul.f32 %v14734_v62, %v2900_v37  ;;  %v14932_v26 = vmul.f32 %v20037_v51, %v4323_v44  ;;  %20039 = vst [vmem:[#allocation229_spill] sm:$0xff] %v14934_v41  ;;  %v5927_v22 = vadd.f32 %v5863_v19, %v20040_v61  ;;  %v5730_v55 = vsub.f32 %v14354_v9, %v20041_v59  ;;  %v20044_v38 = vld [vmem:[#allocation161_spill] sm:$0xff]  ;;  %v20045_v62 = vld [vmem:[#allocation211_spill] sm:$0xff] }
 0x425   :  { %v14940_v13 = vmul.f32 %v12697_v29, %v4728_v30  ;;  %v14943_v8 = vmul.f32 %v12700_v10, %v4729_v12  ;;  %v4325_v37 = vsub.f32 %v20044_v38, %v20022_v48  ;;  %v14948_v44 = vadd.f32 %v3699_v2, %v20045_v62  ;;  %v20048_v30 = vld [vmem:[#allocation34_spill] sm:$0xff] }
 0x426   :  { %20038 = vst [vmem:[#allocation101_spill] sm:$0xff] %v14932_v26  ;;  %v8129_v36 = vunpack.i.h.bf16 %v20026_v24  ;;  %v2837_v19 = vsel %vm2784_vm7, %v8128_v17, %v8189_v1  ;;  %v14954_v61 = vmul.f32 %v20027_v31, %v4324_v23  ;;  %5363 = vrot.lane.b32.xlu1 %v20048_v30, %s8557_s20  ;;  %7488 = vmatprep.mubr.f32.mxu1 %v5927_v22  ;;  %v20049_v24 = vld [vmem:[#allocation163_spill] sm:$0xff]  ;;  %v5336_v22 = vpop.permute.xlu1 %5335 }
 0x427   :  { %20042 = vst [vmem:[#allocation158_spill] sm:$0xff] %v14940_v13  ;;  %20043 = vst [vmem:[#allocation233_spill] sm:$0xff] %v14943_v8  ;;  %v5611_v12 = vmul.f32 %v13254_v52, %v5541_v15  ;;  %v4730_v59 = vsub.f32 %v12649_v27, %v20035_v18  ;;  %v4731_v2 = vsub.f32 %v12652_v60, %v20044_v38  ;;  %3963 = vrot.lane.b32.xlu0 %v14948_v44, %s8557_s20  ;;  %v14972_v30 = vpop.permute.xlu0 %3935  ;;  %v20052_v18 = vld [vmem:[#allocation80_spill] sm:$0xff] }
 0x428   :  { %20046 = vst [vmem:[#allocation234_spill] sm:$0xff] %v14948_v44  ;;  %20047 = vst [vmem:[#allocation7_spill] sm:$0xff] %v14954_v61  ;;  %v4326_v62 = vsub.f32 %v20049_v24, %v20014_v28  ;;  %v4327_v41 = vsub.f32 %v20050_v34, %v20022_v48  ;;  %v4732_v23 = vsub.f32 %v12649_v27, %v20049_v24  ;;  %v20055_v24 = vld [vmem:[#allocation231_spill] sm:$0xff] }
 0x429   :  { %v5800_v15 = vmul.f32 %v14381_v50, %v5730_v55  ;;  %20051 = vst [vmem:[#allocation108_spill] sm:$0xff] %v14972_v30  ;;  %v14975_v8 = vadd.f32 %v3700_v4, %v20052_v18  ;;  %v14978_v38 = vmul.f32 %v5611_v12, %v14085_v42  ;;  %v2901_v13 = vsel %vm2784_vm7, %v8189_v1, %v8128_v17  ;;  %v20056_v4 = vld [vmem:[#allocation112_spill] sm:$0xff] }
 0x42a   :  { %v3701_v61 = vmul.f32 %v14761_v35, %v2837_v19  ;;  %v4733_v44 = vsub.f32 %v12652_v60, %v20050_v34  ;;  %v5456_v55 = vsel %vm2784_vm7, %v5208_v11, %v5336_v22  ;;  %v8193_v26 = vunpack.i.l.bf16 %v20055_v24  ;;  %v20060_v11 = vld [vmem:[#allocation165_spill] sm:$0xff]  ;;  %v20063_v22 = vld [vmem:[#allocation298_spill] sm:$0xff] }
 0x42b   :  { %20053 = vst [vmem:[#allocation293_spill] sm:$0xff] %v14975_v8  ;;  %20054 = vst [vmem:[#allocation77_spill] sm:$0xff] %v14978_v38  ;;  %v14989_v30 = vmul.f32 %v20037_v51, %v4325_v37  ;;  %v5864_v18 = vmul.f32 %v5800_v15, %v5456_v55  ;;  %4091 = vrot.lane.b32.xlu1 %v14975_v8, %s8557_s20  ;;  %v5542_v17 = vsub.f32 %v20056_v4, %v13201_v3  ;;  %v15012_v15 = vpop.permute.xlu1 %4063  ;;  %v20064_v55 = vld [vmem:[#allocation36_spill] sm:$0xff] }
 0x42c   :  { %v14996_v35 = vmul.f32 %v12697_v29, %v4730_v59  ;;  %v14999_v34 = vmul.f32 %v12700_v10, %v4731_v2  ;;  %v15002_v1 = vmul.f32 %v20027_v31, %v4326_v62  ;;  %v4328_v37 = vsub.f32 %v20060_v11, %v20014_v28  ;;  %5237 = vrot.lane.b32.xlu0 %v14085_v42, %s8557_s20  ;;  %v5210_v59 = vpop.permute.xlu0 %5209  ;;  %v20067_v42 = vld [vmem:[#allocation214_spill] sm:$0xff] }
 0x42d   :  { %v3702_v19 = vmul.f32 %v14773_v43, %v2901_v13  ;;  %v15010_v12 = vmul.f32 %v20037_v51, %v4327_v41  ;;  %20062 = vst [vmem:[#allocation142_spill] sm:$0xff] %v15012_v15  ;;  %v5928_v2 = vadd.f32 %v5864_v18, %v20063_v22  ;;  %v5731_v62 = vsub.f32 %v14354_v9, %v20064_v55  ;;  %v20069_v43 = vld [vmem:[#allocation13_spill] sm:$0xff]  ;;  %v20071_v22 = vld [vmem:[#allocation168_spill] sm:$0xff] }
 0x42e   :  { %20057 = vst [vmem:[#allocation294_spill] sm:$0xff] %v14996_v35  ;;  %20058 = vst [vmem:[#allocation290_spill] sm:$0xff] %v14999_v34  ;;  %v15018_v8 = vmul.f32 %v12697_v29, %v4732_v23  ;;  %v15021_v4 = vmul.f32 %v12700_v10, %v4733_v44  ;;  %v15024_v38 = vadd.f32 %v3701_v61, %v20067_v42  ;;  %v20070_v13 = vld [vmem:[#allocation69_spill] sm:$0xff]  ;;  %v20076_v34 = vld [vmem:[#allocation272_spill] sm:$0xff] }
 0x42f   :  { %20059 = vst [vmem:[#allocation148_spill] sm:$0xff] %v15002_v1  ;;  %20061 = vst [vmem:[#allocation95_spill] sm:$0xff] %v15010_v12  ;;  %v3031_v41 = vsub.f32 %v19986_v46, %v20069_v43  ;;  %v8133_v15 = vunpack.i.l.bf16 %v20070_v13  ;;  %v2838_v18 = vsel %vm2784_vm7, %v8129_v36, %v8193_v26  ;;  %v4329_v55 = vsub.f32 %v20071_v22, %v20022_v48  ;;  %v20073_v46 = vld [vmem:[#allocation169_spill] sm:$0xff]  ;;  %v20079_v1 = vld [vmem:[#allocation16_spill] sm:$0xff] }
 0x430   :  { %20065 = vst [vmem:[#allocation237_spill] sm:$0xff] %v15018_v8  ;;  %20066 = vst [vmem:[#allocation192_spill] sm:$0xff] %v15021_v4  ;;  %5365 = vrot.lane.b32.xlu1 %v14088_v5, %s8557_s20  ;;  %7489 = vmatmul.mubr.f32.gmra.mrb[70].mxu1 %v5928_v2  ;;  %v5612_v44 = vmul.f32 %v13254_v52, %v5542_v17  ;;  %v15037_v61 = vmul.f32 %v20027_v31, %v4328_v37  ;;  %v20074_v5 = vld [vmem:[#allocation170_spill] sm:$0xff]  ;;  %v5338_v8 = vpop.permute.xlu1 %5337  ;;  %v15050_v37 = vpop.permute.xlu0 %3937 }
 0x431   :  { %20068 = vst [vmem:[#allocation266_spill] sm:$0xff] %v15024_v38  ;;  %v4734_v23 = vsub.f32 %v12649_v27, %v20060_v11  ;;  %v4735_v42 = vsub.f32 %v12652_v60, %v20071_v22  ;;  %v4330_v4 = vsub.f32 %v20073_v46, %v20014_v28  ;;  %3965 = vrot.lane.b32.xlu0 %v15024_v38, %s8557_s20  ;;  %20075 = vst [vmem:[#allocation236_spill] sm:$0xff] %v15050_v37 }
 0x432   :  { %20072 = vst [vmem:[#allocation70_spill] sm:$0xff] %v15037_v61  ;;  %v4331_v2 = vsub.f32 %v20074_v5, %v20022_v48  ;;  %v5801_v17 = vmul.f32 %v14381_v50, %v5731_v62  ;;  %v15053_v61 = vadd.f32 %v3702_v19, %v20076_v34  ;;  %v15056_v11 = vmul.f32 %v5612_v44, %v14115_v49  ;;  %v20080_v19 = vld [vmem:[#allocation118_spill] sm:$0xff] }
 0x433   :  { %v2902_v22 = vsel %vm2784_vm7, %v8193_v26, %v8129_v36  ;;  %v3703_v12 = vmul.f32 %v14776_v20, %v2838_v18  ;;  %v5457_v38 = vsel %vm2784_vm7, %v5210_v59, %v5338_v8  ;;  %v3170_v35 = vmul.f32 %v20079_v1, %v3031_v41  ;;  %v20082_v18 = vld [vmem:[#allocation119_spill] sm:$0xff] }
 0x434   :  { %20077 = vst [vmem:[#allocation9_spill] sm:$0xff] %v15053_v61  ;;  %20078 = vst [vmem:[#allocation10_spill] sm:$0xff] %v15056_v11  ;;  %v8194_v62 = vunpack.i.h.bf16 %v20055_v24  ;;  %v15066_v37 = vmul.f32 %v20037_v51, %v4329_v55  ;;  %v5865_v34 = vmul.f32 %v5801_v17, %v5457_v38  ;;  %4093 = vrot.lane.b32.xlu1 %v15053_v61, %s8557_s20  ;;  %v15088_v59 = vpop.permute.xlu1 %4065  ;;  %v5212_v41 = vpop.permute.xlu0 %5211  ;;  %v20110_v11 = vld [vmem:[#allocation289_spill] sm:$0xff] }
 0x435   :  { %v5543_v44 = vsub.f32 %v20080_v19, %v13201_v3  ;;  %v15073_v36 = vmul.f32 %v12697_v29, %v4734_v23  ;;  %v15076_v20 = vmul.f32 %v12700_v10, %v4735_v42  ;;  %v4736_v26 = vsub.f32 %v12649_v27, %v20073_v46  ;;  %5239 = vrot.lane.b32.xlu0 %v14115_v49, %s8557_s20  ;;  %v20083_v23 = vld [vmem:[#allocation40_spill] sm:$0xff]  ;;  %v20085_v49 = vld [vmem:[#allocation215_spill] sm:$0xff] }
 0x436   :  { %v4737_v8 = vsub.f32 %v12652_v60, %v20074_v5  ;;  %v3704_v24 = vmul.f32 %v14779_v7, %v2902_v22  ;;  %v15086_v38 = vmul.f32 %v20027_v31, %v4330_v4  ;;  %20081 = vst [vmem:[#allocation295_spill] sm:$0xff] %v15088_v59  ;;  %v5929_v55 = vadd.f32 %v5865_v34, %v20082_v18  ;;  %v20084_v5 = vld [vmem:[#allocation171_spill] sm:$0xff]  ;;  %v20087_v7 = vld [vmem:[#allocation280_spill] sm:$0xff] }
 0x437   :  { %v5732_v42 = vsub.f32 %v14354_v9, %v20083_v23  ;;  %v15094_v17 = vmul.f32 %v20037_v51, %v4331_v2  ;;  %v4332_v46 = vsub.f32 %v20084_v5, %v20014_v28  ;;  %v15099_v61 = vadd.f32 %v3703_v12, %v20085_v49 }
 0x438   :  { %v3298_v4 = vmul.f32 %v3170_v35, %v20087_v7  ;;  %v8134_v22 = vunpack.i.h.bf16 %v20070_v13  ;;  %v2839_v19 = vsel %vm2784_vm7, %v8133_v15, %v8194_v62  ;;  %5367 = vrot.lane.b32.xlu1 %v14118_v14, %s8557_s20  ;;  %7491 = vmatprep.mubr.f32.mxu1 %v5929_v55  ;;  %v3033_v2 = vsub.f32 %v20000_v0, %v20069_v43  ;;  %v20089_v35 = vld [vmem:[#allocation174_spill] sm:$0xff]  ;;  %v5340_v55 = vpop.permute.xlu1 %5339 }
 0x439   :  { %20086 = vst [vmem:[#allocation76_spill] sm:$0xff] %v15099_v61  ;;  %v5613_v34 = vmul.f32 %v13254_v52, %v5543_v44  ;;  %v15111_v18 = vmul.f32 %v12697_v29, %v4736_v26  ;;  %v15114_v12 = vmul.f32 %v12700_v10, %v4737_v8  ;;  %v4333_v13 = vsub.f32 %v20089_v35, %v20022_v48  ;;  %v15125_v26 = vpop.permute.xlu0 %3939 }
 0x43a   :  { %v4738_v23 = vsub.f32 %v12649_v27, %v20084_v5  ;;  %3967 = vrot.lane.b32.xlu0 %v15099_v61, %s8557_s20  ;;  %v4739_v14 = vsub.f32 %v12652_v60, %v20089_v35  ;;  %v5802_v44 = vmul.f32 %v14381_v50, %v5732_v42  ;;  %20090 = vst [vmem:[#allocation281_spill] sm:$0xff] %v15125_v26  ;;  %v8198_v42 = vunpack.i.l.bf16 %v14183_v32 }
 0x43b   :  { %20088 = vst [vmem:[#allocation23_spill] sm:$0xff] %v15114_v12  ;;  %v15127_v49 = vadd.f32 %v3704_v24, %v3298_v4  ;;  %v15130_v8 = vmul.f32 %v5613_v34, %v14148_v45  ;;  %v2903_v7 = vsel %vm2784_vm7, %v8194_v62, %v8133_v15  ;;  %v3705_v5 = vmul.f32 %v14808_v63, %v2839_v19  ;;  %v20093_v4 = vld [vmem:[#allocation123_spill] sm:$0xff]  ;;  %v20167_v12 = vld [vmem:[#allocation221_spill] sm:$0xff] }
 0x43c   :  { %v15136_v61 = vmul.f32 %v20027_v31, %v4332_v46  ;;  %v5458_v35 = vsel %vm2784_vm7, %v5212_v41, %v5340_v55  ;;  %v3172_v24 = vmul.f32 %v20079_v1, %v3033_v2  ;;  %v5544_v34 = vsub.f32 %v20093_v4, %v13201_v3  ;;  %v20094_v46 = vld [vmem:[#allocation175_spill] sm:$0xff] }
 0x43d   :  { %20091 = vst [vmem:[#allocation251_spill] sm:$0xff] %v15127_v49  ;;  %20092 = vst [vmem:[#allocation72_spill] sm:$0xff] %v15130_v8  ;;  %v5866_v0 = vmul.f32 %v5802_v44, %v5458_v35  ;;  %4095 = vrot.lane.b32.xlu1 %v15127_v49, %s8557_s20  ;;  %v15147_v15 = vmul.f32 %v20037_v51, %v4333_v13  ;;  %v4334_v63 = vsub.f32 %v20094_v46, %v20014_v28  ;;  %v15164_v44 = vpop.permute.xlu1 %4067  ;;  %v20098_v35 = vld [vmem:[#allocation176_spill] sm:$0xff] }
 0x43e   :  { %5241 = vrot.lane.b32.xlu0 %v14148_v45, %s8557_s20  ;;  %v4740_v62 = vsub.f32 %v12649_v27, %v20094_v46  ;;  %v5733_v19 = vsub.f32 %v14354_v9, %v19764_v39  ;;  %v3706_v41 = vmul.f32 %v14841_v54, %v2903_v7  ;;  %v15159_v2 = vmul.f32 %v12697_v29, %v4738_v23  ;;  %v5214_v45 = vpop.permute.xlu0 %5213  ;;  %v20099_v39 = vld [vmem:[#allocation218_spill] sm:$0xff]  ;;  %v20101_v23 = vld [vmem:[#allocation125_spill] sm:$0xff] }
 0x43f   :  { %v15162_v13 = vmul.f32 %v12700_v10, %v4739_v14  ;;  %20097 = vst [vmem:[#allocation150_spill] sm:$0xff] %v15164_v44  ;;  %v5930_v55 = vadd.f32 %v5866_v0, %v14063_v21  ;;  %v4335_v49 = vsub.f32 %v20098_v35, %v20022_v48  ;;  %v4741_v46 = vsub.f32 %v12652_v60, %v20098_v35  ;;  %v20102_v21 = vld [vmem:[#allocation238_spill] sm:$0xff] }
 0x440   :  { %20095 = vst [vmem:[#allocation18_spill] sm:$0xff] %v15159_v2  ;;  %v15172_v4 = vadd.f32 %v3705_v5, %v20099_v39  ;;  %v3035_v54 = vsub.f32 %v20005_v25, %v20069_v43  ;;  %v8138_v14 = vunpack.i.l.bf16 %v20101_v23  ;;  %v2840_v7 = vsel %vm2784_vm7, %v8134_v22, %v8198_v42  ;;  %v20105_v23 = vld [vmem:[#allocation48_spill] sm:$0xff] }
 0x441   :  { %20096 = vst [vmem:[#allocation22_spill] sm:$0xff] %v15162_v13  ;;  %5369 = vrot.lane.b32.xlu1 %v14151_v33, %s8557_s20  ;;  %7492 = vmatmul.mubr.f32.gmra.mrb[72].mxu1 %v5930_v55  ;;  %v3300_v0 = vmul.f32 %v3172_v24, %v20102_v21  ;;  %v5614_v8 = vmul.f32 %v13254_v52, %v5544_v34  ;;  %v5342_v33 = vpop.permute.xlu1 %5341  ;;  %v20108_v34 = vld [vmem:[#allocation180_spill] sm:$0xff]  ;;  %v20109_v21 = vld [vmem:[#allocation53_spill] sm:$0xff] }
 0x442   :  { %20100 = vst [vmem:[#allocation235_spill] sm:$0xff] %v15172_v4  ;;  %v15184_v35 = vmul.f32 %v20027_v31, %v4334_v63  ;;  %v15187_v5 = vmul.f32 %v12697_v29, %v4740_v62  ;;  %3969 = vrot.lane.b32.xlu0 %v15172_v4, %s8557_s20  ;;  %v5803_v39 = vmul.f32 %v14381_v50, %v5733_v19  ;;  %v15194_v55 = vpop.permute.xlu0 %3941 }
 0x443   :  { %v5734_v25 = vsub.f32 %v14354_v9, %v20105_v23  ;;  %20106 = vst [vmem:[#allocation17_spill] sm:$0xff] %v15194_v55  ;;  %v15196_v24 = vadd.f32 %v3706_v41, %v3300_v0  ;;  %v4336_v63 = vsub.f32 %v20108_v34, %v20014_v28  ;;  %v5735_v62 = vsub.f32 %v14354_v9, %v20109_v21  ;;  %v20112_v21 = vld [vmem:[#allocation128_spill] sm:$0xff] }
 0x444   :  { %20103 = vst [vmem:[#allocation191_spill] sm:$0xff] %v15184_v35  ;;  %20104 = vst [vmem:[#allocation86_spill] sm:$0xff] %v15187_v5  ;;  %v15203_v5 = vmul.f32 %v5614_v8, %v20110_v11  ;;  %v2904_v19 = vsel %vm2784_vm7, %v8198_v42, %v8134_v22  ;;  %v3707_v4 = vmul.f32 %v14848_v58, %v2840_v7  ;;  %v8199_v0 = vunpack.i.h.bf16 %v14183_v32  ;;  %v20115_v32 = vld [vmem:[#allocation183_spill] sm:$0xff] }
 0x445   :  { %20107 = vst [vmem:[#allocation115_spill] sm:$0xff] %v15196_v24  ;;  %v5459_v23 = vsel %vm2784_vm7, %v5214_v45, %v5342_v33  ;;  %v4742_v41 = vsub.f32 %v12649_v27, %v20108_v34  ;;  %4097 = vrot.lane.b32.xlu1 %v15196_v24, %s8557_s20  ;;  %v3174_v8 = vmul.f32 %v20079_v1, %v3035_v54  ;;  %v20118_v33 = vld [vmem:[#allocation58_spill] sm:$0xff]  ;;  %v20120_v34 = vld [vmem:[#allocation217_spill] sm:$0xff] }
 0x446   :  { %20111 = vst [vmem:[#allocation283_spill] sm:$0xff] %v15203_v5  ;;  %v5867_v55 = vmul.f32 %v5803_v39, %v5459_v23  ;;  %v5545_v5 = vsub.f32 %v20112_v21, %v13201_v3  ;;  %v15219_v22 = vmul.f32 %v20037_v51, %v4335_v49  ;;  %v15222_v58 = vmul.f32 %v12700_v10, %v4741_v46  ;;  %v15234_v39 = vpop.permute.xlu1 %4069  ;;  %v5216_v49 = vpop.permute.xlu0 %5215  ;;  %v20123_v21 = vld [vmem:[#allocation182_spill] sm:$0xff] }
 0x447   :  { %5243 = vrot.lane.b32.xlu0 %v20110_v11, %s8557_s20  ;;  %v4337_v42 = vsub.f32 %v20115_v32, %v20022_v48  ;;  %v4743_v45 = vsub.f32 %v12652_v60, %v20115_v32  ;;  %v3708_v54 = vmul.f32 %v14851_v40, %v2904_v19  ;;  %v15232_v7 = vmul.f32 %v20027_v31, %v4336_v63  ;;  %v20122_v40 = vld [vmem:[#allocation122_spill] sm:$0xff] }
 0x448   :  { %20113 = vst [vmem:[#allocation87_spill] sm:$0xff] %v15219_v22  ;;  %20114 = vst [vmem:[#allocation81_spill] sm:$0xff] %v15222_v58  ;;  %v5931_v46 = vadd.f32 %v5867_v55, %v20118_v33  ;;  %v5804_v23 = vmul.f32 %v14381_v50, %v5734_v25  ;;  %v15239_v11 = vmul.f32 %v12697_v29, %v4742_v41  ;;  %v20124_v25 = vld [vmem:[#allocation98_spill] sm:$0xff] }
 0x449   :  { %20116 = vst [vmem:[#allocation64_spill] sm:$0xff] %v15232_v7  ;;  %20117 = vst [vmem:[#allocation92_spill] sm:$0xff] %v15234_v39  ;;  %v15242_v24 = vadd.f32 %v3707_v4, %v20120_v34  ;;  %v15245_v32 = vmul.f32 %v14381_v50, %v5735_v62  ;;  %v3037_v63 = vsub.f32 %v20122_v40, %v20069_v43  ;;  %5371 = vrot.lane.b32.xlu1 %v20123_v21, %s8557_s20  ;;  %v20127_v62 = vld [vmem:[#allocation185_spill] sm:$0xff]  ;;  %v20128_v40 = vld [vmem:[#allocation59_spill] sm:$0xff] }
 0x44a   :  { %20119 = vst [vmem:[#allocation113_spill] sm:$0xff] %v15239_v11  ;;  %v2841_v19 = vsel %vm2784_vm7, %v8138_v14, %v8199_v0  ;;  %7494 = vmatprep.mubr.f32.mxu1 %v5931_v46  ;;  %v3302_v55 = vmul.f32 %v3174_v8, %v20124_v25  ;;  %v5615_v41 = vmul.f32 %v13254_v52, %v5545_v5  ;;  %v5344_v46 = vpop.permute.xlu1 %5343  ;;  %v15267_v11 = vpop.permute.xlu0 %3943  ;;  %v20131_v5 = vld [vmem:[#allocation187_spill] sm:$0xff]  ;;  %v20132_v25 = vld [vmem:[#allocation220_spill] sm:$0xff]  ;;  %v20145_v7 = vld [vmem:[#allocation177_spill] sm:$0xff] }
 0x44b   :  { %20121 = vst [vmem:[#allocation195_spill] sm:$0xff] %v15242_v24  ;;  %v15256_v4 = vmul.f32 %v20037_v51, %v4337_v42  ;;  %v15259_v34 = vmul.f32 %v12700_v10, %v4743_v45  ;;  %3971 = vrot.lane.b32.xlu0 %v15242_v24, %s8557_s20  ;;  %v4338_v33 = vsub.f32 %v20127_v62, %v20014_v28  ;;  %20129 = vst [vmem:[#allocation286_spill] sm:$0xff] %v15267_v11  ;;  %v20168_v22 = vld [vmem:[#allocation146_spill] sm:$0xff] }
 0x44c   :  { %v5736_v21 = vsub.f32 %v14354_v9, %v20128_v40  ;;  %v15269_v8 = vadd.f32 %v3708_v54, %v3302_v55  ;;  %v4339_v42 = vsub.f32 %v20131_v5, %v20022_v48  ;;  %v4744_v45 = vsub.f32 %v12649_v27, %v20127_v62  ;;  %v20134_v55 = vld [vmem:[#allocation244_spill] sm:$0xff] }
 0x44d   :  { %20125 = vst [vmem:[#allocation4_spill] sm:$0xff] %v15256_v4  ;;  %20126 = vst [vmem:[#allocation153_spill] sm:$0xff] %v15259_v34  ;;  %v15276_v34 = vmul.f32 %v5615_v41, %v20132_v25  ;;  %v2905_v24 = vsel %vm2784_vm7, %v8199_v0, %v8138_v14  ;;  %v3709_v58 = vmul.f32 %v14865_v16, %v2841_v19  ;;  %v8204_v11 = vunpack.i.h.bf16 %v20134_v55  ;;  %v20135_v41 = vld [vmem:[#allocation131_spill] sm:$0xff]  ;;  %v20139_v19 = vld [vmem:[#allocation25_spill] sm:$0xff] }
 0x44e   :  { %20130 = vst [vmem:[#allocation97_spill] sm:$0xff] %v15269_v8  ;;  %v5460_v40 = vsel %vm2784_vm7, %v5216_v49, %v5344_v46  ;;  %v3176_v54 = vmul.f32 %v20079_v1, %v3037_v63  ;;  %v8203_v39 = vunpack.i.l.bf16 %v20134_v55  ;;  %4099 = vrot.lane.b32.xlu1 %v15269_v8, %s8557_s20  ;;  %v5546_v62 = vsub.f32 %v20135_v41, %v13201_v3  ;;  %v20137_v14 = vld [vmem:[#allocation179_spill] sm:$0xff]  ;;  %v20138_v49 = vld [vmem:[#allocation5_spill] sm:$0xff]  ;;  %v15308_v8 = vpop.permute.xlu1 %4071 }
 0x44f   :  { %20133 = vst [vmem:[#allocation265_spill] sm:$0xff] %v15276_v34  ;;  %v5868_v4 = vmul.f32 %v5804_v23, %v5460_v40  ;;  %v20136_v34 = vld [vmem:[#allocation189_spill] sm:$0xff]  ;;  %5245 = vrot.lane.b32.xlu0 %v20132_v25, %s8557_s20  ;;  %v4745_v16 = vsub.f32 %v12652_v60, %v20131_v5  ;;  %v15299_v23 = vmul.f32 %v14381_v50, %v5736_v21  ;;  %20142 = vst [vmem:[#allocation227_spill] sm:$0xff] %v15308_v8  ;;  %v5218_v25 = vpop.permute.xlu0 %5217  ;;  %v20143_v41 = vld [vmem:[#allocation255_spill] sm:$0xff] }
 0x450   :  { %v3444_v0 = vsub.f32 %v20137_v14, %v20136_v34  ;;  %v3038_v63 = vsub.f32 %v20136_v34, %v20138_v49  ;;  %v3710_v46 = vmul.f32 %v20139_v19, %v2905_v24  ;;  %v15303_v40 = vmul.f32 %v20027_v31, %v4338_v33  ;;  %v20144_v5 = vld [vmem:[#allocation190_spill] sm:$0xff]  ;;  %v20146_v34 = vld [vmem:[#allocation219_spill] sm:$0xff] }
 0x451   :  { %v15306_v55 = vmul.f32 %v12697_v29, %v4744_v45  ;;  %v5932_v13 = vadd.f32 %v5868_v4, %v20143_v41  ;;  %v3445_v26 = vsub.f32 %v20145_v7, %v20144_v5  ;;  %v15314_v44 = vadd.f32 %v3709_v58, %v20146_v34  ;;  %v20148_v21 = vld [vmem:[#allocation250_spill] sm:$0xff]  ;;  %v20149_v24 = vld [vmem:[#allocation63_spill] sm:$0xff] }
 0x452   :  { %20140 = vst [vmem:[#allocation21_spill] sm:$0xff] %v15303_v40  ;;  %v3304_v2 = vmul.f32 %v3176_v54, %v20148_v21  ;;  %v5737_v33 = vsub.f32 %v14354_v9, %v20149_v24  ;;  %v2842_v45 = vsel %vm2784_vm7, %v8203_v39, %v8204_v11  ;;  %v20150_v19 = vld [vmem:[#allocation43_spill] sm:$0xff]  ;;  %v3039_v4 = vsub.f32 %v20144_v5, %v20069_v43  ;;  %v20154_v21 = vld [vmem:[#allocation6_spill] sm:$0xff] }
 0x453   :  { %20141 = vst [vmem:[#allocation252_spill] sm:$0xff] %v15306_v55  ;;  %20147 = vst [vmem:[#allocation79_spill] sm:$0xff] %v15314_v44  ;;  %5373 = vrot.lane.b32.xlu1 %v20150_v19, %s8557_s20  ;;  %7495 = vmatmul.mubr.f32.gmra.mrb[74].mxu1 %v5932_v13  ;;  %v5616_v41 = vmul.f32 %v13254_v52, %v5546_v62  ;;  %v20151_v55 = vld [vmem:[#allocation186_spill] sm:$0xff]  ;;  %v15328_v34 = vmul.f32 %v20037_v51, %v4339_v42  ;;  %v5346_v19 = vpop.permute.xlu1 %5345  ;;  %v15338_v5 = vpop.permute.xlu0 %3945 }
 0x454   :  { %v3583_v58 = vmul.f32 %v20151_v55, %v3444_v0  ;;  %v15331_v54 = vmul.f32 %v12700_v10, %v4745_v16  ;;  %3973 = vrot.lane.b32.xlu0 %v15314_v44, %s8557_s20  ;;  %v3177_v24 = vmul.f32 %v20154_v21, %v3038_v63  ;;  %v2906_v13 = vsel %vm2784_vm7, %v8204_v11, %v8203_v39  ;;  %v20157_v0 = vld [vmem:[#allocation188_spill] sm:$0xff] }
 0x455   :  { %20152 = vst [vmem:[#allocation103_spill] sm:$0xff] %v15328_v34  ;;  %20155 = vst [vmem:[#allocation198_spill] sm:$0xff] %v15338_v5  ;;  %v15340_v62 = vadd.f32 %v3710_v46, %v3304_v2  ;;  %v4340_v42 = vsub.f32 %v20157_v0, %v20014_v28  ;;  %v20158_v34 = vld [vmem:[#allocation62_spill] sm:$0xff]  ;;  %v5461_v63 = vsel %vm2784_vm7, %v5218_v25, %v5346_v19  ;;  %v20161_v39 = vld [vmem:[#allocation184_spill] sm:$0xff] }
 0x456   :  { %20153 = vst [vmem:[#allocation239_spill] sm:$0xff] %v15331_v54  ;;  %v15345_v40 = vmul.f32 %v5616_v41, %v20158_v34  ;;  %v3711_v16 = vmul.f32 %v3583_v58, %v2842_v45  ;;  %v20160_v54 = vld [vmem:[#allocation89_spill] sm:$0xff]  ;;  %v3584_v11 = vmul.f32 %v20161_v39, %v3445_v26  ;;  %v5869_v5 = vmul.f32 %v15245_v32, %v5461_v63  ;;  %v20162_v46 = vld [vmem:[#allocation135_spill] sm:$0xff] }
 0x457   :  { %20156 = vst [vmem:[#allocation102_spill] sm:$0xff] %v15340_v62  ;;  %v8209_v8 = vunpack.i.h.bf16 %v20160_v54  ;;  %v8208_v44 = vunpack.i.l.bf16 %v20160_v54  ;;  %4101 = vrot.lane.b32.xlu1 %v15340_v62, %s8557_s20  ;;  %v3178_v2 = vmul.f32 %v20079_v1, %v3039_v4  ;;  %v5547_v41 = vsub.f32 %v20162_v46, %v13201_v3  ;;  %v20163_v45 = vld [vmem:[#allocation149_spill] sm:$0xff]  ;;  %v5220_v46 = vpop.permute.xlu0 %5219 }
 0x458   :  { %20159 = vst [vmem:[#allocation50_spill] sm:$0xff] %v15345_v40  ;;  %v3446_v58 = vsub.f32 %v20137_v14, %v20163_v45  ;;  %5247 = vrot.lane.b32.xlu0 %v20158_v34, %s8557_s20  ;;  %v20164_v25 = vld [vmem:[#allocation45_spill] sm:$0xff]  ;;  %v3040_v32 = vsub.f32 %v20163_v45, %v20138_v49  ;;  %v3712_v63 = vmul.f32 %v3584_v11, %v2906_v13  ;;  %v15371_v40 = vpop.permute.xlu1 %4073  ;;  %v20170_v11 = vld [vmem:[#allocation26_spill] sm:$0xff] }
 0x459   :  { %v4341_v54 = vsub.f32 %v20164_v25, %v20022_v48  ;;  %v20165_v26 = vld [vmem:[#allocation253_spill] sm:$0xff]  ;;  %v4746_v4 = vsub.f32 %v12649_v27, %v20157_v0  ;;  %v4747_v62 = vsub.f32 %v12652_v60, %v20164_v25  ;;  %20166 = vst [vmem:[#allocation287_spill] sm:$0xff] %v15371_v40  ;;  %v5933_v34 = vadd.f32 %v5869_v5, %v20167_v12  ;;  %v20171_v25 = vld [vmem:[#allocation12_spill] sm:$0xff] }
 0x45a   :  { %v3305_v19 = vmul.f32 %v3177_v24, %v20165_v26  ;;  %v3447_v35 = vsub.f32 %v20145_v7, %v20168_v22  ;;  %v2843_v24 = vsel %vm2784_vm7, %v8208_v44, %v8209_v8  ;;  %v5807_v13 = vmul.f32 %v14381_v50, %v5737_v33 }
 0x45b   :  { %5375 = vrot.lane.b32.xlu1 %v20170_v11, %s8557_s20  ;;  %7497 = vmatprep.mubr.f32.mxu1 %v5933_v34  ;;  %v3306_v0 = vmul.f32 %v3178_v2, %v20171_v25  ;;  %v3041_v45 = vsub.f32 %v20168_v22, %v20069_v43  ;;  %v5617_v12 = vmul.f32 %v13254_v52, %v5547_v41  ;;  %v15402_v34 = vpop.permute.xlu0 %3947  ;;  %v20179_v25 = vld [vmem:[#allocation75_spill] sm:$0xff] }
 0x45c   :  { %v15378_v26 = vadd.f32 %v3711_v16, %v3305_v19  ;;  %v3585_v5 = vmul.f32 %v20151_v55, %v3446_v58  ;;  %v15389_v40 = vmul.f32 %v20027_v31, %v4340_v42  ;;  %v15392_v16 = vmul.f32 %v20037_v51, %v4341_v54  ;;  %v5348_v41 = vpop.permute.xlu1 %5347  ;;  %20175 = vst [vmem:[#allocation8_spill] sm:$0xff] %v15402_v34  ;;  %v20177_v42 = vld [vmem:[#allocation285_spill] sm:$0xff] }
 0x45d   :  { %v3179_v33 = vmul.f32 %v20154_v21, %v3040_v32  ;;  %v2907_v2 = vsel %vm2784_vm7, %v8209_v8, %v8208_v44  ;;  %v15400_v19 = vmul.f32 %v12697_v29, %v4746_v4  ;;  %v15404_v58 = vadd.f32 %v3712_v63, %v3306_v0  ;;  %v20180_v63 = vld [vmem:[#allocation139_spill] sm:$0xff] }
 0x45e   :  { %20169 = vst [vmem:[#allocation24_spill] sm:$0xff] %v15378_v26  ;;  %20172 = vst [vmem:[#allocation270_spill] sm:$0xff] %v15389_v40  ;;  %3975 = vrot.lane.b32.xlu0 %v15378_v26, %s8557_s20  ;;  %v15407_v11 = vmul.f32 %v5617_v12, %v20177_v42  ;;  %v3713_v54 = vmul.f32 %v3585_v5, %v2843_v24  ;;  %v8214_v22 = vunpack.i.h.bf16 %v20179_v25  ;;  %v8213_v26 = vunpack.i.l.bf16 %v20179_v25  ;;  %v20181_v24 = vld [vmem:[#allocation37_spill] sm:$0xff] }
 0x45f   :  { %20173 = vst [vmem:[#allocation269_spill] sm:$0xff] %v15392_v16  ;;  %20174 = vst [vmem:[#allocation114_spill] sm:$0xff] %v15400_v19  ;;  %v5462_v32 = vsel %vm2784_vm7, %v5220_v46, %v5348_v41  ;;  %v3586_v44 = vmul.f32 %v20161_v39, %v3447_v35  ;;  %4103 = vrot.lane.b32.xlu1 %v15404_v58, %s8557_s20  ;;  %v3180_v0 = vmul.f32 %v20079_v1, %v3041_v45  ;;  %v20182_v46 = vld [vmem:[#allocation47_spill] sm:$0xff]  ;;  %v20183_v35 = vld [vmem:[#allocation68_spill] sm:$0xff]  ;;  %v5222_v34 = vpop.permute.xlu0 %5221 }
 0x460   :  { %20176 = vst [vmem:[#allocation49_spill] sm:$0xff] %v15404_v58  ;;  %20178 = vst [vmem:[#allocation11_spill] sm:$0xff] %v15407_v11  ;;  %v5870_v8 = vmul.f32 %v15299_v23, %v5462_v32  ;;  %v5548_v4 = vsub.f32 %v20180_v63, %v13201_v3  ;;  %v3448_v12 = vsub.f32 %v20137_v14, %v20181_v24  ;;  %v20184_v32 = vld [vmem:[#allocation194_spill] sm:$0xff]  ;;  %v20185_v58 = vld [vmem:[#allocation51_spill] sm:$0xff]  ;;  %v15433_v63 = vpop.permute.xlu1 %4075 }
 0x461   :  { %v4342_v5 = vsub.f32 %v20182_v46, %v20014_v28  ;;  %v3307_v41 = vmul.f32 %v3179_v33, %v20183_v35  ;;  %v3042_v23 = vsub.f32 %v20181_v24, %v20138_v49  ;;  %v3714_v25 = vmul.f32 %v3586_v44, %v2907_v2  ;;  %20186 = vst [vmem:[#allocation27_spill] sm:$0xff] %v15433_v63  ;;  %v20187_v19 = vld [vmem:[#allocation116_spill] sm:$0xff]  ;;  %v20190_v35 = vld [vmem:[#allocation54_spill] sm:$0xff]  ;;  %v20191_v24 = vld [vmem:[#allocation3_spill] sm:$0xff] }
 0x462   :  { %5249 = vrot.lane.b32.xlu0 %v20177_v42, %s8557_s20  ;;  %v3449_v45 = vsub.f32 %v20145_v7, %v20184_v32  ;;  %v4343_v11 = vsub.f32 %v20185_v58, %v20022_v48  ;;  %v5934_v42 = vadd.f32 %v5870_v8, %v20187_v19  ;;  %v2844_v16 = vsel %vm2784_vm7, %v8213_v26, %v8214_v22 }
 0x463   :  { %v15439_v33 = vmul.f32 %v12700_v10, %v4747_v62  ;;  %v4748_v2 = vsub.f32 %v12649_v27, %v20182_v46  ;;  %v15443_v44 = vadd.f32 %v3713_v54, %v3307_v41  ;;  %5377 = vrot.lane.b32.xlu1 %v20190_v35, %s8557_s20  ;;  %v3308_v63 = vmul.f32 %v3180_v0, %v20191_v24 }
 0x464   :  { %7498 = vmatmul.mubr.f32.gmra.mrb[76].mxu1 %v5934_v42  ;;  %v3043_v19 = vsub.f32 %v20184_v32, %v20069_v43  ;;  %v5618_v8 = vmul.f32 %v13254_v52, %v5548_v4  ;;  %v3587_v40 = vmul.f32 %v20151_v55, %v3448_v12  ;;  %v15453_v62 = vmul.f32 %v20027_v31, %v4342_v5  ;;  %v5350_v42 = vpop.permute.xlu1 %5349  ;;  %v15464_v4 = vpop.permute.xlu0 %3949  ;;  %v20196_v5 = vld [vmem:[#allocation245_spill] sm:$0xff] }
 0x465   :  { %20188 = vst [vmem:[#allocation130_spill] sm:$0xff] %v15439_v33  ;;  %20189 = vst [vmem:[#allocation273_spill] sm:$0xff] %v15443_v44  ;;  %v4749_v54 = vsub.f32 %v12652_v60, %v20185_v58  ;;  %v3181_v41 = vmul.f32 %v20154_v21, %v3042_v23  ;;  %v3588_v0 = vmul.f32 %v20161_v39, %v3449_v45 }
 0x466   :  { %20192 = vst [vmem:[#allocation73_spill] sm:$0xff] %v15453_v62  ;;  %3977 = vrot.lane.b32.xlu0 %v15443_v44, %s8557_s20  ;;  %v15462_v24 = vmul.f32 %v20037_v51, %v4343_v11  ;;  %20194 = vst [vmem:[#allocation29_spill] sm:$0xff] %v15464_v4  ;;  %v15466_v12 = vadd.f32 %v3714_v25, %v3308_v63  ;;  %v15469_v35 = vmul.f32 %v5618_v8, %v20196_v5  ;;  %v20198_v44 = vld [vmem:[#allocation105_spill] sm:$0xff]  ;;  %v20199_v25 = vld [vmem:[#allocation143_spill] sm:$0xff] }
 0x467   :  { %v2908_v58 = vsel %vm2784_vm7, %v8214_v22, %v8213_v26  ;;  %v3715_v46 = vmul.f32 %v3587_v40, %v2844_v16  ;;  %v8219_v32 = vunpack.i.h.bf16 %v20198_v44  ;;  %v5463_v23 = vsel %vm2784_vm7, %v5222_v34, %v5350_v42  ;;  %v20202_v26 = vld [vmem:[#allocation271_spill] sm:$0xff] }
 0x468   :  { %20193 = vst [vmem:[#allocation20_spill] sm:$0xff] %v15462_v24  ;;  %20195 = vst [vmem:[#allocation205_spill] sm:$0xff] %v15466_v12  ;;  %v8218_v11 = vunpack.i.l.bf16 %v20198_v44  ;;  %v5871_v45 = vmul.f32 %v5807_v13, %v5463_v23  ;;  %4105 = vrot.lane.b32.xlu1 %v15466_v12, %s8557_s20  ;;  %v3182_v63 = vmul.f32 %v20079_v1, %v3043_v19  ;;  %v20203_v44 = vld [vmem:[#allocation42_spill] sm:$0xff]  ;;  %v15494_v42 = vpop.permute.xlu1 %4077  ;;  %v20205_v23 = vld [vmem:[#allocation93_spill] sm:$0xff] }
 0x469   :  { %20197 = vst [vmem:[#allocation127_spill] sm:$0xff] %v15469_v35  ;;  %v5549_v8 = vsub.f32 %v20199_v25, %v13201_v3  ;;  %v20200_v35 = vld [vmem:[#allocation39_spill] sm:$0xff]  ;;  %v15485_v40 = vmul.f32 %v12697_v29, %v4748_v2  ;;  %v3309_v16 = vmul.f32 %v3181_v41, %v20202_v26  ;;  %v3716_v34 = vmul.f32 %v3588_v0, %v2908_v58  ;;  %v5224_v26 = vpop.permute.xlu0 %5223 }
 0x46a   :  { %v3450_v22 = vsub.f32 %v20137_v14, %v20200_v35  ;;  %5251 = vrot.lane.b32.xlu0 %v20196_v5, %s8557_s20  ;;  %v3044_v13 = vsub.f32 %v20200_v35, %v20138_v49  ;;  %v3451_v19 = vsub.f32 %v20145_v7, %v20203_v44  ;;  %20204 = vst [vmem:[#allocation225_spill] sm:$0xff] %v15494_v42  ;;  %v20206_v25 = vld [vmem:[#allocation67_spill] sm:$0xff]  ;;  %v20208_v5 = vld [vmem:[#allocation52_spill] sm:$0xff] }
 0x46b   :  { %20201 = vst [vmem:[#allocation223_spill] sm:$0xff] %v15485_v40  ;;  %v5935_v12 = vadd.f32 %v5871_v45, %v20205_v23  ;;  %v5738_v2 = vsub.f32 %v14354_v9, %v20206_v25  ;;  %v15500_v4 = vmul.f32 %v12700_v10, %v4749_v54  ;;  %v4344_v41 = vsub.f32 %v20208_v5, %v20014_v28  ;;  %v20210_v45 = vld [vmem:[#allocation173_spill] sm:$0xff]  ;;  %v20211_v25 = vld [vmem:[#allocation83_spill] sm:$0xff] }
 0x46c   :  { %v15504_v40 = vadd.f32 %v3715_v46, %v3309_v16  ;;  %v3045_v0 = vsub.f32 %v20203_v44, %v20069_v43  ;;  %v2845_v58 = vsel %vm2784_vm7, %v8218_v11, %v8219_v32  ;;  %5379 = vrot.lane.b32.xlu1 %v20210_v45, %s8557_s20  ;;  %v3310_v23 = vmul.f32 %v3182_v63, %v20211_v25  ;;  %v5352_v63 = vpop.permute.xlu1 %5351 }
 0x46d   :  { %20207 = vst [vmem:[#allocation30_spill] sm:$0xff] %v15500_v4  ;;  %7500 = vmatprep.mubr.f32.mxu1 %v5935_v12  ;;  %v5619_v54 = vmul.f32 %v13254_v52, %v5549_v8  ;;  %v3589_v35 = vmul.f32 %v20151_v55, %v3450_v22  ;;  %v20212_v4 = vld [vmem:[#allocation56_spill] sm:$0xff]  ;;  %v3183_v44 = vmul.f32 %v20154_v21, %v3044_v13 }
 0x46e   :  { %20209 = vst [vmem:[#allocation274_spill] sm:$0xff] %v15504_v40  ;;  %v4345_v46 = vsub.f32 %v20212_v4, %v20022_v48  ;;  %3979 = vrot.lane.b32.xlu0 %v15504_v40, %s8557_s20  ;;  %v3590_v45 = vmul.f32 %v20161_v39, %v3451_v19  ;;  %v5808_v12 = vmul.f32 %v14381_v50, %v5738_v2  ;;  %v20214_v8 = vld [vmem:[#allocation248_spill] sm:$0xff]  ;;  %v15533_v40 = vpop.permute.xlu0 %3951 }
 0x46f   :  { %v15524_v25 = vadd.f32 %v3716_v34, %v3310_v23  ;;  %v15527_v22 = vmul.f32 %v5619_v54, %v20214_v8  ;;  %v2909_v42 = vsel %vm2784_vm7, %v8219_v32, %v8218_v11  ;;  %v3717_v33 = vmul.f32 %v3589_v35, %v2845_v58  ;;  %20216 = vst [vmem:[#allocation224_spill] sm:$0xff] %v15533_v40  ;;  %v20217_v19 = vld [vmem:[#allocation264_spill] sm:$0xff]  ;;  %v20218_v23 = vld [vmem:[#allocation147_spill] sm:$0xff]  ;;  %v20219_v32 = vld [vmem:[#allocation258_spill] sm:$0xff] }
 0x470   :  { %v5464_v16 = vsel %vm2784_vm7, %v5224_v26, %v5352_v63  ;;  %v3184_v13 = vmul.f32 %v20079_v1, %v3045_v0  ;;  %v8224_v24 = vunpack.i.h.bf16 %v20217_v19  ;;  %v8223_v2 = vunpack.i.l.bf16 %v20217_v19  ;;  %v20220_v26 = vld [vmem:[#allocation100_spill] sm:$0xff]  ;;  %v15554_v63 = vpop.permute.xlu1 %4079  ;;  %v20223_v19 = vld [vmem:[#allocation167_spill] sm:$0xff]  ;;  %v20225_v11 = vld [vmem:[#allocation230_spill] sm:$0xff] }
 0x471   :  { %20213 = vst [vmem:[#allocation275_spill] sm:$0xff] %v15524_v25  ;;  %20215 = vst [vmem:[#allocation296_spill] sm:$0xff] %v15527_v22  ;;  %v5872_v34 = vmul.f32 %v5808_v12, %v5464_v16  ;;  %4107 = vrot.lane.b32.xlu1 %v15524_v25, %s8557_s20  ;;  %v5550_v54 = vsub.f32 %v20218_v23, %v13201_v3  ;;  %v3452_v35 = vsub.f32 %v20137_v14, %v20219_v32  ;;  %v20224_v22 = vld [vmem:[#allocation74_spill] sm:$0xff] }
 0x472   :  { %5253 = vrot.lane.b32.xlu0 %v20214_v8, %s8557_s20  ;;  %v3311_v0 = vmul.f32 %v3183_v44, %v20220_v26  ;;  %v3046_v58 = vsub.f32 %v20219_v32, %v20138_v49  ;;  %v3718_v16 = vmul.f32 %v3590_v45, %v2909_v42  ;;  %v15552_v12 = vmul.f32 %v20027_v31, %v4344_v41  ;;  %v5226_v8 = vpop.permute.xlu0 %5225  ;;  %v20227_v44 = vld [vmem:[#allocation14_spill] sm:$0xff] }
 0x473   :  { %20222 = vst [vmem:[#allocation210_spill] sm:$0xff] %v15554_v63  ;;  %v5936_v25 = vadd.f32 %v5872_v34, %v20223_v19  ;;  %v5739_v3 = vsub.f32 %v14354_v9, %v20224_v22  ;;  %v3453_v23 = vsub.f32 %v20145_v7, %v20225_v11  ;;  %v3312_v26 = vmul.f32 %v3184_v13, %v20227_v44  ;;  %v20228_v45 = vld [vmem:[#allocation90_spill] sm:$0xff]  ;;  %v20229_v22 = vld [vmem:[#allocation156_spill] sm:$0xff] }
 0x474   :  { %20221 = vst [vmem:[#allocation152_spill] sm:$0xff] %v15552_v12  ;;  %v15561_v40 = vadd.f32 %v3717_v33, %v3311_v0  ;;  %v3047_v42 = vsub.f32 %v20225_v11, %v20069_v43  ;;  %v2846_v41 = vsel %vm2784_vm7, %v8223_v2, %v8224_v24  ;;  %v8229_v32 = vunpack.i.h.bf16 %v20228_v45  ;;  %v20230_v0 = vld [vmem:[#allocation260_spill] sm:$0xff] }
 0x475   :  { %v8228_v34 = vunpack.i.l.bf16 %v20228_v45  ;;  %5381 = vrot.lane.b32.xlu1 %v20229_v22, %s8557_s20  ;;  %7501 = vmatmul.mubr.f32.gmra.mrb[78].mxu1 %v5936_v25  ;;  %v5620_v19 = vmul.f32 %v13254_v52, %v5550_v54  ;;  %v3591_v33 = vmul.f32 %v20151_v55, %v3452_v35  ;;  %v3454_v13 = vsub.f32 %v20137_v14, %v20230_v0  ;;  %v20231_v45 = vld [vmem:[#allocation262_spill] sm:$0xff]  ;;  %v5354_v22 = vpop.permute.xlu1 %5353  ;;  %v20233_v35 = vld [vmem:[#allocation136_spill] sm:$0xff] }
 0x476   :  { %20226 = vst [vmem:[#allocation257_spill] sm:$0xff] %v15561_v40  ;;  %3981 = vrot.lane.b32.xlu0 %v15561_v40, %s8557_s20  ;;  %v3185_v44 = vmul.f32 %v20154_v21, %v3046_v58  ;;  %v3048_v11 = vsub.f32 %v20230_v0, %v20138_v49  ;;  %v3455_v63 = vsub.f32 %v20145_v7, %v20231_v45  ;;  %v15593_v62 = vpop.permute.xlu0 %3953 }
 0x477   :  { %v5809_v25 = vmul.f32 %v14381_v50, %v5739_v3  ;;  %v15584_v54 = vadd.f32 %v3718_v16, %v3312_v26  ;;  %v15587_v52 = vmul.f32 %v5620_v19, %v20233_v35  ;;  %v2910_v12 = vsel %vm2784_vm7, %v8224_v24, %v8223_v2  ;;  %20235 = vst [vmem:[#allocation133_spill] sm:$0xff] %v15593_v62  ;;  %v20236_v26 = vld [vmem:[#allocation31_spill] sm:$0xff] }
 0x478   :  { %v3719_v40 = vmul.f32 %v3591_v33, %v2846_v41  ;;  %v5465_v58 = vsel %vm2784_vm7, %v5226_v8, %v5354_v22  ;;  %v3186_v0 = vmul.f32 %v20079_v1, %v3047_v42  ;;  %v3592_v59 = vmul.f32 %v20161_v39, %v3453_v23 }
 0x479   :  { %20232 = vst [vmem:[#allocation228_spill] sm:$0xff] %v15584_v54  ;;  %20234 = vst [vmem:[#allocation157_spill] sm:$0xff] %v15587_v52  ;;  %v2847_v3 = vsel %vm2784_vm7, %v8228_v34, %v8229_v32  ;;  %v5873_v16 = vmul.f32 %v5809_v25, %v5465_v58  ;;  %4109 = vrot.lane.b32.xlu1 %v15584_v54, %s8557_s20  ;;  %v3049_v24 = vsub.f32 %v20231_v45, %v20069_v43  ;;  %v15612_v33 = vpop.permute.xlu1 %4081  ;;  %v20237_v25 = vld [vmem:[#allocation222_spill] sm:$0xff] }
 0x47a   :  { %v3593_v2 = vmul.f32 %v20151_v55, %v3454_v13  ;;  %v15605_v8 = vmul.f32 %v20037_v51, %v4345_v46  ;;  %5255 = vrot.lane.b32.xlu0 %v20233_v35, %s8557_s20  ;;  %v3313_v23 = vmul.f32 %v3185_v44, %v20236_v26  ;;  %v3187_v42 = vmul.f32 %v20154_v21, %v3048_v11  ;;  %v20238_v58 = vld [vmem:[#allocation78_spill] sm:$0xff]  ;;  %v5228_v54 = vpop.permute.xlu0 %5227  ;;  %v20240_v44 = vld [vmem:[#allocation284_spill] sm:$0xff] }
 0x47b   :  { %v3720_v41 = vmul.f32 %v3592_v59, %v2910_v12  ;;  %v3594_v19 = vmul.f32 %v20161_v39, %v3455_v63  ;;  %v5937_v22 = vadd.f32 %v5873_v16, %v20237_v25  ;;  %v5740_v13 = vsub.f32 %v14354_v9, %v20238_v58  ;;  %v20241_v11 = vld [vmem:[#allocation232_spill] sm:$0xff]  ;;  %v20242_v59 = vld [vmem:[#allocation19_spill] sm:$0xff] }
 0x47c   :  { %v2911_v46 = vsel %vm2784_vm7, %v8229_v32, %v8228_v34  ;;  %v3721_v45 = vmul.f32 %v3593_v2, %v2847_v3  ;;  %v15619_v35 = vadd.f32 %v3719_v40, %v3313_v23  ;;  %v3314_v26 = vmul.f32 %v3186_v0, %v20240_v44  ;;  %v20243_v63 = vld [vmem:[#allocation172_spill] sm:$0xff]  ;;  %v20245_v34 = vld [vmem:[#allocation178_spill] sm:$0xff]  ;;  %v20246_v3 = vld [vmem:[#allocation267_spill] sm:$0xff] }
 0x47d   :  { %v4149_v12 = vsel %vm2784_vm7, %v20242_v59, %v20241_v11  ;;  %v8234_v52 = vunpack.i.h.bf16 %v20243_v63  ;;  %v8233_v16 = vunpack.i.l.bf16 %v20243_v63  ;;  %v20244_v25 = vld [vmem:[#allocation140_spill] sm:$0xff]  ;;  %7503 = vmatprep.mubr.f32.mxu1 %v5937_v22  ;;  %v3188_v32 = vmul.f32 %v20079_v1, %v3049_v24  ;;  %v20247_v2 = vld [vmem:[#allocation46_spill] sm:$0xff] }
 0x47e   :  { %20239 = vst [vmem:[#allocation226_spill] sm:$0xff] %v15619_v35  ;;  %5383 = vrot.lane.b32.xlu1 %v20244_v25, %s8557_s20  ;;  %v4588_v40 = vmul.f32 %v14918_v57, %v20245_v34  ;;  %v3456_v0 = vsub.f32 %v20137_v14, %v20246_v3  ;;  %3983 = vrot.lane.b32.xlu0 %v15619_v35, %s8557_s20  ;;  %v20248_v63 = vld [vmem:[#allocation268_spill] sm:$0xff]  ;;  %v5356_v25 = vpop.permute.xlu1 %5355 }
 0x47f   :  { %v3315_v23 = vmul.f32 %v3187_v42, %v20247_v2  ;;  %v3050_v58 = vsub.f32 %v20246_v3, %v20138_v49  ;;  %v3722_v44 = vmul.f32 %v3594_v19, %v2911_v46  ;;  %v3457_v22 = vsub.f32 %v20145_v7, %v20248_v63  ;;  %v15652_v49 = vpop.permute.xlu0 %3955  ;;  %v20333_v3 = vld [vmem:[#allocation22_spill] sm:$0xff] }
 0x480   :  { %v5810_v24 = vmul.f32 %v14381_v50, %v5740_v13  ;;  %v15643_v62 = vadd.f32 %v3720_v41, %v3314_v26  ;;  %v4213_v57 = vsel %vm2784_vm7, %v20241_v11, %v20242_v59  ;;  %v4993_v14 = vmul.f32 %v14921_v47, %v4149_v12  ;;  %v20251_v41 = vld [vmem:[#allocation35_spill] sm:$0xff]  ;;  %v20252_v47 = vld [vmem:[#allocation66_spill] sm:$0xff]  ;;  %v20253_v11 = vld [vmem:[#allocation144_spill] sm:$0xff] }
 0x481   :  { %v5466_v42 = vsel %vm2784_vm7, %v5228_v54, %v5356_v25  ;;  %v15654_v19 = vadd.f32 %v3721_v45, %v3315_v23  ;;  %v2848_v7 = vsel %vm2784_vm7, %v8233_v16, %v8234_v52  ;;  %v3316_v46 = vmul.f32 %v3188_v32, %v20251_v41  ;;  %v20256_v23 = vld [vmem:[#allocation38_spill] sm:$0xff] }
 0x482   :  { %20249 = vst [vmem:[#allocation297_spill] sm:$0xff] %v15643_v62  ;;  %v5874_v13 = vmul.f32 %v5810_v24, %v5466_v42  ;;  %4111 = vrot.lane.b32.xlu1 %v15643_v62, %s8557_s20  ;;  %v3051_v26 = vsub.f32 %v20248_v63, %v20069_v43  ;;  %v4587_v59 = vmul.f32 %v20253_v11, %v20252_v47  ;;  %v15676_v2 = vpop.permute.xlu1 %4083  ;;  %v20265_v11 = vld [vmem:[#allocation166_spill] sm:$0xff] }
 0x483   :  { %20250 = vst [vmem:[#allocation33_spill] sm:$0xff] %v15654_v19  ;;  %v3595_v54 = vmul.f32 %v20151_v55, %v3456_v0  ;;  %v20254_v45 = vsub.f32 %v12649_v27, %v20208_v5  ;;  %3985 = vrot.lane.b32.xlu0 %v15654_v19, %s8557_s20  ;;  %v3189_v34 = vmul.f32 %v20154_v21, %v3050_v58  ;;  %v20257_v55 = vld [vmem:[#allocation85_spill] sm:$0xff]  ;;  %v5230_v58 = vpop.permute.xlu0 %5229 }
 0x484   :  { %v4994_v32 = vmul.f32 %v14924_v6, %v4213_v57  ;;  %v15678_v43 = vadd.f32 %v3722_v44, %v3316_v46  ;;  %v5938_v24 = vadd.f32 %v5874_v13, %v20256_v23  ;;  %v5741_v0 = vsub.f32 %v14354_v9, %v20257_v55  ;;  %v20260_v57 = vld [vmem:[#allocation28_spill] sm:$0xff]  ;;  %v20261_v13 = vld [vmem:[#allocation291_spill] sm:$0xff] }
 0x485   :  { %v15670_v12 = vmul.f32 %v12697_v29, %v20254_v45  ;;  %v15683_v25 = vadd.f32 %v4993_v14, %v4587_v59  ;;  %v2912_v42 = vsel %vm2784_vm7, %v8234_v52, %v8233_v16  ;;  %v3723_v41 = vmul.f32 %v3595_v54, %v2848_v7  ;;  %v20262_v16 = vld [vmem:[#allocation160_spill] sm:$0xff]  ;;  %v20264_v7 = vld [vmem:[#allocation101_spill] sm:$0xff]  ;;  %v20266_v59 = vld [vmem:[#allocation7_spill] sm:$0xff] }
 0x486   :  { %20255 = vst [vmem:[#allocation161_spill] sm:$0xff] %v15678_v43  ;;  %v20259_v21 = vsub.f32 %v12652_v60, %v20212_v4  ;;  %v3596_v44 = vmul.f32 %v20161_v39, %v3457_v22  ;;  %v4150_v46 = vsel %vm2784_vm7, %v20261_v13, %v20260_v57  ;;  %4113 = vrot.lane.b32.xlu1 %v15678_v43, %s8557_s20  ;;  %v20263_v14 = vld [vmem:[#allocation60_spill] sm:$0xff]  ;;  %v20267_v22 = vld [vmem:[#allocation162_spill] sm:$0xff] }
 0x487   :  { %20258 = vst [vmem:[#allocation211_spill] sm:$0xff] %v15683_v25  ;;  %7504 = vmatmul.mubr.f32.gmra.mrb[80].mxu1 %v5938_v24  ;;  %v3190_v52 = vmul.f32 %v20079_v1, %v3051_v26  ;;  %v4589_v4 = vmul.f32 %v14927_v53, %v20262_v16  ;;  %v4590_v47 = vmul.f32 %v20264_v7, %v20263_v14  ;;  %v532_v45 = vld [vmem:[%s17811_s3] sm:$0xff]  ;;  %v533_v1 = vld [vmem:[%s17811_s3 + $0x8] sm:$0xff]  ;;  %v5358_v24 = vpop.permute.xlu1 %5357  ;;  %v15724_v7 = vpop.permute.xlu0 %3957 }
 0x488   :  { %v15691_v6 = vmul.f32 %v12700_v10, %v20259_v21  ;;  %v4591_v39 = vmul.f32 %v20266_v59, %v20265_v11  ;;  %5257 = vrot.lane.b32.xlu0 %v15683_v25, %s8557_s20  ;;  %v3317_v54 = vmul.f32 %v3189_v34, %v20267_v22  ;;  %v5122_v53 = vadd.f32 %v4994_v32, %v4588_v40  ;;  %v20268_v34 = vld [vmem:[#allocation158_spill] sm:$0xff]  ;;  %v20271_v32 = vld [vmem:[#allocation277_spill] sm:$0xff] }
 0x489   :  { %v3724_v26 = vmul.f32 %v3596_v44, %v2912_v42  ;;  %v5811_v23 = vmul.f32 %v14381_v50, %v5741_v0  ;;  %v7715_v55 = vpack.c.bf16 %v533_v1, %v532_v45  ;;  %v4214_v21 = vsel %vm2784_vm7, %v20260_v57, %v20261_v13  ;;  %v20270_v40 = vld [vmem:[#allocation154_spill] sm:$0xff]  ;;  %v20273_v57 = vld [vmem:[#allocation199_spill] sm:$0xff] }
 0x48a   :  { %v4995_v16 = vmul.f32 %v20268_v34, %v4150_v46  ;;  %v5467_v14 = vsel %vm2784_vm7, %v5230_v58, %v5358_v24  ;;  %v15726_v11 = vadd.f32 %v3723_v41, %v3317_v54  ;;  %v4151_v0 = vsel %vm2784_vm7, %v20271_v32, %v20270_v40  ;;  %5385 = vrot.lane.b32.xlu1 %v5122_v53, %s8557_s20  ;;  %v20272_v44 = vld [vmem:[#allocation242_spill] sm:$0xff]  ;;  %v20274_v58 = vld [vmem:[#allocation57_spill] sm:$0xff]  ;;  %v20279_v24 = vld [vmem:[#allocation88_spill] sm:$0xff] }
 0x48b   :  { %v5875_v42 = vmul.f32 %v5811_v23, %v5467_v14  ;;  %v3318_v59 = vmul.f32 %v3190_v52, %v20272_v44  ;;  %7716 = vmatprep.subr.bf16.mxu1 %v7715_v55  ;;  %v4592_v13 = vmul.f32 %v14989_v30, %v20273_v57  ;;  %v4346_v46 = vsub.f32 %v20274_v58, %v20014_v28  ;;  %v20275_v41 = vld [vmem:[#allocation61_spill] sm:$0xff]  ;;  %v15743_v1 = vpop.permute.xlu1 %4085  ;;  %v20278_v52 = vld [vmem:[#allocation263_spill] sm:$0xff]  ;;  %v20281_v44 = vld [vmem:[#allocation294_spill] sm:$0xff]  ;;  %v5232_v57 = vpop.permute.xlu0 %5231 }
 0x48c   :  { %20269 = vst [vmem:[#allocation34_spill] sm:$0xff] %v15726_v11  ;;  %v4347_v22 = vsub.f32 %v20275_v41, %v20022_v48  ;;  %3987 = vrot.lane.b32.xlu0 %v15726_v11, %s8557_s20  ;;  %7718 = vmatpush3.bf16.msra.mxu1 %v7715_v55  ;;  %v20276_v54 = vld [vmem:[#allocation233_spill] sm:$0xff]  ;;  %v5742_v30 = vsub.f32 %v14354_v9, %v20279_v24  ;;  %v20322_v25 = vld [vmem:[#allocation138_spill] sm:$0xff] }
 0x48d   :  { %v4996_v45 = vmul.f32 %v20276_v54, %v4214_v21  ;;  %v15745_v53 = vadd.f32 %v3724_v26, %v3318_v59  ;;  %v5939_v23 = vadd.f32 %v5875_v42, %v20278_v52  ;;  %v15750_v34 = vadd.f32 %v4995_v16, %v4589_v4  ;;  %v20282_v26 = vld [vmem:[#allocation126_spill] sm:$0xff]  ;;  %v20283_v59 = vld [vmem:[#allocation148_spill] sm:$0xff]  ;;  %v20284_v42 = vld [vmem:[#allocation261_spill] sm:$0xff] }
 0x48e   :  { %v4215_v14 = vsel %vm2784_vm7, %v20270_v40, %v20271_v32  ;;  %v4997_v55 = vmul.f32 %v20281_v44, %v4151_v0  ;;  %v4752_v21 = vsub.f32 %v12649_v27, %v20274_v58  ;;  %v4593_v54 = vmul.f32 %v20283_v59, %v20282_v26  ;;  %v20285_v52 = vld [vmem:[#allocation95_spill] sm:$0xff]  ;;  %v20286_v24 = vld [vmem:[#allocation145_spill] sm:$0xff]  ;;  %v20287_v4 = vld [vmem:[#allocation292_spill] sm:$0xff] }
 0x48f   :  { %20277 = vst [vmem:[#allocation164_spill] sm:$0xff] %v15745_v53  ;;  %20280 = vst [vmem:[#allocation80_spill] sm:$0xff] %v15750_v34  ;;  %v4594_v5 = vmul.f32 %v20285_v52, %v20284_v42  ;;  %v4152_v16 = vsel %vm2784_vm7, %v20287_v4, %v20286_v24  ;;  %4115 = vrot.lane.b32.xlu1 %v15745_v53, %s8557_s20  ;;  %7506 = vmatprep.mubr.f32.mxu1 %v5939_v23  ;;  %v20288_v40 = vld [vmem:[#allocation15_spill] sm:$0xff]  ;;  %v20289_v32 = vld [vmem:[#allocation70_spill] sm:$0xff] }
 0x490   :  { %v4595_v0 = vmul.f32 %v20289_v32, %v20288_v40  ;;  %v15772_v44 = vmul.f32 %v20027_v31, %v4346_v46  ;;  %v15775_v26 = vmul.f32 %v20037_v51, %v4347_v22  ;;  %v4753_v59 = vsub.f32 %v12652_v60, %v20275_v41  ;;  %5259 = vrot.lane.b32.xlu0 %v15750_v34, %s8557_s20  ;;  %v20290_v52 = vld [vmem:[#allocation290_spill] sm:$0xff]  ;;  %v20291_v23 = vld [vmem:[#allocation193_spill] sm:$0xff]  ;;  %v5360_v32 = vpop.permute.xlu1 %5359 }
 0x491   :  { %v5124_v42 = vadd.f32 %v4996_v45, %v4590_v47  ;;  %v4998_v58 = vmul.f32 %v20290_v52, %v4215_v14  ;;  %v4348_v53 = vsub.f32 %v20291_v23, %v20014_v28  ;;  %v5812_v40 = vmul.f32 %v14381_v50, %v5742_v30  ;;  %v20293_v41 = vld [vmem:[#allocation237_spill] sm:$0xff]  ;;  %v15794_v45 = vpop.permute.xlu0 %3959  ;;  %v20295_v14 = vld [vmem:[#allocation279_spill] sm:$0xff]  ;;  %v20297_v30 = vld [vmem:[#allocation2_spill] sm:$0xff] }
 0x492   :  { %v15785_v46 = vadd.f32 %v4997_v55, %v4591_v39  ;;  %v4216_v22 = vsel %vm2784_vm7, %v20286_v24, %v20287_v4  ;;  %v4999_v11 = vmul.f32 %v20293_v41, %v4152_v16  ;;  %v5468_v47 = vsel %vm2784_vm7, %v5232_v57, %v5360_v32  ;;  %20294 = vst [vmem:[#allocation298_spill] sm:$0xff] %v15794_v45  ;;  %v20296_v34 = vld [vmem:[#allocation229_spill] sm:$0xff]  ;;  %v20299_v32 = vld [vmem:[#allocation192_spill] sm:$0xff] }
 0x493   :  { %v4596_v52 = vmul.f32 %v15066_v37, %v20295_v14  ;;  %v4153_v39 = vsel %vm2784_vm7, %v20297_v30, %v20296_v34  ;;  %v20298_v55 = vld [vmem:[#allocation65_spill] sm:$0xff]  ;;  %v5876_v19 = vmul.f32 %v5812_v40, %v5468_v47  ;;  %5387 = vrot.lane.b32.xlu1 %v5124_v42, %s8557_s20  ;;  %v15806_v24 = vmul.f32 %v12697_v29, %v4752_v21  ;;  %v20301_v42 = vld [vmem:[#allocation247_spill] sm:$0xff]  ;;  %v20302_v47 = vld [vmem:[#allocation96_spill] sm:$0xff] }
 0x494   :  { %20292 = vst [vmem:[#allocation231_spill] sm:$0xff] %v15785_v46  ;;  %v4349_v43 = vsub.f32 %v20298_v55, %v20022_v48  ;;  %v15809_v57 = vmul.f32 %v12700_v10, %v4753_v59  ;;  %v4754_v37 = vsub.f32 %v12649_v27, %v20291_v23  ;;  %v4755_v4 = vsub.f32 %v12652_v60, %v20298_v55  ;;  %v15818_v41 = vpop.permute.xlu1 %4087  ;;  %v20348_v45 = vld [vmem:[#allocation113_spill] sm:$0xff] }
 0x495   :  { %5261 = vrot.lane.b32.xlu0 %v15785_v46, %s8557_s20  ;;  %v5126_v16 = vadd.f32 %v4998_v58, %v4592_v13  ;;  %v5000_v40 = vmul.f32 %v20299_v32, %v4216_v22  ;;  %20300 = vst [vmem:[#allocation36_spill] sm:$0xff] %v15818_v41  ;;  %v5940_v21 = vadd.f32 %v5876_v19, %v20301_v42  ;;  %v5234_v58 = vpop.permute.xlu0 %5233  ;;  %v20304_v22 = vld [vmem:[#allocation241_spill] sm:$0xff]  ;;  %v20305_v19 = vld [vmem:[#allocation142_spill] sm:$0xff]  ;;  %v20306_v42 = vld [vmem:[#allocation108_spill] sm:$0xff] }
 0x496   :  { %v5743_v59 = vsub.f32 %v14354_v9, %v20302_v47  ;;  %v15823_v14 = vadd.f32 %v4999_v11, %v4593_v54  ;;  %v4217_v55 = vsel %vm2784_vm7, %v20296_v34, %v20297_v30  ;;  %v5001_v23 = vmul.f32 %v15073_v36, %v4153_v39  ;;  %v20307_v34 = vld [vmem:[#allocation282_spill] sm:$0xff] }
 0x497   :  { %v15831_v13 = vmul.f32 %v20027_v31, %v4348_v53  ;;  %v4597_v32 = vmul.f32 %v15086_v38, %v20304_v22  ;;  %v4154_v11 = vsel %vm2784_vm7, %v20306_v42, %v20305_v19  ;;  %v15840_v54 = vmul.f32 %v20037_v51, %v4349_v43  ;;  %5389 = vrot.lane.b32.xlu1 %v5126_v16, %s8557_s20  ;;  %v20308_v53 = vld [vmem:[#allocation278_spill] sm:$0xff]  ;;  %v20309_v16 = vld [vmem:[#allocation196_spill] sm:$0xff] }
 0x498   :  { %20303 = vst [vmem:[#allocation214_spill] sm:$0xff] %v15823_v14  ;;  %7507 = vmatmul.mubr.f32.gmra.mrb[82].mxu1 %v5940_v21  ;;  %v4598_v36 = vmul.f32 %v15094_v17, %v20307_v34  ;;  %v4599_v30 = vmul.f32 %v15136_v61, %v20308_v53  ;;  %v15848_v39 = vmul.f32 %v12697_v29, %v4754_v37  ;;  %v5362_v22 = vpop.permute.xlu1 %5361 }
 0x499   :  { %v15851_v38 = vmul.f32 %v12700_v10, %v4755_v4  ;;  %5263 = vrot.lane.b32.xlu0 %v15823_v14, %s8557_s20  ;;  %v5128_v43 = vadd.f32 %v5000_v40, %v4594_v5  ;;  %v5002_v47 = vmul.f32 %v15076_v20, %v4217_v55  ;;  %v4350_v21 = vsub.f32 %v20309_v16, %v20014_v28  ;;  %v15868_v4 = vpop.permute.xlu0 %3961  ;;  %v20312_v20 = vld [vmem:[#allocation124_spill] sm:$0xff]  ;;  %v20313_v55 = vld [vmem:[#allocation295_spill] sm:$0xff] }
 0x49a   :  { %v5813_v17 = vmul.f32 %v14381_v50, %v5743_v59  ;;  %v15859_v34 = vadd.f32 %v5001_v23, %v4595_v0  ;;  %v4218_v61 = vsel %vm2784_vm7, %v20305_v19, %v20306_v42  ;;  %v5003_v37 = vmul.f32 %v15111_v18, %v4154_v11  ;;  %20311 = vst [vmem:[#allocation69_spill] sm:$0xff] %v15868_v4  ;;  %v20314_v59 = vld [vmem:[#allocation236_spill] sm:$0xff]  ;;  %v20315_v23 = vld [vmem:[#allocation71_spill] sm:$0xff]  ;;  %v20316_v18 = vld [vmem:[#allocation141_spill] sm:$0xff] }
 0x49b   :  { %v5469_v5 = vsel %vm2784_vm7, %v5234_v58, %v5362_v22  ;;  %v4600_v40 = vmul.f32 %v15147_v15, %v20312_v20  ;;  %v4155_v0 = vsel %vm2784_vm7, %v20314_v59, %v20313_v55  ;;  %v4351_v53 = vsub.f32 %v20315_v23, %v20022_v48  ;;  %5391 = vrot.lane.b32.xlu1 %v5128_v43, %s8557_s20  ;;  %v20317_v19 = vld [vmem:[#allocation191_spill] sm:$0xff]  ;;  %v20318_v58 = vld [vmem:[#allocation129_spill] sm:$0xff] }
 0x49c   :  { %20310 = vst [vmem:[#allocation13_spill] sm:$0xff] %v15859_v34  ;;  %v5877_v14 = vmul.f32 %v5813_v17, %v5469_v5  ;;  %v4601_v42 = vmul.f32 %v20317_v19, %v20316_v18  ;;  %v20319_v11 = vld [vmem:[#allocation87_spill] sm:$0xff]  ;;  %v4756_v15 = vsub.f32 %v12649_v27, %v20309_v16  ;;  %v4757_v20 = vsub.f32 %v12652_v60, %v20315_v23  ;;  %v15892_v43 = vpop.permute.xlu1 %4089  ;;  %v20325_v16 = vld [vmem:[#allocation18_spill] sm:$0xff] }
 0x49d   :  { %v15883_v22 = vmul.f32 %v20319_v11, %v20318_v58  ;;  %5265 = vrot.lane.b32.xlu0 %v15859_v34, %s8557_s20  ;;  %v5130_v46 = vadd.f32 %v5002_v47, %v4596_v52  ;;  %v20320_v17 = vld [vmem:[#allocation23_spill] sm:$0xff]  ;;  %20321 = vst [vmem:[#allocation168_spill] sm:$0xff] %v15892_v43  ;;  %v15897_v11 = vadd.f32 %v5003_v37, %v4597_v32  ;;  %v5236_v47 = vpop.permute.xlu0 %5235  ;;  %v20328_v32 = vld [vmem:[#allocation197_spill] sm:$0xff] }
 0x49e   :  { %v5004_v5 = vmul.f32 %v20320_v17, %v4218_v61  ;;  %v5941_v18 = vadd.f32 %v5877_v14, %v20322_v25  ;;  %v20323_v19 = vld [vmem:[#allocation99_spill] sm:$0xff]  ;;  %v4219_v23 = vsel %vm2784_vm7, %v20313_v55, %v20314_v59  ;;  %v5005_v63 = vmul.f32 %v20325_v16, %v4155_v0  ;;  %v20326_v61 = vld [vmem:[#allocation150_spill] sm:$0xff]  ;;  %v20327_v17 = vld [vmem:[#allocation281_spill] sm:$0xff] }
 0x49f   :  { %v5744_v58 = vsub.f32 %v14354_v9, %v20323_v19  ;;  %20324 = vst [vmem:[#allocation170_spill] sm:$0xff] %v15897_v11  ;;  %v15905_v52 = vmul.f32 %v20027_v31, %v4350_v21  ;;  %v4156_v25 = vsel %vm2784_vm7, %v20327_v17, %v20326_v61  ;;  %v15912_v14 = vmul.f32 %v20037_v51, %v4351_v53  ;;  %v20329_v55 = vld [vmem:[#allocation111_spill] sm:$0xff]  ;;  %v20330_v16 = vld [vmem:[#allocation64_spill] sm:$0xff] }
 0x4a0   :  { %v4352_v37 = vsub.f32 %v20328_v32, %v20014_v28  ;;  %5393 = vrot.lane.b32.xlu1 %v5130_v46, %s8557_s20  ;;  %7509 = vmatprep.mubr.f32.mxu1 %v5941_v18  ;;  %v4603_v59 = vmul.f32 %v20330_v16, %v20329_v55  ;;  %v15920_v21 = vmul.f32 %v12697_v29, %v4756_v15  ;;  %v20332_v19 = vld [vmem:[#allocation200_spill] sm:$0xff]  ;;  %v5364_v55 = vpop.permute.xlu1 %5363  ;;  %v20335_v16 = vld [vmem:[#allocation86_spill] sm:$0xff] }
 0x4a1   :  { %v15923_v0 = vmul.f32 %v12700_v10, %v4757_v20  ;;  %v4353_v34 = vsub.f32 %v20332_v19, %v20022_v48  ;;  %5267 = vrot.lane.b32.xlu0 %v15897_v11, %s8557_s20  ;;  %v5132_v53 = vadd.f32 %v5004_v5, %v4598_v36  ;;  %v5006_v62 = vmul.f32 %v20333_v3, %v4219_v23  ;;  %v15942_v5 = vpop.permute.xlu0 %3963  ;;  %v20337_v3 = vld [vmem:[#allocation243_spill] sm:$0xff]  ;;  %v20338_v23 = vld [vmem:[#allocation4_spill] sm:$0xff] }
 0x4a2   :  { %v4758_v46 = vsub.f32 %v12649_v27, %v20328_v32  ;;  %v5814_v18 = vmul.f32 %v14381_v50, %v5744_v58  ;;  %v15933_v15 = vadd.f32 %v5005_v63, %v4599_v30  ;;  %v4220_v20 = vsel %vm2784_vm7, %v20326_v61, %v20327_v17  ;;  %20336 = vst [vmem:[#allocation119_spill] sm:$0xff] %v15942_v5  ;;  %v20339_v11 = vld [vmem:[#allocation92_spill] sm:$0xff]  ;;  %v20340_v58 = vld [vmem:[#allocation17_spill] sm:$0xff] }
 0x4a3   :  { %20331 = vst [vmem:[#allocation272_spill] sm:$0xff] %v15923_v0  ;;  %v5007_v35 = vmul.f32 %v20335_v16, %v4156_v25  ;;  %v5470_v36 = vsel %vm2784_vm7, %v5236_v47, %v5364_v55  ;;  %v4604_v32 = vmul.f32 %v20338_v23, %v20337_v3  ;;  %v4157_v63 = vsel %vm2784_vm7, %v20340_v58, %v20339_v11  ;;  %v20341_v17 = vld [vmem:[#allocation201_spill] sm:$0xff]  ;;  %v20342_v55 = vld [vmem:[#allocation202_spill] sm:$0xff]  ;;  %v20346_v23 = vld [vmem:[#allocation107_spill] sm:$0xff] }
 0x4a4   :  { %20334 = vst [vmem:[#allocation16_spill] sm:$0xff] %v15933_v15  ;;  %v15951_v30 = vmul.f32 %v20027_v31, %v4352_v37  ;;  %v5878_v4 = vmul.f32 %v5814_v18, %v5470_v36  ;;  %5395 = vrot.lane.b32.xlu1 %v5132_v53, %s8557_s20  ;;  %v15955_v61 = vmul.f32 %v20037_v51, %v4353_v34  ;;  %v20343_v3 = vld [vmem:[#allocation81_spill] sm:$0xff]  ;;  %v15966_v36 = vpop.permute.xlu1 %4091 }
 0x4a5   :  { %v4759_v47 = vsub.f32 %v12652_v60, %v20332_v19  ;;  %v4354_v25 = vsub.f32 %v20341_v17, %v20014_v28  ;;  %v4355_v16 = vsub.f32 %v20342_v55, %v20022_v48  ;;  %5269 = vrot.lane.b32.xlu0 %v15933_v15, %s8557_s20  ;;  %v5134_v37 = vadd.f32 %v5006_v62, %v4600_v40  ;;  %v20345_v53 = vld [vmem:[#allocation249_spill] sm:$0xff]  ;;  %v5238_v40 = vpop.permute.xlu0 %5237 }
 0x4a6   :  { %v5008_v18 = vmul.f32 %v20343_v3, %v4220_v20  ;;  %20344 = vst [vmem:[#allocation40_spill] sm:$0xff] %v15966_v36  ;;  %v5942_v34 = vadd.f32 %v5878_v4, %v20345_v53  ;;  %v5745_v5 = vsub.f32 %v14354_v9, %v20346_v23  ;;  %v15971_v19 = vadd.f32 %v5007_v35, %v4601_v42  ;;  %v20350_v20 = vld [vmem:[#allocation227_spill] sm:$0xff]  ;;  %v20351_v3 = vld [vmem:[#allocation286_spill] sm:$0xff] }
 0x4a7   :  { %v4221_v43 = vsel %vm2784_vm7, %v20339_v11, %v20340_v58  ;;  %v5009_v41 = vmul.f32 %v20348_v45, %v4157_v63  ;;  %v15979_v62 = vmul.f32 %v12697_v29, %v4758_v46  ;;  %v4158_v4 = vsel %vm2784_vm7, %v20351_v3, %v20350_v20  ;;  %v20352_v11 = vld [vmem:[#allocation91_spill] sm:$0xff]  ;;  %v20353_v45 = vld [vmem:[#allocation21_spill] sm:$0xff]  ;;  %v20354_v46 = vld [vmem:[#allocation132_spill] sm:$0xff] }
 0x4a8   :  { %20347 = vst [vmem:[#allocation215_spill] sm:$0xff] %v15971_v19  ;;  %v4760_v35 = vsub.f32 %v12649_v27, %v20341_v17  ;;  %v4761_v42 = vsub.f32 %v12652_v60, %v20342_v55  ;;  %5397 = vrot.lane.b32.xlu1 %v5134_v37, %s8557_s20  ;;  %7510 = vmatmul.mubr.f32.gmra.mrb[84].mxu1 %v5942_v34  ;;  %v20355_v63 = vld [vmem:[#allocation103_spill] sm:$0xff]  ;;  %v20357_v17 = vld [vmem:[#allocation153_spill] sm:$0xff]  ;;  %v20370_v36 = vld [vmem:[#allocation206_spill] sm:$0xff] }
 0x4a9   :  { %20349 = vst [vmem:[#allocation280_spill] sm:$0xff] %v15979_v62  ;;  %v4605_v58 = vmul.f32 %v20353_v45, %v20352_v11  ;;  %v4606_v53 = vmul.f32 %v20355_v63, %v20354_v46  ;;  %v15995_v23 = vmul.f32 %v12700_v10, %v4759_v47  ;;  %v15998_v15 = vmul.f32 %v20027_v31, %v4354_v25  ;;  %v5366_v45 = vpop.permute.xlu1 %5365  ;;  %v20359_v25 = vld [vmem:[#allocation252_spill] sm:$0xff] }
 0x4aa   :  { %5271 = vrot.lane.b32.xlu0 %v15971_v19, %s8557_s20  ;;  %v5136_v55 = vadd.f32 %v5008_v18, %v15883_v22  ;;  %v5010_v37 = vmul.f32 %v20357_v17, %v4221_v43  ;;  %v16005_v34 = vmul.f32 %v20037_v51, %v4355_v16  ;;  %v5815_v11 = vmul.f32 %v14381_v50, %v5745_v5  ;;  %v16017_v18 = vpop.permute.xlu0 %3965  ;;  %v20361_v43 = vld [vmem:[#allocation287_spill] sm:$0xff]  ;;  %v20362_v17 = vld [vmem:[#allocation198_spill] sm:$0xff] }
 0x4ab   :  { %20356 = vst [vmem:[#allocation174_spill] sm:$0xff] %v15995_v23  ;;  %v16008_v46 = vadd.f32 %v5009_v41, %v4603_v59  ;;  %v4222_v47 = vsel %vm2784_vm7, %v20350_v20, %v20351_v3  ;;  %v5011_v63 = vmul.f32 %v20359_v25, %v4158_v4  ;;  %v5471_v22 = vsel %vm2784_vm7, %v5238_v40, %v5366_v45  ;;  %v20365_v20 = vld [vmem:[#allocation41_spill] sm:$0xff]  ;;  %v20366_v3 = vld [vmem:[#allocation270_spill] sm:$0xff]  ;;  %v20367_v40 = vld [vmem:[#allocation288_spill] sm:$0xff] }
 0x4ac   :  { %20360 = vst [vmem:[#allocation218_spill] sm:$0xff] %v16017_v18  ;;  %v4159_v5 = vsel %vm2784_vm7, %v20362_v17, %v20361_v43  ;;  %v16024_v41 = vmul.f32 %v12697_v29, %v4760_v35  ;;  %v16027_v59 = vmul.f32 %v12700_v10, %v4761_v42  ;;  %v5879_v16 = vmul.f32 %v5815_v11, %v5471_v22  ;;  %v20368_v45 = vld [vmem:[#allocation269_spill] sm:$0xff]  ;;  %v20369_v19 = vld [vmem:[#allocation203_spill] sm:$0xff] }
 0x4ad   :  { %20358 = vst [vmem:[#allocation176_spill] sm:$0xff] %v16008_v46  ;;  %5399 = vrot.lane.b32.xlu1 %v5136_v55, %s8557_s20  ;;  %v4607_v4 = vmul.f32 %v20366_v3, %v20365_v20  ;;  %v4608_v25 = vmul.f32 %v20368_v45, %v20367_v40  ;;  %v4356_v18 = vsub.f32 %v20369_v19, %v20014_v28  ;;  %v20371_v42 = vld [vmem:[#allocation239_spill] sm:$0xff]  ;;  %v16041_v22 = vpop.permute.xlu1 %4093  ;;  %v20373_v55 = vld [vmem:[#allocation77_spill] sm:$0xff]  ;;  %v20374_v20 = vld [vmem:[#allocation112_spill] sm:$0xff] }
 0x4ae   :  { %20363 = vst [vmem:[#allocation125_spill] sm:$0xff] %v16024_v41  ;;  %20364 = vst [vmem:[#allocation238_spill] sm:$0xff] %v16027_v59  ;;  %v4357_v23 = vsub.f32 %v20370_v36, %v20022_v48  ;;  %5273 = vrot.lane.b32.xlu0 %v16008_v46, %s8557_s20  ;;  %v5138_v35 = vadd.f32 %v5010_v37, %v4604_v32  ;;  %v5012_v11 = vmul.f32 %v20371_v42, %v4222_v47  ;;  %v20376_v41 = vld [vmem:[#allocation114_spill] sm:$0xff]  ;;  %v20377_v46 = vld [vmem:[#allocation84_spill] sm:$0xff]  ;;  %v5240_v47 = vpop.permute.xlu0 %5239 }
 0x4af   :  { %20372 = vst [vmem:[#allocation48_spill] sm:$0xff] %v16041_v22  ;;  %v5943_v59 = vadd.f32 %v5879_v16, %v20373_v55  ;;  %v5746_v3 = vsub.f32 %v14354_v9, %v20374_v20  ;;  %v16046_v40 = vadd.f32 %v5011_v63, %v4605_v58  ;;  %v4223_v45 = vsel %vm2784_vm7, %v20361_v43, %v20362_v17  ;;  %v20378_v32 = vld [vmem:[#allocation73_spill] sm:$0xff]  ;;  %v20379_v42 = vld [vmem:[#allocation120_spill] sm:$0xff]  ;;  %v20381_v16 = vld [vmem:[#allocation27_spill] sm:$0xff] }
 0x4b0   :  { %v5013_v62 = vmul.f32 %v20376_v41, %v4159_v5  ;;  %v4609_v37 = vmul.f32 %v20378_v32, %v20377_v46  ;;  %v20380_v22 = vld [vmem:[#allocation20_spill] sm:$0xff]  ;;  %v4762_v63 = vsub.f32 %v12649_v27, %v20369_v19  ;;  %v20385_v41 = vld [vmem:[#allocation94_spill] sm:$0xff]  ;;  %v16074_v20 = vmul.f32 %v20037_v51, %v4357_v23 }
 0x4b1   :  { %20375 = vst [vmem:[#allocation53_spill] sm:$0xff] %v16046_v40  ;;  %v4610_v0 = vmul.f32 %v20380_v22, %v20379_v42  ;;  %v20382_v55 = vld [vmem:[#allocation8_spill] sm:$0xff]  ;;  %5401 = vrot.lane.b32.xlu1 %v5138_v35, %s8557_s20  ;;  %7512 = vmatprep.mubr.f32.mxu1 %v5943_v59  ;;  %v16068_v46 = vmul.f32 %v15605_v8, %v20385_v41  ;;  %v20386_v42 = vld [vmem:[#allocation130_spill] sm:$0xff] }
 0x4b2   :  { %v4160_v58 = vsel %vm2784_vm7, %v20382_v55, %v20381_v16  ;;  %v20383_v43 = vld [vmem:[#allocation240_spill] sm:$0xff]  ;;  %v16071_v22 = vmul.f32 %v20027_v31, %v4356_v18  ;;  %5275 = vrot.lane.b32.xlu0 %v16046_v40, %s8557_s20  ;;  %v5140_v32 = vadd.f32 %v5012_v11, %v4606_v53  ;;  %v5014_v35 = vmul.f32 %v20386_v42, %v4223_v45  ;;  %v20388_v18 = vld [vmem:[#allocation223_spill] sm:$0xff]  ;;  %v16091_v11 = vpop.permute.xlu0 %3967  ;;  %v20390_v45 = vld [vmem:[#allocation225_spill] sm:$0xff] }
 0x4b3   :  { %v20384_v17 = vld [vmem:[#allocation152_spill] sm:$0xff]  ;;  %v4763_v59 = vsub.f32 %v12652_v60, %v20370_v36  ;;  %v16082_v8 = vadd.f32 %v5013_v62, %v4607_v4  ;;  %v4224_v23 = vsel %vm2784_vm7, %v20381_v16, %v20382_v55  ;;  %v5015_v41 = vmul.f32 %v20388_v18, %v4160_v58  ;;  %20389 = vst [vmem:[#allocation183_spill] sm:$0xff] %v16091_v11  ;;  %v20391_v42 = vld [vmem:[#allocation29_spill] sm:$0xff]  ;;  %v20394_v16 = vld [vmem:[#allocation207_spill] sm:$0xff] }
 0x4b4   :  { %v4611_v5 = vmul.f32 %v20384_v17, %v20383_v43  ;;  %v5816_v43 = vmul.f32 %v14381_v50, %v5746_v3  ;;  %v5368_v17 = vpop.permute.xlu1 %5367  ;;  %v4161_v36 = vsel %vm2784_vm7, %v20391_v42, %v20390_v45  ;;  %v20392_v3 = vld [vmem:[#allocation246_spill] sm:$0xff]  ;;  %v16100_v4 = vmul.f32 %v12697_v29, %v4762_v63 }
 0x4b5   :  { %20387 = vst [vmem:[#allocation289_spill] sm:$0xff] %v16082_v8  ;;  %v5472_v53 = vsel %vm2784_vm7, %v5240_v47, %v5368_v17  ;;  %v4613_v62 = vmul.f32 %v15772_v44, %v20392_v3  ;;  %5403 = vrot.lane.b32.xlu1 %v5140_v32, %s8557_s20  ;;  %v4358_v55 = vsub.f32 %v20394_v16, %v20014_v28  ;;  %v20395_v47 = vld [vmem:[#allocation208_spill] sm:$0xff]  ;;  %v20396_v63 = vld [vmem:[#allocation30_spill] sm:$0xff] }
 0x4b6   :  { %20393 = vst [vmem:[#allocation58_spill] sm:$0xff] %v16100_v4  ;;  %v5880_v19 = vmul.f32 %v5816_v43, %v5472_v53  ;;  %v4359_v58 = vsub.f32 %v20395_v47, %v20022_v48  ;;  %v4764_v17 = vsub.f32 %v12649_v27, %v20394_v16  ;;  %v4765_v18 = vsub.f32 %v12652_v60, %v20395_v47  ;;  %v20397_v32 = vld [vmem:[#allocation10_spill] sm:$0xff] }
 0x4b7   :  { %5277 = vrot.lane.b32.xlu0 %v16082_v8, %s8557_s20  ;;  %v5142_v44 = vadd.f32 %v5014_v35, %v4608_v25  ;;  %v5016_v43 = vmul.f32 %v20396_v63, %v4224_v23  ;;  %v20398_v40 = vld [vmem:[#allocation118_spill] sm:$0xff]  ;;  %v16119_v4 = vadd.f32 %v5015_v41, %v4609_v37  ;;  %v4225_v47 = vsel %vm2784_vm7, %v20390_v45, %v20391_v42  ;;  %v20399_v8 = vld [vmem:[#allocation181_spill] sm:$0xff]  ;;  %v5242_v35 = vpop.permute.xlu0 %5241  ;;  %v20401_v63 = vld [vmem:[#allocation224_spill] sm:$0xff] }
 0x4b8   :  { %v16114_v53 = vpop.permute.xlu1 %4095  ;;  %v5944_v3 = vadd.f32 %v5880_v19, %v20397_v32  ;;  %v5747_v11 = vsub.f32 %v14354_v9, %v20398_v40  ;;  %v5017_v16 = vmul.f32 %v15670_v12, %v4161_v36  ;;  %v4614_v25 = vmul.f32 %v15775_v26, %v20399_v8  ;;  %v20400_v23 = vld [vmem:[#allocation210_spill] sm:$0xff]  ;;  %v20402_v32 = vld [vmem:[#allocation256_spill] sm:$0xff] }
 0x4b9   :  { %v4162_v19 = vsel %vm2784_vm7, %v20401_v63, %v20400_v23  ;;  %v4615_v40 = vmul.f32 %v15831_v13, %v20402_v32  ;;  %v16135_v37 = vmul.f32 %v12700_v10, %v4763_v59  ;;  %5405 = vrot.lane.b32.xlu1 %v5142_v44, %s8557_s20  ;;  %v20403_v41 = vld [vmem:[#allocation44_spill] sm:$0xff]  ;;  %v16143_v26 = vmul.f32 %v20027_v31, %v4358_v55 }
 0x4ba   :  { %7513 = vmatmul.mubr.f32.gmra.mrb[86].mxu1 %v5944_v3  ;;  %v16140_v12 = vmul.f32 %v15840_v54, %v20403_v41  ;;  %v16146_v8 = vmul.f32 %v20037_v51, %v4359_v58  ;;  %v16149_v45 = vmul.f32 %v12697_v29, %v4764_v17  ;;  %v5144_v13 = vadd.f32 %v5016_v43, %v4610_v0 }
 0x4bb   :  { %5279 = vrot.lane.b32.xlu0 %v16119_v4, %s8557_s20  ;;  %v5018_v59 = vmul.f32 %v15691_v6, %v4225_v47  ;;  %v16155_v42 = vmul.f32 %v12700_v10, %v4765_v18  ;;  %v5817_v54 = vmul.f32 %v14381_v50, %v5747_v11  ;;  %v16158_v55 = vadd.f32 %v5017_v16, %v4611_v5  ;;  %v16167_v44 = vpop.permute.xlu0 %3969  ;;  %v20405_v6 = vld [vmem:[#allocation133_spill] sm:$0xff]  ;;  %v20406_v18 = vld [vmem:[#allocation259_spill] sm:$0xff] }
 0x4bc   :  { %v5370_v36 = vpop.permute.xlu1 %5369  ;;  %v4226_v58 = vsel %vm2784_vm7, %v20400_v23, %v20401_v63  ;;  %v5019_v17 = vmul.f32 %v15806_v24, %v4162_v19  ;;  %v4163_v11 = vsel %vm2784_vm7, %v20405_v6, %v15612_v33  ;;  %v4617_v5 = vmul.f32 %v15905_v52, %v20406_v18  ;;  %v20407_v16 = vld [vmem:[#allocation209_spill] sm:$0xff]  ;;  %v20408_v24 = vld [vmem:[#allocation134_spill] sm:$0xff] }
 0x4bd   :  { %20404 = vst [vmem:[#allocation217_spill] sm:$0xff] %v16158_v55  ;;  %v5473_v0 = vsel %vm2784_vm7, %v5242_v35, %v5370_v36  ;;  %v4360_v43 = vsub.f32 %v20407_v16, %v20014_v28  ;;  %5407 = vrot.lane.b32.xlu1 %v5144_v13, %s8557_s20  ;;  %v16180_v47 = vmul.f32 %v15912_v14, %v20408_v24  ;;  %v20409_v35 = vld [vmem:[#allocation212_spill] sm:$0xff] }
 0x4be   :  { %v5881_v3 = vmul.f32 %v5817_v54, %v5473_v0  ;;  %v4361_v23 = vsub.f32 %v20409_v35, %v20022_v48  ;;  %v4766_v63 = vsub.f32 %v12649_v27, %v20407_v16  ;;  %v4767_v19 = vsub.f32 %v12652_v60, %v20409_v35  ;;  %v20410_v14 = vld [vmem:[#allocation72_spill] sm:$0xff]  ;;  %v20411_v54 = vld [vmem:[#allocation123_spill] sm:$0xff] }
 0x4bf   :  { %5281 = vrot.lane.b32.xlu0 %v16158_v55, %s8557_s20  ;;  %v5146_v52 = vadd.f32 %v5018_v59, %v16068_v46  ;;  %v5020_v32 = vmul.f32 %v15809_v57, %v4226_v58  ;;  %v5748_v36 = vsub.f32 %v14354_v9, %v20411_v54  ;;  %v16197_v0 = vadd.f32 %v5019_v17, %v4613_v62  ;;  %v20413_v35 = vld [vmem:[#allocation55_spill] sm:$0xff]  ;;  %v5244_v57 = vpop.permute.xlu0 %5243  ;;  %v20414_v58 = vld [vmem:[#allocation106_spill] sm:$0xff] }
 0x4c0   :  { %v16192_v41 = vpop.permute.xlu1 %4097  ;;  %v5945_v13 = vadd.f32 %v5881_v3, %v20410_v14  ;;  %v4227_v18 = vsel %vm2784_vm7, %v15612_v33, %v20405_v6  ;;  %v5021_v24 = vmul.f32 %v15848_v39, %v4163_v11  ;;  %v4619_v46 = vmul.f32 %v15951_v30, %v20413_v35  ;;  %v20415_v6 = vld [vmem:[#allocation213_spill] sm:$0xff]  ;;  %v20416_v3 = vld [vmem:[#allocation104_spill] sm:$0xff] }
 0x4c1   :  { %20412 = vst [vmem:[#allocation182_spill] sm:$0xff] %v16197_v0  ;;  %v4164_v59 = vsel %vm2784_vm7, %v15652_v49, %v15676_v2  ;;  %v16212_v62 = vmul.f32 %v15955_v61, %v20414_v58  ;;  %v16215_v17 = vmul.f32 %v20027_v31, %v4360_v43  ;;  %5409 = vrot.lane.b32.xlu1 %v5146_v52, %s8557_s20  ;;  %v20420_v35 = vld [vmem:[#allocation109_spill] sm:$0xff]  ;;  %v20421_v58 = vld [vmem:[#allocation272_spill] sm:$0xff] }
 0x4c2   :  { %7515 = vmatprep.mubr.f32.mxu1 %v5945_v13  ;;  %v16219_v33 = vmul.f32 %v20037_v51, %v4361_v23  ;;  %v16222_v39 = vmul.f32 %v12697_v29, %v4766_v63  ;;  %v16225_v30 = vmul.f32 %v12700_v10, %v4767_v19  ;;  %v4362_v11 = vsub.f32 %v20415_v6, %v20014_v28 }
 0x4c3   :  { %5283 = vrot.lane.b32.xlu0 %v16197_v0, %s8557_s20  ;;  %v5148_v61 = vadd.f32 %v5020_v32, %v4614_v25  ;;  %v5022_v43 = vmul.f32 %v15851_v38, %v4227_v18  ;;  %v4363_v52 = vsub.f32 %v20416_v3, %v20022_v48  ;;  %v5818_v23 = vmul.f32 %v14381_v50, %v5748_v36  ;;  %v16244_v32 = vpop.permute.xlu0 %3971  ;;  %v20442_v0 = vld [vmem:[#allocation58_spill] sm:$0xff] }
 0x4c4   :  { %v5372_v14 = vpop.permute.xlu1 %5371  ;;  %v16235_v63 = vadd.f32 %v5021_v24, %v4615_v40  ;;  %v4228_v19 = vsel %vm2784_vm7, %v15676_v2, %v15652_v49  ;;  %v5023_v13 = vmul.f32 %v15920_v21, %v4164_v59  ;;  %v4165_v38 = vsel %vm2784_vm7, %v15724_v7, %v15743_v1  ;;  %v20418_v49 = vld [vmem:[#allocation137_spill] sm:$0xff]  ;;  %v20419_v21 = vld [vmem:[#allocation254_spill] sm:$0xff] }
 0x4c5   :  { %v5474_v25 = vsel %vm2784_vm7, %v5244_v57, %v5372_v14  ;;  %v4768_v40 = vsub.f32 %v12649_v27, %v20415_v6  ;;  %v4769_v54 = vsub.f32 %v12652_v60, %v20416_v3  ;;  %5411 = vrot.lane.b32.xlu1 %v5148_v61, %s8557_s20  ;;  %v4621_v2 = vmul.f32 %v15998_v15, %v20418_v49  ;;  %v20422_v15 = vld [vmem:[#allocation283_spill] sm:$0xff]  ;;  %v20423_v14 = vld [vmem:[#allocation128_spill] sm:$0xff] }
 0x4c6   :  { %20417 = vst [vmem:[#allocation98_spill] sm:$0xff] %v16235_v63  ;;  %v5882_v36 = vmul.f32 %v5818_v23, %v5474_v25  ;;  %v16259_v18 = vmul.f32 %v16005_v34, %v20419_v21  ;;  %v16262_v24 = vmul.f32 %v20027_v31, %v4362_v11  ;;  %v4364_v57 = vsub.f32 %v20420_v35, %v20014_v28  ;;  %v20425_v49 = vld [vmem:[#allocation280_spill] sm:$0xff] }
 0x4c7   :  { %5285 = vrot.lane.b32.xlu0 %v16235_v63, %s8557_s20  ;;  %v5150_v59 = vadd.f32 %v5022_v43, %v16140_v12  ;;  %v5024_v61 = vmul.f32 %v20421_v58, %v4228_v19  ;;  %v5749_v34 = vsub.f32 %v14354_v9, %v20423_v14  ;;  %v16275_v25 = vadd.f32 %v5023_v13, %v4617_v5  ;;  %v5246_v43 = vpop.permute.xlu0 %5245  ;;  %v20426_v19 = vld [vmem:[#allocation36_spill] sm:$0xff]  ;;  %v20427_v58 = vld [vmem:[#allocation298_spill] sm:$0xff] }
 0x4c8   :  { %v16270_v3 = vpop.permute.xlu1 %4099  ;;  %v5946_v23 = vadd.f32 %v5882_v36, %v20422_v15  ;;  %v4229_v11 = vsel %vm2784_vm7, %v15743_v1, %v15724_v7  ;;  %v5025_v21 = vmul.f32 %v20425_v49, %v4165_v38  ;;  %v16283_v12 = vmul.f32 %v20037_v51, %v4363_v52  ;;  %v20428_v7 = vld [vmem:[#allocation32_spill] sm:$0xff]  ;;  %v20429_v52 = vld [vmem:[#allocation110_spill] sm:$0xff] }
 0x4c9   :  { %20424 = vst [vmem:[#allocation59_spill] sm:$0xff] %v16275_v25  ;;  %v4166_v36 = vsel %vm2784_vm7, %v20427_v58, %v20426_v19  ;;  %v16290_v15 = vmul.f32 %v12697_v29, %v4768_v40  ;;  %v16293_v5 = vmul.f32 %v12700_v10, %v4769_v54  ;;  %5413 = vrot.lane.b32.xlu1 %v5150_v59, %s8557_s20  ;;  %v20430_v54 = vld [vmem:[#allocation174_spill] sm:$0xff] }
 0x4ca   :  { %7516 = vmatmul.mubr.f32.gmra.mrb[88].mxu1 %v5946_v23  ;;  %v4623_v1 = vmul.f32 %v16071_v22, %v20428_v7  ;;  %v4365_v13 = vsub.f32 %v20429_v52, %v20022_v48  ;;  %v16301_v38 = vmul.f32 %v20027_v31, %v4364_v57  ;;  %v4770_v14 = vsub.f32 %v12649_v27, %v20420_v35  ;;  %v20432_v35 = vld [vmem:[#allocation125_spill] sm:$0xff] }
 0x4cb   :  { %5287 = vrot.lane.b32.xlu0 %v16275_v25, %s8557_s20  ;;  %v5152_v40 = vadd.f32 %v5024_v61, %v16180_v47  ;;  %v5026_v59 = vmul.f32 %v20430_v54, %v4229_v11  ;;  %v4771_v23 = vsub.f32 %v12652_v60, %v20429_v52  ;;  %v5819_v22 = vmul.f32 %v14381_v50, %v5749_v34  ;;  %v16321_v61 = vpop.permute.xlu0 %3973  ;;  %v20433_v11 = vld [vmem:[#allocation82_spill] sm:$0xff]  ;;  %v20434_v54 = vld [vmem:[#allocation168_spill] sm:$0xff]  ;;  %v20435_v34 = vld [vmem:[#allocation69_spill] sm:$0xff] }
 0x4cc   :  { %v5374_v49 = vpop.permute.xlu1 %5373  ;;  %v16312_v7 = vadd.f32 %v5025_v21, %v4619_v46  ;;  %v4230_v57 = vsel %vm2784_vm7, %v20426_v19, %v20427_v58  ;;  %v5027_v6 = vmul.f32 %v20432_v35, %v4166_v36  ;;  %v4624_v52 = vmul.f32 %v16074_v20, %v20433_v11  ;;  %v20436_v21 = vld [vmem:[#allocation216_spill] sm:$0xff]  ;;  %v20437_v19 = vld [vmem:[#allocation117_spill] sm:$0xff]  ;;  %v20440_v11 = vld [vmem:[#allocation131_spill] sm:$0xff] }
 0x4cd   :  { %v5475_v47 = vsel %vm2784_vm7, %v5246_v43, %v5374_v49  ;;  %v4167_v46 = vsel %vm2784_vm7, %v20435_v34, %v20434_v54  ;;  %v4366_v16 = vsub.f32 %v20436_v21, %v20014_v28  ;;  %5415 = vrot.lane.b32.xlu1 %v5152_v40, %s8557_s20  ;;  %v16333_v35 = vmul.f32 %v20037_v51, %v4365_v13  ;;  %v20439_v13 = vld [vmem:[#allocation265_spill] sm:$0xff] }
 0x4ce   :  { %20431 = vst [vmem:[#allocation187_spill] sm:$0xff] %v16312_v7  ;;  %v5883_v25 = vmul.f32 %v5819_v22, %v5475_v47  ;;  %v16336_v43 = vmul.f32 %v12697_v29, %v4770_v14  ;;  %v4367_v20 = vsub.f32 %v20437_v19, %v20022_v48  ;;  %v4772_v58 = vsub.f32 %v12649_v27, %v20436_v21  ;;  %v20438_v22 = vld [vmem:[#allocation238_spill] sm:$0xff] }
 0x4cf   :  { %5289 = vrot.lane.b32.xlu0 %v16312_v7, %s8557_s20  ;;  %v5154_v36 = vadd.f32 %v5026_v59, %v16212_v62  ;;  %v5028_v49 = vmul.f32 %v20438_v22, %v4230_v57  ;;  %v5750_v14 = vsub.f32 %v14354_v9, %v20440_v11  ;;  %v16351_v63 = vadd.f32 %v5027_v6, %v4621_v2  ;;  %v5248_v59 = vpop.permute.xlu0 %5247  ;;  %v20443_v57 = vld [vmem:[#allocation40_spill] sm:$0xff]  ;;  %v20444_v22 = vld [vmem:[#allocation119_spill] sm:$0xff] }
 0x4d0   :  { %v16346_v40 = vpop.permute.xlu1 %4101  ;;  %v5947_v47 = vadd.f32 %v5883_v25, %v20439_v13  ;;  %v4231_v21 = vsel %vm2784_vm7, %v20434_v54, %v20435_v34  ;;  %v5029_v7 = vmul.f32 %v20442_v0, %v4167_v46  ;;  %v16359_v62 = vmul.f32 %v12700_v10, %v4771_v23  ;;  %v20445_v23 = vld [vmem:[#allocation121_spill] sm:$0xff]  ;;  %v20446_v34 = vld [vmem:[#allocation122_spill] sm:$0xff] }
 0x4d1   :  { %20441 = vst [vmem:[#allocation220_spill] sm:$0xff] %v16351_v63  ;;  %v4168_v25 = vsel %vm2784_vm7, %v20444_v22, %v20443_v57  ;;  %v16366_v13 = vmul.f32 %v20027_v31, %v4366_v16  ;;  %v4773_v6 = vsub.f32 %v12652_v60, %v20437_v19  ;;  %5417 = vrot.lane.b32.xlu1 %v5154_v36, %s8557_s20 }
 0x4d2   :  { %7518 = vmatprep.mubr.f32.mxu1 %v5947_v47  ;;  %v16372_v0 = vmul.f32 %v20037_v51, %v4367_v20  ;;  %v16375_v2 = vmul.f32 %v12697_v29, %v4772_v58  ;;  %v4368_v54 = vsub.f32 %v20445_v23, %v20014_v28  ;;  %v4369_v46 = vsub.f32 %v20446_v34, %v20022_v48 }
 0x4d3   :  { %5291 = vrot.lane.b32.xlu0 %v16351_v63, %s8557_s20  ;;  %v5156_v16 = vadd.f32 %v5028_v49, %v16259_v18  ;;  %v5030_v19 = vmul.f32 %v16135_v37, %v4231_v21  ;;  %v4774_v20 = vsub.f32 %v12649_v27, %v20445_v23  ;;  %v5820_v36 = vmul.f32 %v14381_v50, %v5750_v14  ;;  %v16397_v49 = vpop.permute.xlu0 %3975  ;;  %v20447_v37 = vld [vmem:[#allocation48_spill] sm:$0xff]  ;;  %v20448_v21 = vld [vmem:[#allocation218_spill] sm:$0xff] }
 0x4d4   :  { %v5376_v58 = vpop.permute.xlu1 %5375  ;;  %v16388_v47 = vadd.f32 %v5029_v7, %v4623_v1  ;;  %v4232_v11 = vsel %vm2784_vm7, %v20443_v57, %v20444_v22  ;;  %v5031_v55 = vmul.f32 %v16149_v45, %v4168_v25  ;;  %v4169_v14 = vsel %vm2784_vm7, %v20448_v21, %v20447_v37  ;;  %v20449_v45 = vld [vmem:[#allocation234_spill] sm:$0xff] }
 0x4d5   :  { %v5476_v18 = vsel %vm2784_vm7, %v5248_v59, %v5376_v58  ;;  %v16404_v1 = vmul.f32 %v12700_v10, %v4773_v6  ;;  %v4775_v7 = vsub.f32 %v12652_v60, %v20446_v34  ;;  %5419 = vrot.lane.b32.xlu1 %v5156_v16, %s8557_s20  ;;  %v4625_v57 = vmul.f32 %v16143_v26, %v20449_v45  ;;  %v20450_v59 = vld [vmem:[#allocation293_spill] sm:$0xff]  ;;  %v20451_v6 = vld [vmem:[#allocation135_spill] sm:$0xff]  ;;  %v20452_v26 = vld [vmem:[#allocation50_spill] sm:$0xff] }
 0x4d6   :  { %v5884_v23 = vmul.f32 %v5820_v36, %v5476_v18  ;;  %v4626_v22 = vmul.f32 %v16146_v8, %v20450_v59  ;;  %v16414_v25 = vmul.f32 %v20027_v31, %v4368_v54  ;;  %v5751_v58 = vsub.f32 %v14354_v9, %v20451_v6 }
 0x4d7   :  { %5293 = vrot.lane.b32.xlu0 %v16388_v47, %s8557_s20  ;;  %v5158_v63 = vadd.f32 %v5030_v19, %v4624_v52  ;;  %v5032_v34 = vmul.f32 %v16155_v42, %v4232_v11  ;;  %v16422_v16 = vmul.f32 %v20037_v51, %v4369_v46  ;;  %v16427_v8 = vadd.f32 %v5031_v55, %v4625_v57  ;;  %v5250_v42 = vpop.permute.xlu0 %5249  ;;  %v20453_v46 = vld [vmem:[#allocation183_spill] sm:$0xff] }
 0x4d8   :  { %v16424_v36 = vpop.permute.xlu1 %4103  ;;  %v5948_v18 = vadd.f32 %v5884_v23, %v20452_v26  ;;  %v4233_v54 = vsel %vm2784_vm7, %v20447_v37, %v20448_v21  ;;  %v5033_v45 = vmul.f32 %v16222_v39, %v4169_v14  ;;  %v16435_v52 = vmul.f32 %v12697_v29, %v4774_v20  ;;  %v20454_v55 = vld [vmem:[#allocation139_spill] sm:$0xff]  ;;  %v20455_v37 = vld [vmem:[#allocation266_spill] sm:$0xff] }
 0x4d9   :  { %v4170_v19 = vsel %vm2784_vm7, %v20453_v46, %v16114_v53  ;;  %v16442_v23 = vmul.f32 %v12700_v10, %v4775_v7  ;;  %5421 = vrot.lane.b32.xlu1 %v5158_v63, %s8557_s20  ;;  %v5752_v11 = vsub.f32 %v14354_v9, %v20454_v55  ;;  %v4627_v39 = vmul.f32 %v16215_v17, %v20455_v37  ;;  %v20456_v21 = vld [vmem:[#allocation143_spill] sm:$0xff]  ;;  %v20459_v55 = vld [vmem:[#allocation276_spill] sm:$0xff] }
 0x4da   :  { %7519 = vmatmul.mubr.f32.gmra.mrb[90].mxu1 %v5948_v18  ;;  %v5821_v20 = vmul.f32 %v14381_v50, %v5751_v58  ;;  %v5753_v14 = vsub.f32 %v14354_v9, %v20456_v21  ;;  %v20457_v57 = vld [vmem:[#allocation147_spill] sm:$0xff]  ;;  %v5160_v59 = vadd.f32 %v5032_v34, %v4626_v22  ;;  %v5034_v63 = vmul.f32 %v16225_v30, %v4233_v54  ;;  %v20460_v34 = vld [vmem:[#allocation9_spill] sm:$0xff] }
 0x4db   :  { %5295 = vrot.lane.b32.xlu0 %v16427_v8, %s8557_s20  ;;  %v5754_v7 = vsub.f32 %v14354_v9, %v20457_v57  ;;  %v20458_v26 = vld [vmem:[#allocation151_spill] sm:$0xff]  ;;  %v16461_v37 = vadd.f32 %v5033_v45, %v4627_v39  ;;  %v4234_v58 = vsel %vm2784_vm7, %v16114_v53, %v20453_v46  ;;  %v5035_v21 = vmul.f32 %v16290_v15, %v4170_v19  ;;  %v16470_v30 = vpop.permute.xlu0 %3977  ;;  %v20461_v46 = vld [vmem:[#allocation76_spill] sm:$0xff] }
 0x4dc   :  { %v5378_v6 = vpop.permute.xlu1 %5377  ;;  %v5755_v18 = vsub.f32 %v14354_v9, %v20458_v26  ;;  %v5551_v17 = vsub.f32 %v20458_v26, %v20459_v55  ;;  %v4628_v54 = vmul.f32 %v16219_v33, %v20460_v34  ;;  %v4171_v45 = vsel %vm2784_vm7, %v16167_v44, %v16192_v41  ;;  %v20462_v19 = vld [vmem:[#allocation155_spill] sm:$0xff] }
 0x4dd   :  { %v5477_v22 = vsel %vm2784_vm7, %v5250_v42, %v5378_v6  ;;  %5423 = vrot.lane.b32.xlu1 %v5160_v59, %s8557_s20  ;;  %v5822_v53 = vmul.f32 %v14381_v50, %v5752_v11  ;;  %v4629_v15 = vmul.f32 %v16262_v24, %v20461_v46  ;;  %v16485_v42 = vmul.f32 %v14381_v50, %v5753_v14  ;;  %v20463_v11 = vld [vmem:[#allocation11_spill] sm:$0xff] }
 0x4de   :  { %v5885_v39 = vmul.f32 %v5821_v20, %v5477_v22  ;;  %v16488_v33 = vmul.f32 %v14381_v50, %v5754_v7  ;;  %v5756_v57 = vsub.f32 %v14354_v9, %v20462_v19  ;;  %v5162_v20 = vadd.f32 %v5034_v63, %v4628_v54  ;;  %v20464_v63 = vld [vmem:[#allocation204_spill] sm:$0xff] }
 0x4df   :  { %5297 = vrot.lane.b32.xlu0 %v16461_v37, %s8557_s20  ;;  %v5036_v59 = vmul.f32 %v16293_v5, %v4234_v58  ;;  %v16497_v24 = vmul.f32 %v14381_v50, %v5755_v18  ;;  %v16499_v22 = vadd.f32 %v5035_v21, %v4629_v15  ;;  %v4235_v14 = vsel %vm2784_vm7, %v16192_v41, %v16167_v44  ;;  %v5252_v34 = vpop.permute.xlu0 %5251  ;;  %v20465_v5 = vld [vmem:[#allocation251_spill] sm:$0xff] }
 0x4e0   :  { %v16493_v6 = vpop.permute.xlu1 %4105  ;;  %v5949_v26 = vadd.f32 %v5885_v39, %v20463_v11  ;;  %v5037_v7 = vmul.f32 %v16336_v43, %v4171_v45  ;;  %v16507_v54 = vmul.f32 %v20464_v63, %v5551_v17  ;;  %v4630_v58 = vmul.f32 %v16283_v12, %v20465_v5  ;;  %v20466_v41 = vld [vmem:[#allocation235_spill] sm:$0xff]  ;;  %v20469_v39 = vld [vmem:[#allocation189_spill] sm:$0xff] }
 0x4e1   :  { %v4172_v18 = vsel %vm2784_vm7, %v16244_v32, %v16270_v3  ;;  %5425 = vrot.lane.b32.xlu1 %v5162_v20, %s8557_s20  ;;  %v4631_v43 = vmul.f32 %v16301_v38, %v20466_v41  ;;  %v20467_v21 = vld [vmem:[#allocation115_spill] sm:$0xff]  ;;  %v4370_v46 = vsub.f32 %v20469_v39, %v20014_v28  ;;  %v5038_v20 = vmul.f32 %v16359_v62, %v4235_v14  ;;  %v20470_v11 = vld [vmem:[#allocation97_spill] sm:$0xff]  ;;  %v20471_v38 = vld [vmem:[#allocation190_spill] sm:$0xff] }
 0x4e2   :  { %7521 = vmatprep.mubr.f32.mxu1 %v5949_v26  ;;  %v4632_v17 = vmul.f32 %v16333_v35, %v20467_v21  ;;  %v20468_v45 = vld [vmem:[#allocation195_spill] sm:$0xff]  ;;  %v5164_v15 = vadd.f32 %v5036_v59, %v4630_v58  ;;  %v4634_v26 = vmul.f32 %v16372_v0, %v20470_v11  ;;  %v4371_v5 = vsub.f32 %v20471_v38, %v20022_v48 }
 0x4e3   :  { %v4633_v12 = vmul.f32 %v16366_v13, %v20468_v45  ;;  %5299 = vrot.lane.b32.xlu0 %v16499_v22, %s8557_s20  ;;  %v16533_v35 = vadd.f32 %v5037_v7, %v4631_v43  ;;  %v4236_v13 = vsel %vm2784_vm7, %v16270_v3, %v16244_v32  ;;  %v5039_v21 = vmul.f32 %v16375_v2, %v4172_v18  ;;  %v16542_v62 = vpop.permute.xlu0 %3979  ;;  %v20472_v14 = vld [vmem:[#allocation79_spill] sm:$0xff]  ;;  %v20473_v32 = vld [vmem:[#allocation102_spill] sm:$0xff] }
 0x4e4   :  { %v5380_v41 = vpop.permute.xlu1 %5379  ;;  %v4635_v0 = vmul.f32 %v16414_v25, %v20472_v14  ;;  %v4173_v7 = vsel %vm2784_vm7, %v16321_v61, %v16346_v40  ;;  %v4776_v58 = vsub.f32 %v12649_v27, %v20469_v39  ;;  %v4636_v3 = vmul.f32 %v16422_v16, %v20473_v32  ;;  %v20474_v25 = vld [vmem:[#allocation149_spill] sm:$0xff]  ;;  %v20476_v16 = vld [vmem:[#allocation127_spill] sm:$0xff] }
 0x4e5   :  { %v5478_v59 = vsel %vm2784_vm7, %v5252_v34, %v5380_v41  ;;  %5427 = vrot.lane.b32.xlu1 %v5164_v15, %s8557_s20  ;;  %v4509_v2 = vmul.f32 %v20027_v31, %v4370_v46  ;;  %v4777_v34 = vsub.f32 %v12652_v60, %v20471_v38  ;;  %v4372_v18 = vsub.f32 %v20474_v25, %v20014_v28 }
 0x4e6   :  { %v5886_v43 = vmul.f32 %v5822_v53, %v5478_v59  ;;  %v5166_v45 = vadd.f32 %v5038_v20, %v4632_v17  ;;  %v5040_v11 = vmul.f32 %v16404_v1, %v4236_v13  ;;  %v20475_v53 = vld [vmem:[#allocation146_spill] sm:$0xff]  ;;  %v16568_v46 = vadd.f32 %v5039_v21, %v4633_v12  ;;  %v20477_v1 = vld [vmem:[#allocation24_spill] sm:$0xff]  ;;  %v20478_v21 = vld [vmem:[#allocation49_spill] sm:$0xff] }
 0x4e7   :  { %5301 = vrot.lane.b32.xlu0 %v16533_v35, %s8557_s20  ;;  %v4373_v15 = vsub.f32 %v20475_v53, %v20022_v48  ;;  %v4237_v38 = vsel %vm2784_vm7, %v16346_v40, %v16321_v61  ;;  %v5041_v14 = vmul.f32 %v16435_v52, %v4173_v7  ;;  %v4510_v17 = vmul.f32 %v20037_v51, %v4371_v5  ;;  %v5254_v20 = vpop.permute.xlu0 %5253 }
 0x4e8   :  { %v16565_v41 = vpop.permute.xlu1 %4107  ;;  %v5950_v59 = vadd.f32 %v5886_v43, %v20476_v16  ;;  %v4637_v13 = vmul.f32 %v4509_v2, %v20477_v1  ;;  %v4915_v32 = vmul.f32 %v12697_v29, %v4776_v58  ;;  %v4174_v12 = vsel %vm2784_vm7, %v16397_v49, %v16424_v36 }
 0x4e9   :  { %5429 = vrot.lane.b32.xlu1 %v5166_v45, %s8557_s20  ;;  %v4638_v43 = vmul.f32 %v4510_v17, %v20478_v21  ;;  %v4916_v61 = vmul.f32 %v12700_v10, %v4777_v34  ;;  %v4778_v40 = vsub.f32 %v12649_v27, %v20474_v25  ;;  %v4779_v52 = vsub.f32 %v12652_v60, %v20475_v53 }
 0x4ea   :  { %7522 = vmatmul.mubr.f32.gmra.mrb[92].mxu1 %v5950_v59  ;;  %v5168_v5 = vadd.f32 %v5040_v11, %v4634_v26  ;;  %v5042_v7 = vmul.f32 %v16442_v23, %v4237_v38  ;;  %v4511_v58 = vmul.f32 %v20027_v31, %v4372_v18  ;;  %v4512_v2 = vmul.f32 %v20037_v51, %v4373_v15  ;;  %v20479_v26 = vld [vmem:[#allocation37_spill] sm:$0xff] }
 0x4eb   :  { %5303 = vrot.lane.b32.xlu0 %v16568_v46, %s8557_s20  ;;  %v16594_v16 = vadd.f32 %v5041_v14, %v4635_v0  ;;  %v4238_v34 = vsel %vm2784_vm7, %v16424_v36, %v16397_v49  ;;  %v5043_v59 = vmul.f32 %v4915_v32, %v4174_v12  ;;  %v3982_v17 = vpop.permute.xlu0 %3981  ;;  %v4175_v23 = vsel %vm2784_vm7, %v16470_v30, %v16493_v6  ;;  %v20480_v0 = vld [vmem:[#allocation194_spill] sm:$0xff]  ;;  %v20481_v49 = vld [vmem:[#allocation273_spill] sm:$0xff] }
 0x4ec   :  { %v5382_v45 = vpop.permute.xlu1 %5381  ;;  %v4374_v18 = vsub.f32 %v20479_v26, %v20014_v28  ;;  %v4375_v11 = vsub.f32 %v20480_v0, %v20022_v48  ;;  %v4639_v36 = vmul.f32 %v4511_v58, %v20481_v49  ;;  %v20482_v38 = vld [vmem:[#allocation205_spill] sm:$0xff]  ;;  %v4780_v1 = vsub.f32 %v12649_v27, %v20479_v26 }
 0x4ed   :  { %v5479_v53 = vsel %vm2784_vm7, %v5254_v20, %v5382_v45  ;;  %5431 = vrot.lane.b32.xlu1 %v5168_v5, %s8557_s20  ;;  %v4640_v14 = vmul.f32 %v4512_v2, %v20482_v38  ;;  %v4917_v20 = vmul.f32 %v12697_v29, %v4778_v40  ;;  %v5170_v32 = vadd.f32 %v5042_v7, %v4636_v3  ;;  %v20485_v7 = vld [vmem:[#allocation42_spill] sm:$0xff] }
 0x4ee   :  { %v5887_v15 = vmul.f32 %v16485_v42, %v5479_v53  ;;  %v5044_v12 = vmul.f32 %v4916_v61, %v4238_v34  ;;  %v4918_v21 = vmul.f32 %v12700_v10, %v4779_v52  ;;  %v20483_v42 = vld [vmem:[#allocation296_spill] sm:$0xff]  ;;  %v16621_v5 = vadd.f32 %v5043_v59, %v4637_v13 }
 0x4ef   :  { %5305 = vrot.lane.b32.xlu0 %v16594_v16, %s8557_s20  ;;  %v4239_v40 = vsel %vm2784_vm7, %v16493_v6, %v16470_v30  ;;  %v5045_v58 = vmul.f32 %v4917_v20, %v4175_v23  ;;  %v4781_v2 = vsub.f32 %v12652_v60, %v20480_v0  ;;  %v5256_v49 = vpop.permute.xlu0 %5255  ;;  %v4513_v3 = vmul.f32 %v20027_v31, %v4374_v18  ;;  %v20484_v30 = vld [vmem:[#allocation39_spill] sm:$0xff]  ;;  %v20486_v0 = vld [vmem:[#allocation274_spill] sm:$0xff] }
 0x4f0   :  { %v4110_v45 = vpop.permute.xlu1 %4109  ;;  %v5951_v53 = vadd.f32 %v5887_v15, %v20483_v42  ;;  %v4514_v61 = vmul.f32 %v20037_v51, %v4375_v11  ;;  %v4176_v13 = vsel %vm2784_vm7, %v16542_v62, %v16565_v41  ;;  %v4919_v52 = vmul.f32 %v12697_v29, %v4780_v1  ;;  %v20487_v15 = vld [vmem:[#allocation275_spill] sm:$0xff] }
 0x4f1   :  { %5433 = vrot.lane.b32.xlu1 %v5170_v32, %s8557_s20  ;;  %v4376_v6 = vsub.f32 %v20484_v30, %v20014_v28  ;;  %v4377_v34 = vsub.f32 %v20485_v7, %v20022_v48  ;;  %v4782_v59 = vsub.f32 %v12649_v27, %v20484_v30  ;;  %v5172_v23 = vadd.f32 %v5044_v12, %v4638_v43 }
 0x4f2   :  { %7524 = vmatprep.mubr.f32.mxu1 %v5951_v53  ;;  %v5046_v18 = vmul.f32 %v4918_v21, %v4239_v40  ;;  %v4641_v11 = vmul.f32 %v4513_v3, %v20486_v0  ;;  %v4642_v38 = vmul.f32 %v4514_v61, %v20487_v15  ;;  %v16647_v1 = vadd.f32 %v5045_v58, %v4639_v36  ;;  %v20488_v58 = vld [vmem:[#allocation258_spill] sm:$0xff] }
 0x4f3   :  { %5307 = vrot.lane.b32.xlu0 %v16621_v5, %s8557_s20  ;;  %v4240_v32 = vsel %vm2784_vm7, %v16565_v41, %v16542_v62  ;;  %v5047_v42 = vmul.f32 %v4919_v52, %v4176_v13  ;;  %v3984_v44 = vpop.permute.xlu0 %3983  ;;  %v4920_v43 = vmul.f32 %v12700_v10, %v4781_v2  ;;  %v4783_v12 = vsub.f32 %v12652_v60, %v20485_v7  ;;  %v20489_v13 = vld [vmem:[#allocation157_spill] sm:$0xff] }
 0x4f4   :  { %v5384_v20 = vpop.permute.xlu1 %5383  ;;  %v4177_v21 = vsel %vm2784_vm7, %v3982_v17, %v4110_v45  ;;  %v4515_v40 = vmul.f32 %v20027_v31, %v4376_v6  ;;  %v4516_v62 = vmul.f32 %v20037_v51, %v4377_v34  ;;  %v4921_v41 = vmul.f32 %v12697_v29, %v4782_v59  ;;  %v20490_v59 = vld [vmem:[#allocation230_spill] sm:$0xff] }
 0x4f5   :  { %v5480_v53 = vsel %vm2784_vm7, %v5256_v49, %v5384_v20  ;;  %5435 = vrot.lane.b32.xlu1 %v5172_v23, %s8557_s20  ;;  %v4784_v2 = vsub.f32 %v12649_v27, %v20488_v58  ;;  %v5174_v49 = vadd.f32 %v5046_v18, %v4640_v14  ;;  %v5048_v3 = vmul.f32 %v4920_v43, %v4240_v32  ;;  %v20492_v32 = vld [vmem:[#allocation228_spill] sm:$0xff] }
 0x4f6   :  { %v5888_v36 = vmul.f32 %v16488_v33, %v5480_v53  ;;  %v4378_v61 = vsub.f32 %v20488_v58, %v20014_v28  ;;  %v16672_v7 = vadd.f32 %v5047_v42, %v4641_v11  ;;  %v4241_v6 = vsel %vm2784_vm7, %v4110_v45, %v3982_v17  ;;  %v20491_v11 = vld [vmem:[#allocation257_spill] sm:$0xff]  ;;  %v20493_v42 = vld [vmem:[#allocation260_spill] sm:$0xff] }
 0x4f7   :  { %5309 = vrot.lane.b32.xlu0 %v16647_v1, %s8557_s20  ;;  %v5049_v34 = vmul.f32 %v4921_v41, %v4177_v21  ;;  %v4379_v23 = vsub.f32 %v20490_v59, %v20022_v48  ;;  %v3986_v0 = vpop.permute.xlu0 %3985  ;;  %v4922_v15 = vmul.f32 %v12700_v10, %v4783_v12  ;;  %v4785_v14 = vsub.f32 %v12652_v60, %v20490_v59 }
 0x4f8   :  { %v4112_v33 = vpop.permute.xlu1 %4111  ;;  %v5952_v52 = vadd.f32 %v5888_v36, %v20489_v13  ;;  %v4643_v20 = vmul.f32 %v4515_v40, %v20491_v11  ;;  %v4644_v17 = vmul.f32 %v4516_v62, %v20492_v32  ;;  %v4923_v45 = vmul.f32 %v12697_v29, %v4784_v2 }
 0x4f9   :  { %v4178_v18 = vsel %vm2784_vm7, %v3984_v44, %v4112_v33  ;;  %5437 = vrot.lane.b32.xlu1 %v5174_v49, %s8557_s20  ;;  %v4786_v53 = vsub.f32 %v12649_v27, %v20493_v42  ;;  %v5176_v43 = vadd.f32 %v5048_v3, %v4642_v38  ;;  %v5050_v12 = vmul.f32 %v4922_v15, %v4241_v6  ;;  %v20495_v3 = vld [vmem:[#allocation262_spill] sm:$0xff] }
 0x4fa   :  { %7525 = vmatmul.mubr.f32.gmra.mrb[94].mxu1 %v5952_v52  ;;  %v4517_v21 = vmul.f32 %v20027_v31, %v4378_v61  ;;  %v4380_v36 = vsub.f32 %v20493_v42, %v20014_v28  ;;  %v16694_v49 = vadd.f32 %v5049_v34, %v4643_v20  ;;  %v4518_v40 = vmul.f32 %v20037_v51, %v4379_v23  ;;  %v20494_v52 = vld [vmem:[#allocation226_spill] sm:$0xff]  ;;  %v20496_v34 = vld [vmem:[#allocation297_spill] sm:$0xff] }
 0x4fb   :  { %5311 = vrot.lane.b32.xlu0 %v16672_v7, %s8557_s20  ;;  %v4242_v62 = vsel %vm2784_vm7, %v4112_v33, %v3984_v44  ;;  %v5051_v2 = vmul.f32 %v4923_v45, %v4178_v18  ;;  %v5258_v13 = vpop.permute.xlu0 %5257  ;;  %v4924_v38 = vmul.f32 %v12700_v10, %v4785_v14  ;;  %v4787_v61 = vsub.f32 %v12652_v60, %v20495_v3  ;;  %v20497_v33 = vld [vmem:[#allocation267_spill] sm:$0xff] }
 0x4fc   :  { %v4114_v41 = vpop.permute.xlu1 %4113  ;;  %v4645_v59 = vmul.f32 %v4517_v21, %v20494_v52  ;;  %v4646_v15 = vmul.f32 %v4518_v40, %v20496_v34  ;;  %v4381_v23 = vsub.f32 %v20495_v3, %v20022_v48  ;;  %v4925_v44 = vmul.f32 %v12697_v29, %v4786_v53 }
 0x4fd   :  { %v4179_v6 = vsel %vm2784_vm7, %v3986_v0, %v4114_v41  ;;  %5439 = vrot.lane.b32.xlu1 %v5176_v43, %s8557_s20  ;;  %v4382_v14 = vsub.f32 %v20497_v33, %v20014_v28  ;;  %v5178_v18 = vadd.f32 %v5050_v12, %v4644_v17  ;;  %v5052_v11 = vmul.f32 %v4924_v38, %v4242_v62  ;;  %v20498_v12 = vld [vmem:[#allocation268_spill] sm:$0xff] }
 0x4fe   :  { %v4519_v20 = vmul.f32 %v20027_v31, %v4380_v36  ;;  %v4788_v45 = vsub.f32 %v12649_v27, %v20497_v33  ;;  %v16717_v43 = vadd.f32 %v5051_v2, %v4645_v59  ;;  %v4243_v21 = vsel %vm2784_vm7, %v4114_v41, %v3986_v0  ;;  %v20499_v27 = vld [vmem:[#allocation211_spill] sm:$0xff]  ;;  %v20500_v0 = vld [vmem:[#allocation33_spill] sm:$0xff] }
 0x4ff   :  { %5313 = vrot.lane.b32.xlu0 %v16694_v49, %s8557_s20  ;;  %v5053_v53 = vmul.f32 %v4925_v44, %v4179_v6  ;;  %v3988_v52 = vpop.permute.xlu0 %3987  ;;  %v4926_v28 = vmul.f32 %v12700_v10, %v4787_v61  ;;  %v4789_v36 = vsub.f32 %v12652_v60, %v20498_v12  ;;  %v5685_v62 = vmul.f32 %v16507_v54, %v20499_v27  ;;  %v20501_v6 = vld [vmem:[#allocation161_spill] sm:$0xff] }
 0x500   :  { %v5386_v32 = vpop.permute.xlu1 %5385  ;;  %v4520_v2 = vmul.f32 %v20037_v51, %v4381_v23  ;;  %v4647_v41 = vmul.f32 %v4519_v20, %v20500_v0  ;;  %v5180_v59 = vadd.f32 %v5052_v11, %v4646_v15  ;;  %v4927_v3 = vmul.f32 %v12697_v29, %v4788_v45 }
 0x501   :  { %v5481_v40 = vsel %vm2784_vm7, %v5258_v13, %v5386_v32  ;;  %5441 = vrot.lane.b32.xlu1 %v5178_v18, %s8557_s20  ;;  %v4383_v13 = vsub.f32 %v20498_v12, %v20022_v48  ;;  %v5054_v38 = vmul.f32 %v4926_v28, %v4243_v21  ;;  %v20502_v48 = vld [vmem:[#allocation34_spill] sm:$0xff]  ;;  %v5826_v29 = vmul.f32 %v14381_v50, %v5756_v57  ;;  %v20505_v12 = vld [vmem:[#allocation164_spill] sm:$0xff] }
 0x502   :  { %v5889_v17 = vmul.f32 %v16497_v24, %v5481_v40  ;;  %v4521_v24 = vmul.f32 %v20027_v31, %v4382_v14  ;;  %v4648_v54 = vmul.f32 %v4520_v2, %v20501_v6  ;;  %v16739_v34 = vadd.f32 %v5053_v53, %v4647_v41  ;;  %v20503_v14 = vld [vmem:[#allocation159_spill] sm:$0xff] }
 0x503   :  { %5315 = vrot.lane.b32.xlu0 %v16717_v43, %s8557_s20  ;;  %v5260_v18 = vpop.permute.xlu0 %5259  ;;  %v4928_v31 = vmul.f32 %v12700_v10, %v4789_v36  ;;  %v5757_v11 = vsub.f32 %v14354_v9, %v20503_v14  ;;  %v20504_v32 = vsub.f32 %v20462_v19, %v20459_v55  ;;  %v5553_v45 = vsub.f32 %v20503_v14, %v20459_v55  ;;  %v20506_v19 = vld [vmem:[#allocation80_spill] sm:$0xff]  ;;  %v20507_v2 = vld [vmem:[#allocation163_spill] sm:$0xff] }
 0x504   :  { %v4116_v60 = vpop.permute.xlu1 %4115  ;;  %v5953_v61 = vadd.f32 %v5889_v17, %v5685_v62  ;;  %v4649_v20 = vmul.f32 %v4521_v24, %v20502_v48  ;;  %v5182_v21 = vadd.f32 %v5054_v38, %v4648_v54  ;;  %v4522_v53 = vmul.f32 %v20037_v51, %v4383_v13  ;;  %v20508_v6 = vld [vmem:[#allocation231_spill] sm:$0xff] }
 0x505   :  { %v4180_v23 = vsel %vm2784_vm7, %v3988_v52, %v4116_v60  ;;  %v4244_v44 = vsel %vm2784_vm7, %v4116_v60, %v3988_v52  ;;  %5443 = vrot.lane.b32.xlu1 %v5180_v59, %s8557_s20  ;;  %v5622_v10 = vmul.f32 %v20464_v63, %v20504_v32  ;;  %v5827_v51 = vmul.f32 %v14381_v50, %v5757_v11  ;;  %v20510_v32 = vld [vmem:[#allocation214_spill] sm:$0xff] }
 0x506   :  { %v5055_v15 = vmul.f32 %v4927_v3, %v4180_v23  ;;  %7527 = vmatprep.mubr.f32.mxu1 %v5953_v61  ;;  %v5056_v40 = vmul.f32 %v4928_v31, %v4244_v44  ;;  %v4650_v36 = vmul.f32 %v4522_v53, %v20505_v12  ;;  %v5758_v0 = vsub.f32 %v14354_v9, %v20507_v2  ;;  %v20509_v23 = vld [vmem:[#allocation165_spill] sm:$0xff] }
 0x507   :  { %5317 = vrot.lane.b32.xlu0 %v16739_v34, %s8557_s20  ;;  %v5262_v17 = vpop.permute.xlu0 %5261  ;;  %v5686_v62 = vmul.f32 %v5622_v10, %v20506_v19  ;;  %v5623_v59 = vmul.f32 %v20464_v63, %v5553_v45  ;;  %v5554_v38 = vsub.f32 %v20507_v2, %v20459_v55  ;;  %v5759_v44 = vsub.f32 %v14354_v9, %v20509_v23  ;;  %v20512_v19 = vld [vmem:[#allocation13_spill] sm:$0xff] }
 0x508   :  { %v16763_v52 = vadd.f32 %v5055_v15, %v4649_v20  ;;  %v5388_v28 = vpop.permute.xlu1 %5387  ;;  %v5184_v41 = vadd.f32 %v5056_v40, %v4650_v36  ;;  %v5555_v15 = vsub.f32 %v20509_v23, %v20459_v55  ;;  %v20511_v40 = vld [vmem:[#allocation169_spill] sm:$0xff] }
 0x509   :  { %v5482_v57 = vsel %vm2784_vm7, %v5260_v18, %v5388_v28  ;;  %5445 = vrot.lane.b32.xlu1 %v5182_v21, %s8557_s20  ;;  %v5687_v54 = vmul.f32 %v5623_v59, %v20508_v6  ;;  %v5828_v18 = vmul.f32 %v14381_v50, %v5758_v0  ;;  %v5624_v31 = vmul.f32 %v20464_v63, %v5554_v38 }
 0x50a   :  { %v5890_v27 = vmul.f32 %v5826_v29, %v5482_v57  ;;  %v5829_v45 = vmul.f32 %v14381_v50, %v5759_v44  ;;  %v5760_v28 = vsub.f32 %v14354_v9, %v20511_v40  ;;  %v5625_v57 = vmul.f32 %v20464_v63, %v5555_v15 }
 0x50b   :  { %5319 = vrot.lane.b32.xlu0 %v16763_v52, %s8557_s20  ;;  %v5264_v60 = vpop.permute.xlu0 %5263  ;;  %v5688_v10 = vmul.f32 %v5624_v31, %v20510_v32 }
 0x50c   :  { %v5390_v13 = vpop.permute.xlu1 %5389  ;;  %v5954_v24 = vadd.f32 %v5890_v27, %v5686_v62  ;;  %v5689_v62 = vmul.f32 %v5625_v57, %v20512_v19  ;;  %v5830_v0 = vmul.f32 %v14381_v50, %v5760_v28 }
 0x50d   :  { %v5483_v3 = vsel %vm2784_vm7, %v5262_v17, %v5390_v13  ;;  %5447 = vrot.lane.b32.xlu1 %v5184_v41, %s8557_s20  ;;  %v5556_v17 = vsub.f32 %v20511_v40, %v20459_v55 }
 0x50e   :  { %v5891_v61 = vmul.f32 %v5827_v51, %v5483_v3  ;;  %7528 = vmatmul.mubr.f32.gmra.mrb[96].mxu1 %v5954_v24  ;;  %v20513_v51 = vld [vmem:[#allocation171_spill] sm:$0xff] }
 0x50f   :  { %v5266_v14 = vpop.permute.xlu0 %5265  ;;  %v5761_v2 = vsub.f32 %v14354_v9, %v20513_v51  ;;  %v5626_v24 = vmul.f32 %v20464_v63, %v5556_v17  ;;  %v5557_v59 = vsub.f32 %v20513_v51, %v20459_v55 }
 0x510   :  { %v5392_v48 = vpop.permute.xlu1 %5391  ;;  %v5955_v20 = vadd.f32 %v5891_v61, %v5687_v54  ;;  %v20514_v61 = vld [vmem:[#allocation170_spill] sm:$0xff] }
 0x511   :  { %v5484_v29 = vsel %vm2784_vm7, %v5264_v60, %v5392_v48  ;;  %v5690_v6 = vmul.f32 %v5626_v24, %v20514_v61  ;;  %v5831_v54 = vmul.f32 %v14381_v50, %v5761_v2 }
 0x512   :  { %v5892_v11 = vmul.f32 %v5828_v18, %v5484_v29  ;;  %7530 = vmatprep.mubr.f32.mxu1 %v5955_v20  ;;  %v20515_v18 = vld [vmem:[#allocation175_spill] sm:$0xff]  ;;  %v5627_v20 = vmul.f32 %v20464_v63, %v5557_v59 }
 0x513   :  { %v5268_v36 = vpop.permute.xlu0 %5267  ;;  %v5762_v48 = vsub.f32 %v14354_v9, %v20515_v18  ;;  %v5558_v31 = vsub.f32 %v20515_v18, %v20459_v55 }
 0x514   :  { %v5394_v21 = vpop.permute.xlu1 %5393  ;;  %v5956_v53 = vadd.f32 %v5892_v11, %v5688_v10  ;;  %v20516_v11 = vld [vmem:[#allocation16_spill] sm:$0xff] }
 0x515   :  { %v5485_v12 = vsel %vm2784_vm7, %v5266_v14, %v5394_v21  ;;  %v5691_v32 = vmul.f32 %v5627_v20, %v20516_v11  ;;  %v20517_v10 = vld [vmem:[#allocation180_spill] sm:$0xff]  ;;  %v5832_v21 = vmul.f32 %v14381_v50, %v5762_v48  ;;  %v5628_v28 = vmul.f32 %v20464_v63, %v5558_v31 }
 0x516   :  { %v5893_v27 = vmul.f32 %v5829_v45, %v5485_v12  ;;  %7531 = vmatmul.mubr.f32.gmra.mrb[98].mxu1 %v5956_v53  ;;  %v5763_v45 = vsub.f32 %v14354_v9, %v20517_v10  ;;  %v5559_v57 = vsub.f32 %v20517_v10, %v20459_v55 }
 0x517   :  { %v5270_v3 = vpop.permute.xlu0 %5269 }
 0x518   :  { %v5396_v41 = vpop.permute.xlu1 %5395  ;;  %v5957_v13 = vadd.f32 %v5893_v27, %v5689_v62  ;;  %v20518_v27 = vld [vmem:[#allocation215_spill] sm:$0xff]  ;;  %v5833_v62 = vmul.f32 %v14381_v50, %v5763_v45 }
 0x519   :  { %v5486_v38 = vsel %vm2784_vm7, %v5268_v36, %v5396_v41  ;;  %v5692_v19 = vmul.f32 %v5628_v28, %v20518_v27 }
 0x51a   :  { %v5894_v60 = vmul.f32 %v5830_v0, %v5486_v38  ;;  %7533 = vmatprep.mubr.f32.mxu1 %v5957_v13  ;;  %v20519_v0 = vld [vmem:[#allocation185_spill] sm:$0xff]  ;;  %v5629_v13 = vmul.f32 %v20464_v63, %v5559_v57 }
 0x51b   :  { %v5764_v41 = vsub.f32 %v14354_v9, %v20519_v0  ;;  %v5560_v24 = vsub.f32 %v20519_v0, %v20459_v55 }
 0x51c   :  { %v5398_v23 = vpop.permute.xlu1 %5397  ;;  %v5958_v44 = vadd.f32 %v5894_v60, %v5690_v6  ;;  %v5272_v29 = vpop.permute.xlu0 %5271  ;;  %v20520_v60 = vld [vmem:[#allocation176_spill] sm:$0xff] }
 0x51d   :  { %v5487_v15 = vsel %vm2784_vm7, %v5270_v3, %v5398_v23  ;;  %v5693_v61 = vmul.f32 %v5629_v13, %v20520_v60  ;;  %v20521_v6 = vld [vmem:[#allocation188_spill] sm:$0xff]  ;;  %v5834_v23 = vmul.f32 %v14381_v50, %v5764_v41  ;;  %v5630_v48 = vmul.f32 %v20464_v63, %v5560_v24  ;;  %v20526_v60 = vld [vmem:[#allocation57_spill] sm:$0xff] }
 0x51e   :  { %v5895_v14 = vmul.f32 %v5831_v54, %v5487_v15  ;;  %7534 = vmatmul.mubr.f32.gmra.mrb[100].mxu1 %v5958_v44  ;;  %v5765_v54 = vsub.f32 %v14354_v9, %v20521_v6  ;;  %v5561_v20 = vsub.f32 %v20521_v6, %v20459_v55 }
 0x520   :  { %v5400_v53 = vpop.permute.xlu1 %5399  ;;  %v5959_v40 = vadd.f32 %v5895_v14, %v5691_v32  ;;  %v5274_v12 = vpop.permute.xlu0 %5273  ;;  %v20522_v14 = vld [vmem:[#allocation53_spill] sm:$0xff]  ;;  %v20523_v32 = vld [vmem:[#allocation47_spill] sm:$0xff]  ;;  %v5835_v45 = vmul.f32 %v14381_v50, %v5765_v54 }
 0x521   :  { %v5488_v17 = vsel %vm2784_vm7, %v5272_v29, %v5400_v53  ;;  %v5694_v11 = vmul.f32 %v5630_v48, %v20522_v14  ;;  %v5766_v10 = vsub.f32 %v14354_v9, %v20523_v32  ;;  %v5562_v28 = vsub.f32 %v20523_v32, %v20459_v55  ;;  %v20528_v32 = vld [vmem:[#allocation193_spill] sm:$0xff] }
 0x522   :  { %v5896_v36 = vmul.f32 %v5832_v21, %v5488_v17  ;;  %7536 = vmatprep.mubr.f32.mxu1 %v5959_v40  ;;  %v5631_v40 = vmul.f32 %v20464_v63, %v5561_v20 }
 0x523   :  { %v5632_v41 = vmul.f32 %v20464_v63, %v5562_v28 }
 0x524   :  { %v5402_v51 = vpop.permute.xlu1 %5401  ;;  %v5960_v2 = vadd.f32 %v5896_v36, %v5692_v19  ;;  %v5276_v38 = vpop.permute.xlu0 %5275  ;;  %v20524_v36 = vld [vmem:[#allocation289_spill] sm:$0xff]  ;;  %v5836_v19 = vmul.f32 %v14381_v50, %v5766_v10  ;;  %v5769_v10 = vsub.f32 %v14354_v9, %v20528_v32 }
 0x525   :  { %v5489_v59 = vsel %vm2784_vm7, %v5274_v12, %v5402_v51  ;;  %v5695_v27 = vmul.f32 %v5631_v40, %v20524_v36 }
 0x526   :  { %v5897_v3 = vmul.f32 %v5833_v62, %v5489_v59  ;;  %7537 = vmatmul.mubr.f32.gmra.mrb[102].mxu1 %v5960_v2  ;;  %v20525_v2 = vld [vmem:[#allocation52_spill] sm:$0xff] }
 0x527   :  { %v5767_v0 = vsub.f32 %v14354_v9, %v20525_v2  ;;  %v5563_v13 = vsub.f32 %v20525_v2, %v20459_v55 }
 0x528   :  { %v5404_v44 = vpop.permute.xlu1 %5403  ;;  %v5961_v18 = vadd.f32 %v5897_v3, %v5693_v61  ;;  %v5696_v3 = vmul.f32 %v5632_v41, %v16119_v4  ;;  %v5768_v61 = vsub.f32 %v14354_v9, %v20526_v60 }
 0x529   :  { %v5490_v31 = vsel %vm2784_vm7, %v5276_v38, %v5404_v44  ;;  %v5278_v15 = vpop.permute.xlu0 %5277  ;;  %v5837_v6 = vmul.f32 %v14381_v50, %v5767_v0  ;;  %v5633_v44 = vmul.f32 %v20464_v63, %v5563_v13 }
 0x52a   :  { %v5898_v29 = vmul.f32 %v5834_v23, %v5490_v31  ;;  %7539 = vmatprep.mubr.f32.mxu1 %v5961_v18  ;;  %v5564_v18 = vsub.f32 %v20526_v60, %v20459_v55 }
 0x52c   :  { %v5406_v21 = vpop.permute.xlu1 %5405  ;;  %v5962_v53 = vadd.f32 %v5898_v29, %v5694_v11  ;;  %v5838_v29 = vmul.f32 %v14381_v50, %v5768_v61  ;;  %v20532_v61 = vld [vmem:[#allocation197_spill] sm:$0xff] }
 0x52d   :  { %v5491_v57 = vsel %vm2784_vm7, %v5278_v15, %v5406_v21  ;;  %v5280_v17 = vpop.permute.xlu0 %5279  ;;  %v20527_v15 = vld [vmem:[#allocation217_spill] sm:$0xff]  ;;  %v5565_v21 = vsub.f32 %v20528_v32, %v20459_v55 }
 0x52e   :  { %v5899_v12 = vmul.f32 %v5835_v45, %v5491_v57  ;;  %7540 = vmatmul.mubr.f32.gmra.mrb[104].mxu1 %v5962_v53  ;;  %v5697_v4 = vmul.f32 %v5633_v44, %v20527_v15  ;;  %v5634_v45 = vmul.f32 %v20464_v63, %v5564_v18  ;;  %v20529_v57 = vld [vmem:[#allocation182_spill] sm:$0xff]  ;;  %v20534_v15 = vld [vmem:[#allocation201_spill] sm:$0xff] }
 0x530   :  { %v5408_v62 = vpop.permute.xlu1 %5407  ;;  %v5963_v51 = vadd.f32 %v5899_v12, %v5695_v27  ;;  %v20530_v12 = vld [vmem:[#allocation196_spill] sm:$0xff]  ;;  %v5839_v27 = vmul.f32 %v14381_v50, %v5769_v10  ;;  %v5568_v10 = vsub.f32 %v20534_v15, %v20459_v55 }
 0x531   :  { %v5492_v24 = vsel %vm2784_vm7, %v5280_v17, %v5408_v62  ;;  %v5282_v59 = vpop.permute.xlu0 %5281  ;;  %v5698_v17 = vmul.f32 %v5634_v45, %v20529_v57  ;;  %v5770_v36 = vsub.f32 %v14354_v9, %v20530_v12  ;;  %v5566_v2 = vsub.f32 %v20530_v12, %v20459_v55  ;;  %v20536_v57 = vld [vmem:[#allocation203_spill] sm:$0xff] }
 0x532   :  { %v5900_v38 = vmul.f32 %v5836_v19, %v5492_v24  ;;  %7542 = vmatprep.mubr.f32.mxu1 %v5963_v51  ;;  %v5635_v51 = vmul.f32 %v20464_v63, %v5565_v21  ;;  %v20531_v24 = vld [vmem:[#allocation98_spill] sm:$0xff] }
 0x534   :  { %v5410_v54 = vpop.permute.xlu1 %5409  ;;  %v5964_v23 = vadd.f32 %v5900_v38, %v5696_v3  ;;  %v5840_v38 = vmul.f32 %v14381_v50, %v5770_v36 }
 0x535   :  { %v5493_v48 = vsel %vm2784_vm7, %v5282_v59, %v5410_v54  ;;  %v5284_v20 = vpop.permute.xlu0 %5283  ;;  %v5699_v59 = vmul.f32 %v5635_v51, %v20531_v24  ;;  %v5636_v54 = vmul.f32 %v20464_v63, %v5566_v2 }
 0x536   :  { %v5901_v31 = vmul.f32 %v5837_v6, %v5493_v48  ;;  %7543 = vmatmul.mubr.f32.gmra.mrb[106].mxu1 %v5964_v23  ;;  %v5771_v6 = vsub.f32 %v14354_v9, %v20532_v61  ;;  %v5567_v23 = vsub.f32 %v20532_v61, %v20459_v55 }
 0x538   :  { %v5412_v14 = vpop.permute.xlu1 %5411  ;;  %v5965_v11 = vadd.f32 %v5901_v31, %v5697_v4  ;;  %v5772_v4 = vsub.f32 %v14354_v9, %v20534_v15  ;;  %v5637_v32 = vmul.f32 %v20464_v63, %v5567_v23 }
 0x539   :  { %v5494_v53 = vsel %vm2784_vm7, %v5284_v20, %v5412_v14  ;;  %v5286_v40 = vpop.permute.xlu0 %5285  ;;  %v20533_v20 = vld [vmem:[#allocation59_spill] sm:$0xff] }
 0x53a   :  { %v5902_v28 = vmul.f32 %v5838_v29, %v5494_v53  ;;  %7545 = vmatprep.mubr.f32.mxu1 %v5965_v11  ;;  %v5700_v31 = vmul.f32 %v5636_v54, %v20533_v20  ;;  %v5841_v29 = vmul.f32 %v14381_v50, %v5771_v6  ;;  %v5842_v12 = vmul.f32 %v14381_v50, %v5772_v4 }
 0x53c   :  { %v5414_v19 = vpop.permute.xlu1 %5413  ;;  %v5966_v62 = vadd.f32 %v5902_v28, %v5698_v17  ;;  %v5773_v17 = vsub.f32 %v14354_v9, %v20536_v57 }
 0x53d   :  { %v5495_v0 = vsel %vm2784_vm7, %v5286_v40, %v5414_v19  ;;  %v5288_v41 = vpop.permute.xlu0 %5287  ;;  %v20535_v40 = vld [vmem:[#allocation187_spill] sm:$0xff]  ;;  %v5638_v19 = vmul.f32 %v20464_v63, %v5568_v10 }
 0x53e   :  { %v5903_v13 = vmul.f32 %v5839_v27, %v5495_v0  ;;  %7546 = vmatmul.mubr.f32.gmra.mrb[108].mxu1 %v5966_v62  ;;  %v5701_v28 = vmul.f32 %v5637_v32, %v20535_v40  ;;  %v5569_v62 = vsub.f32 %v20536_v57, %v20459_v55  ;;  %v5843_v24 = vmul.f32 %v14381_v50, %v5773_v17  ;;  %v20540_v40 = vld [vmem:[#allocation213_spill] sm:$0xff] }
 0x53f   :  { %v5572_v17 = vsub.f32 %v20540_v40, %v20459_v55 }
 0x540   :  { %v5416_v3 = vpop.permute.xlu1 %5415  ;;  %v5967_v60 = vadd.f32 %v5903_v13, %v5699_v59  ;;  %v5639_v61 = vmul.f32 %v20464_v63, %v5569_v62 }
 0x541   :  { %v5496_v44 = vsel %vm2784_vm7, %v5288_v41, %v5416_v3  ;;  %v5290_v18 = vpop.permute.xlu0 %5289  ;;  %v20537_v41 = vld [vmem:[#allocation220_spill] sm:$0xff]  ;;  %v20538_v3 = vld [vmem:[#allocation207_spill] sm:$0xff] }
 0x542   :  { %v5904_v48 = vmul.f32 %v5840_v38, %v5496_v44  ;;  %7548 = vmatprep.mubr.f32.mxu1 %v5967_v60  ;;  %v5702_v13 = vmul.f32 %v5638_v19, %v20537_v41  ;;  %v5774_v60 = vsub.f32 %v14354_v9, %v20538_v3  ;;  %v5570_v6 = vsub.f32 %v20538_v3, %v20459_v55  ;;  %v20541_v19 = vld [vmem:[#allocation109_spill] sm:$0xff] }
 0x543   :  { %v5777_v62 = vsub.f32 %v14354_v9, %v20541_v19  ;;  %v5642_v41 = vmul.f32 %v20464_v63, %v5572_v17 }
 0x544   :  { %v5418_v14 = vpop.permute.xlu1 %5417  ;;  %v5968_v11 = vadd.f32 %v5904_v48, %v5700_v31  ;;  %v20539_v48 = vld [vmem:[#allocation209_spill] sm:$0xff]  ;;  %v5844_v31 = vmul.f32 %v14381_v50, %v5774_v60 }
 0x545   :  { %v5497_v45 = vsel %vm2784_vm7, %v5290_v18, %v5418_v14  ;;  %v5292_v21 = vpop.permute.xlu0 %5291  ;;  %v5703_v18 = vmul.f32 %v5639_v61, %v16388_v47  ;;  %v5775_v20 = vsub.f32 %v14354_v9, %v20539_v48  ;;  %v5571_v14 = vsub.f32 %v20539_v48, %v20459_v55 }
 0x546   :  { %v5905_v53 = vmul.f32 %v5841_v29, %v5497_v45  ;;  %7549 = vmatmul.mubr.f32.gmra.mrb[110].mxu1 %v5968_v11  ;;  %v5640_v29 = vmul.f32 %v20464_v63, %v5570_v6  ;;  %v5847_v3 = vmul.f32 %v14381_v50, %v5777_v62  ;;  %v20542_v6 = vld [vmem:[#allocation216_spill] sm:$0xff] }
 0x547   :  { %v5845_v45 = vmul.f32 %v14381_v50, %v5775_v20  ;;  %v5641_v57 = vmul.f32 %v20464_v63, %v5571_v14 }
 0x548   :  { %v5420_v36 = vpop.permute.xlu1 %5419  ;;  %v5969_v27 = vadd.f32 %v5905_v53, %v5701_v28  ;;  %v5704_v47 = vmul.f32 %v5640_v29, %v16427_v8  ;;  %v5776_v28 = vsub.f32 %v14354_v9, %v20540_v40  ;;  %v16980_v40 = vld [vmem:[%s17808_s0 + $0x8] sm:$0xff] }
 0x549   :  { %v5498_v51 = vsel %vm2784_vm7, %v5292_v21, %v5420_v36  ;;  %v5294_v2 = vpop.permute.xlu0 %5293  ;;  %v5705_v8 = vmul.f32 %v5641_v57, %v16461_v37  ;;  %v5706_v37 = vmul.f32 %v5642_v41, %v16499_v22 }
 0x54a   :  { %v5906_v0 = vmul.f32 %v5842_v12, %v5498_v51  ;;  %7551 = vmatprep.mubr.f32.mxu1 %v5969_v27  ;;  %v5846_v51 = vmul.f32 %v14381_v50, %v5776_v28  ;;  %v7033_v28 = vmul.f32 -1.442695, %v16980_v40 }
 0x54c   :  { %v5422_v59 = vpop.permute.xlu1 %5421  ;;  %v5970_v38 = vadd.f32 %v5906_v0, %v5702_v13  ;;  %v5573_v13 = vsub.f32 %v20541_v19, %v20459_v55 }
 0x54d   :  { %v5499_v54 = vsel %vm2784_vm7, %v5294_v2, %v5422_v59  ;;  %v5296_v23 = vpop.permute.xlu0 %5295 }
 0x54e   :  { %v5907_v44 = vmul.f32 %v5843_v24, %v5499_v54  ;;  %7552 = vmatmul.mubr.f32.gmra.mrb[112].mxu1 %v5970_v38  ;;  %v5778_v54 = vsub.f32 %v14354_v9, %v20542_v6 }
 0x550   :  { %v5424_v15 = vpop.permute.xlu1 %5423  ;;  %v5971_v4 = vadd.f32 %v5907_v44, %v5703_v18  ;;  %v5574_v44 = vsub.f32 %v20542_v6, %v20459_v55 }
 0x551   :  { %v5500_v11 = vsel %vm2784_vm7, %v5296_v23, %v5424_v15  ;;  %v5298_v32 = vpop.permute.xlu0 %5297  ;;  %v5643_v23 = vmul.f32 %v20464_v63, %v5573_v13  ;;  %v5781_v13 = vsub.f32 %v14354_v9, %v20474_v25 }
 0x552   :  { %v5908_v10 = vmul.f32 %v5844_v31, %v5500_v11  ;;  %7554 = vmatprep.mubr.f32.mxu1 %v5971_v4  ;;  %v20543_v31 = vld [vmem:[#allocation121_spill] sm:$0xff]  ;;  %v5848_v4 = vmul.f32 %v14381_v50, %v5778_v54  ;;  %v5644_v11 = vmul.f32 %v20464_v63, %v5574_v44  ;;  %v17021_v54 = vld [vmem:[%s17808_s0 + $0x28] sm:$0xff] }
 0x553   :  { %v5707_v22 = vmul.f32 %v5643_v23, %v16533_v35  ;;  %v5779_v15 = vsub.f32 %v14354_v9, %v20543_v31  ;;  %v7037_v23 = vmul.f32 -1.442695, %v17021_v54 }
 0x554   :  { %v5426_v21 = vpop.permute.xlu1 %5425  ;;  %v5972_v53 = vadd.f32 %v5908_v10, %v5704_v47  ;;  %v16971_v10 = vld [vmem:[%s17808_s0] sm:$0xff] }
 0x555   :  { %v5501_v12 = vsel %vm2784_vm7, %v5298_v32, %v5426_v21  ;;  %v5300_v36 = vpop.permute.xlu0 %5299  ;;  %v5575_v32 = vsub.f32 %v20543_v31, %v20459_v55  ;;  %v7032_v47 = vmul.f32 -1.442695, %v16971_v10  ;;  %v5849_v57 = vmul.f32 %v14381_v50, %v5779_v15 }
 0x556   :  { %v5909_v27 = vmul.f32 %v5845_v45, %v5501_v12  ;;  %7555 = vmatmul.mubr.f32.gmra.mrb[114].mxu1 %v5972_v53  ;;  %v5708_v53 = vmul.f32 %v5644_v11, %v16568_v46  ;;  %v16992_v46 = vld [vmem:[%s17808_s0 + $0x10] sm:$0xff]  ;;  %v5782_v15 = vsub.f32 %v14354_v9, %v20479_v26 }
 0x557   :  { %8235 = vpow2.f32 %v7032_v47  ;;  %v7034_v19 = vmul.f32 -1.442695, %v16992_v46  ;;  %v17048_v47 = vld [vmem:[%s17808_s0 + $0x40] sm:$0xff] }
 0x558   :  { %v5428_v2 = vpop.permute.xlu1 %5427  ;;  %v5973_v0 = vadd.f32 %v5909_v27, %v5705_v8  ;;  %v5645_v27 = vmul.f32 %v20464_v63, %v5575_v32  ;;  %v5576_v8 = vsub.f32 %v20469_v39, %v20459_v55  ;;  %8237 = vpow2.f32 %v7033_v28 }
 0x559   :  { %v5502_v24 = vsel %vm2784_vm7, %v5300_v36, %v5428_v2  ;;  %v5302_v59 = vpop.permute.xlu0 %5301  ;;  %v5780_v36 = vsub.f32 %v14354_v9, %v20469_v39  ;;  %v17001_v39 = vld [vmem:[%s17808_s0 + $0x18] sm:$0xff]  ;;  %8239 = vpow2.f32 %v7034_v19  ;;  %v17067_v19 = vld [vmem:[%s17808_s0 + $0x50] sm:$0xff] }
 0x55a   :  { %v5910_v38 = vmul.f32 %v5846_v51, %v5502_v24  ;;  %7557 = vmatprep.mubr.f32.mxu1 %v5973_v0  ;;  %v5709_v0 = vmul.f32 %v5645_v27, %v16594_v16  ;;  %v7035_v41 = vmul.f32 -1.442695, %v17001_v39  ;;  %v5577_v16 = vsub.f32 %v20474_v25, %v20459_v55 }
 0x55b   :  { %v5850_v24 = vmul.f32 %v14381_v50, %v5780_v36 }
 0x55c   :  { %v5430_v60 = vpop.permute.xlu1 %5429  ;;  %v5974_v61 = vadd.f32 %v5910_v38, %v5706_v37  ;;  %v5646_v37 = vmul.f32 %v20464_v63, %v5576_v8  ;;  %8241 = vpow2.f32 %v7035_v41 }
 0x55d   :  { %v5503_v18 = vsel %vm2784_vm7, %v5302_v59, %v5430_v60  ;;  %v5304_v48 = vpop.permute.xlu0 %5303 }
 0x55e   :  { %v5911_v20 = vmul.f32 %v5847_v3, %v5503_v18  ;;  %7558 = vmatmul.mubr.f32.gmra.mrb[116].mxu1 %v5974_v61  ;;  %v17013_v3 = vld [vmem:[%s17808_s0 + $0x20] sm:$0xff]  ;;  %v5710_v44 = vmul.f32 %v5646_v37, %v16621_v5  ;;  %v17028_v18 = vld [vmem:[%s17808_s0 + $0x30] sm:$0xff]  ;;  %v5578_v5 = vsub.f32 %v20479_v26, %v20459_v55  ;;  %v7040_v26 = vmul.f32 -1.442695, %v17048_v47 }
 0x55f   :  { %v7036_v60 = vmul.f32 -1.442695, %v17013_v3 }
 0x560   :  { %v5432_v29 = vpop.permute.xlu1 %5431  ;;  %v5975_v14 = vadd.f32 %v5911_v20, %v5707_v22  ;;  %v5851_v20 = vmul.f32 %v14381_v50, %v5781_v13  ;;  %v5648_v27 = vmul.f32 %v20464_v63, %v5578_v5 }
 0x561   :  { %v5504_v35 = vsel %vm2784_vm7, %v5304_v48, %v5432_v29  ;;  %v5306_v45 = vpop.permute.xlu0 %5305  ;;  %v7038_v48 = vmul.f32 -1.442695, %v17028_v18  ;;  %8243 = vpow2.f32 %v7036_v60  ;;  %v17040_v29 = vld [vmem:[%s17808_s0 + $0x38] sm:$0xff]  ;;  %v5784_v60 = vsub.f32 %v14354_v9, %v20488_v58 }
 0x562   :  { %v5912_v21 = vmul.f32 %v5848_v4, %v5504_v35  ;;  %7560 = vmatprep.mubr.f32.mxu1 %v5975_v14  ;;  %v5647_v4 = vmul.f32 %v20464_v63, %v5577_v16  ;;  %v7039_v14 = vmul.f32 -1.442695, %v17040_v29  ;;  %8245 = vpow2.f32 %v7037_v23 }
 0x563   :  { %8247 = vpow2.f32 %v7038_v48  ;;  %v5712_v13 = vmul.f32 %v5648_v27, %v16672_v7  ;;  %v5580_v7 = vsub.f32 %v20488_v58, %v20459_v55  ;;  %v17106_v27 = vld [vmem:[%s17808_s0 + $0x68] sm:$0xff] }
 0x564   :  { %v5434_v17 = vpop.permute.xlu1 %5433  ;;  %v5976_v12 = vadd.f32 %v5912_v21, %v5708_v53  ;;  %v8236_v21 = vpop.eup %8235  ;;  %v17055_v53 = vld [vmem:[%s17808_s0 + $0x48] sm:$0xff]  ;;  %8249 = vpow2.f32 %v7039_v14  ;;  %v5854_v14 = vmul.f32 %v14381_v50, %v5784_v60 }
 0x565   :  { %v5505_v62 = vsel %vm2784_vm7, %v5306_v45, %v5434_v17  ;;  %v5308_v51 = vpop.permute.xlu0 %5307  ;;  %v5711_v45 = vmul.f32 %v5647_v4, %v16647_v1  ;;  %v7041_v28 = vmul.f32 -1.442695, %v17055_v53  ;;  %v5852_v17 = vmul.f32 %v14381_v50, %v5782_v15  ;;  %v8238_v8 = vpop.eup %8237  ;;  %v17091_v15 = vld [vmem:[%s17808_s0 + $0x60] sm:$0xff] }
 0x566   :  { %v5913_v2 = vmul.f32 %v5849_v57, %v5505_v62  ;;  %7561 = vmatmul.mubr.f32.gmra.mrb[118].mxu1 %v5976_v12  ;;  %v5783_v57 = vsub.f32 %v14354_v9, %v20484_v30  ;;  %v5579_v1 = vsub.f32 %v20484_v30, %v20459_v55  ;;  %v7042_v62 = vmul.f32 -1.442695, %v17067_v19  ;;  %v8240_v30 = vpop.eup %8239 }
 0x567   :  { %8251 = vpow2.f32 %v7040_v26  ;;  %v277_v23 = vadd.f32 1.0, %v8238_v8  ;;  %v278_v48 = vadd.f32 1.0, %v8240_v30  ;;  %v7044_v58 = vmul.f32 -1.442695, %v17091_v15 }
 0x568   :  { %v5436_v59 = vpop.permute.xlu1 %5435  ;;  %v5977_v38 = vadd.f32 %v5913_v2, %v5709_v0  ;;  %v276_v0 = vadd.f32 1.0, %v8236_v21  ;;  %8253 = vpow2.f32 %v7041_v28  ;;  %v5785_v4 = vsub.f32 %v14354_v9, %v20493_v42 }
 0x569   :  { %v5506_v61 = vsel %vm2784_vm7, %v5308_v51, %v5436_v59  ;;  %v5310_v6 = vpop.permute.xlu0 %5309  ;;  %8255 = vpow2.f32 %v7042_v62  ;;  %v5581_v26 = vsub.f32 %v20493_v42, %v20459_v55  ;;  %v7045_v42 = vmul.f32 -1.442695, %v17106_v27 }
 0x56a   :  { %v5914_v25 = vmul.f32 %v5850_v24, %v5506_v61  ;;  %7563 = vmatprep.mubr.f32.mxu1 %v5977_v38  ;;  %v17076_v24 = vld [vmem:[%s17808_s0 + $0x58] sm:$0xff]  ;;  %v5853_v38 = vmul.f32 %v14381_v50, %v5783_v57  ;;  %v5649_v61 = vmul.f32 %v20464_v63, %v5579_v1  ;;  %8257 = vrcp.f32 %v276_v0  ;;  %v17112_v1 = vld [vmem:[%s17808_s0 + $0x70] sm:$0xff] }
 0x56b   :  { %v7043_v59 = vmul.f32 -1.442695, %v17076_v24  ;;  %v7046_v8 = vmul.f32 -1.442695, %v17112_v1  ;;  %v5855_v62 = vmul.f32 %v14381_v50, %v5785_v4  ;;  %v5786_v0 = vsub.f32 %v14354_v9, %v20497_v33  ;;  %v17127_v9 = vld [vmem:[%s17808_s0 + $0x78] sm:$0xff] }
 0x56c   :  { %v5438_v22 = vpop.permute.xlu1 %5437  ;;  %v5978_v31 = vadd.f32 %v5914_v25, %v5710_v44 }
 0x56d   :  { %v5507_v11 = vsel %vm2784_vm7, %v5310_v6, %v5438_v22  ;;  %v5312_v32 = vpop.permute.xlu0 %5311  ;;  %v8242_v6 = vpop.eup %8241  ;;  %v5713_v22 = vmul.f32 %v5649_v61, %v16694_v49  ;;  %8259 = vpow2.f32 %v7043_v59  ;;  %v5650_v49 = vmul.f32 %v20464_v63, %v5580_v7 }
 0x56e   :  { %v5915_v35 = vmul.f32 %v5851_v20, %v5507_v11  ;;  %7564 = vmatmul.mubr.f32.gmra.mrb[120].mxu1 %v5978_v31  ;;  %v8244_v31 = vpop.eup %8243  ;;  %8261 = vrcp.f32 %v277_v23  ;;  %v279_v21 = vadd.f32 1.0, %v8242_v6  ;;  %v5856_v23 = vmul.f32 %v14381_v50, %v5786_v0  ;;  %v17144_v50 = vld [vmem:[%s17808_s0 + $0x88] sm:$0xff] }
 0x56f   :  { %v8246_v5 = vpop.eup %8245  ;;  %v280_v28 = vadd.f32 1.0, %v8244_v31  ;;  %8263 = vrcp.f32 %v278_v48 }
 0x570   :  { %v5440_v12 = vpop.permute.xlu1 %5439  ;;  %v5979_v36 = vadd.f32 %v5915_v35, %v5711_v45  ;;  %v8248_v35 = vpop.eup %8247  ;;  %8265 = vpow2.f32 %v7044_v58 }
 0x571   :  { %v5508_v51 = vsel %vm2784_vm7, %v5312_v32, %v5440_v12  ;;  %v5314_v2 = vpop.permute.xlu0 %5313  ;;  %v5714_v12 = vmul.f32 %v5650_v49, %v16717_v43  ;;  %8267 = vrcp.f32 %v279_v21 }
 0x572   :  { %v5916_v41 = vmul.f32 %v5852_v17, %v5508_v51  ;;  %7566 = vmatprep.mubr.f32.mxu1 %v5979_v36  ;;  %v8250_v36 = vpop.eup %8249  ;;  %8269 = vrcp.f32 %v280_v28 }
 0x573   :  { %v8252_v43 = vpop.eup %8251  ;;  %8271 = vpow2.f32 %v7045_v42  ;;  %v283_v31 = vadd.f32 1.0, %v8250_v36 }
 0x574   :  { %v5442_v37 = vpop.permute.xlu1 %5441  ;;  %v5980_v16 = vadd.f32 %v5916_v41, %v5712_v13  ;;  %v5651_v41 = vmul.f32 %v20464_v63, %v5581_v26  ;;  %v5582_v13 = vsub.f32 %v20497_v33, %v20459_v55  ;;  %v8254_v30 = vpop.eup %8253  ;;  %v7047_v55 = vmul.f32 -1.442695, %v17127_v9  ;;  %v17133_v33 = vld [vmem:[%s17808_s0 + $0x80] sm:$0xff] }
 0x575   :  { %v5509_v25 = vsel %vm2784_vm7, %v5314_v2, %v5442_v37  ;;  %v5316_v44 = vpop.permute.xlu0 %5315  ;;  %v282_v37 = vadd.f32 1.0, %v8248_v35  ;;  %v8256_v61 = vpop.eup %8255  ;;  %v7048_v7 = vmul.f32 -1.442695, %v17133_v33  ;;  %8273 = vpow2.f32 %v7046_v8 }
 0x576   :  { %v5917_v20 = vmul.f32 %v5853_v38, %v5509_v25  ;;  %7567 = vmatmul.mubr.f32.gmra.mrb[122].mxu1 %v5980_v16  ;;  %v281_v38 = vadd.f32 1.0, %v8246_v5  ;;  %v5715_v60 = vmul.f32 %v5651_v41, %v16739_v34  ;;  %v8258_v6 = vpop.eup %8257  ;;  %v5652_v48 = vmul.f32 %v20464_v63, %v5582_v13 }
 0x577   :  { %v284_v58 = vadd.f32 1.0, %v8252_v43  ;;  %v7049_v63 = vmul.f32 -1.442695, %v17144_v50  ;;  %v468_v56 = vmul.f32 %v16971_v10, %v8258_v6  ;;  %v285_v35 = vadd.f32 1.0, %v8254_v30  ;;  %v17158_v10 = vld [vmem:[%s17808_s0 + $0x98] sm:$0xff] }
 0x578   :  { %v5444_v11 = vpop.permute.xlu1 %5443  ;;  %v5981_v32 = vadd.f32 %v5917_v20, %v5713_v22  ;;  %v8260_v20 = vpop.eup %8259  ;;  %8275 = vrcp.f32 %v281_v38  ;;  %v5716_v5 = vmul.f32 %v5652_v48, %v16763_v52 }
 0x579   :  { %v5510_v45 = vsel %vm2784_vm7, %v5316_v44, %v5444_v11  ;;  %v5318_v17 = vpop.permute.xlu0 %5317  ;;  %8277 = vrcp.f32 %v282_v37  ;;  %v287_v8 = vadd.f32 1.0, %v8260_v20 }
 0x57a   :  { %v5918_v57 = vmul.f32 %v5854_v14, %v5510_v45  ;;  %7569 = vmatprep.mubr.f32.mxu1 %v5981_v32  ;;  %v8262_v14 = vpop.eup %8261  ;;  %8279 = vpow2.f32 %v7047_v55  ;;  %v17151_v32 = vld [vmem:[%s17808_s0 + $0x90] sm:$0xff]  ;;  %v286_v45 = vadd.f32 1.0, %v8256_v61  ;;  %v17190_v61 = vld [vmem:[%s17808_s0 + $0xb8] sm:$0xff] }
 0x57b   :  { %v8264_v11 = vpop.eup %8263  ;;  %8281 = vpow2.f32 %v7048_v7  ;;  %v7050_v52 = vmul.f32 -1.442695, %v17151_v32  ;;  %v469_v21 = vmul.f32 %v16980_v40, %v8262_v14  ;;  %v17166_v40 = vld [vmem:[%s17808_s0 + $0xa0] sm:$0xff]  ;;  %v7055_v55 = vmul.f32 -1.442695, %v17190_v61 }
 0x57c   :  { %v5446_v51 = vpop.permute.xlu1 %5445  ;;  %v5982_v2 = vadd.f32 %v5918_v57, %v5714_v12  ;;  %v8266_v26 = vpop.eup %8265  ;;  %8283 = vrcp.f32 %v283_v31  ;;  %v7051_v57 = vmul.f32 -1.442695, %v17158_v10  ;;  %v7052_v36 = vmul.f32 -1.442695, %v17166_v40 }
 0x57d   :  { %v5511_v59 = vsel %vm2784_vm7, %v5318_v17, %v5446_v51  ;;  %v5320_v34 = vpop.permute.xlu0 %5319  ;;  %8285 = vrcp.f32 %v284_v58  ;;  %v8268_v28 = vpop.eup %8267  ;;  %v470_v17 = vmul.f32 %v16992_v46, %v8264_v11  ;;  %v288_v43 = vadd.f32 1.0, %v8266_v26 }
 0x57e   :  { %v5919_v16 = vmul.f32 %v5855_v62, %v5511_v59  ;;  %7570 = vmatmul.mubr.f32.gmra.mrb[124].mxu1 %v5982_v2  ;;  %8287 = vpow2.f32 %v7049_v63  ;;  %v8270_v12 = vpop.eup %8269  ;;  %v471_v51 = vmul.f32 %v17001_v39, %v8268_v28  ;;  %v17174_v2 = vld [vmem:[%s17808_s0 + $0xa8] sm:$0xff]  ;;  %v17182_v39 = vld [vmem:[%s17808_s0 + $0xb0] sm:$0xff] }
 0x57f   :  { %8289 = vpow2.f32 %v7050_v52  ;;  %v8272_v42 = vpop.eup %8271  ;;  %v7053_v0 = vmul.f32 -1.442695, %v17174_v2  ;;  %v472_v41 = vmul.f32 %v17013_v3, %v8270_v12  ;;  %v7054_v30 = vmul.f32 -1.442695, %v17182_v39 }
 0x580   :  { %v5448_v25 = vpop.permute.xlu1 %5447  ;;  %v5983_v44 = vadd.f32 %v5919_v16, %v5715_v60  ;;  %8291 = vrcp.f32 %v285_v35  ;;  %v8274_v62 = vpop.eup %8273  ;;  %v289_v38 = vadd.f32 1.0, %v8272_v42  ;;  %v17238_v42 = vld [vmem:[%s17808_s0 + $0xe8] sm:$0xff] }
 0x581   :  { %v5512_v22 = vsel %vm2784_vm7, %v5320_v34, %v5448_v25  ;;  %8293 = vrcp.f32 %v286_v45  ;;  %v290_v16 = vadd.f32 1.0, %v8274_v62  ;;  %vm6963_vm7 = vcmask 261120  }
 0x582   :  { %v5920_v4 = vmul.f32 %v5856_v23, %v5512_v22  ;;  %7572 = vmatprep.mubr.f32.mxu1 %v5983_v44  ;;  %v8276_v46 = vpop.eup %8275  ;;  %8295 = vpow2.f32 %v7051_v57  ;;  %v17206_v22 = vld [vmem:[%s17808_s0 + $0xc8] sm:$0xff] }
 0x583   :  { %v8278_v13 = vpop.eup %8277  ;;  %8297 = vpow2.f32 %v7052_v36  ;;  %v473_v60 = vmul.f32 %v17021_v54, %v8276_v46  ;;  %v17198_v54 = vld [vmem:[%s17808_s0 + $0xc0] sm:$0xff]  ;;  %v7057_v31 = vmul.f32 -1.442695, %v17206_v22 }
 0x584   :  { %v5984_v49 = vadd.f32 %v5920_v4, %v5716_v5  ;;  %v8280_v59 = vpop.eup %8279  ;;  %8299 = vrcp.f32 %v287_v8  ;;  %v474_v7 = vmul.f32 %v17028_v18, %v8278_v13  ;;  %v7056_v34 = vmul.f32 -1.442695, %v17198_v54 }
 0x585   :  { %v8282_v37 = vpop.eup %8281  ;;  %8301 = vrcp.f32 %v288_v43  ;;  %v291_v25 = vadd.f32 1.0, %v8280_v59  ;;  %v7061_v8 = vmul.f32 -1.442695, %v17238_v42  ;;  %v17254_v59 = vld [vmem:[%s17808_s0 + $0xf8] sm:$0xff] }
 0x586   :  { %7573 = vmatmul.mubr.f32.gmra.mrb[126].mxu1 %v5984_v49  ;;  %v8284_v3 = vpop.eup %8283  ;;  %8303 = vpow2.f32 %v7053_v0  ;;  %v292_v48 = vadd.f32 1.0, %v8282_v37  ;;  %v17222_v49 = vld [vmem:[%s17808_s0 + $0xd8] sm:$0xff] }
 0x587   :  { %7579 = vmatprep.mubr.msk.f32.mxu1 %vm698_vm0, %v468_v56  ;;  %v8286_v6 = vpop.eup %8285  ;;  %8305 = vpow2.f32 %v7054_v30  ;;  %v475_v20 = vmul.f32 %v17040_v29, %v8284_v3  ;;  %v17214_v29 = vld [vmem:[%s17808_s0 + $0xd0] sm:$0xff]  ;;  %v7059_v26 = vmul.f32 -1.442695, %v17222_v49 }
 0x588   :  { %v8288_v23 = vpop.eup %8287  ;;  %8307 = vrcp.f32 %v289_v38  ;;  %v476_v58 = vmul.f32 %v17048_v47, %v8286_v6  ;;  %v7058_v5 = vmul.f32 -1.442695, %v17214_v29  ;;  %v7063_v38 = vmul.f32 -1.442695, %v17254_v59 }
 0x589   :  { %v8290_v44 = vpop.eup %8289  ;;  %8309 = vrcp.f32 %v290_v16  ;;  %v293_v63 = vadd.f32 1.0, %v8288_v23  ;;  %v17270_v23 = vld [vmem:[%s17808_s0 + $0x108] sm:$0xff] }
 0x58a   :  { %7580 = vmatmul.mubr.msk.f32.vlgmr.msra.gmra.mrb[64].mxu1 %vm698_vm0, %v469_v21  ;;  %v8292_v18 = vpop.eup %8291  ;;  %8311 = vpow2.f32 %v7055_v55  ;;  %v294_v11 = vadd.f32 1.0, %v8290_v44 }
 0x58b   :  { %7582 = vmatprep.mubr.msk.f32.mxu1 %vm698_vm0, %v470_v17  ;;  %v8294_v4 = vpop.eup %8293  ;;  %8313 = vpow2.f32 %v7056_v34  ;;  %v477_v52 = vmul.f32 %v17055_v53, %v8292_v18  ;;  %v17230_v53 = vld [vmem:[%s17808_s0 + $0xe0] sm:$0xff] }
 0x58c   :  { %v8296_v14 = vpop.eup %8295  ;;  %8315 = vrcp.f32 %v291_v25  ;;  %v478_v35 = vmul.f32 %v17067_v19, %v8294_v4  ;;  %v7060_v21 = vmul.f32 -1.442695, %v17230_v53  ;;  %v7065_v25 = vmul.f32 -1.442695, %v17270_v23 }
 0x58d   :  { %v8298_v56 = vpop.eup %8297  ;;  %8317 = vrcp.f32 %v292_v48  ;;  %v295_v57 = vadd.f32 1.0, %v8296_v14  ;;  %v17286_v14 = vld [vmem:[%s17808_s0 + $0x118] sm:$0xff] }
 0x58e   :  { %7583 = vmatmul.mubr.msk.f32.gmra.mrb[66].mxu1 %vm698_vm0, %v471_v51  ;;  %v8300_v47 = vpop.eup %8299  ;;  %8319 = vpow2.f32 %v7057_v31  ;;  %v296_v12 = vadd.f32 1.0, %v8298_v56 }
 0x58f   :  { %7585 = vmatprep.mubr.msk.f32.mxu1 %vm698_vm0, %v472_v41  ;;  %v8302_v45 = vpop.eup %8301  ;;  %8321 = vpow2.f32 %v7058_v5  ;;  %v479_v36 = vmul.f32 %v17076_v24, %v8300_v47  ;;  %v17246_v24 = vld [vmem:[%s17808_s0 + $0xf0] sm:$0xff] }
 0x590   :  { %v8304_v28 = vpop.eup %8303  ;;  %8323 = vrcp.f32 %v293_v63  ;;  %v480_v62 = vmul.f32 %v17091_v15, %v8302_v45  ;;  %v7062_v51 = vmul.f32 -1.442695, %v17246_v24  ;;  %v7067_v63 = vmul.f32 -1.442695, %v17286_v14 }
 0x591   :  { %v8306_v17 = vpop.eup %8305  ;;  %8325 = vrcp.f32 %v294_v11  ;;  %v297_v0 = vadd.f32 1.0, %v8304_v28  ;;  %v17302_v28 = vld [vmem:[%s17808_s0 + $0x128] sm:$0xff] }
 0x592   :  { %7586 = vmatmul.mubr.msk.f32.gmra.mrb[68].mxu1 %vm698_vm0, %v473_v60  ;;  %v8308_v19 = vpop.eup %8307  ;;  %8327 = vpow2.f32 %v7059_v26  ;;  %v298_v13 = vadd.f32 1.0, %v8306_v17 }
 0x593   :  { %7588 = vmatprep.mubr.msk.f32.mxu1 %vm698_vm0, %v474_v7  ;;  %v8310_v43 = vpop.eup %8309  ;;  %8329 = vpow2.f32 %v7060_v21  ;;  %v481_v30 = vmul.f32 %v17106_v27, %v8308_v19  ;;  %v17262_v27 = vld [vmem:[%s17808_s0 + $0x100] sm:$0xff] }
 0x594   :  { %v8312_v46 = vpop.eup %8311  ;;  %8331 = vrcp.f32 %v295_v57  ;;  %v482_v37 = vmul.f32 %v17112_v1, %v8310_v43  ;;  %v7064_v60 = vmul.f32 -1.442695, %v17262_v27  ;;  %v7069_v57 = vmul.f32 -1.442695, %v17302_v28 }
 0x595   :  { %v8314_v41 = vpop.eup %8313  ;;  %8333 = vrcp.f32 %v296_v12  ;;  %v299_v55 = vadd.f32 1.0, %v8312_v46  ;;  %v17318_v46 = vld [vmem:[%s17808_s0 + $0x138] sm:$0xff] }
 0x596   :  { %7589 = vmatmul.mubr.msk.f32.gmra.mrb[70].mxu1 %vm698_vm0, %v475_v20  ;;  %v8316_v15 = vpop.eup %8315  ;;  %8335 = vpow2.f32 %v7061_v8  ;;  %v300_v6 = vadd.f32 1.0, %v8314_v41 }
 0x597   :  { %7591 = vmatprep.mubr.msk.f32.mxu1 %vm698_vm0, %v476_v58  ;;  %v8318_v16 = vpop.eup %8317  ;;  %8337 = vpow2.f32 %v7062_v51  ;;  %v483_v34 = vmul.f32 %v17127_v9, %v8316_v15  ;;  %v17278_v9 = vld [vmem:[%s17808_s0 + $0x110] sm:$0xff] }
 0x598   :  { %v8320_v3 = vpop.eup %8319  ;;  %8339 = vrcp.f32 %v297_v0  ;;  %v484_v44 = vmul.f32 %v17133_v33, %v8318_v16  ;;  %v7066_v20 = vmul.f32 -1.442695, %v17278_v9  ;;  %v7071_v0 = vmul.f32 -1.442695, %v17318_v46 }
 0x599   :  { %v8322_v7 = vpop.eup %8321  ;;  %8341 = vrcp.f32 %v298_v13  ;;  %v301_v31 = vadd.f32 1.0, %v8320_v3  ;;  %v17334_v3 = vld [vmem:[%s17808_s0 + $0x148] sm:$0xff] }
 0x59a   :  { %7592 = vmatmul.mubr.msk.f32.gmra.mrb[72].mxu1 %vm698_vm0, %v477_v52  ;;  %v8324_v1 = vpop.eup %8323  ;;  %8343 = vpow2.f32 %v7063_v38  ;;  %v302_v4 = vadd.f32 1.0, %v8322_v7 }
 0x59b   :  { %7594 = vmatprep.mubr.msk.f32.mxu1 %vm698_vm0, %v478_v35  ;;  %v8326_v48 = vpop.eup %8325  ;;  %8345 = vpow2.f32 %v7064_v60  ;;  %v485_v5 = vmul.f32 %v17144_v50, %v8324_v1  ;;  %v17294_v50 = vld [vmem:[%s17808_s0 + $0x120] sm:$0xff] }
 0x59c   :  { %v8328_v18 = vpop.eup %8327  ;;  %8347 = vrcp.f32 %v299_v55  ;;  %v486_v56 = vmul.f32 %v17151_v32, %v8326_v48  ;;  %v7068_v52 = vmul.f32 -1.442695, %v17294_v50  ;;  %v7073_v55 = vmul.f32 -1.442695, %v17334_v3 }
 0x59d   :  { %v8330_v58 = vpop.eup %8329  ;;  %8349 = vrcp.f32 %v300_v6  ;;  %v303_v26 = vadd.f32 1.0, %v8328_v18  ;;  %v17350_v18 = vld [vmem:[%s17808_s0 + $0x158] sm:$0xff] }
 0x59e   :  { %7595 = vmatmul.mubr.msk.f32.gmra.mrb[74].mxu1 %vm698_vm0, %v479_v36  ;;  %v8332_v33 = vpop.eup %8331  ;;  %8351 = vpow2.f32 %v7065_v25  ;;  %v304_v45 = vadd.f32 1.0, %v8330_v58 }
 0x59f   :  { %7597 = vmatprep.mubr.msk.f32.mxu1 %vm698_vm0, %v480_v62  ;;  %v8334_v11 = vpop.eup %8333  ;;  %8353 = vpow2.f32 %v7066_v20  ;;  %v487_v21 = vmul.f32 %v17158_v10, %v8332_v33  ;;  %v17310_v10 = vld [vmem:[%s17808_s0 + $0x130] sm:$0xff] }
 0x5a0   :  { %v8336_v47 = vpop.eup %8335  ;;  %8355 = vrcp.f32 %v301_v31  ;;  %v488_v17 = vmul.f32 %v17166_v40, %v8334_v11  ;;  %v7070_v36 = vmul.f32 -1.442695, %v17310_v10  ;;  %v7075_v31 = vmul.f32 -1.442695, %v17350_v18 }
 0x5a1   :  { %v8338_v35 = vpop.eup %8337  ;;  %8357 = vrcp.f32 %v302_v4  ;;  %v305_v8 = vadd.f32 1.0, %v8336_v47  ;;  %v17366_v47 = vld [vmem:[%s17808_s0 + $0x168] sm:$0xff] }
 0x5a2   :  { %7598 = vmatmul.mubr.msk.f32.gmra.mrb[76].mxu1 %vm698_vm0, %v481_v30  ;;  %v8340_v32 = vpop.eup %8339  ;;  %8359 = vpow2.f32 %v7067_v63  ;;  %v306_v43 = vadd.f32 1.0, %v8338_v35 }
 0x5a3   :  { %7600 = vmatprep.mubr.msk.f32.mxu1 %vm698_vm0, %v482_v37  ;;  %v8342_v12 = vpop.eup %8341  ;;  %8361 = vpow2.f32 %v7068_v52  ;;  %v489_v51 = vmul.f32 %v17174_v2, %v8340_v32  ;;  %v17326_v2 = vld [vmem:[%s17808_s0 + $0x140] sm:$0xff] }
 0x5a4   :  { %v8344_v19 = vpop.eup %8343  ;;  %8363 = vrcp.f32 %v303_v26  ;;  %v490_v41 = vmul.f32 %v17182_v39, %v8342_v12  ;;  %v7072_v30 = vmul.f32 -1.442695, %v17326_v2  ;;  %v7077_v26 = vmul.f32 -1.442695, %v17366_v47 }
 0x5a5   :  { %v8346_v62 = vpop.eup %8345  ;;  %8365 = vrcp.f32 %v304_v45  ;;  %v307_v38 = vadd.f32 1.0, %v8344_v19  ;;  %v17382_v19 = vld [vmem:[%s17808_s0 + $0x178] sm:$0xff] }
 0x5a6   :  { %7601 = vmatmul.mubr.msk.f32.gmra.mrb[78].mxu1 %vm698_vm0, %v483_v34  ;;  %v8348_v40 = vpop.eup %8347  ;;  %8367 = vpow2.f32 %v7069_v57  ;;  %v308_v16 = vadd.f32 1.0, %v8346_v62 }
 0x5a7   :  { %7603 = vmatprep.mubr.msk.f32.mxu1 %vm698_vm0, %v484_v44  ;;  %v8350_v13 = vpop.eup %8349  ;;  %8369 = vpow2.f32 %v7070_v36  ;;  %v491_v60 = vmul.f32 %v17190_v61, %v8348_v40  ;;  %v17342_v61 = vld [vmem:[%s17808_s0 + $0x150] sm:$0xff] }
 0x5a8   :  { %v8352_v15 = vpop.eup %8351  ;;  %8371 = vrcp.f32 %v305_v8  ;;  %v492_v7 = vmul.f32 %v17198_v54, %v8350_v13  ;;  %v7074_v34 = vmul.f32 -1.442695, %v17342_v61  ;;  %v7079_v8 = vmul.f32 -1.442695, %v17382_v19 }
 0x5a9   :  { %v8354_v37 = vpop.eup %8353  ;;  %8373 = vrcp.f32 %v306_v43  ;;  %v309_v25 = vadd.f32 1.0, %v8352_v15  ;;  %v17398_v15 = vld [vmem:[%s17808_s0 + $0x188] sm:$0xff] }
 0x5aa   :  { %7604 = vmatmul.mubr.msk.f32.gmra.mrb[80].mxu1 %vm698_vm0, %v485_v5  ;;  %v8356_v39 = vpop.eup %8355  ;;  %8375 = vpow2.f32 %v7071_v0  ;;  %v310_v48 = vadd.f32 1.0, %v8354_v37 }
 0x5ab   :  { %7606 = vmatprep.mubr.msk.f32.mxu1 %vm698_vm0, %v486_v56  ;;  %v8358_v6 = vpop.eup %8357  ;;  %8377 = vpow2.f32 %v7072_v30  ;;  %v493_v20 = vmul.f32 %v17206_v22, %v8356_v39  ;;  %v17358_v22 = vld [vmem:[%s17808_s0 + $0x160] sm:$0xff] }
 0x5ac   :  { %v8360_v1 = vpop.eup %8359  ;;  %8379 = vrcp.f32 %v307_v38  ;;  %v494_v58 = vmul.f32 %v17214_v29, %v8358_v6  ;;  %v7076_v5 = vmul.f32 -1.442695, %v17358_v22  ;;  %v7081_v38 = vmul.f32 -1.442695, %v17398_v15 }
 0x5ad   :  { %v8362_v44 = vpop.eup %8361  ;;  %8381 = vrcp.f32 %v308_v16  ;;  %v311_v63 = vadd.f32 1.0, %v8360_v1  ;;  %v17414_v1 = vld [vmem:[%s17808_s0 + $0x198] sm:$0xff] }
 0x5ae   :  { %7607 = vmatmul.mubr.msk.f32.gmra.mrb[82].mxu1 %vm698_vm0, %v487_v21  ;;  %v8364_v54 = vpop.eup %8363  ;;  %8383 = vpow2.f32 %v7073_v55  ;;  %v312_v11 = vadd.f32 1.0, %v8362_v44 }
 0x5af   :  { %7609 = vmatprep.mubr.msk.f32.mxu1 %vm698_vm0, %v488_v17  ;;  %v8366_v4 = vpop.eup %8365  ;;  %8385 = vpow2.f32 %v7074_v34  ;;  %v495_v52 = vmul.f32 %v17222_v49, %v8364_v54  ;;  %v17374_v49 = vld [vmem:[%s17808_s0 + $0x170] sm:$0xff] }
 0x5b0   :  { %v8368_v33 = vpop.eup %8367  ;;  %8387 = vrcp.f32 %v309_v25  ;;  %v496_v35 = vmul.f32 %v17230_v53, %v8366_v4  ;;  %v7078_v21 = vmul.f32 -1.442695, %v17374_v49  ;;  %v7083_v25 = vmul.f32 -1.442695, %v17414_v1 }
 0x5b1   :  { %v8370_v56 = vpop.eup %8369  ;;  %8389 = vrcp.f32 %v310_v48  ;;  %v313_v57 = vadd.f32 1.0, %v8368_v33  ;;  %v17430_v33 = vld [vmem:[%s17808_s0 + $0x1a8] sm:$0xff] }
 0x5b2   :  { %7610 = vmatmul.mubr.msk.f32.gmra.mrb[84].mxu1 %vm698_vm0, %v489_v51  ;;  %v8372_v29 = vpop.eup %8371  ;;  %8391 = vpow2.f32 %v7075_v31  ;;  %v314_v12 = vadd.f32 1.0, %v8370_v56 }
 0x5b3   :  { %7612 = vmatprep.mubr.msk.f32.mxu1 %vm698_vm0, %v490_v41  ;;  %v8374_v45 = vpop.eup %8373  ;;  %8393 = vpow2.f32 %v7076_v5  ;;  %v497_v36 = vmul.f32 %v17238_v42, %v8372_v29  ;;  %v17390_v42 = vld [vmem:[%s17808_s0 + $0x180] sm:$0xff] }
 0x5b4   :  { %v8376_v32 = vpop.eup %8375  ;;  %8395 = vrcp.f32 %v311_v63  ;;  %v498_v62 = vmul.f32 %v17246_v24, %v8374_v45  ;;  %v7080_v51 = vmul.f32 -1.442695, %v17390_v42  ;;  %v7085_v63 = vmul.f32 -1.442695, %v17430_v33 }
 0x5b5   :  { %v8378_v17 = vpop.eup %8377  ;;  %8397 = vrcp.f32 %v312_v11  ;;  %v315_v0 = vadd.f32 1.0, %v8376_v32  ;;  %v17446_v32 = vld [vmem:[%s17808_s0 + $0x1b8] sm:$0xff] }
 0x5b6   :  { %7613 = vmatmul.mubr.msk.f32.gmra.mrb[86].mxu1 %vm698_vm0, %v491_v60  ;;  %v8380_v53 = vpop.eup %8379  ;;  %8399 = vpow2.f32 %v7077_v26  ;;  %v316_v13 = vadd.f32 1.0, %v8378_v17 }
 0x5b7   :  { %7615 = vmatprep.mubr.msk.f32.mxu1 %vm698_vm0, %v492_v7  ;;  %v8382_v43 = vpop.eup %8381  ;;  %8401 = vpow2.f32 %v7078_v21  ;;  %v499_v30 = vmul.f32 %v17254_v59, %v8380_v53  ;;  %v17406_v59 = vld [vmem:[%s17808_s0 + $0x190] sm:$0xff] }
 0x5b8   :  { %v8384_v40 = vpop.eup %8383  ;;  %8403 = vrcp.f32 %v313_v57  ;;  %v500_v37 = vmul.f32 %v17262_v27, %v8382_v43  ;;  %v7082_v60 = vmul.f32 -1.442695, %v17406_v59  ;;  %v7087_v57 = vmul.f32 -1.442695, %v17446_v32 }
 0x5b9   :  { %v8386_v41 = vpop.eup %8385  ;;  %8405 = vrcp.f32 %v314_v12  ;;  %v317_v55 = vadd.f32 1.0, %v8384_v40  ;;  %v17462_v40 = vld [vmem:[%s17808_s0 + $0x1c8] sm:$0xff] }
 0x5ba   :  { %7616 = vmatmul.mubr.msk.f32.gmra.mrb[88].mxu1 %vm698_vm0, %v493_v20  ;;  %v8388_v24 = vpop.eup %8387  ;;  %8407 = vpow2.f32 %v7079_v8  ;;  %v318_v6 = vadd.f32 1.0, %v8386_v41 }
 0x5bb   :  { %7618 = vmatprep.mubr.msk.f32.mxu1 %vm698_vm0, %v494_v58  ;;  %v8390_v16 = vpop.eup %8389  ;;  %8409 = vpow2.f32 %v7080_v51  ;;  %v501_v34 = vmul.f32 %v17270_v23, %v8388_v24  ;;  %v17422_v23 = vld [vmem:[%s17808_s0 + $0x1a0] sm:$0xff] }
 0x5bc   :  { %v8392_v39 = vpop.eup %8391  ;;  %8411 = vrcp.f32 %v315_v0  ;;  %v502_v44 = vmul.f32 %v17278_v9, %v8390_v16  ;;  %v7084_v20 = vmul.f32 -1.442695, %v17422_v23  ;;  %v7089_v0 = vmul.f32 -1.442695, %v17462_v40 }
 0x5bd   :  { %v8394_v7 = vpop.eup %8393  ;;  %8413 = vrcp.f32 %v316_v13  ;;  %v319_v31 = vadd.f32 1.0, %v8392_v39  ;;  %v17478_v39 = vld [vmem:[%s17808_s0 + $0x1d8] sm:$0xff] }
 0x5be   :  { %7619 = vmatmul.mubr.msk.f32.gmra.mrb[90].mxu1 %vm698_vm0, %v495_v52  ;;  %v8396_v27 = vpop.eup %8395  ;;  %8415 = vpow2.f32 %v7081_v38  ;;  %v320_v4 = vadd.f32 1.0, %v8394_v7 }
 0x5bf   :  { %7621 = vmatprep.mubr.msk.f32.mxu1 %vm698_vm0, %v496_v35  ;;  %v8398_v48 = vpop.eup %8397  ;;  %8417 = vpow2.f32 %v7082_v60  ;;  %v503_v5 = vmul.f32 %v17286_v14, %v8396_v27  ;;  %v17438_v14 = vld [vmem:[%s17808_s0 + $0x1b0] sm:$0xff] }
 0x5c0   :  { %v8400_v54 = vpop.eup %8399  ;;  %8419 = vrcp.f32 %v317_v55  ;;  %v504_v56 = vmul.f32 %v17294_v50, %v8398_v48  ;;  %v7086_v52 = vmul.f32 -1.442695, %v17438_v14  ;;  %v7091_v55 = vmul.f32 -1.442695, %v17478_v39 }
 0x5c1   :  { %v8402_v58 = vpop.eup %8401  ;;  %8421 = vrcp.f32 %v318_v6  ;;  %v321_v26 = vadd.f32 1.0, %v8400_v54  ;;  %v17494_v54 = vld [vmem:[%s17808_s0 + $0x1e8] sm:$0xff] }
 0x5c2   :  { %7622 = vmatmul.mubr.msk.f32.gmra.mrb[92].mxu1 %vm698_vm0, %v497_v36  ;;  %v8404_v9 = vpop.eup %8403  ;;  %8423 = vpow2.f32 %v7083_v25  ;;  %v322_v45 = vadd.f32 1.0, %v8402_v58 }
 0x5c3   :  { %7624 = vmatprep.mubr.msk.f32.mxu1 %vm698_vm0, %v498_v62  ;;  %v8406_v11 = vpop.eup %8405  ;;  %8425 = vpow2.f32 %v7084_v20  ;;  %v505_v21 = vmul.f32 %v17302_v28, %v8404_v9  ;;  %v17454_v28 = vld [vmem:[%s17808_s0 + $0x1c0] sm:$0xff] }
 0x5c4   :  { %v8408_v29 = vpop.eup %8407  ;;  %8427 = vrcp.f32 %v319_v31  ;;  %v506_v17 = vmul.f32 %v17310_v10, %v8406_v11  ;;  %v7088_v36 = vmul.f32 -1.442695, %v17454_v28  ;;  %v7093_v31 = vmul.f32 -1.442695, %v17494_v54 }
 0x5c5   :  { %v8410_v35 = vpop.eup %8409  ;;  %8429 = vrcp.f32 %v320_v4  ;;  %v323_v8 = vadd.f32 1.0, %v8408_v29 }
 0x5c6   :  { %7625 = vmatmul.mubr.msk.f32.gmra.mrb[94].mxu1 %vm698_vm0, %v499_v30  ;;  %v8412_v50 = vpop.eup %8411  ;;  %8431 = vpow2.f32 %v7085_v63  ;;  %v324_v43 = vadd.f32 1.0, %v8410_v35  ;;  %v17512_v35 = vld [vmem:[%s17808_s0 + $0x1f8] sm:$0xff] }
 0x5c7   :  { %7627 = vmatprep.mubr.msk.f32.mxu1 %vm698_vm0, %v500_v37  ;;  %v8414_v12 = vpop.eup %8413  ;;  %8433 = vpow2.f32 %v7086_v52  ;;  %v507_v51 = vmul.f32 %v17318_v46, %v8412_v50  ;;  %v17470_v46 = vld [vmem:[%s17808_s0 + $0x1d0] sm:$0xff] }
 0x5c8   :  { %v8416_v53 = vpop.eup %8415  ;;  %8435 = vrcp.f32 %v321_v26  ;;  %v508_v41 = vmul.f32 %v17326_v2, %v8414_v12  ;;  %v7090_v30 = vmul.f32 -1.442695, %v17470_v46 }
 0x5c9   :  { %v8418_v62 = vpop.eup %8417  ;;  %8437 = vrcp.f32 %v322_v45  ;;  %v325_v38 = vadd.f32 1.0, %v8416_v53  ;;  %v7095_v45 = vmul.f32 -1.442695, %v17512_v35 }
 0x5ca   :  { %7628 = vmatmul.mubr.msk.f32.gmra.mrb[96].mxu1 %vm698_vm0, %v501_v34  ;;  %v8420_v10 = vpop.eup %8419  ;;  %8439 = vpow2.f32 %v7087_v57  ;;  %v326_v16 = vadd.f32 1.0, %v8418_v62 }
 0x5cb   :  { %7630 = vmatprep.mubr.msk.f32.mxu1 %vm698_vm0, %v502_v44  ;;  %v8422_v13 = vpop.eup %8421  ;;  %8441 = vpow2.f32 %v7088_v36  ;;  %v509_v60 = vmul.f32 %v17334_v3, %v8420_v10  ;;  %v17486_v3 = vld [vmem:[%s17808_s0 + $0x1e0] sm:$0xff] }
 0x5cc   :  { %v8424_v24 = vpop.eup %8423  ;;  %8443 = vrcp.f32 %v323_v8  ;;  %v510_v7 = vmul.f32 %v17342_v61, %v8422_v13  ;;  %v7092_v34 = vmul.f32 -1.442695, %v17486_v3 }
 0x5cd   :  { %v8426_v37 = vpop.eup %8425  ;;  %8445 = vrcp.f32 %v324_v43  ;;  %v327_v25 = vadd.f32 1.0, %v8424_v24 }
 0x5ce   :  { %7631 = vmatmul.mubr.msk.f32.gmra.mrb[98].mxu1 %vm698_vm0, %v503_v5  ;;  %v8428_v2 = vpop.eup %8427  ;;  %8447 = vpow2.f32 %v7089_v0  ;;  %v328_v48 = vadd.f32 1.0, %v8426_v37 }
 0x5cf   :  { %7633 = vmatprep.mubr.msk.f32.mxu1 %vm698_vm0, %v504_v56  ;;  %v8430_v6 = vpop.eup %8429  ;;  %8449 = vpow2.f32 %v7090_v30  ;;  %v511_v20 = vmul.f32 %v17350_v18, %v8428_v2  ;;  %v17502_v18 = vld [vmem:[%s17808_s0 + $0x1f0] sm:$0xff] }
 0x5d0   :  { %v8432_v27 = vpop.eup %8431  ;;  %8451 = vrcp.f32 %v325_v38  ;;  %v512_v58 = vmul.f32 %v17358_v22, %v8430_v6  ;;  %v7094_v5 = vmul.f32 -1.442695, %v17502_v18 }
 0x5d1   :  { %v8434_v44 = vpop.eup %8433  ;;  %8453 = vrcp.f32 %v326_v16  ;;  %v329_v63 = vadd.f32 1.0, %v8432_v27 }
 0x5d2   :  { %7634 = vmatmul.mubr.msk.f32.gmra.mrb[100].mxu1 %vm698_vm0, %v505_v21  ;;  %v8436_v61 = vpop.eup %8435  ;;  %8455 = vpow2.f32 %v7091_v55  ;;  %v330_v11 = vadd.f32 1.0, %v8434_v44 }
 0x5d3   :  { %7636 = vmatprep.mubr.msk.f32.mxu1 %vm698_vm0, %v506_v17  ;;  %v8438_v4 = vpop.eup %8437  ;;  %8457 = vpow2.f32 %v7092_v34  ;;  %v513_v52 = vmul.f32 %v17366_v47, %v8436_v61 }
 0x5d4   :  { %v8440_v9 = vpop.eup %8439  ;;  %8459 = vrcp.f32 %v327_v25  ;;  %v514_v29 = vmul.f32 %v17374_v49, %v8438_v4 }
 0x5d5   :  { %v8442_v56 = vpop.eup %8441  ;;  %8461 = vrcp.f32 %v328_v48  ;;  %v331_v50 = vadd.f32 1.0, %v8440_v9 }
 0x5d6   :  { %7637 = vmatmul.mubr.msk.f32.gmra.mrb[102].mxu1 %vm698_vm0, %v507_v51  ;;  %v8444_v22 = vpop.eup %8443  ;;  %8463 = vpow2.f32 %v7093_v31  ;;  %v332_v57 = vadd.f32 1.0, %v8442_v56 }
 0x5d7   :  { %7639 = vmatprep.mubr.msk.f32.mxu1 %vm698_vm0, %v508_v41  ;;  %v8446_v26 = vpop.eup %8445  ;;  %8465 = vpow2.f32 %v7094_v5  ;;  %v515_v17 = vmul.f32 %v17382_v19, %v8444_v22 }
 0x5d8   :  { %v8448_v21 = vpop.eup %8447  ;;  %8467 = vrcp.f32 %v329_v63  ;;  %v516_v12 = vmul.f32 %v17390_v42, %v8446_v26 }
 0x5d9   :  { %v8450_v47 = vpop.eup %8449  ;;  %8469 = vrcp.f32 %v330_v11  ;;  %v333_v8 = vadd.f32 1.0, %v8448_v21 }
 0x5da   :  { %7640 = vmatmul.mubr.msk.f32.gmra.mrb[104].mxu1 %vm698_vm0, %v509_v60  ;;  %v8452_v49 = vpop.eup %8451  ;;  %8471 = vpow2.f32 %v7095_v45  ;;  %v334_v43 = vadd.f32 1.0, %v8450_v47 }
 0x5db   :  { %7642 = vmatprep.mubr.msk.f32.mxu1 %vm698_vm0, %v510_v7  ;;  %v8454_v36 = vpop.eup %8453  ;;  %8473 = vrcp.f32 %v331_v50  ;;  %v517_v51 = vmul.f32 %v17398_v15, %v8452_v49 }
 0x5dc   :  { %v8456_v53 = vpop.eup %8455  ;;  %8475 = vrcp.f32 %v332_v57  ;;  %v518_v19 = vmul.f32 %v17406_v59, %v8454_v36 }
 0x5dd   :  { %v8458_v62 = vpop.eup %8457  ;;  %8477 = vrcp.f32 %v333_v8  ;;  %v335_v42 = vadd.f32 1.0, %v8456_v53 }
 0x5de   :  { %7643 = vmatmul.mubr.msk.f32.gmra.mrb[106].mxu1 %vm698_vm0, %v511_v20  ;;  %v8460_v10 = vpop.eup %8459  ;;  %v336_v30 = vadd.f32 1.0, %v8458_v62  ;;  %8479 = vrcp.f32 %v334_v43 }
 0x5df   :  { %7645 = vmatprep.mubr.msk.f32.mxu1 %vm698_vm0, %v512_v58  ;;  %v8462_v0 = vpop.eup %8461  ;;  %v519_v24 = vmul.f32 %v17414_v1, %v8460_v10  ;;  %8481 = vrcp.f32 %v335_v42 }
 0x5e0   :  { %v8464_v41 = vpop.eup %8463  ;;  %v520_v15 = vmul.f32 %v17422_v23, %v8462_v0  ;;  %8483 = vrcp.f32 %v336_v30 }
 0x5e1   :  { %v8466_v13 = vpop.eup %8465  ;;  %v337_v16 = vadd.f32 1.0, %v8464_v41 }
 0x5e2   :  { %7646 = vmatmul.mubr.msk.f32.gmra.mrb[108].mxu1 %vm698_vm0, %v513_v52  ;;  %v8468_v38 = vpop.eup %8467  ;;  %v338_v60 = vadd.f32 1.0, %v8466_v13 }
 0x5e3   :  { %7648 = vmatprep.mubr.msk.f32.mxu1 %vm698_vm0, %v514_v29  ;;  %v8470_v37 = vpop.eup %8469  ;;  %v521_v2 = vmul.f32 %v17430_v33, %v8468_v38  ;;  %8485 = vrcp.f32 %v337_v16 }
 0x5e4   :  { %v8472_v59 = vpop.eup %8471  ;;  %v522_v1 = vmul.f32 %v17438_v14, %v8470_v37  ;;  %8487 = vrcp.f32 %v338_v60 }
 0x5e5   :  { %v8474_v55 = vpop.eup %8473  ;;  %v339_v6 = vadd.f32 1.0, %v8472_v59 }
 0x5e6   :  { %7649 = vmatmul.mubr.msk.f32.gmra.mrb[110].mxu1 %vm698_vm0, %v515_v17  ;;  %v8476_v7 = vpop.eup %8475  ;;  %v523_v23 = vmul.f32 %v17446_v32, %v8474_v55 }
 0x5e7   :  { %7651 = vmatprep.mubr.msk.f32.mxu1 %vm698_vm0, %v516_v12  ;;  %v8478_v34 = vpop.eup %8477  ;;  %v524_v27 = vmul.f32 %v17454_v28, %v8476_v7  ;;  %8489 = vrcp.f32 %v339_v6 }
 0x5e8   :  { %v8480_v33 = vpop.eup %8479  ;;  %v525_v25 = vmul.f32 %v17462_v40, %v8478_v34 }
 0x5e9   :  { %v8482_v14 = vpop.eup %8481  ;;  %v526_v44 = vmul.f32 %v17470_v46, %v8480_v33 }
 0x5ea   :  { %7652 = vmatmul.mubr.msk.f32.gmra.mrb[112].mxu1 %vm698_vm0, %v517_v51  ;;  %v8484_v48 = vpop.eup %8483  ;;  %v527_v32 = vmul.f32 %v17478_v39, %v8482_v14 }
 0x5eb   :  { %7654 = vmatprep.mubr.msk.f32.mxu1 %vm698_vm0, %v518_v19  ;;  %v528_v28 = vmul.f32 %v17486_v3, %v8484_v48 }
 0x5ed   :  { %v8486_v20 = vpop.eup %8485 }
 0x5ee   :  { %7655 = vmatmul.mubr.msk.f32.gmra.mrb[114].mxu1 %vm698_vm0, %v519_v24  ;;  %v8488_v61 = vpop.eup %8487  ;;  %v529_v40 = vmul.f32 %v17494_v54, %v8486_v20 }
 0x5ef   :  { %7657 = vmatprep.mubr.msk.f32.mxu1 %vm698_vm0, %v520_v15  ;;  %v530_v46 = vmul.f32 %v17502_v18, %v8488_v61 }
 0x5f1   :  { %v8490_v31 = vpop.eup %8489 }
 0x5f2   :  { %7658 = vmatmul.mubr.msk.f32.gmra.mrb[116].mxu1 %vm698_vm0, %v521_v2  ;;  %v531_v58 = vmul.f32 %v17512_v35, %v8490_v31 }
 0x5f3   :  { %7660 = vmatprep.mubr.msk.f32.mxu1 %vm698_vm0, %v522_v1 }
 0x5f6   :  { %7661 = vmatmul.mubr.msk.f32.gmra.mrb[118].mxu1 %vm698_vm0, %v523_v23 }
 0x5f7   :  { %7663 = vmatprep.mubr.msk.f32.mxu1 %vm698_vm0, %v524_v27 }
 0x5fa   :  { %7664 = vmatmul.mubr.msk.f32.gmra.mrb[120].mxu1 %vm698_vm0, %v525_v25 }
 0x5fb   :  { %7666 = vmatprep.mubr.msk.f32.mxu1 %vm698_vm0, %v526_v44 }
 0x5fe   :  { %7667 = vmatmul.mubr.msk.f32.gmra.mrb[122].mxu1 %vm698_vm0, %v527_v32 }
 0x5ff   :  { %7669 = vmatprep.mubr.msk.f32.mxu1 %vm698_vm0, %v528_v28 }
 0x602   :  { %7670 = vmatmul.mubr.msk.f32.gmra.mrb[124].mxu1 %vm698_vm0, %v529_v40 }
 0x603   :  { %7672 = vmatprep.mubr.msk.f32.mxu1 %vm698_vm0, %v530_v46 }
 0x606   :  { %7673 = vmatmul.mubr.msk.f32.gmra.mrb[126].mxu1 %vm698_vm0, %v531_v58 }
 0x65d   :  { %v7581_v39 = vpop.f32.mrb[64].mxu1 }
 0x65e   :  { %6965 = vst.msk [vmem:[%s17812_s5 + $0x8] sm:$0xff] %vm6963_vm7, %v7581_v39  ;;  %v6644_v3 = vpop.f32.mrb[65].mxu1 }
 0x65f   :  { %6964 = vst.msk [vmem:[%s17812_s5] sm:$0xff] %vm6963_vm7, %v6644_v3 }
 0x661   :  { %v7584_v54 = vpop.f32.mrb[66].mxu1 }
 0x662   :  { %6967 = vst.msk [vmem:[%s17812_s5 + $0x18] sm:$0xff] %vm6963_vm7, %v7584_v54  ;;  %v6654_v4 = vpop.f32.mrb[67].mxu1 }
 0x663   :  { %6966 = vst.msk [vmem:[%s17812_s5 + $0x10] sm:$0xff] %vm6963_vm7, %v6654_v4 }
 0x665   :  { %v7587_v18 = vpop.f32.mrb[68].mxu1 }
 0x666   :  { %6969 = vst.msk [vmem:[%s17812_s5 + $0x28] sm:$0xff] %vm6963_vm7, %v7587_v18  ;;  %v6664_v5 = vpop.f32.mrb[69].mxu1 }
 0x667   :  { %6968 = vst.msk [vmem:[%s17812_s5 + $0x20] sm:$0xff] %vm6963_vm7, %v6664_v5 }
 0x669   :  { %v7590_v9 = vpop.f32.mrb[70].mxu1 }
 0x66a   :  { %6971 = vst.msk [vmem:[%s17812_s5 + $0x38] sm:$0xff] %vm6963_vm7, %v7590_v9  ;;  %v6674_v63 = vpop.f32.mrb[71].mxu1 }
 0x66b   :  { %6970 = vst.msk [vmem:[%s17812_s5 + $0x30] sm:$0xff] %vm6963_vm7, %v6674_v63 }
 0x66d   :  { %v7593_v56 = vpop.f32.mrb[72].mxu1 }
 0x66e   :  { %6973 = vst.msk [vmem:[%s17812_s5 + $0x48] sm:$0xff] %vm6963_vm7, %v7593_v56  ;;  %v6684_v11 = vpop.f32.mrb[73].mxu1 }
 0x66f   :  { %6972 = vst.msk [vmem:[%s17812_s5 + $0x40] sm:$0xff] %vm6963_vm7, %v6684_v11 }
 0x671   :  { %v7596_v52 = vpop.f32.mrb[74].mxu1 }
 0x672   :  { %6975 = vst.msk [vmem:[%s17812_s5 + $0x58] sm:$0xff] %vm6963_vm7, %v7596_v52  ;;  %v6694_v22 = vpop.f32.mrb[75].mxu1 }
 0x673   :  { %6974 = vst.msk [vmem:[%s17812_s5 + $0x50] sm:$0xff] %vm6963_vm7, %v6694_v22 }
 0x675   :  { %v7599_v29 = vpop.f32.mrb[76].mxu1 }
 0x676   :  { %6977 = vst.msk [vmem:[%s17812_s5 + $0x68] sm:$0xff] %vm6963_vm7, %v7599_v29  ;;  %v6704_v26 = vpop.f32.mrb[77].mxu1 }
 0x677   :  { %6976 = vst.msk [vmem:[%s17812_s5 + $0x60] sm:$0xff] %vm6963_vm7, %v6704_v26 }
 0x679   :  { %v7602_v35 = vpop.f32.mrb[78].mxu1 }
 0x67a   :  { %6979 = vst.msk [vmem:[%s17812_s5 + $0x78] sm:$0xff] %vm6963_vm7, %v7602_v35  ;;  %v6714_v45 = vpop.f32.mrb[79].mxu1 }
 0x67b   :  { %6978 = vst.msk [vmem:[%s17812_s5 + $0x70] sm:$0xff] %vm6963_vm7, %v6714_v45 }
 0x67d   :  { %v7605_v21 = vpop.f32.mrb[80].mxu1 }
 0x67e   :  { %6981 = vst.msk [vmem:[%s17812_s5 + $0x88] sm:$0xff] %vm6963_vm7, %v7605_v21  ;;  %v6724_v50 = vpop.f32.mrb[81].mxu1 }
 0x67f   :  { %6980 = vst.msk [vmem:[%s17812_s5 + $0x80] sm:$0xff] %vm6963_vm7, %v6724_v50 }
 0x681   :  { %v7608_v47 = vpop.f32.mrb[82].mxu1 }
 0x682   :  { %6983 = vst.msk [vmem:[%s17812_s5 + $0x98] sm:$0xff] %vm6963_vm7, %v7608_v47  ;;  %v6734_v57 = vpop.f32.mrb[83].mxu1 }
 0x683   :  { %6982 = vst.msk [vmem:[%s17812_s5 + $0x90] sm:$0xff] %vm6963_vm7, %v6734_v57 }
 0x685   :  { %v7611_v17 = vpop.f32.mrb[84].mxu1 }
 0x686   :  { %6985 = vst.msk [vmem:[%s17812_s5 + $0xa8] sm:$0xff] %vm6963_vm7, %v7611_v17  ;;  %v6744_v49 = vpop.f32.mrb[85].mxu1 }
 0x687   :  { %6984 = vst.msk [vmem:[%s17812_s5 + $0xa0] sm:$0xff] %vm6963_vm7, %v6744_v49 }
 0x689   :  { %v7614_v12 = vpop.f32.mrb[86].mxu1 }
 0x68a   :  { %6987 = vst.msk [vmem:[%s17812_s5 + $0xb8] sm:$0xff] %vm6963_vm7, %v7614_v12  ;;  %v6754_v36 = vpop.f32.mrb[87].mxu1 }
 0x68b   :  { %6986 = vst.msk [vmem:[%s17812_s5 + $0xb0] sm:$0xff] %vm6963_vm7, %v6754_v36 }
 0x68d   :  { %v7617_v53 = vpop.f32.mrb[88].mxu1 }
 0x68e   :  { %6989 = vst.msk [vmem:[%s17812_s5 + $0xc8] sm:$0xff] %vm6963_vm7, %v7617_v53  ;;  %v6764_v8 = vpop.f32.mrb[89].mxu1 }
 0x68f   :  { %6988 = vst.msk [vmem:[%s17812_s5 + $0xc0] sm:$0xff] %vm6963_vm7, %v6764_v8 }
 0x691   :  { %v7620_v62 = vpop.f32.mrb[90].mxu1 }
 0x692   :  { %6991 = vst.msk [vmem:[%s17812_s5 + $0xd8] sm:$0xff] %vm6963_vm7, %v7620_v62  ;;  %v6774_v43 = vpop.f32.mrb[91].mxu1 }
 0x693   :  { %6990 = vst.msk [vmem:[%s17812_s5 + $0xd0] sm:$0xff] %vm6963_vm7, %v6774_v43 }
 0x695   :  { %v7623_v51 = vpop.f32.mrb[92].mxu1 }
 0x696   :  { %6993 = vst.msk [vmem:[%s17812_s5 + $0xe8] sm:$0xff] %vm6963_vm7, %v7623_v51  ;;  %v6784_v10 = vpop.f32.mrb[93].mxu1 }
 0x697   :  { %6992 = vst.msk [vmem:[%s17812_s5 + $0xe0] sm:$0xff] %vm6963_vm7, %v6784_v10 }
 0x699   :  { %v7626_v19 = vpop.f32.mrb[94].mxu1 }
 0x69a   :  { %6995 = vst.msk [vmem:[%s17812_s5 + $0xf8] sm:$0xff] %vm6963_vm7, %v7626_v19  ;;  %v6794_v0 = vpop.f32.mrb[95].mxu1 }
 0x69b   :  { %6994 = vst.msk [vmem:[%s17812_s5 + $0xf0] sm:$0xff] %vm6963_vm7, %v6794_v0 }
 0x69d   :  { %v7629_v41 = vpop.f32.mrb[96].mxu1 }
 0x69e   :  { %6997 = vst.msk [vmem:[%s17812_s5 + $0x108] sm:$0xff] %vm6963_vm7, %v7629_v41  ;;  %v6804_v42 = vpop.f32.mrb[97].mxu1 }
 0x69f   :  { %6996 = vst.msk [vmem:[%s17812_s5 + $0x100] sm:$0xff] %vm6963_vm7, %v6804_v42 }
 0x6a1   :  { %v7632_v13 = vpop.f32.mrb[98].mxu1 }
 0x6a2   :  { %6999 = vst.msk [vmem:[%s17812_s5 + $0x118] sm:$0xff] %vm6963_vm7, %v7632_v13  ;;  %v6814_v30 = vpop.f32.mrb[99].mxu1 }
 0x6a3   :  { %6998 = vst.msk [vmem:[%s17812_s5 + $0x110] sm:$0xff] %vm6963_vm7, %v6814_v30 }
 0x6a5   :  { %v7635_v24 = vpop.f32.mrb[100].mxu1 }
 0x6a6   :  { %7001 = vst.msk [vmem:[%s17812_s5 + $0x128] sm:$0xff] %vm6963_vm7, %v7635_v24  ;;  %v6824_v38 = vpop.f32.mrb[101].mxu1 }
 0x6a7   :  { %7000 = vst.msk [vmem:[%s17812_s5 + $0x120] sm:$0xff] %vm6963_vm7, %v6824_v38 }
 0x6a9   :  { %v7638_v15 = vpop.f32.mrb[102].mxu1 }
 0x6aa   :  { %7003 = vst.msk [vmem:[%s17812_s5 + $0x138] sm:$0xff] %vm6963_vm7, %v7638_v15  ;;  %v6834_v37 = vpop.f32.mrb[103].mxu1 }
 0x6ab   :  { %7002 = vst.msk [vmem:[%s17812_s5 + $0x130] sm:$0xff] %vm6963_vm7, %v6834_v37 }
 0x6ad   :  { %v7641_v16 = vpop.f32.mrb[104].mxu1 }
 0x6ae   :  { %7005 = vst.msk [vmem:[%s17812_s5 + $0x148] sm:$0xff] %vm6963_vm7, %v7641_v16  ;;  %v6844_v59 = vpop.f32.mrb[105].mxu1 }
 0x6af   :  { %7004 = vst.msk [vmem:[%s17812_s5 + $0x140] sm:$0xff] %vm6963_vm7, %v6844_v59 }
 0x6b1   :  { %v7644_v60 = vpop.f32.mrb[106].mxu1 }
 0x6b2   :  { %7007 = vst.msk [vmem:[%s17812_s5 + $0x158] sm:$0xff] %vm6963_vm7, %v7644_v60  ;;  %v6854_v2 = vpop.f32.mrb[107].mxu1 }
 0x6b3   :  { %7006 = vst.msk [vmem:[%s17812_s5 + $0x150] sm:$0xff] %vm6963_vm7, %v6854_v2 }
 0x6b5   :  { %v7647_v55 = vpop.f32.mrb[108].mxu1 }
 0x6b6   :  { %7009 = vst.msk [vmem:[%s17812_s5 + $0x168] sm:$0xff] %vm6963_vm7, %v7647_v55  ;;  %v6864_v1 = vpop.f32.mrb[109].mxu1 }
 0x6b7   :  { %7008 = vst.msk [vmem:[%s17812_s5 + $0x160] sm:$0xff] %vm6963_vm7, %v6864_v1 }
 0x6b9   :  { %v7650_v7 = vpop.f32.mrb[110].mxu1 }
 0x6ba   :  { %7011 = vst.msk [vmem:[%s17812_s5 + $0x178] sm:$0xff] %vm6963_vm7, %v7650_v7  ;;  %v6874_v6 = vpop.f32.mrb[111].mxu1 }
 0x6bb   :  { %7010 = vst.msk [vmem:[%s17812_s5 + $0x170] sm:$0xff] %vm6963_vm7, %v6874_v6 }
 0x6bd   :  { %v7653_v23 = vpop.f32.mrb[112].mxu1 }
 0x6be   :  { %7013 = vst.msk [vmem:[%s17812_s5 + $0x188] sm:$0xff] %vm6963_vm7, %v7653_v23  ;;  %v6884_v34 = vpop.f32.mrb[113].mxu1 }
 0x6bf   :  { %7012 = vst.msk [vmem:[%s17812_s5 + $0x180] sm:$0xff] %vm6963_vm7, %v6884_v34 }
 0x6c1   :  { %v7656_v27 = vpop.f32.mrb[114].mxu1 }
 0x6c2   :  { %7015 = vst.msk [vmem:[%s17812_s5 + $0x198] sm:$0xff] %vm6963_vm7, %v7656_v27  ;;  %v6894_v33 = vpop.f32.mrb[115].mxu1 }
 0x6c3   :  { %7014 = vst.msk [vmem:[%s17812_s5 + $0x190] sm:$0xff] %vm6963_vm7, %v6894_v33 }
 0x6c5   :  { %v7659_v25 = vpop.f32.mrb[116].mxu1 }
 0x6c6   :  { %7017 = vst.msk [vmem:[%s17812_s5 + $0x1a8] sm:$0xff] %vm6963_vm7, %v7659_v25  ;;  %v6904_v14 = vpop.f32.mrb[117].mxu1 }
 0x6c7   :  { %7016 = vst.msk [vmem:[%s17812_s5 + $0x1a0] sm:$0xff] %vm6963_vm7, %v6904_v14 }
 0x6c9   :  { %v7662_v44 = vpop.f32.mrb[118].mxu1 }
 0x6ca   :  { %7019 = vst.msk [vmem:[%s17812_s5 + $0x1b8] sm:$0xff] %vm6963_vm7, %v7662_v44  ;;  %v6914_v48 = vpop.f32.mrb[119].mxu1 }
 0x6cb   :  { %7018 = vst.msk [vmem:[%s17812_s5 + $0x1b0] sm:$0xff] %vm6963_vm7, %v6914_v48 }
 0x6cd   :  { %v7665_v32 = vpop.f32.mrb[120].mxu1 }
 0x6ce   :  { %7021 = vst.msk [vmem:[%s17812_s5 + $0x1c8] sm:$0xff] %vm6963_vm7, %v7665_v32  ;;  %v6924_v20 = vpop.f32.mrb[121].mxu1 }
 0x6cf   :  { %7020 = vst.msk [vmem:[%s17812_s5 + $0x1c0] sm:$0xff] %vm6963_vm7, %v6924_v20 }
 0x6d1   :  { %v7668_v28 = vpop.f32.mrb[122].mxu1 }
 0x6d2   :  { %7023 = vst.msk [vmem:[%s17812_s5 + $0x1d8] sm:$0xff] %vm6963_vm7, %v7668_v28  ;;  %v6934_v61 = vpop.f32.mrb[123].mxu1 }
 0x6d3   :  { %7022 = vst.msk [vmem:[%s17812_s5 + $0x1d0] sm:$0xff] %vm6963_vm7, %v6934_v61 }
 0x6d5   :  { %v7671_v40 = vpop.f32.mrb[124].mxu1 }
 0x6d6   :  { %7025 = vst.msk [vmem:[%s17812_s5 + $0x1e8] sm:$0xff] %vm6963_vm7, %v7671_v40  ;;  %v6944_v31 = vpop.f32.mrb[125].mxu1 }
 0x6d7   :  { %7024 = vst.msk [vmem:[%s17812_s5 + $0x1e0] sm:$0xff] %vm6963_vm7, %v6944_v31 }
 0x6d9   :  { %v7674_v46 = vpop.f32.mrb[126].mxu1 }
 0x6da   :  { %7027 = vst.msk [vmem:[%s17812_s5 + $0x1f8] sm:$0xff] %vm6963_vm7, %v7674_v46  ;;  %v6954_v58 = vpop.f32.mrb[127].mxu1 }
 0x6db   :  { %7026 = vst.msk [vmem:[%s17812_s5 + $0x1f0] sm:$0xff] %vm6963_vm7, %v6954_v58 }

</bundles_post_ra>
